<compile_context>
chip_gen: v5e
topology: v5e:2x2
jax: 0.10.0
libtpu: 0.0.40
codegen_flags: <defaults>
</compile_context>

<pallas_src>
import functools

import jax
import jax.numpy as jnp
from jax.experimental import pallas as pl
from jax.experimental.pallas import tpu as pltpu

Z_DIM = 10
NC = 1


def _round_up(x, m):
    return ((x + m - 1) // m) * m


def _choose_tm(M):
    """Adaptive M-tile: exact tile for small layers, 2+ big tiles for large M."""
    Mr = _round_up(M, 8)
    if Mr <= 512:
        return Mr                       # one tile; splitting would only add step overhead
    tiles = max(2, -(-Mr // 1024))      # >=2 tiles so both v7x TensorCores get work
    return _round_up(-(-Mr // tiles), 8)


# ----------------------------------------------------------------------------
# Pallas kernels
# ----------------------------------------------------------------------------
def _mm_bias_act_kernel(x_ref, w_ref, b_ref, o_ref, *, relu):
    # bf16 operands, f32 accumulate on the MXU; bias+ReLU epilogue stays f32.
    acc = jnp.dot(x_ref[...], w_ref[...], preferred_element_type=jnp.float32)
    acc = acc + b_ref[...]
    if relu:
        acc = jnp.maximum(acc, 0.0)
    o_ref[...] = acc.astype(o_ref.dtype)


def matmul_bias(x, w, b, relu=False):
    """(M, K) @ (K, N) + b, optional ReLU.  Adaptive M-tiling in the grid."""
    M, K = x.shape
    N = w.shape[1]
    x = x.astype(w.dtype)
    TM = _choose_tm(M)
    G = pl.cdiv(M, TM)
    Mp = G * TM
    if Mp != M:
        x = jnp.pad(x, ((0, Mp - M), (0, 0)))

    out = pl.pallas_call(
        functools.partial(_mm_bias_act_kernel, relu=relu),
        out_shape=jax.ShapeDtypeStruct((Mp, N), jnp.float32),
        grid_spec=pltpu.PrefetchScalarGridSpec(
            num_scalar_prefetch=0,
            grid=(G,),
            in_specs=[
                pl.BlockSpec((TM, K), lambda i: (i, 0)),
                pl.BlockSpec((K, N), lambda i: (0, 0)),
                pl.BlockSpec((1, N), lambda i: (0, 0)),
            ],
            out_specs=pl.BlockSpec((TM, N), lambda i: (i, 0)),
        ),
        compiler_params=pltpu.CompilerParams(
            dimension_semantics=("parallel",)),
    )(x, w, b)
    return out[:M] if Mp != M else out


def _fc_reparam_kernel(h_ref, eps_ref,
                       ef1w, ef1b, ef2w, ef2b,
                       ef3wm, ef3bm, ef3wl, ef3bl,
                       df1w, df1b, df2w, df2b, df3w, df3b,
                       mu_ref, logvar_ref, dfc_ref):
    """Entire FC stack + reparametrization in one VMEM-resident kernel."""
    f32 = jnp.float32

    def relu(v):
        return jnp.maximum(v, 0.0)

    h = h_ref[...]
    h = relu(jnp.dot(h, ef1w[...], preferred_element_type=f32) + ef1b[...])
    h = relu(jnp.dot(h, ef2w[...], preferred_element_type=f32) + ef2b[...])
    mu = jnp.dot(h, ef3wm[...], preferred_element_type=f32) + ef3bm[...]
    logvar = jnp.dot(h, ef3wl[...], preferred_element_type=f32) + ef3bl[...]
    mu_ref[...] = mu
    logvar_ref[...] = logvar

    # reparametrize: z = mu + exp(logvar / 2) * eps
    z = mu + jnp.exp(logvar * 0.5) * eps_ref[...]

    d = relu(jnp.dot(z, df1w[...], preferred_element_type=f32) + df1b[...])
    d = relu(jnp.dot(d, df2w[...], preferred_element_type=f32) + df2b[...])
    d = relu(jnp.dot(d, df3w[...], preferred_element_type=f32) + df3b[...])
    dfc_ref[...] = d


def fc_reparam_fused(h, eps, p):
    B = h.shape[0]
    args = (h, eps,
            p["ef1_w"], p["ef1_b"], p["ef2_w"], p["ef2_b"],
            p["ef3_w_mu"], p["ef3_b_mu"], p["ef3_w_lv"], p["ef3_b_lv"],
            p["df1_w"], p["df1_b"], p["df2_w"], p["df2_b"],
            p["df3_w"], p["df3_b"])
    vmem = lambda: pl.BlockSpec(memory_space=pltpu.MemorySpace.VMEM)
    return pl.pallas_call(
        _fc_reparam_kernel,
        out_shape=(jax.ShapeDtypeStruct((B, Z_DIM), jnp.float32),
                   jax.ShapeDtypeStruct((B, Z_DIM), jnp.float32),
                   jax.ShapeDtypeStruct((B, 32 * 4 * 4), jnp.float32)),
        in_specs=[vmem() for _ in args],
        out_specs=(vmem(), vmem(), vmem()),
    )(*args)


# ----------------------------------------------------------------------------
# Conv / deconv lowering glue (im2col in plain JAX, matmul in Pallas)
# ----------------------------------------------------------------------------
# TODO(synk): fuse im2col into the conv kernel (pl.ANY input + in-kernel patch
# assembly) to remove the kxk HBM duplication; buffers are <=1.2 MiB bf16 now,
# so the remaining win at B=2 is small.
def _im2col(x, k, s, p):
    """x: (N, H, W, C) NHWC -> ((N*Ho*Wo, k*k*C), (N, Ho, Wo)).
    Patch flattening order is (kh, kw, c_in)."""
    N, H, W, C = x.shape
    xp = jnp.pad(x, ((0, 0), (p, p), (p, p), (0, 0)))
    Ho = (H + 2 * p - k) // s + 1
    Wo = (W + 2 * p - k) // s + 1
    patches = []
    for di in range(k):
        for dj in range(k):
            patches.append(xp[:, di:di + s * Ho:s, dj:dj + s * Wo:s, :])
    patches = jnp.stack(patches, axis=3)                 # (N, Ho, Wo, k*k, C)
    return patches.reshape(N * Ho * Wo, k * k * C), (N, Ho, Wo)


def _conv_w_to_mat(w):
    """PyTorch Conv2d weight (Cout, Cin, kH, kW) -> (kH*kW*Cin, Cout)."""
    cout = w.shape[0]
    return jnp.transpose(w, (2, 3, 1, 0)).reshape(-1, cout)


def _deconv_w_to_subpixel(w):
    """PyTorch ConvTranspose2d weight (Cin, Cout, 4, 4), stride 2, pad 1 ->
    fused sub-pixel weight (3*3*Cin, 4*Cout).

    Output pixel (2m+ry, 2n+rx) equals a 2x2 stride-1 conv over the 1-padded
    input; all four parities (ry, rx) read sub-patches of one shared 3x3
    window, so a single (9*Cin, 4*Cout) matmul computes all of them with a
    lane-dense N = 4*Cout output.  Column order is (ry, rx, cout)."""
    cin, cout = w.shape[0], w.shape[1]
    wf = jnp.zeros((3, 3, cin, 2, 2, cout), w.dtype)
    for pp in range(3):
        for qq in range(3):
            for ry in range(2):
                for rx in range(2):
                    dy, dx = pp - ry, qq - rx
                    if 0 <= dy <= 1 and 0 <= dx <= 1:
                        ky = 3 - ry - 2 * dy
                        kx = 3 - rx - 2 * dx
                        wf = wf.at[pp, qq, :, ry, rx, :].set(w[:, :, ky, kx])
    return wf.reshape(9 * cin, 4 * cout)


def _deconv_b_to_subpixel(b):
    """(Cout,) bias -> (1, 4*Cout) replicated per output parity (ry, rx)."""
    return jnp.tile(b, 4).reshape(1, -1).astype(jnp.float32)


def conv2d(x, w_mat, b_row, k, stride, pad, relu):
    """x NHWC, matmul-ready weight (k*k*Cin, Cout) -> NHWC output (f32)."""
    cols, (N, Ho, Wo) = _im2col(x.astype(jnp.bfloat16), k, stride, pad)
    out = matmul_bias(cols, w_mat, b_row, relu)
    return out.reshape(N, Ho, Wo, -1)


def deconv2d(x, w_fused, b_fused, relu):
    """ConvTranspose2d(k=4, s=2, p=1) on NHWC input via sub-pixel phases:
    one 3x3/stride-1 im2col + one lane-dense matmul, then pixel interleave."""
    N, H, W, _ = x.shape
    cout = w_fused.shape[1] // 4
    cols, _ = _im2col(x.astype(jnp.bfloat16), 3, 1, 1)
    out = matmul_bias(cols, w_fused, b_fused, relu)      # (N*H*W, 4*cout) f32
    out = out.reshape(N, H, W, 2, 2, cout)
    out = jnp.transpose(out, (0, 1, 3, 2, 4, 5))
    return out.reshape(N, 2 * H, 2 * W, cout)


# ----------------------------------------------------------------------------
# Parameter init (deterministic, kaiming-normal-like; biases zero).
# All layout conversion / bf16 casting is hoisted here (not in the forward).
# ----------------------------------------------------------------------------
def _kaiming(key, shape, fan_in):
    return jax.random.normal(key, shape, jnp.float32) * jnp.sqrt(2.0 / fan_in)


def init_params(key):
    keys = jax.random.split(key, 14)
    p = {}
    # encoder convs: Conv2d(cin, cout, 4, 2, 1) -> matmul-ready bf16 weights
    enc_conv_ch = [(NC, 32), (32, 32), (32, 32), (32, 32)]
    for i, (cin, cout) in enumerate(enc_conv_ch):
        w = _kaiming(keys[i], (cout, cin, 4, 4), cin * 16)        # PyTorch layout
        p[f"ec{i+1}_w"] = _conv_w_to_mat(w).astype(jnp.bfloat16)  # (16*cin, cout)
        p[f"ec{i+1}_b"] = jnp.zeros((1, cout), jnp.float32)
    # encoder linears, stored (in, out) f32 for the fused FC kernel
    p["ef1_w"] = _kaiming(keys[4], (32 * 4 * 4, 256), 32 * 4 * 4)
    p["ef1_b"] = jnp.zeros((1, 256), jnp.float32)
    p["ef2_w"] = _kaiming(keys[5], (256, 256), 256)
    p["ef2_b"] = jnp.zeros((1, 256), jnp.float32)
    ef3_w = _kaiming(keys[6], (256, 2 * Z_DIM), 256)
    p["ef3_w_mu"] = ef3_w[:, :Z_DIM]
    p["ef3_w_lv"] = ef3_w[:, Z_DIM:]
    p["ef3_b_mu"] = jnp.zeros((1, Z_DIM), jnp.float32)
    p["ef3_b_lv"] = jnp.zeros((1, Z_DIM), jnp.float32)
    # decoder linears
    p["df1_w"] = _kaiming(keys[7], (Z_DIM, 256), Z_DIM)
    p["df1_b"] = jnp.zeros((1, 256), jnp.float32)
    p["df2_w"] = _kaiming(keys[8], (256, 256), 256)
    p["df2_b"] = jnp.zeros((1, 256), jnp.float32)
    p["df3_w"] = _kaiming(keys[9], (256, 32 * 4 * 4), 256)
    p["df3_b"] = jnp.zeros((1, 32 * 4 * 4), jnp.float32)
    # decoder deconvs: ConvTranspose2d(cin, cout, 4, 2, 1) -> fused sub-pixel
    dec_conv_ch = [(32, 32), (32, 32), (32, 32), (32, NC)]
    for i, (cin, cout) in enumerate(dec_conv_ch):
        w = _kaiming(keys[10 + i], (cin, cout, 4, 4), cin * 16)   # PyTorch layout
        b = jnp.zeros((cout,), jnp.float32)
        p[f"dc{i+1}_w"] = _deconv_w_to_subpixel(w).astype(jnp.bfloat16)
        p[f"dc{i+1}_b"] = _deconv_b_to_subpixel(b)
    return p


# ----------------------------------------------------------------------------
# Forward pass (matches BetaVAE_B.forward semantics)
# ----------------------------------------------------------------------------
@jax.jit
def beta_vae_b_forward(params, x_nchw, eps):
    B = x_nchw.shape[0]
    x = jnp.transpose(x_nchw, (0, 2, 3, 1))  # NCHW -> NHWC

    # ---------------- encoder ----------------
    h = conv2d(x, params["ec1_w"], params["ec1_b"], 4, 2, 1, True)   # 64 -> 32
    h = conv2d(h, params["ec2_w"], params["ec2_b"], 4, 2, 1, True)   # 32 -> 16
    h = conv2d(h, params["ec3_w"], params["ec3_b"], 4, 2, 1, True)   # 16 -> 8
    h = conv2d(h, params["ec4_w"], params["ec4_b"], 4, 2, 1, True)   # 8  -> 4
    # View((-1, 32*4*4)) in PyTorch flattens NCHW order.
    h = jnp.transpose(h, (0, 3, 1, 2)).reshape(B, 32 * 4 * 4)

    # -- fused dense stack + reparametrization trick (single pallas_call) --
    mu, logvar, d = fc_reparam_fused(h, eps, params)

    # ---------------- decoder ----------------
    d = d.reshape(B, 32, 4, 4)                  # View((-1, 32, 4, 4)), NCHW
    d = jnp.transpose(d, (0, 2, 3, 1))          # -> NHWC for deconv path
    d = deconv2d(d, params["dc1_w"], params["dc1_b"], True)    # 4  -> 8
    d = deconv2d(d, params["dc2_w"], params["dc2_b"], True)    # 8  -> 16
    d = deconv2d(d, params["dc3_w"], params["dc3_b"], True)    # 16 -> 32
    d = deconv2d(d, params["dc4_w"], params["dc4_b"], False)   # 32 -> 64
    x_recon = jnp.transpose(d, (0, 3, 1, 2)).reshape(x_nchw.shape)
    return x_recon, mu, logvar


# ----------------------------------------------------------------------------
if __name__ == "__main__":
    key = jax.random.PRNGKey(0)
    k_param, k_x, k_eps = jax.random.split(key, 3)

    params = init_params(k_param)
    # Architecture fixes spatial size: 4 stride-2 convs must land on 4x4.
    x = jax.random.normal(k_x, (2, NC, 64, 64), jnp.float32)
    # TODO(synk): eps drawn host-side with jax.random for determinism
    # (torch samples it inside forward); could be moved to pltpu.prng_*.
    eps = jax.random.normal(k_eps, (2, Z_DIM), jnp.float32)

    x_recon, mu, logvar = beta_vae_b_forward(params, x, eps)
    jax.block_until_ready((x_recon, mu, logvar))

    assert x_recon.shape == x.shape
    assert mu.shape == (2, Z_DIM)
    assert logvar.shape == (2, Z_DIM)
    assert bool(jnp.all(jnp.isfinite(x_recon)))
    print("KERNEL_OK")
</pallas_src>

<mosaic_0001>
module attributes {stable_mosaic.version = 11 : i64} {
  func.func @_mm_bias_act_kernel(%arg0: i32, %arg1: memref<1024x16xbf16, #tpu.memory_space<vmem>>, %arg2: memref<16x32xbf16, #tpu.memory_space<vmem>>, %arg3: memref<1x32xf32, #tpu.memory_space<vmem>>, %arg4: memref<1024x32xf32, #tpu.memory_space<vmem>>) attributes {dimension_semantics = [#tpu.dimension_semantics<parallel>], iteration_bounds = array<i64: 2>, scalar_prefetch = 0 : i64, scratch_operands = 0 : i64, tpu.core_type = #tpu.core_type<tc>, window_params = [{transform_indices = @transform_0, window_bounds = array<i64: 1024, 16>}, {pipeline_mode = #tpu.pipeline_mode<synchronous>, transform_indices = @transform_1, window_bounds = array<i64: 16, 32>}, {pipeline_mode = #tpu.pipeline_mode<synchronous>, transform_indices = @transform_2, window_bounds = array<i64: 1, 32>}, {transform_indices = @transform_3, window_bounds = array<i64: 1024, 32>}]} {
    %c0 = arith.constant 0 : index
    %c0_0 = arith.constant 0 : index
    %0 = vector.load %arg1[%c0, %c0_0] : memref<1024x16xbf16, #tpu.memory_space<vmem>>, vector<1024x16xbf16>
    %c0_1 = arith.constant 0 : index
    %c0_2 = arith.constant 0 : index
    %1 = vector.load %arg2[%c0_1, %c0_2] : memref<16x32xbf16, #tpu.memory_space<vmem>>, vector<16x32xbf16>
    %cst = arith.constant dense<0.000000e+00> : vector<1024x32xf32>
    %2 = tpu.matmul %0, %1, %cst {dimension_numbers = #tpu.dot_dimension_numbers<[1], [0], [0], [1], [0, 0, 1, 1], [], []>} : vector<1024x16xbf16>, vector<16x32xbf16>, vector<1024x32xf32> -> vector<1024x32xf32>
    %c0_3 = arith.constant 0 : index
    %c0_4 = arith.constant 0 : index
    %3 = vector.load %arg3[%c0_3, %c0_4] : memref<1x32xf32, #tpu.memory_space<vmem>>, vector<1x32xf32>
    %4 = vector.broadcast %3 : vector<1x32xf32> to vector<1024x32xf32>
    %5 = arith.addf %2, %4 : vector<1024x32xf32>
    %cst_5 = arith.constant 0.000000e+00 : f32
    %6 = vector.broadcast %cst_5 : f32 to vector<1024x32xf32>
    %7 = arith.maximumf %5, %6 : vector<1024x32xf32>
    %c0_6 = arith.constant 0 : index
    %c0_7 = arith.constant 0 : index
    %8 = vector.load %arg4[%c0_6, %c0_7] : memref<1024x32xf32, #tpu.memory_space<vmem>>, vector<1024x32xf32>
    tpu.vector_store %arg4[%c0_6, %c0_7], %7 {strides = array<i32>} : memref<1024x32xf32, #tpu.memory_space<vmem>>, vector<1024x32xf32>,
    return
  }
  func.func @transform_0(%arg0: i32) -> (i32, i32) {
    %c0_i32 = arith.constant 0 : i32
    %c0_i32_0 = arith.constant 0 : i32
    return %arg0, %c0_i32 : i32, i32
  }
  func.func @transform_1(%arg0: i32) -> (i32, i32) {
    %c0_i32 = arith.constant 0 : i32
    %c0_i32_0 = arith.constant 0 : i32
    %c0_i32_1 = arith.constant 0 : i32
    return %c0_i32, %c0_i32_0 : i32, i32
  }
  func.func @transform_2(%arg0: i32) -> (i32, i32) {
    %c0_i32 = arith.constant 0 : i32
    %c0_i32_0 = arith.constant 0 : i32
    %c0_i32_1 = arith.constant 0 : i32
    return %c0_i32, %c0_i32_0 : i32, i32
  }
  func.func @transform_3(%arg0: i32) -> (i32, i32) {
    %c0_i32 = arith.constant 0 : i32
    %c0_i32_0 = arith.constant 0 : i32
    return %arg0, %c0_i32 : i32, i32
  }
}

module attributes {stable_mosaic.version = 11 : i64} {
  func.func @_mm_bias_act_kernel(%arg0: i32, %arg1: memref<512x512xbf16, #tpu.memory_space<vmem>>, %arg2: memref<512x32xbf16, #tpu.memory_space<vmem>>, %arg3: memref<1x32xf32, #tpu.memory_space<vmem>>, %arg4: memref<512x32xf32, #tpu.memory_space<vmem>>) attributes {dimension_semantics = [#tpu.dimension_semantics<parallel>], iteration_bounds = array<i64: 1>, scalar_prefetch = 0 : i64, scratch_operands = 0 : i64, tpu.core_type = #tpu.core_type<tc>, window_params = [{transform_indices = @transform_0, window_bounds = array<i64: 512, 512>}, {pipeline_mode = #tpu.pipeline_mode<synchronous>, transform_indices = @transform_1, window_bounds = array<i64: 512, 32>}, {pipeline_mode = #tpu.pipeline_mode<synchronous>, transform_indices = @transform_2, window_bounds = array<i64: 1, 32>}, {transform_indices = @transform_3, window_bounds = array<i64: 512, 32>}]} {
    %c0 = arith.constant 0 : index
    %c0_0 = arith.constant 0 : index
    %0 = vector.load %arg1[%c0, %c0_0] : memref<512x512xbf16, #tpu.memory_space<vmem>>, vector<512x512xbf16>
    %c0_1 = arith.constant 0 : index
    %c0_2 = arith.constant 0 : index
    %1 = vector.load %arg2[%c0_1, %c0_2] : memref<512x32xbf16, #tpu.memory_space<vmem>>, vector<512x32xbf16>
    %cst = arith.constant dense<0.000000e+00> : vector<512x32xf32>
    %2 = tpu.matmul %0, %1, %cst {dimension_numbers = #tpu.dot_dimension_numbers<[1], [0], [0], [1], [0, 0, 1, 1], [], []>} : vector<512x512xbf16>, vector<512x32xbf16>, vector<512x32xf32> -> vector<512x32xf32>
    %c0_3 = arith.constant 0 : index
    %c0_4 = arith.constant 0 : index
    %3 = vector.load %arg3[%c0_3, %c0_4] : memref<1x32xf32, #tpu.memory_space<vmem>>, vector<1x32xf32>
    %4 = vector.broadcast %3 : vector<1x32xf32> to vector<512x32xf32>
    %5 = arith.addf %2, %4 : vector<512x32xf32>
    %cst_5 = arith.constant 0.000000e+00 : f32
    %6 = vector.broadcast %cst_5 : f32 to vector<512x32xf32>
    %7 = arith.maximumf %5, %6 : vector<512x32xf32>
    %c0_6 = arith.constant 0 : index
    %c0_7 = arith.constant 0 : index
    %8 = vector.load %arg4[%c0_6, %c0_7] : memref<512x32xf32, #tpu.memory_space<vmem>>, vector<512x32xf32>
    tpu.vector_store %arg4[%c0_6, %c0_7], %7 {strides = array<i32>} : memref<512x32xf32, #tpu.memory_space<vmem>>, vector<512x32xf32>,
    return
  }
  func.func @transform_0(%arg0: i32) -> (i32, i32) {
    %c0_i32 = arith.constant 0 : i32
    %c0_i32_0 = arith.constant 0 : i32
    return %arg0, %c0_i32 : i32, i32
  }
  func.func @transform_1(%arg0: i32) -> (i32, i32) {
    %c0_i32 = arith.constant 0 : i32
    %c0_i32_0 = arith.constant 0 : i32
    %c0_i32_1 = arith.constant 0 : i32
    return %c0_i32, %c0_i32_0 : i32, i32
  }
  func.func @transform_2(%arg0: i32) -> (i32, i32) {
    %c0_i32 = arith.constant 0 : i32
    %c0_i32_0 = arith.constant 0 : i32
    %c0_i32_1 = arith.constant 0 : i32
    return %c0_i32, %c0_i32_0 : i32, i32
  }
  func.func @transform_3(%arg0: i32) -> (i32, i32) {
    %c0_i32 = arith.constant 0 : i32
    %c0_i32_0 = arith.constant 0 : i32
    return %arg0, %c0_i32 : i32, i32
  }
}

module attributes {stable_mosaic.version = 11 : i64} {
  func.func @_mm_bias_act_kernel(%arg0: i32, %arg1: memref<128x512xbf16, #tpu.memory_space<vmem>>, %arg2: memref<512x32xbf16, #tpu.memory_space<vmem>>, %arg3: memref<1x32xf32, #tpu.memory_space<vmem>>, %arg4: memref<128x32xf32, #tpu.memory_space<vmem>>) attributes {dimension_semantics = [#tpu.dimension_semantics<parallel>], iteration_bounds = array<i64: 1>, scalar_prefetch = 0 : i64, scratch_operands = 0 : i64, tpu.core_type = #tpu.core_type<tc>, window_params = [{transform_indices = @transform_0, window_bounds = array<i64: 128, 512>}, {pipeline_mode = #tpu.pipeline_mode<synchronous>, transform_indices = @transform_1, window_bounds = array<i64: 512, 32>}, {pipeline_mode = #tpu.pipeline_mode<synchronous>, transform_indices = @transform_2, window_bounds = array<i64: 1, 32>}, {transform_indices = @transform_3, window_bounds = array<i64: 128, 32>}]} {
    %c0 = arith.constant 0 : index
    %c0_0 = arith.constant 0 : index
    %0 = vector.load %arg1[%c0, %c0_0] : memref<128x512xbf16, #tpu.memory_space<vmem>>, vector<128x512xbf16>
    %c0_1 = arith.constant 0 : index
    %c0_2 = arith.constant 0 : index
    %1 = vector.load %arg2[%c0_1, %c0_2] : memref<512x32xbf16, #tpu.memory_space<vmem>>, vector<512x32xbf16>
    %cst = arith.constant dense<0.000000e+00> : vector<128x32xf32>
    %2 = tpu.matmul %0, %1, %cst {dimension_numbers = #tpu.dot_dimension_numbers<[1], [0], [0], [1], [0, 0, 1, 1], [], []>} : vector<128x512xbf16>, vector<512x32xbf16>, vector<128x32xf32> -> vector<128x32xf32>
    %c0_3 = arith.constant 0 : index
    %c0_4 = arith.constant 0 : index
    %3 = vector.load %arg3[%c0_3, %c0_4] : memref<1x32xf32, #tpu.memory_space<vmem>>, vector<1x32xf32>
    %4 = vector.broadcast %3 : vector<1x32xf32> to vector<128x32xf32>
    %5 = arith.addf %2, %4 : vector<128x32xf32>
    %cst_5 = arith.constant 0.000000e+00 : f32
    %6 = vector.broadcast %cst_5 : f32 to vector<128x32xf32>
    %7 = arith.maximumf %5, %6 : vector<128x32xf32>
    %c0_6 = arith.constant 0 : index
    %c0_7 = arith.constant 0 : index
    %8 = vector.load %arg4[%c0_6, %c0_7] : memref<128x32xf32, #tpu.memory_space<vmem>>, vector<128x32xf32>
    tpu.vector_store %arg4[%c0_6, %c0_7], %7 {strides = array<i32>} : memref<128x32xf32, #tpu.memory_space<vmem>>, vector<128x32xf32>,
    return
  }
  func.func @transform_0(%arg0: i32) -> (i32, i32) {
    %c0_i32 = arith.constant 0 : i32
    %c0_i32_0 = arith.constant 0 : i32
    return %arg0, %c0_i32 : i32, i32
  }
  func.func @transform_1(%arg0: i32) -> (i32, i32) {
    %c0_i32 = arith.constant 0 : i32
    %c0_i32_0 = arith.constant 0 : i32
    %c0_i32_1 = arith.constant 0 : i32
    return %c0_i32, %c0_i32_0 : i32, i32
  }
  func.func @transform_2(%arg0: i32) -> (i32, i32) {
    %c0_i32 = arith.constant 0 : i32
    %c0_i32_0 = arith.constant 0 : i32
    %c0_i32_1 = arith.constant 0 : i32
    return %c0_i32, %c0_i32_0 : i32, i32
  }
  func.func @transform_3(%arg0: i32) -> (i32, i32) {
    %c0_i32 = arith.constant 0 : i32
    %c0_i32_0 = arith.constant 0 : i32
    return %arg0, %c0_i32 : i32, i32
  }
}

module attributes {stable_mosaic.version = 11 : i64} {
  func.func @_mm_bias_act_kernel(%arg0: i32, %arg1: memref<32x512xbf16, #tpu.memory_space<vmem>>, %arg2: memref<512x32xbf16, #tpu.memory_space<vmem>>, %arg3: memref<1x32xf32, #tpu.memory_space<vmem>>, %arg4: memref<32x32xf32, #tpu.memory_space<vmem>>) attributes {dimension_semantics = [#tpu.dimension_semantics<parallel>], iteration_bounds = array<i64: 1>, scalar_prefetch = 0 : i64, scratch_operands = 0 : i64, tpu.core_type = #tpu.core_type<tc>, window_params = [{transform_indices = @transform_0, window_bounds = array<i64: 32, 512>}, {pipeline_mode = #tpu.pipeline_mode<synchronous>, transform_indices = @transform_1, window_bounds = array<i64: 512, 32>}, {pipeline_mode = #tpu.pipeline_mode<synchronous>, transform_indices = @transform_2, window_bounds = array<i64: 1, 32>}, {transform_indices = @transform_3, window_bounds = array<i64: 32, 32>}]} {
    %c0 = arith.constant 0 : index
    %c0_0 = arith.constant 0 : index
    %0 = vector.load %arg1[%c0, %c0_0] : memref<32x512xbf16, #tpu.memory_space<vmem>>, vector<32x512xbf16>
    %c0_1 = arith.constant 0 : index
    %c0_2 = arith.constant 0 : index
    %1 = vector.load %arg2[%c0_1, %c0_2] : memref<512x32xbf16, #tpu.memory_space<vmem>>, vector<512x32xbf16>
    %cst = arith.constant dense<0.000000e+00> : vector<32x32xf32>
    %2 = tpu.matmul %0, %1, %cst {dimension_numbers = #tpu.dot_dimension_numbers<[1], [0], [0], [1], [0, 0, 1, 1], [], []>} : vector<32x512xbf16>, vector<512x32xbf16>, vector<32x32xf32> -> vector<32x32xf32>
    %c0_3 = arith.constant 0 : index
    %c0_4 = arith.constant 0 : index
    %3 = vector.load %arg3[%c0_3, %c0_4] : memref<1x32xf32, #tpu.memory_space<vmem>>, vector<1x32xf32>
    %4 = vector.broadcast %3 : vector<1x32xf32> to vector<32x32xf32>
    %5 = arith.addf %2, %4 : vector<32x32xf32>
    %cst_5 = arith.constant 0.000000e+00 : f32
    %6 = vector.broadcast %cst_5 : f32 to vector<32x32xf32>
    %7 = arith.maximumf %5, %6 : vector<32x32xf32>
    %c0_6 = arith.constant 0 : index
    %c0_7 = arith.constant 0 : index
    %8 = vector.load %arg4[%c0_6, %c0_7] : memref<32x32xf32, #tpu.memory_space<vmem>>, vector<32x32xf32>
    tpu.vector_store %arg4[%c0_6, %c0_7], %7 {strides = array<i32>} : memref<32x32xf32, #tpu.memory_space<vmem>>, vector<32x32xf32>,
    return
  }
  func.func @transform_0(%arg0: i32) -> (i32, i32) {
    %c0_i32 = arith.constant 0 : i32
    %c0_i32_0 = arith.constant 0 : i32
    return %arg0, %c0_i32 : i32, i32
  }
  func.func @transform_1(%arg0: i32) -> (i32, i32) {
    %c0_i32 = arith.constant 0 : i32
    %c0_i32_0 = arith.constant 0 : i32
    %c0_i32_1 = arith.constant 0 : i32
    return %c0_i32, %c0_i32_0 : i32, i32
  }
  func.func @transform_2(%arg0: i32) -> (i32, i32) {
    %c0_i32 = arith.constant 0 : i32
    %c0_i32_0 = arith.constant 0 : i32
    %c0_i32_1 = arith.constant 0 : i32
    return %c0_i32, %c0_i32_0 : i32, i32
  }
  func.func @transform_3(%arg0: i32) -> (i32, i32) {
    %c0_i32 = arith.constant 0 : i32
    %c0_i32_0 = arith.constant 0 : i32
    return %arg0, %c0_i32 : i32, i32
  }
}

module attributes {stable_mosaic.version = 11 : i64} {
  func.func @_fc_reparam_kernel(%arg0: memref<2x512xf32, #tpu.memory_space<vmem>>, %arg1: memref<2x10xf32, #tpu.memory_space<vmem>>, %arg2: memref<512x256xf32, #tpu.memory_space<vmem>>, %arg3: memref<1x256xf32, #tpu.memory_space<vmem>>, %arg4: memref<256x256xf32, #tpu.memory_space<vmem>>, %arg5: memref<1x256xf32, #tpu.memory_space<vmem>>, %arg6: memref<256x10xf32, #tpu.memory_space<vmem>>, %arg7: memref<1x10xf32, #tpu.memory_space<vmem>>, %arg8: memref<256x10xf32, #tpu.memory_space<vmem>>, %arg9: memref<1x10xf32, #tpu.memory_space<vmem>>, %arg10: memref<10x256xf32, #tpu.memory_space<vmem>>, %arg11: memref<1x256xf32, #tpu.memory_space<vmem>>, %arg12: memref<256x256xf32, #tpu.memory_space<vmem>>, %arg13: memref<1x256xf32, #tpu.memory_space<vmem>>, %arg14: memref<256x512xf32, #tpu.memory_space<vmem>>, %arg15: memref<1x512xf32, #tpu.memory_space<vmem>>, %arg16: memref<2x10xf32, #tpu.memory_space<vmem>>, %arg17: memref<2x10xf32, #tpu.memory_space<vmem>>, %arg18: memref<2x512xf32, #tpu.memory_space<vmem>>) attributes {dimension_semantics = [], scalar_prefetch = 0 : i64, scratch_operands = 0 : i64, tpu.core_type = #tpu.core_type<tc>} {
    %c0 = arith.constant 0 : index
    %c0_0 = arith.constant 0 : index
    %0 = vector.load %arg0[%c0, %c0_0] : memref<2x512xf32, #tpu.memory_space<vmem>>, vector<2x512xf32>
    %c0_1 = arith.constant 0 : index
    %c0_2 = arith.constant 0 : index
    %1 = vector.load %arg2[%c0_1, %c0_2] : memref<512x256xf32, #tpu.memory_space<vmem>>, vector<512x256xf32>
    %cst = arith.constant dense<0.000000e+00> : vector<2x256xf32>
    %2 = tpu.matmul %0, %1, %cst {dimension_numbers = #tpu.dot_dimension_numbers<[1], [0], [0], [1], [0, 0, 1, 1], [], []>} : vector<2x512xf32>, vector<512x256xf32>, vector<2x256xf32> -> vector<2x256xf32>
    %c0_3 = arith.constant 0 : index
    %c0_4 = arith.constant 0 : index
    %3 = vector.load %arg3[%c0_3, %c0_4] : memref<1x256xf32, #tpu.memory_space<vmem>>, vector<1x256xf32>
    %4 = vector.broadcast %3 : vector<1x256xf32> to vector<2x256xf32>
    %5 = arith.addf %2, %4 : vector<2x256xf32>
    %cst_5 = arith.constant 0.000000e+00 : f32
    %6 = vector.broadcast %cst_5 : f32 to vector<2x256xf32>
    %7 = arith.maximumf %5, %6 : vector<2x256xf32>
    %c0_6 = arith.constant 0 : index
    %c0_7 = arith.constant 0 : index
    %8 = vector.load %arg4[%c0_6, %c0_7] : memref<256x256xf32, #tpu.memory_space<vmem>>, vector<256x256xf32>
    %cst_8 = arith.constant dense<0.000000e+00> : vector<2x256xf32>
    %9 = tpu.matmul %7, %8, %cst_8 {dimension_numbers = #tpu.dot_dimension_numbers<[1], [0], [0], [1], [0, 0, 1, 1], [], []>} : vector<2x256xf32>, vector<256x256xf32>, vector<2x256xf32> -> vector<2x256xf32>
    %c0_9 = arith.constant 0 : index
    %c0_10 = arith.constant 0 : index
    %10 = vector.load %arg5[%c0_9, %c0_10] : memref<1x256xf32, #tpu.memory_space<vmem>>, vector<1x256xf32>
    %11 = vector.broadcast %10 : vector<1x256xf32> to vector<2x256xf32>
    %12 = arith.addf %9, %11 : vector<2x256xf32>
    %cst_11 = arith.constant 0.000000e+00 : f32
    %13 = vector.broadcast %cst_11 : f32 to vector<2x256xf32>
    %14 = arith.maximumf %12, %13 : vector<2x256xf32>
    %c0_12 = arith.constant 0 : index
    %c0_13 = arith.constant 0 : index
    %15 = vector.load %arg6[%c0_12, %c0_13] : memref<256x10xf32, #tpu.memory_space<vmem>>, vector<256x10xf32>
    %cst_14 = arith.constant dense<0.000000e+00> : vector<2x10xf32>
    %16 = tpu.matmul %14, %15, %cst_14 {dimension_numbers = #tpu.dot_dimension_numbers<[1], [0], [0], [1], [0, 0, 1, 1], [], []>} : vector<2x256xf32>, vector<256x10xf32>, vector<2x10xf32> -> vector<2x10xf32>
    %c0_15 = arith.constant 0 : index
    %c0_16 = arith.constant 0 : index
    %17 = vector.load %arg7[%c0_15, %c0_16] : memref<1x10xf32, #tpu.memory_space<vmem>>, vector<1x10xf32>
    %18 = vector.broadcast %17 : vector<1x10xf32> to vector<2x10xf32>
    %19 = arith.addf %16, %18 : vector<2x10xf32>
    %c0_17 = arith.constant 0 : index
    %c0_18 = arith.constant 0 : index
    %20 = vector.load %arg8[%c0_17, %c0_18] : memref<256x10xf32, #tpu.memory_space<vmem>>, vector<256x10xf32>
    %cst_19 = arith.constant dense<0.000000e+00> : vector<2x10xf32>
    %21 = tpu.matmul %14, %20, %cst_19 {dimension_numbers = #tpu.dot_dimension_numbers<[1], [0], [0], [1], [0, 0, 1, 1], [], []>} : vector<2x256xf32>, vector<256x10xf32>, vector<2x10xf32> -> vector<2x10xf32>
    %c0_20 = arith.constant 0 : index
    %c0_21 = arith.constant 0 : index
    %22 = vector.load %arg9[%c0_20, %c0_21] : memref<1x10xf32, #tpu.memory_space<vmem>>, vector<1x10xf32>
    %23 = vector.broadcast %22 : vector<1x10xf32> to vector<2x10xf32>
    %24 = arith.addf %21, %23 : vector<2x10xf32>
    %c0_22 = arith.constant 0 : index
    %c0_23 = arith.constant 0 : index
    %25 = vector.load %arg16[%c0_22, %c0_23] : memref<2x10xf32, #tpu.memory_space<vmem>>, vector<2x10xf32>
    tpu.vector_store %arg16[%c0_22, %c0_23], %19 {strides = array<i32>} : memref<2x10xf32, #tpu.memory_space<vmem>>, vector<2x10xf32>,
    %c0_24 = arith.constant 0 : index
    %c0_25 = arith.constant 0 : index
    %26 = vector.load %arg17[%c0_24, %c0_25] : memref<2x10xf32, #tpu.memory_space<vmem>>, vector<2x10xf32>
    tpu.vector_store %arg17[%c0_24, %c0_25], %24 {strides = array<i32>} : memref<2x10xf32, #tpu.memory_space<vmem>>, vector<2x10xf32>,
    %cst_26 = arith.constant 5.000000e-01 : f32
    %27 = vector.broadcast %cst_26 : f32 to vector<2x10xf32>
    %28 = arith.mulf %24, %27 : vector<2x10xf32>
    %29 = math.exp %28 : vector<2x10xf32>
    %c0_27 = arith.constant 0 : index
    %c0_28 = arith.constant 0 : index
    %30 = vector.load %arg1[%c0_27, %c0_28] : memref<2x10xf32, #tpu.memory_space<vmem>>, vector<2x10xf32>
    %31 = arith.mulf %29, %30 : vector<2x10xf32>
    %32 = arith.addf %19, %31 : vector<2x10xf32>
    %c0_29 = arith.constant 0 : index
    %c0_30 = arith.constant 0 : index
    %33 = vector.load %arg10[%c0_29, %c0_30] : memref<10x256xf32, #tpu.memory_space<vmem>>, vector<10x256xf32>
    %cst_31 = arith.constant dense<0.000000e+00> : vector<2x256xf32>
    %34 = tpu.matmul %32, %33, %cst_31 {dimension_numbers = #tpu.dot_dimension_numbers<[1], [0], [0], [1], [0, 0, 1, 1], [], []>} : vector<2x10xf32>, vector<10x256xf32>, vector<2x256xf32> -> vector<2x256xf32>
    %c0_32 = arith.constant 0 : index
    %c0_33 = arith.constant 0 : index
    %35 = vector.load %arg11[%c0_32, %c0_33] : memref<1x256xf32, #tpu.memory_space<vmem>>, vector<1x256xf32>
    %36 = vector.broadcast %35 : vector<1x256xf32> to vector<2x256xf32>
    %37 = arith.addf %34, %36 : vector<2x256xf32>
    %cst_34 = arith.constant 0.000000e+00 : f32
    %38 = vector.broadcast %cst_34 : f32 to vector<2x256xf32>
    %39 = arith.maximumf %37, %38 : vector<2x256xf32>
    %c0_35 = arith.constant 0 : index
    %c0_36 = arith.constant 0 : index
    %40 = vector.load %arg12[%c0_35, %c0_36] : memref<256x256xf32, #tpu.memory_space<vmem>>, vector<256x256xf32>
    %cst_37 = arith.constant dense<0.000000e+00> : vector<2x256xf32>
    %41 = tpu.matmul %39, %40, %cst_37 {dimension_numbers = #tpu.dot_dimension_numbers<[1], [0], [0], [1], [0, 0, 1, 1], [], []>} : vector<2x256xf32>, vector<256x256xf32>, vector<2x256xf32> -> vector<2x256xf32>
    %c0_38 = arith.constant 0 : index
    %c0_39 = arith.constant 0 : index
    %42 = vector.load %arg13[%c0_38, %c0_39] : memref<1x256xf32, #tpu.memory_space<vmem>>, vector<1x256xf32>
    %43 = vector.broadcast %42 : vector<1x256xf32> to vector<2x256xf32>
    %44 = arith.addf %41, %43 : vector<2x256xf32>
    %cst_40 = arith.constant 0.000000e+00 : f32
    %45 = vector.broadcast %cst_40 : f32 to vector<2x256xf32>
    %46 = arith.maximumf %44, %45 : vector<2x256xf32>
    %c0_41 = arith.constant 0 : index
    %c0_42 = arith.constant 0 : index
    %47 = vector.load %arg14[%c0_41, %c0_42] : memref<256x512xf32, #tpu.memory_space<vmem>>, vector<256x512xf32>
    %cst_43 = arith.constant dense<0.000000e+00> : vector<2x512xf32>
    %48 = tpu.matmul %46, %47, %cst_43 {dimension_numbers = #tpu.dot_dimension_numbers<[1], [0], [0], [1], [0, 0, 1, 1], [], []>} : vector<2x256xf32>, vector<256x512xf32>, vector<2x512xf32> -> vector<2x512xf32>
    %c0_44 = arith.constant 0 : index
    %c0_45 = arith.constant 0 : index
    %49 = vector.load %arg15[%c0_44, %c0_45] : memref<1x512xf32, #tpu.memory_space<vmem>>, vector<1x512xf32>
    %50 = vector.broadcast %49 : vector<1x512xf32> to vector<2x512xf32>
    %51 = arith.addf %48, %50 : vector<2x512xf32>
    %cst_46 = arith.constant 0.000000e+00 : f32
    %52 = vector.broadcast %cst_46 : f32 to vector<2x512xf32>
    %53 = arith.maximumf %51, %52 : vector<2x512xf32>
    %c0_47 = arith.constant 0 : index
    %c0_48 = arith.constant 0 : index
    %54 = vector.load %arg18[%c0_47, %c0_48] : memref<2x512xf32, #tpu.memory_space<vmem>>, vector<2x512xf32>
    tpu.vector_store %arg18[%c0_47, %c0_48], %53 {strides = array<i32>} : memref<2x512xf32, #tpu.memory_space<vmem>>, vector<2x512xf32>,
    return
  }
}

module attributes {stable_mosaic.version = 11 : i64} {
  func.func @_mm_bias_act_kernel(%arg0: i32, %arg1: memref<32x288xbf16, #tpu.memory_space<vmem>>, %arg2: memref<288x128xbf16, #tpu.memory_space<vmem>>, %arg3: memref<1x128xf32, #tpu.memory_space<vmem>>, %arg4: memref<32x128xf32, #tpu.memory_space<vmem>>) attributes {dimension_semantics = [#tpu.dimension_semantics<parallel>], iteration_bounds = array<i64: 1>, scalar_prefetch = 0 : i64, scratch_operands = 0 : i64, tpu.core_type = #tpu.core_type<tc>, window_params = [{transform_indices = @transform_0, window_bounds = array<i64: 32, 288>}, {pipeline_mode = #tpu.pipeline_mode<synchronous>, transform_indices = @transform_1, window_bounds = array<i64: 288, 128>}, {pipeline_mode = #tpu.pipeline_mode<synchronous>, transform_indices = @transform_2, window_bounds = array<i64: 1, 128>}, {transform_indices = @transform_3, window_bounds = array<i64: 32, 128>}]} {
    %c0 = arith.constant 0 : index
    %c0_0 = arith.constant 0 : index
    %0 = vector.load %arg1[%c0, %c0_0] : memref<32x288xbf16, #tpu.memory_space<vmem>>, vector<32x288xbf16>
    %c0_1 = arith.constant 0 : index
    %c0_2 = arith.constant 0 : index
    %1 = vector.load %arg2[%c0_1, %c0_2] : memref<288x128xbf16, #tpu.memory_space<vmem>>, vector<288x128xbf16>
    %cst = arith.constant dense<0.000000e+00> : vector<32x128xf32>
    %2 = tpu.matmul %0, %1, %cst {dimension_numbers = #tpu.dot_dimension_numbers<[1], [0], [0], [1], [0, 0, 1, 1], [], []>} : vector<32x288xbf16>, vector<288x128xbf16>, vector<32x128xf32> -> vector<32x128xf32>
    %c0_3 = arith.constant 0 : index
    %c0_4 = arith.constant 0 : index
    %3 = vector.load %arg3[%c0_3, %c0_4] : memref<1x128xf32, #tpu.memory_space<vmem>>, vector<1x128xf32>
    %4 = vector.broadcast %3 : vector<1x128xf32> to vector<32x128xf32>
    %5 = arith.addf %2, %4 : vector<32x128xf32>
    %cst_5 = arith.constant 0.000000e+00 : f32
    %6 = vector.broadcast %cst_5 : f32 to vector<32x128xf32>
    %7 = arith.maximumf %5, %6 : vector<32x128xf32>
    %c0_6 = arith.constant 0 : index
    %c0_7 = arith.constant 0 : index
    %8 = vector.load %arg4[%c0_6, %c0_7] : memref<32x128xf32, #tpu.memory_space<vmem>>, vector<32x128xf32>
    tpu.vector_store %arg4[%c0_6, %c0_7], %7 {strides = array<i32>} : memref<32x128xf32, #tpu.memory_space<vmem>>, vector<32x128xf32>,
    return
  }
  func.func @transform_0(%arg0: i32) -> (i32, i32) {
    %c0_i32 = arith.constant 0 : i32
    %c0_i32_0 = arith.constant 0 : i32
    return %arg0, %c0_i32 : i32, i32
  }
  func.func @transform_1(%arg0: i32) -> (i32, i32) {
    %c0_i32 = arith.constant 0 : i32
    %c0_i32_0 = arith.constant 0 : i32
    %c0_i32_1 = arith.constant 0 : i32
    return %c0_i32, %c0_i32_0 : i32, i32
  }
  func.func @transform_2(%arg0: i32) -> (i32, i32) {
    %c0_i32 = arith.constant 0 : i32
    %c0_i32_0 = arith.constant 0 : i32
    %c0_i32_1 = arith.constant 0 : i32
    return %c0_i32, %c0_i32_0 : i32, i32
  }
  func.func @transform_3(%arg0: i32) -> (i32, i32) {
    %c0_i32 = arith.constant 0 : i32
    %c0_i32_0 = arith.constant 0 : i32
    return %arg0, %c0_i32 : i32, i32
  }
}

module attributes {stable_mosaic.version = 11 : i64} {
  func.func @_mm_bias_act_kernel(%arg0: i32, %arg1: memref<128x288xbf16, #tpu.memory_space<vmem>>, %arg2: memref<288x128xbf16, #tpu.memory_space<vmem>>, %arg3: memref<1x128xf32, #tpu.memory_space<vmem>>, %arg4: memref<128x128xf32, #tpu.memory_space<vmem>>) attributes {dimension_semantics = [#tpu.dimension_semantics<parallel>], iteration_bounds = array<i64: 1>, scalar_prefetch = 0 : i64, scratch_operands = 0 : i64, tpu.core_type = #tpu.core_type<tc>, window_params = [{transform_indices = @transform_0, window_bounds = array<i64: 128, 288>}, {pipeline_mode = #tpu.pipeline_mode<synchronous>, transform_indices = @transform_1, window_bounds = array<i64: 288, 128>}, {pipeline_mode = #tpu.pipeline_mode<synchronous>, transform_indices = @transform_2, window_bounds = array<i64: 1, 128>}, {transform_indices = @transform_3, window_bounds = array<i64: 128, 128>}]} {
    %c0 = arith.constant 0 : index
    %c0_0 = arith.constant 0 : index
    %0 = vector.load %arg1[%c0, %c0_0] : memref<128x288xbf16, #tpu.memory_space<vmem>>, vector<128x288xbf16>
    %c0_1 = arith.constant 0 : index
    %c0_2 = arith.constant 0 : index
    %1 = vector.load %arg2[%c0_1, %c0_2] : memref<288x128xbf16, #tpu.memory_space<vmem>>, vector<288x128xbf16>
    %cst = arith.constant dense<0.000000e+00> : vector<128x128xf32>
    %2 = tpu.matmul %0, %1, %cst {dimension_numbers = #tpu.dot_dimension_numbers<[1], [0], [0], [1], [0, 0, 1, 1], [], []>} : vector<128x288xbf16>, vector<288x128xbf16>, vector<128x128xf32> -> vector<128x128xf32>
    %c0_3 = arith.constant 0 : index
    %c0_4 = arith.constant 0 : index
    %3 = vector.load %arg3[%c0_3, %c0_4] : memref<1x128xf32, #tpu.memory_space<vmem>>, vector<1x128xf32>
    %4 = vector.broadcast %3 : vector<1x128xf32> to vector<128x128xf32>
    %5 = arith.addf %2, %4 : vector<128x128xf32>
    %cst_5 = arith.constant 0.000000e+00 : f32
    %6 = vector.broadcast %cst_5 : f32 to vector<128x128xf32>
    %7 = arith.maximumf %5, %6 : vector<128x128xf32>
    %c0_6 = arith.constant 0 : index
    %c0_7 = arith.constant 0 : index
    %8 = vector.load %arg4[%c0_6, %c0_7] : memref<128x128xf32, #tpu.memory_space<vmem>>, vector<128x128xf32>
    tpu.vector_store %arg4[%c0_6, %c0_7], %7 {strides = array<i32>} : memref<128x128xf32, #tpu.memory_space<vmem>>, vector<128x128xf32>,
    return
  }
  func.func @transform_0(%arg0: i32) -> (i32, i32) {
    %c0_i32 = arith.constant 0 : i32
    %c0_i32_0 = arith.constant 0 : i32
    return %arg0, %c0_i32 : i32, i32
  }
  func.func @transform_1(%arg0: i32) -> (i32, i32) {
    %c0_i32 = arith.constant 0 : i32
    %c0_i32_0 = arith.constant 0 : i32
    %c0_i32_1 = arith.constant 0 : i32
    return %c0_i32, %c0_i32_0 : i32, i32
  }
  func.func @transform_2(%arg0: i32) -> (i32, i32) {
    %c0_i32 = arith.constant 0 : i32
    %c0_i32_0 = arith.constant 0 : i32
    %c0_i32_1 = arith.constant 0 : i32
    return %c0_i32, %c0_i32_0 : i32, i32
  }
  func.func @transform_3(%arg0: i32) -> (i32, i32) {
    %c0_i32 = arith.constant 0 : i32
    %c0_i32_0 = arith.constant 0 : i32
    return %arg0, %c0_i32 : i32, i32
  }
}

module attributes {stable_mosaic.version = 11 : i64} {
  func.func @_mm_bias_act_kernel(%arg0: i32, %arg1: memref<512x288xbf16, #tpu.memory_space<vmem>>, %arg2: memref<288x128xbf16, #tpu.memory_space<vmem>>, %arg3: memref<1x128xf32, #tpu.memory_space<vmem>>, %arg4: memref<512x128xf32, #tpu.memory_space<vmem>>) attributes {dimension_semantics = [#tpu.dimension_semantics<parallel>], iteration_bounds = array<i64: 1>, scalar_prefetch = 0 : i64, scratch_operands = 0 : i64, tpu.core_type = #tpu.core_type<tc>, window_params = [{transform_indices = @transform_0, window_bounds = array<i64: 512, 288>}, {pipeline_mode = #tpu.pipeline_mode<synchronous>, transform_indices = @transform_1, window_bounds = array<i64: 288, 128>}, {pipeline_mode = #tpu.pipeline_mode<synchronous>, transform_indices = @transform_2, window_bounds = array<i64: 1, 128>}, {transform_indices = @transform_3, window_bounds = array<i64: 512, 128>}]} {
    %c0 = arith.constant 0 : index
    %c0_0 = arith.constant 0 : index
    %0 = vector.load %arg1[%c0, %c0_0] : memref<512x288xbf16, #tpu.memory_space<vmem>>, vector<512x288xbf16>
    %c0_1 = arith.constant 0 : index
    %c0_2 = arith.constant 0 : index
    %1 = vector.load %arg2[%c0_1, %c0_2] : memref<288x128xbf16, #tpu.memory_space<vmem>>, vector<288x128xbf16>
    %cst = arith.constant dense<0.000000e+00> : vector<512x128xf32>
    %2 = tpu.matmul %0, %1, %cst {dimension_numbers = #tpu.dot_dimension_numbers<[1], [0], [0], [1], [0, 0, 1, 1], [], []>} : vector<512x288xbf16>, vector<288x128xbf16>, vector<512x128xf32> -> vector<512x128xf32>
    %c0_3 = arith.constant 0 : index
    %c0_4 = arith.constant 0 : index
    %3 = vector.load %arg3[%c0_3, %c0_4] : memref<1x128xf32, #tpu.memory_space<vmem>>, vector<1x128xf32>
    %4 = vector.broadcast %3 : vector<1x128xf32> to vector<512x128xf32>
    %5 = arith.addf %2, %4 : vector<512x128xf32>
    %cst_5 = arith.constant 0.000000e+00 : f32
    %6 = vector.broadcast %cst_5 : f32 to vector<512x128xf32>
    %7 = arith.maximumf %5, %6 : vector<512x128xf32>
    %c0_6 = arith.constant 0 : index
    %c0_7 = arith.constant 0 : index
    %8 = vector.load %arg4[%c0_6, %c0_7] : memref<512x128xf32, #tpu.memory_space<vmem>>, vector<512x128xf32>
    tpu.vector_store %arg4[%c0_6, %c0_7], %7 {strides = array<i32>} : memref<512x128xf32, #tpu.memory_space<vmem>>, vector<512x128xf32>,
    return
  }
  func.func @transform_0(%arg0: i32) -> (i32, i32) {
    %c0_i32 = arith.constant 0 : i32
    %c0_i32_0 = arith.constant 0 : i32
    return %arg0, %c0_i32 : i32, i32
  }
  func.func @transform_1(%arg0: i32) -> (i32, i32) {
    %c0_i32 = arith.constant 0 : i32
    %c0_i32_0 = arith.constant 0 : i32
    %c0_i32_1 = arith.constant 0 : i32
    return %c0_i32, %c0_i32_0 : i32, i32
  }
  func.func @transform_2(%arg0: i32) -> (i32, i32) {
    %c0_i32 = arith.constant 0 : i32
    %c0_i32_0 = arith.constant 0 : i32
    %c0_i32_1 = arith.constant 0 : i32
    return %c0_i32, %c0_i32_0 : i32, i32
  }
  func.func @transform_3(%arg0: i32) -> (i32, i32) {
    %c0_i32 = arith.constant 0 : i32
    %c0_i32_0 = arith.constant 0 : i32
    return %arg0, %c0_i32 : i32, i32
  }
}

module attributes {stable_mosaic.version = 11 : i64} {
  func.func @_mm_bias_act_kernel(%arg0: i32, %arg1: memref<1024x288xbf16, #tpu.memory_space<vmem>>, %arg2: memref<288x4xbf16, #tpu.memory_space<vmem>>, %arg3: memref<1x4xf32, #tpu.memory_space<vmem>>, %arg4: memref<1024x4xf32, #tpu.memory_space<vmem>>) attributes {dimension_semantics = [#tpu.dimension_semantics<parallel>], iteration_bounds = array<i64: 2>, scalar_prefetch = 0 : i64, scratch_operands = 0 : i64, tpu.core_type = #tpu.core_type<tc>, window_params = [{transform_indices = @transform_0, window_bounds = array<i64: 1024, 288>}, {pipeline_mode = #tpu.pipeline_mode<synchronous>, transform_indices = @transform_1, window_bounds = array<i64: 288, 4>}, {pipeline_mode = #tpu.pipeline_mode<synchronous>, transform_indices = @transform_2, window_bounds = array<i64: 1, 4>}, {transform_indices = @transform_3, window_bounds = array<i64: 1024, 4>}]} {
    %c0 = arith.constant 0 : index
    %c0_0 = arith.constant 0 : index
    %0 = vector.load %arg1[%c0, %c0_0] : memref<1024x288xbf16, #tpu.memory_space<vmem>>, vector<1024x288xbf16>
    %c0_1 = arith.constant 0 : index
    %c0_2 = arith.constant 0 : index
    %1 = vector.load %arg2[%c0_1, %c0_2] : memref<288x4xbf16, #tpu.memory_space<vmem>>, vector<288x4xbf16>
    %cst = arith.constant dense<0.000000e+00> : vector<1024x4xf32>
    %2 = tpu.matmul %0, %1, %cst {dimension_numbers = #tpu.dot_dimension_numbers<[1], [0], [0], [1], [0, 0, 1, 1], [], []>} : vector<1024x288xbf16>, vector<288x4xbf16>, vector<1024x4xf32> -> vector<1024x4xf32>
    %c0_3 = arith.constant 0 : index
    %c0_4 = arith.constant 0 : index
    %3 = vector.load %arg3[%c0_3, %c0_4] : memref<1x4xf32, #tpu.memory_space<vmem>>, vector<1x4xf32>
    %4 = vector.broadcast %3 : vector<1x4xf32> to vector<1024x4xf32>
    %5 = arith.addf %2, %4 : vector<1024x4xf32>
    %c0_5 = arith.constant 0 : index
    %c0_6 = arith.constant 0 : index
    %6 = vector.load %arg4[%c0_5, %c0_6] : memref<1024x4xf32, #tpu.memory_space<vmem>>, vector<1024x4xf32>
    tpu.vector_store %arg4[%c0_5, %c0_6], %5 {strides = array<i32>} : memref<1024x4xf32, #tpu.memory_space<vmem>>, vector<1024x4xf32>,
    return
  }
  func.func @transform_0(%arg0: i32) -> (i32, i32) {
    %c0_i32 = arith.constant 0 : i32
    %c0_i32_0 = arith.constant 0 : i32
    return %arg0, %c0_i32 : i32, i32
  }
  func.func @transform_1(%arg0: i32) -> (i32, i32) {
    %c0_i32 = arith.constant 0 : i32
    %c0_i32_0 = arith.constant 0 : i32
    %c0_i32_1 = arith.constant 0 : i32
    return %c0_i32, %c0_i32_0 : i32, i32
  }
  func.func @transform_2(%arg0: i32) -> (i32, i32) {
    %c0_i32 = arith.constant 0 : i32
    %c0_i32_0 = arith.constant 0 : i32
    %c0_i32_1 = arith.constant 0 : i32
    return %c0_i32, %c0_i32_0 : i32, i32
  }
  func.func @transform_3(%arg0: i32) -> (i32, i32) {
    %c0_i32 = arith.constant 0 : i32
    %c0_i32_0 = arith.constant 0 : i32
    return %arg0, %c0_i32 : i32, i32
  }
}

</mosaic_0001>

<bundles_post_ra>
// kernel: beta_vae_b_forward.9
= control target key start
LH: loop header
LB: loop body
LE: loop exit
PB: predicated region body
PF: predicated region fallthrough
CT: control target
= control target key end

     0   :  { %8 = vsyncpa [#allocation3], 0  ;;  %s2615_s0 = inlined_call_operand.vmem [shape: bf16[2048,16], index: 0, kind: input, shape index: {}]   ;;  %s2616_s1 = inlined_call_operand.hbm [shape: bf16[16,32], index: 1, kind: input, shape index: {}]   ;;  %s2617_s2 = inlined_call_operand.hbm [shape: f32[1,32], index: 2, kind: input, shape index: {}]   ;;  %s2618_s3 = inlined_call_operand.vmem [shape: f32[2048,32], index: 3, kind: output, shape index: {}]  }
   0x1   :  { %9 = vsyncpa [#allocation5], 0  ;;  %s2064_s12 = smov 0  }
   0x2 LB: > { %s125_s15 = sshll.u32 %s2616_s1, 4  ;;  %s1524_s16 = sadd.s32 4294967295, %s2038_s12   ;;  %s2038_s12 = sphi %s2064_s12, %s15_s12   ;;  %s126_s15 = int_to_ptr.hbm [resolvable:$true] %s125_s15 }
   0x3   : > { %p1526_p0 = scmp.ge.s32.totalorder %s2038_s12, 1  ;;  %p114_p1 = scmp.lt.s32.totalorder %s2038_s12, 3 }
   0x4   : > { %p2075_p2 = scmp.eq.s32.totalorder %s1524_s16, 0  ;;  %s2040_s19 = smov [#allocation2]  }
   0x5   : > { %p2079_p3 = pnand %p1526_p0, %p114_p1  ;;  %s127_s20 = sshll.u32 %s2040_s19, 4  ;;  %s128_s20 = int_to_ptr.vmem [resolvable:$true] %s127_s20 }
   0x6   : > { %s140_s23 = sshll.u32 %s2617_s2, 4  ;;  %s2041_s24 = smov [#allocation4]   ;;  %s141_s23 = int_to_ptr.hbm [resolvable:$true] %s140_s23 }
   0x7   : > { %p1939_p4 = pneg %p2079_p3  ;;  %s142_s25 = sshll.u32 %s2041_s24, 4  ;;  %s143_s25 = int_to_ptr.vmem [resolvable:$true] %s142_s25 }
   0x8   : > { %s2042_s26 = smov 64   ;;  %s2043_s27 = smov 4  }
   0x9   : > { %p1940_p5 = pnand %p2075_p2, %p1939_p4  ;;  %164 = sbr.rel (%p2079_p3) target bundleno = 412 (0x19c), region = 32 }
   0xb   : > { %1942 = dma.hbm_to_vmem [thread:$0]  (!%p1940_p5), %s126_s15, 128, %s128_s20, [#allocation3], %s2042_s26, %s2042_s26, %s2043_s27  }
   0xc   : > { %1945 = dma.hbm_to_vmem [thread:$0]  (!%p1940_p5), %s141_s23, 16, %s143_s25, [#allocation5]  }
   0xe   : > { %2029 = dma.done.wait (%p2075_p2), [#allocation3], 128  }
   0xf   : > { %2031 = vsyncadd (%p2075_p2), [#allocation3], 4294967168 }
  0x10   : > { %2033 = dma.done.wait (%p2075_p2), [#allocation5], 16  }
  0x11   : > { %2035 = vsyncadd (%p2075_p2), [#allocation5], 4294967280  ;;  %s1533_s28 = sshll.u32 %s1524_s16, 7  ;;  %v1927_v0 = vld [vmem:[#allocation2] sm:$0xff]  ;;  %vm667_vm0 = vcmask 130048   ;;  %vm1317_vm1 = vcmask 261120  }
  0x12   : > { %p195_p6 = scmp.lt.s32.totalorder %s1533_s28, 255  ;;  %867 = vmatpush.bf16.msra.mxu0 %v1927_v0  ;;  %1928 = vmatpush.bf16.msra.mxu1 %v1927_v0  ;;  %v2172_v33 = vld [vmem:[#allocation4] ss:$0 sm:$0xff] }
  0x13   : > { %1929 = vmatpush.bf16.msra.mxu2 %v1927_v0  ;;  %1930 = vmatpush.bf16.msra.mxu3 %v1927_v0 }
  0x14   : > { %s2622_s28 = smov (!%p195_p6, %s1533_s28), 255 }
  0x15   : > { %s1534_s29 = sshll.u32 %s2622_s28, 2  ;;  %s1536_s6 = sshll.u32 %s2622_s28, 3 }
  0x16   : > { %s2106_s5 = scalar_lea.vmem %s2615_s0, %s1534_s29  ;;  %s2184_s9 = scalar_lea.vmem %s2618_s3, %s1536_s6 }
  0x17   : > { %v1863_v1 = vld [vmem:[%s2106_s5] sm:$0xff]  ;;  %v1864_v5 = vld [vmem:[%s2106_s5 + $0x8] sm:$0xff]  ;;  %v1865_v9 = vld [vmem:[%s2106_s5 + $0x10] sm:$0xff] }
  0x18   : > { %v1879_v2 = vld [vmem:[%s2106_s5 + $0x80] sm:$0xff]  ;;  %1797 = vmatmul.msk.bf16.vlgmr.msra.gmra.mxu0 %vm667_vm0, %v1863_v1  ;;  %v1880_v6 = vld [vmem:[%s2106_s5 + $0x88] sm:$0xff]  ;;  %v1881_v10 = vld [vmem:[%s2106_s5 + $0x90] sm:$0xff] }
  0x19   : > { %v1895_v3 = vld [vmem:[%s2106_s5 + $0x100] sm:$0xff]  ;;  %1813 = vmatmul.msk.bf16.vlgmr.msra.gmra.mxu1 %vm667_vm0, %v1879_v2  ;;  %v1896_v7 = vld [vmem:[%s2106_s5 + $0x108] sm:$0xff]  ;;  %v1897_v11 = vld [vmem:[%s2106_s5 + $0x110] sm:$0xff] }
  0x1a   : > { %v1911_v4 = vld [vmem:[%s2106_s5 + $0x180] sm:$0xff]  ;;  %1829 = vmatmul.msk.bf16.vlgmr.msra.gmra.mxu2 %vm667_vm0, %v1895_v3  ;;  %v1912_v8 = vld [vmem:[%s2106_s5 + $0x188] sm:$0xff]  ;;  %v1913_v12 = vld [vmem:[%s2106_s5 + $0x190] sm:$0xff] }
  0x1b   : > { %1845 = vmatmul.msk.bf16.vlgmr.msra.gmra.mxu3 %vm667_vm0, %v1911_v4  ;;  %v1866_v13 = vld [vmem:[%s2106_s5 + $0x18] sm:$0xff]  ;;  %v1867_v17 = vld [vmem:[%s2106_s5 + $0x20] sm:$0xff]  ;;  %v1868_v21 = vld [vmem:[%s2106_s5 + $0x28] sm:$0xff] }
  0x1c   : > { %v1882_v14 = vld [vmem:[%s2106_s5 + $0x98] sm:$0xff]  ;;  %v1883_v18 = vld [vmem:[%s2106_s5 + $0xa0] sm:$0xff]  ;;  %v1884_v22 = vld [vmem:[%s2106_s5 + $0xa8] sm:$0xff] }
  0x1d   : > { %v1898_v15 = vld [vmem:[%s2106_s5 + $0x118] sm:$0xff]  ;;  %v1899_v19 = vld [vmem:[%s2106_s5 + $0x120] sm:$0xff]  ;;  %v1900_v23 = vld [vmem:[%s2106_s5 + $0x128] sm:$0xff] }
  0x1e   : > { %v1914_v16 = vld [vmem:[%s2106_s5 + $0x198] sm:$0xff]  ;;  %v1915_v20 = vld [vmem:[%s2106_s5 + $0x1a0] sm:$0xff]  ;;  %v1916_v24 = vld [vmem:[%s2106_s5 + $0x1a8] sm:$0xff] }
  0x1f   : > { %v1869_v25 = vld [vmem:[%s2106_s5 + $0x30] sm:$0xff]  ;;  %v1870_v29 = vld [vmem:[%s2106_s5 + $0x38] sm:$0xff]  ;;  %v1871_v34 = vld [vmem:[%s2106_s5 + $0x40] sm:$0xff] }
  0x20   : > { %v1885_v26 = vld [vmem:[%s2106_s5 + $0xb0] sm:$0xff]  ;;  %v1886_v30 = vld [vmem:[%s2106_s5 + $0xb8] sm:$0xff]  ;;  %v1887_v35 = vld [vmem:[%s2106_s5 + $0xc0] sm:$0xff] }
  0x21   : > { %v1901_v27 = vld [vmem:[%s2106_s5 + $0x130] sm:$0xff]  ;;  %v1902_v31 = vld [vmem:[%s2106_s5 + $0x138] sm:$0xff]  ;;  %v1903_v38 = vld [vmem:[%s2106_s5 + $0x140] sm:$0xff] }
  0x22   : > { %v1917_v28 = vld [vmem:[%s2106_s5 + $0x1b0] sm:$0xff]  ;;  %v1918_v32 = vld [vmem:[%s2106_s5 + $0x1b8] sm:$0xff]  ;;  %v1919_v39 = vld [vmem:[%s2106_s5 + $0x1c0] sm:$0xff] }
  0x23   : > { %v1872_v58 = vld [vmem:[%s2106_s5 + $0x48] sm:$0xff] }
  0x24   : > { %v1888_v59 = vld [vmem:[%s2106_s5 + $0xc8] sm:$0xff] }
  0x25   : > { %v1904_v0 = vld [vmem:[%s2106_s5 + $0x148] sm:$0xff] }
  0x26   : > { %v1920_v1 = vld [vmem:[%s2106_s5 + $0x1c8] sm:$0xff] }
  0x28   : > { %1798 = vmatmul.msk.bf16.gmra.mxu0 %vm667_vm0, %v1864_v5 }
  0x29   : > { %1814 = vmatmul.msk.bf16.gmra.mxu1 %vm667_vm0, %v1880_v6 }
  0x2a   : > { %1830 = vmatmul.msk.bf16.gmra.mxu2 %vm667_vm0, %v1896_v7 }
  0x2b   : > { %1846 = vmatmul.msk.bf16.gmra.mxu3 %vm667_vm0, %v1912_v8 }
  0x38   : > { %1799 = vmatmul.msk.bf16.gmra.mxu0 %vm667_vm0, %v1865_v9 }
  0x39   : > { %1815 = vmatmul.msk.bf16.gmra.mxu1 %vm667_vm0, %v1881_v10 }
  0x3a   : > { %1831 = vmatmul.msk.bf16.gmra.mxu2 %vm667_vm0, %v1897_v11 }
  0x3b   : > { %1847 = vmatmul.msk.bf16.gmra.mxu3 %vm667_vm0, %v1913_v12 }
  0x48   : > { %1800 = vmatmul.msk.bf16.gmra.mxu0 %vm667_vm0, %v1866_v13 }
  0x49   : > { %1816 = vmatmul.msk.bf16.gmra.mxu1 %vm667_vm0, %v1882_v14 }
  0x4a   : > { %1832 = vmatmul.msk.bf16.gmra.mxu2 %vm667_vm0, %v1898_v15 }
  0x4b   : > { %1848 = vmatmul.msk.bf16.gmra.mxu3 %vm667_vm0, %v1914_v16 }
  0x58   : > { %1801 = vmatmul.msk.bf16.gmra.mxu0 %vm667_vm0, %v1867_v17 }
  0x59   : > { %1817 = vmatmul.msk.bf16.gmra.mxu1 %vm667_vm0, %v1883_v18 }
  0x5a   : > { %1833 = vmatmul.msk.bf16.gmra.mxu2 %vm667_vm0, %v1899_v19 }
  0x5b   : > { %1849 = vmatmul.msk.bf16.gmra.mxu3 %vm667_vm0, %v1915_v20 }
  0x68   : > { %1802 = vmatmul.msk.bf16.gmra.mxu0 %vm667_vm0, %v1868_v21 }
  0x69   : > { %1818 = vmatmul.msk.bf16.gmra.mxu1 %vm667_vm0, %v1884_v22  ;;  %v1873_v22 = vld [vmem:[%s2106_s5 + $0x50] sm:$0xff] }
  0x6a   : > { %1834 = vmatmul.msk.bf16.gmra.mxu2 %vm667_vm0, %v1900_v23  ;;  %v1889_v23 = vld [vmem:[%s2106_s5 + $0xd0] sm:$0xff] }
  0x6b   : > { %1850 = vmatmul.msk.bf16.gmra.mxu3 %vm667_vm0, %v1916_v24 }
  0x78   : > { %1803 = vmatmul.msk.bf16.gmra.mxu0 %vm667_vm0, %v1869_v25 }
  0x79   : > { %1819 = vmatmul.msk.bf16.gmra.mxu1 %vm667_vm0, %v1885_v26 }
  0x7a   : > { %1835 = vmatmul.msk.bf16.gmra.mxu2 %vm667_vm0, %v1901_v27 }
  0x7b   : > { %1851 = vmatmul.msk.bf16.gmra.mxu3 %vm667_vm0, %v1917_v28  ;;  %v1905_v28 = vld [vmem:[%s2106_s5 + $0x150] sm:$0xff] }
  0x88   : > { %1804 = vmatmul.msk.bf16.gmra.mxu0 %vm667_vm0, %v1870_v29  ;;  %v1921_v29 = vld [vmem:[%s2106_s5 + $0x1d0] sm:$0xff] }
  0x89   : > { %1820 = vmatmul.msk.bf16.gmra.mxu1 %vm667_vm0, %v1886_v30 }
  0x8a   : > { %1836 = vmatmul.msk.bf16.gmra.mxu2 %vm667_vm0, %v1902_v31 }
  0x8b   : > { %1852 = vmatmul.msk.bf16.gmra.mxu3 %vm667_vm0, %v1918_v32 }
  0x95   : > { %v869_v36 = vpop.f32.mrf.mxu0 }
  0x96   : > { %v949_v37 = vpop.f32.mrf.mxu1  ;;  %v870_v40 = vadd.f32 %v2172_v33, %v869_v36 }
  0x97   : > { %v950_v41 = vadd.f32 %v2172_v33, %v949_v37 }
  0x98   : > { %v1189_v42 = vmax.f32 %v870_v40, 0.0  ;;  %1805 = vmatmul.msk.bf16.gmra.mxu0 %vm667_vm0, %v1871_v34 }
  0x99   : > { %v1221_v43 = vmax.f32 %v950_v41, 0.0  ;;  %1821 = vmatmul.msk.bf16.gmra.mxu1 %vm667_vm0, %v1887_v35 }
  0x9a   : > { %1837 = vmatmul.msk.bf16.gmra.mxu2 %vm667_vm0, %v1903_v38  ;;  %1318 = vst.msk [vmem:[%s2184_s9] sm:$0xff] %vm1317_vm1, %v1189_v42 }
  0x9b   : > { %1853 = vmatmul.msk.bf16.gmra.mxu3 %vm667_vm0, %v1919_v39  ;;  %1350 = vst.msk [vmem:[%s2184_s9 + $0x100] sm:$0xff] %vm1317_vm1, %v1221_v43 }
  0x9d   : > { %v1029_v44 = vpop.f32.mrf.mxu2  ;;  %v871_v48 = vpop.f32.mrf.mxu0 }
  0x9e   : > { %v1109_v45 = vpop.f32.mrf.mxu3  ;;  %v1030_v46 = vadd.f32 %v2172_v33, %v1029_v44  ;;  %v951_v49 = vpop.f32.mrf.mxu1  ;;  %v872_v50 = vadd.f32 %v2172_v33, %v871_v48 }
  0x9f   : > { %v1110_v47 = vadd.f32 %v2172_v33, %v1109_v45  ;;  %v952_v51 = vadd.f32 %v2172_v33, %v951_v49 }
  0xa0   : > { %v1253_v52 = vmax.f32 %v1030_v46, 0.0  ;;  %v1190_v54 = vmax.f32 %v872_v50, 0.0 }
  0xa1   : > { %v1285_v53 = vmax.f32 %v1110_v47, 0.0  ;;  %v1222_v55 = vmax.f32 %v952_v51, 0.0  ;;  %v1874_v51 = vld [vmem:[%s2106_s5 + $0x58] sm:$0xff] }
  0xa2   : > { %1382 = vst.msk [vmem:[%s2184_s9 + $0x200] sm:$0xff] %vm1317_vm1, %v1253_v52  ;;  %v1890_v52 = vld [vmem:[%s2106_s5 + $0xd8] sm:$0xff] }
  0xa3   : > { %1414 = vst.msk [vmem:[%s2184_s9 + $0x300] sm:$0xff] %vm1317_vm1, %v1285_v53 }
  0xa4   : > { %1319 = vst.msk [vmem:[%s2184_s9 + $0x8] sm:$0xff] %vm1317_vm1, %v1190_v54 }
  0xa5   : > { %1351 = vst.msk [vmem:[%s2184_s9 + $0x108] sm:$0xff] %vm1317_vm1, %v1222_v55  ;;  %v1031_v56 = vpop.f32.mrf.mxu2  ;;  %v874_v62 = vpop.f32.mrf.mxu0 }
  0xa6   : > { %v1111_v57 = vpop.f32.mrf.mxu3  ;;  %v1032_v60 = vadd.f32 %v2172_v33, %v1031_v56  ;;  %v954_v63 = vpop.f32.mrf.mxu1  ;;  %v875_v2 = vadd.f32 %v2172_v33, %v874_v62 }
  0xa7   : > { %v1112_v61 = vadd.f32 %v2172_v33, %v1111_v57  ;;  %v955_v3 = vadd.f32 %v2172_v33, %v954_v63  ;;  %v1906_v57 = vld [vmem:[%s2106_s5 + $0x158] sm:$0xff] }
  0xa8   : > { %v1254_v4 = vmax.f32 %v1032_v60, 0.0  ;;  %v1191_v6 = vmax.f32 %v875_v2, 0.0  ;;  %1806 = vmatmul.msk.bf16.gmra.mxu0 %vm667_vm0, %v1872_v58  ;;  %v1922_v58 = vld [vmem:[%s2106_s5 + $0x1d8] sm:$0xff] }
  0xa9   : > { %v1286_v5 = vmax.f32 %v1112_v61, 0.0  ;;  %v1223_v7 = vmax.f32 %v955_v3, 0.0  ;;  %1822 = vmatmul.msk.bf16.gmra.mxu1 %vm667_vm0, %v1888_v59 }
  0xaa   : > { %1383 = vst.msk [vmem:[%s2184_s9 + $0x208] sm:$0xff] %vm1317_vm1, %v1254_v4  ;;  %1838 = vmatmul.msk.bf16.gmra.mxu2 %vm667_vm0, %v1904_v0 }
  0xab   : > { %1854 = vmatmul.msk.bf16.gmra.mxu3 %vm667_vm0, %v1920_v1  ;;  %1415 = vst.msk [vmem:[%s2184_s9 + $0x308] sm:$0xff] %vm1317_vm1, %v1286_v5 }
  0xac   : > { %1320 = vst.msk [vmem:[%s2184_s9 + $0x10] sm:$0xff] %vm1317_vm1, %v1191_v6 }
  0xad   : > { %1352 = vst.msk [vmem:[%s2184_s9 + $0x110] sm:$0xff] %vm1317_vm1, %v1223_v7  ;;  %v1034_v8 = vpop.f32.mrf.mxu2  ;;  %v876_v12 = vpop.f32.mrf.mxu0 }
  0xae   : > { %v1114_v9 = vpop.f32.mrf.mxu3  ;;  %v1035_v10 = vadd.f32 %v2172_v33, %v1034_v8  ;;  %v956_v13 = vpop.f32.mrf.mxu1  ;;  %v877_v14 = vadd.f32 %v2172_v33, %v876_v12 }
  0xaf   : > { %v1115_v11 = vadd.f32 %v2172_v33, %v1114_v9  ;;  %v957_v15 = vadd.f32 %v2172_v33, %v956_v13 }
  0xb0   : > { %v1255_v16 = vmax.f32 %v1035_v10, 0.0  ;;  %v1192_v18 = vmax.f32 %v877_v14, 0.0 }
  0xb1   : > { %v1287_v17 = vmax.f32 %v1115_v11, 0.0  ;;  %v1224_v19 = vmax.f32 %v957_v15, 0.0  ;;  %v1875_v15 = vld [vmem:[%s2106_s5 + $0x60] sm:$0xff] }
  0xb2   : > { %1384 = vst.msk [vmem:[%s2184_s9 + $0x210] sm:$0xff] %vm1317_vm1, %v1255_v16  ;;  %v1891_v16 = vld [vmem:[%s2106_s5 + $0xe0] sm:$0xff] }
  0xb3   : > { %1416 = vst.msk [vmem:[%s2184_s9 + $0x310] sm:$0xff] %vm1317_vm1, %v1287_v17 }
  0xb4   : > { %1321 = vst.msk [vmem:[%s2184_s9 + $0x18] sm:$0xff] %vm1317_vm1, %v1192_v18 }
  0xb5   : > { %1353 = vst.msk [vmem:[%s2184_s9 + $0x118] sm:$0xff] %vm1317_vm1, %v1224_v19  ;;  %v1036_v20 = vpop.f32.mrf.mxu2  ;;  %v879_v26 = vpop.f32.mrf.mxu0 }
  0xb6   : > { %v1116_v21 = vpop.f32.mrf.mxu3  ;;  %v1037_v24 = vadd.f32 %v2172_v33, %v1036_v20  ;;  %v959_v27 = vpop.f32.mrf.mxu1  ;;  %v880_v30 = vadd.f32 %v2172_v33, %v879_v26 }
  0xb7   : > { %v1117_v25 = vadd.f32 %v2172_v33, %v1116_v21  ;;  %v960_v31 = vadd.f32 %v2172_v33, %v959_v27  ;;  %v1907_v21 = vld [vmem:[%s2106_s5 + $0x160] sm:$0xff] }
  0xb8   : > { %v1256_v32 = vmax.f32 %v1037_v24, 0.0  ;;  %v1193_v35 = vmax.f32 %v880_v30, 0.0  ;;  %1807 = vmatmul.msk.bf16.gmra.mxu0 %vm667_vm0, %v1873_v22  ;;  %v1923_v22 = vld [vmem:[%s2106_s5 + $0x1e0] sm:$0xff] }
  0xb9   : > { %v1288_v34 = vmax.f32 %v1117_v25, 0.0  ;;  %v1225_v36 = vmax.f32 %v960_v31, 0.0  ;;  %1823 = vmatmul.msk.bf16.gmra.mxu1 %vm667_vm0, %v1889_v23 }
  0xba   : > { %1385 = vst.msk [vmem:[%s2184_s9 + $0x218] sm:$0xff] %vm1317_vm1, %v1256_v32  ;;  %1839 = vmatmul.msk.bf16.gmra.mxu2 %vm667_vm0, %v1905_v28 }
  0xbb   : > { %1855 = vmatmul.msk.bf16.gmra.mxu3 %vm667_vm0, %v1921_v29  ;;  %1417 = vst.msk [vmem:[%s2184_s9 + $0x318] sm:$0xff] %vm1317_vm1, %v1288_v34 }
  0xbc   : > { %1322 = vst.msk [vmem:[%s2184_s9 + $0x20] sm:$0xff] %vm1317_vm1, %v1193_v35 }
  0xbd   : > { %1354 = vst.msk [vmem:[%s2184_s9 + $0x120] sm:$0xff] %vm1317_vm1, %v1225_v36  ;;  %v1039_v37 = vpop.f32.mrf.mxu2  ;;  %v881_v41 = vpop.f32.mrf.mxu0 }
  0xbe   : > { %v1119_v38 = vpop.f32.mrf.mxu3  ;;  %v1040_v39 = vadd.f32 %v2172_v33, %v1039_v37  ;;  %v961_v42 = vpop.f32.mrf.mxu1  ;;  %v882_v43 = vadd.f32 %v2172_v33, %v881_v41 }
  0xbf   : > { %v1120_v40 = vadd.f32 %v2172_v33, %v1119_v38  ;;  %v962_v44 = vadd.f32 %v2172_v33, %v961_v42 }
  0xc0   : > { %v1257_v45 = vmax.f32 %v1040_v39, 0.0  ;;  %v1194_v47 = vmax.f32 %v882_v43, 0.0 }
  0xc1   : > { %v1289_v46 = vmax.f32 %v1120_v40, 0.0  ;;  %v1226_v48 = vmax.f32 %v962_v44, 0.0  ;;  %v1876_v44 = vld [vmem:[%s2106_s5 + $0x68] sm:$0xff] }
  0xc2   : > { %1386 = vst.msk [vmem:[%s2184_s9 + $0x220] sm:$0xff] %vm1317_vm1, %v1257_v45  ;;  %v1892_v45 = vld [vmem:[%s2106_s5 + $0xe8] sm:$0xff] }
  0xc3   : > { %1418 = vst.msk [vmem:[%s2184_s9 + $0x320] sm:$0xff] %vm1317_vm1, %v1289_v46 }
  0xc4   : > { %1323 = vst.msk [vmem:[%s2184_s9 + $0x28] sm:$0xff] %vm1317_vm1, %v1194_v47 }
  0xc5   : > { %1355 = vst.msk [vmem:[%s2184_s9 + $0x128] sm:$0xff] %vm1317_vm1, %v1226_v48  ;;  %v1041_v49 = vpop.f32.mrf.mxu2  ;;  %v884_v55 = vpop.f32.mrf.mxu0 }
  0xc6   : > { %v1121_v50 = vpop.f32.mrf.mxu3  ;;  %v1042_v53 = vadd.f32 %v2172_v33, %v1041_v49  ;;  %v964_v56 = vpop.f32.mrf.mxu1  ;;  %v885_v59 = vadd.f32 %v2172_v33, %v884_v55 }
  0xc7   : > { %v1122_v54 = vadd.f32 %v2172_v33, %v1121_v50  ;;  %v965_v60 = vadd.f32 %v2172_v33, %v964_v56  ;;  %v1908_v50 = vld [vmem:[%s2106_s5 + $0x168] sm:$0xff] }
  0xc8   : > { %v1258_v61 = vmax.f32 %v1042_v53, 0.0  ;;  %v1195_v63 = vmax.f32 %v885_v59, 0.0  ;;  %1808 = vmatmul.msk.bf16.gmra.mxu0 %vm667_vm0, %v1874_v51  ;;  %v1924_v51 = vld [vmem:[%s2106_s5 + $0x1e8] sm:$0xff] }
  0xc9   : > { %v1290_v62 = vmax.f32 %v1122_v54, 0.0  ;;  %v1227_v0 = vmax.f32 %v965_v60, 0.0  ;;  %1824 = vmatmul.msk.bf16.gmra.mxu1 %vm667_vm0, %v1890_v52 }
  0xca   : > { %1387 = vst.msk [vmem:[%s2184_s9 + $0x228] sm:$0xff] %vm1317_vm1, %v1258_v61  ;;  %1840 = vmatmul.msk.bf16.gmra.mxu2 %vm667_vm0, %v1906_v57 }
  0xcb   : > { %1856 = vmatmul.msk.bf16.gmra.mxu3 %vm667_vm0, %v1922_v58  ;;  %1419 = vst.msk [vmem:[%s2184_s9 + $0x328] sm:$0xff] %vm1317_vm1, %v1290_v62 }
  0xcc   : > { %1324 = vst.msk [vmem:[%s2184_s9 + $0x30] sm:$0xff] %vm1317_vm1, %v1195_v63 }
  0xcd   : > { %1356 = vst.msk [vmem:[%s2184_s9 + $0x130] sm:$0xff] %vm1317_vm1, %v1227_v0  ;;  %v1044_v1 = vpop.f32.mrf.mxu2  ;;  %v886_v5 = vpop.f32.mrf.mxu0 }
  0xce   : > { %v1124_v2 = vpop.f32.mrf.mxu3  ;;  %v1045_v3 = vadd.f32 %v2172_v33, %v1044_v1  ;;  %v966_v6 = vpop.f32.mrf.mxu1  ;;  %v887_v7 = vadd.f32 %v2172_v33, %v886_v5 }
  0xcf   : > { %v1125_v4 = vadd.f32 %v2172_v33, %v1124_v2  ;;  %v967_v8 = vadd.f32 %v2172_v33, %v966_v6 }
  0xd0   : > { %v1259_v9 = vmax.f32 %v1045_v3, 0.0  ;;  %v1196_v11 = vmax.f32 %v887_v7, 0.0 }
  0xd1   : > { %v1291_v10 = vmax.f32 %v1125_v4, 0.0  ;;  %v1228_v12 = vmax.f32 %v967_v8, 0.0  ;;  %v1877_v8 = vld [vmem:[%s2106_s5 + $0x70] sm:$0xff] }
  0xd2   : > { %1388 = vst.msk [vmem:[%s2184_s9 + $0x230] sm:$0xff] %vm1317_vm1, %v1259_v9  ;;  %v1893_v9 = vld [vmem:[%s2106_s5 + $0xf0] sm:$0xff] }
  0xd3   : > { %1420 = vst.msk [vmem:[%s2184_s9 + $0x330] sm:$0xff] %vm1317_vm1, %v1291_v10 }
  0xd4   : > { %1325 = vst.msk [vmem:[%s2184_s9 + $0x38] sm:$0xff] %vm1317_vm1, %v1196_v11 }
  0xd5   : > { %1357 = vst.msk [vmem:[%s2184_s9 + $0x138] sm:$0xff] %vm1317_vm1, %v1228_v12  ;;  %v1046_v13 = vpop.f32.mrf.mxu2  ;;  %v889_v19 = vpop.f32.mrf.mxu0 }
  0xd6   : > { %v1126_v14 = vpop.f32.mrf.mxu3  ;;  %v1047_v17 = vadd.f32 %v2172_v33, %v1046_v13  ;;  %v969_v20 = vpop.f32.mrf.mxu1  ;;  %v890_v23 = vadd.f32 %v2172_v33, %v889_v19 }
  0xd7   : > { %v1127_v18 = vadd.f32 %v2172_v33, %v1126_v14  ;;  %v970_v24 = vadd.f32 %v2172_v33, %v969_v20  ;;  %v1909_v14 = vld [vmem:[%s2106_s5 + $0x170] sm:$0xff] }
  0xd8   : > { %v1260_v25 = vmax.f32 %v1047_v17, 0.0  ;;  %v1197_v27 = vmax.f32 %v890_v23, 0.0  ;;  %1809 = vmatmul.msk.bf16.gmra.mxu0 %vm667_vm0, %v1875_v15  ;;  %v1925_v15 = vld [vmem:[%s2106_s5 + $0x1f0] sm:$0xff] }
  0xd9   : > { %v1292_v26 = vmax.f32 %v1127_v18, 0.0  ;;  %v1229_v28 = vmax.f32 %v970_v24, 0.0  ;;  %1825 = vmatmul.msk.bf16.gmra.mxu1 %vm667_vm0, %v1891_v16 }
  0xda   : > { %1389 = vst.msk [vmem:[%s2184_s9 + $0x238] sm:$0xff] %vm1317_vm1, %v1260_v25  ;;  %1841 = vmatmul.msk.bf16.gmra.mxu2 %vm667_vm0, %v1907_v21 }
  0xdb   : > { %1857 = vmatmul.msk.bf16.gmra.mxu3 %vm667_vm0, %v1923_v22  ;;  %1421 = vst.msk [vmem:[%s2184_s9 + $0x338] sm:$0xff] %vm1317_vm1, %v1292_v26 }
  0xdc   : > { %1326 = vst.msk [vmem:[%s2184_s9 + $0x40] sm:$0xff] %vm1317_vm1, %v1197_v27 }
  0xdd   : > { %1358 = vst.msk [vmem:[%s2184_s9 + $0x140] sm:$0xff] %vm1317_vm1, %v1229_v28  ;;  %v1049_v29 = vpop.f32.mrf.mxu2  ;;  %v891_v34 = vpop.f32.mrf.mxu0 }
  0xde   : > { %v1129_v30 = vpop.f32.mrf.mxu3  ;;  %v1050_v31 = vadd.f32 %v2172_v33, %v1049_v29  ;;  %v971_v35 = vpop.f32.mrf.mxu1  ;;  %v892_v36 = vadd.f32 %v2172_v33, %v891_v34 }
  0xdf   : > { %v1130_v32 = vadd.f32 %v2172_v33, %v1129_v30  ;;  %v972_v37 = vadd.f32 %v2172_v33, %v971_v35 }
  0xe0   : > { %v1261_v38 = vmax.f32 %v1050_v31, 0.0  ;;  %v1198_v40 = vmax.f32 %v892_v36, 0.0 }
  0xe1   : > { %v1293_v39 = vmax.f32 %v1130_v32, 0.0  ;;  %v1230_v41 = vmax.f32 %v972_v37, 0.0  ;;  %v1878_v37 = vld [vmem:[%s2106_s5 + $0x78] sm:$0xff] }
  0xe2   : > { %1390 = vst.msk [vmem:[%s2184_s9 + $0x240] sm:$0xff] %vm1317_vm1, %v1261_v38  ;;  %v1894_v38 = vld [vmem:[%s2106_s5 + $0xf8] sm:$0xff] }
  0xe3   : > { %1422 = vst.msk [vmem:[%s2184_s9 + $0x340] sm:$0xff] %vm1317_vm1, %v1293_v39 }
  0xe4   : > { %1327 = vst.msk [vmem:[%s2184_s9 + $0x48] sm:$0xff] %vm1317_vm1, %v1198_v40 }
  0xe5   : > { %1359 = vst.msk [vmem:[%s2184_s9 + $0x148] sm:$0xff] %vm1317_vm1, %v1230_v41  ;;  %v1051_v42 = vpop.f32.mrf.mxu2  ;;  %v894_v48 = vpop.f32.mrf.mxu0 }
  0xe6   : > { %v1131_v43 = vpop.f32.mrf.mxu3  ;;  %v1052_v46 = vadd.f32 %v2172_v33, %v1051_v42  ;;  %v974_v49 = vpop.f32.mrf.mxu1  ;;  %v895_v52 = vadd.f32 %v2172_v33, %v894_v48 }
  0xe7   : > { %v1132_v47 = vadd.f32 %v2172_v33, %v1131_v43  ;;  %v975_v53 = vadd.f32 %v2172_v33, %v974_v49  ;;  %v1910_v43 = vld [vmem:[%s2106_s5 + $0x178] sm:$0xff] }
  0xe8   : > { %v1262_v54 = vmax.f32 %v1052_v46, 0.0  ;;  %v1199_v56 = vmax.f32 %v895_v52, 0.0  ;;  %1810 = vmatmul.msk.bf16.gmra.mxu0 %vm667_vm0, %v1876_v44  ;;  %v1926_v44 = vld [vmem:[%s2106_s5 + $0x1f8] sm:$0xff] }
  0xe9   : > { %v1294_v55 = vmax.f32 %v1132_v47, 0.0  ;;  %v1231_v57 = vmax.f32 %v975_v53, 0.0  ;;  %1826 = vmatmul.msk.bf16.gmra.mxu1 %vm667_vm0, %v1892_v45 }
  0xea   : > { %1391 = vst.msk [vmem:[%s2184_s9 + $0x248] sm:$0xff] %vm1317_vm1, %v1262_v54  ;;  %1842 = vmatmul.msk.bf16.gmra.mxu2 %vm667_vm0, %v1908_v50 }
  0xeb   : > { %1858 = vmatmul.msk.bf16.gmra.mxu3 %vm667_vm0, %v1924_v51  ;;  %1423 = vst.msk [vmem:[%s2184_s9 + $0x348] sm:$0xff] %vm1317_vm1, %v1294_v55 }
  0xec   : > { %1328 = vst.msk [vmem:[%s2184_s9 + $0x50] sm:$0xff] %vm1317_vm1, %v1199_v56 }
  0xed   : > { %1360 = vst.msk [vmem:[%s2184_s9 + $0x150] sm:$0xff] %vm1317_vm1, %v1231_v57  ;;  %v1054_v58 = vpop.f32.mrf.mxu2  ;;  %v896_v62 = vpop.f32.mrf.mxu0 }
  0xee   : > { %v1134_v59 = vpop.f32.mrf.mxu3  ;;  %v1055_v60 = vadd.f32 %v2172_v33, %v1054_v58  ;;  %v976_v63 = vpop.f32.mrf.mxu1  ;;  %v897_v0 = vadd.f32 %v2172_v33, %v896_v62 }
  0xef   : > { %v1135_v61 = vadd.f32 %v2172_v33, %v1134_v59  ;;  %v977_v1 = vadd.f32 %v2172_v33, %v976_v63 }
  0xf0   : > { %v1263_v2 = vmax.f32 %v1055_v60, 0.0  ;;  %v1200_v4 = vmax.f32 %v897_v0, 0.0 }
  0xf1   : > { %v1295_v3 = vmax.f32 %v1135_v61, 0.0  ;;  %v1232_v5 = vmax.f32 %v977_v1, 0.0 }
  0xf2   : > { %1392 = vst.msk [vmem:[%s2184_s9 + $0x250] sm:$0xff] %vm1317_vm1, %v1263_v2 }
  0xf3   : > { %1424 = vst.msk [vmem:[%s2184_s9 + $0x350] sm:$0xff] %vm1317_vm1, %v1295_v3 }
  0xf4   : > { %1329 = vst.msk [vmem:[%s2184_s9 + $0x58] sm:$0xff] %vm1317_vm1, %v1200_v4 }
  0xf5   : > { %1361 = vst.msk [vmem:[%s2184_s9 + $0x158] sm:$0xff] %vm1317_vm1, %v1232_v5  ;;  %v1056_v6 = vpop.f32.mrf.mxu2  ;;  %v899_v12 = vpop.f32.mrf.mxu0 }
  0xf6   : > { %v1136_v7 = vpop.f32.mrf.mxu3  ;;  %v1057_v10 = vadd.f32 %v2172_v33, %v1056_v6  ;;  %v979_v13 = vpop.f32.mrf.mxu1  ;;  %v900_v16 = vadd.f32 %v2172_v33, %v899_v12 }
  0xf7   : > { %v1137_v11 = vadd.f32 %v2172_v33, %v1136_v7  ;;  %v980_v17 = vadd.f32 %v2172_v33, %v979_v13 }
  0xf8   : > { %v1264_v18 = vmax.f32 %v1057_v10, 0.0  ;;  %v1201_v20 = vmax.f32 %v900_v16, 0.0  ;;  %1811 = vmatmul.msk.bf16.gmra.mxu0 %vm667_vm0, %v1877_v8 }
  0xf9   : > { %v1296_v19 = vmax.f32 %v1137_v11, 0.0  ;;  %v1233_v21 = vmax.f32 %v980_v17, 0.0  ;;  %1827 = vmatmul.msk.bf16.gmra.mxu1 %vm667_vm0, %v1893_v9 }
  0xfa   : > { %1393 = vst.msk [vmem:[%s2184_s9 + $0x258] sm:$0xff] %vm1317_vm1, %v1264_v18  ;;  %1843 = vmatmul.msk.bf16.gmra.mxu2 %vm667_vm0, %v1909_v14 }
  0xfb   : > { %1859 = vmatmul.msk.bf16.gmra.mxu3 %vm667_vm0, %v1925_v15  ;;  %1425 = vst.msk [vmem:[%s2184_s9 + $0x358] sm:$0xff] %vm1317_vm1, %v1296_v19 }
  0xfc   : > { %1330 = vst.msk [vmem:[%s2184_s9 + $0x60] sm:$0xff] %vm1317_vm1, %v1201_v20 }
  0xfd   : > { %1362 = vst.msk [vmem:[%s2184_s9 + $0x160] sm:$0xff] %vm1317_vm1, %v1233_v21  ;;  %v1059_v22 = vpop.f32.mrf.mxu2  ;;  %v901_v26 = vpop.f32.mrf.mxu0 }
  0xfe   : > { %v1139_v23 = vpop.f32.mrf.mxu3  ;;  %v1060_v24 = vadd.f32 %v2172_v33, %v1059_v22  ;;  %v981_v27 = vpop.f32.mrf.mxu1  ;;  %v902_v28 = vadd.f32 %v2172_v33, %v901_v26 }
  0xff   : > { %v1140_v25 = vadd.f32 %v2172_v33, %v1139_v23  ;;  %v982_v29 = vadd.f32 %v2172_v33, %v981_v27 }
 0x100   : > { %v1265_v30 = vmax.f32 %v1060_v24, 0.0  ;;  %v1202_v32 = vmax.f32 %v902_v28, 0.0 }
 0x101   : > { %v1297_v31 = vmax.f32 %v1140_v25, 0.0  ;;  %v1234_v34 = vmax.f32 %v982_v29, 0.0 }
 0x102   : > { %1394 = vst.msk [vmem:[%s2184_s9 + $0x260] sm:$0xff] %vm1317_vm1, %v1265_v30 }
 0x103   : > { %1426 = vst.msk [vmem:[%s2184_s9 + $0x360] sm:$0xff] %vm1317_vm1, %v1297_v31 }
 0x104   : > { %1331 = vst.msk [vmem:[%s2184_s9 + $0x68] sm:$0xff] %vm1317_vm1, %v1202_v32 }
 0x105   : > { %1363 = vst.msk [vmem:[%s2184_s9 + $0x168] sm:$0xff] %vm1317_vm1, %v1234_v34  ;;  %v1061_v35 = vpop.f32.mrf.mxu2  ;;  %v904_v41 = vpop.f32.mrf.mxu0 }
 0x106   : > { %v1141_v36 = vpop.f32.mrf.mxu3  ;;  %v1062_v39 = vadd.f32 %v2172_v33, %v1061_v35  ;;  %v984_v42 = vpop.f32.mrf.mxu1  ;;  %v905_v45 = vadd.f32 %v2172_v33, %v904_v41 }
 0x107   : > { %v1142_v40 = vadd.f32 %v2172_v33, %v1141_v36  ;;  %v985_v46 = vadd.f32 %v2172_v33, %v984_v42 }
 0x108   : > { %v1266_v47 = vmax.f32 %v1062_v39, 0.0  ;;  %v1203_v49 = vmax.f32 %v905_v45, 0.0  ;;  %1812 = vmatmul.msk.bf16.gmra.mxu0 %vm667_vm0, %v1878_v37 }
 0x109   : > { %v1298_v48 = vmax.f32 %v1142_v40, 0.0  ;;  %v1235_v50 = vmax.f32 %v985_v46, 0.0  ;;  %1828 = vmatmul.msk.bf16.gmra.mxu1 %vm667_vm0, %v1894_v38 }
 0x10a   : > { %1395 = vst.msk [vmem:[%s2184_s9 + $0x268] sm:$0xff] %vm1317_vm1, %v1266_v47  ;;  %1844 = vmatmul.msk.bf16.gmra.mxu2 %vm667_vm0, %v1910_v43 }
 0x10b   : > { %1860 = vmatmul.msk.bf16.gmra.mxu3 %vm667_vm0, %v1926_v44  ;;  %1427 = vst.msk [vmem:[%s2184_s9 + $0x368] sm:$0xff] %vm1317_vm1, %v1298_v48 }
 0x10c   : > { %1332 = vst.msk [vmem:[%s2184_s9 + $0x70] sm:$0xff] %vm1317_vm1, %v1203_v49 }
 0x10d   : > { %1364 = vst.msk [vmem:[%s2184_s9 + $0x170] sm:$0xff] %vm1317_vm1, %v1235_v50  ;;  %v1064_v51 = vpop.f32.mrf.mxu2  ;;  %v906_v55 = vpop.f32.mrf.mxu0 }
 0x10e   : > { %v1144_v52 = vpop.f32.mrf.mxu3  ;;  %v1065_v53 = vadd.f32 %v2172_v33, %v1064_v51  ;;  %v986_v56 = vpop.f32.mrf.mxu1  ;;  %v907_v57 = vadd.f32 %v2172_v33, %v906_v55 }
 0x10f   : > { %v1145_v54 = vadd.f32 %v2172_v33, %v1144_v52  ;;  %v987_v58 = vadd.f32 %v2172_v33, %v986_v56 }
 0x110   : > { %v1267_v59 = vmax.f32 %v1065_v53, 0.0  ;;  %v1204_v61 = vmax.f32 %v907_v57, 0.0 }
 0x111   : > { %v1299_v60 = vmax.f32 %v1145_v54, 0.0  ;;  %v1236_v62 = vmax.f32 %v987_v58, 0.0 }
 0x112   : > { %1396 = vst.msk [vmem:[%s2184_s9 + $0x270] sm:$0xff] %vm1317_vm1, %v1267_v59 }
 0x113   : > { %1428 = vst.msk [vmem:[%s2184_s9 + $0x370] sm:$0xff] %vm1317_vm1, %v1299_v60 }
 0x114   : > { %1333 = vst.msk [vmem:[%s2184_s9 + $0x78] sm:$0xff] %vm1317_vm1, %v1204_v61 }
 0x115   : > { %1365 = vst.msk [vmem:[%s2184_s9 + $0x178] sm:$0xff] %vm1317_vm1, %v1236_v62  ;;  %v1066_v63 = vpop.f32.mrf.mxu2  ;;  %v909_v3 = vpop.f32.mrf.mxu0 }
 0x116   : > { %v1146_v0 = vpop.f32.mrf.mxu3  ;;  %v1067_v1 = vadd.f32 %v2172_v33, %v1066_v63  ;;  %v989_v4 = vpop.f32.mrf.mxu1  ;;  %v910_v5 = vadd.f32 %v2172_v33, %v909_v3 }
 0x117   : > { %v1147_v2 = vadd.f32 %v2172_v33, %v1146_v0  ;;  %v990_v6 = vadd.f32 %v2172_v33, %v989_v4 }
 0x118   : > { %v1268_v7 = vmax.f32 %v1067_v1, 0.0  ;;  %v1205_v9 = vmax.f32 %v910_v5, 0.0 }
 0x119   : > { %v1300_v8 = vmax.f32 %v1147_v2, 0.0  ;;  %v1237_v10 = vmax.f32 %v990_v6, 0.0 }
 0x11a   : > { %1397 = vst.msk [vmem:[%s2184_s9 + $0x278] sm:$0xff] %vm1317_vm1, %v1268_v7 }
 0x11b   : > { %1429 = vst.msk [vmem:[%s2184_s9 + $0x378] sm:$0xff] %vm1317_vm1, %v1300_v8 }
 0x11c   : > { %1334 = vst.msk [vmem:[%s2184_s9 + $0x80] sm:$0xff] %vm1317_vm1, %v1205_v9 }
 0x11d   : > { %1366 = vst.msk [vmem:[%s2184_s9 + $0x180] sm:$0xff] %vm1317_vm1, %v1237_v10  ;;  %v1069_v11 = vpop.f32.mrf.mxu2  ;;  %v911_v15 = vpop.f32.mrf.mxu0 }
 0x11e   : > { %v1149_v12 = vpop.f32.mrf.mxu3  ;;  %v1070_v13 = vadd.f32 %v2172_v33, %v1069_v11  ;;  %v991_v16 = vpop.f32.mrf.mxu1  ;;  %v912_v17 = vadd.f32 %v2172_v33, %v911_v15 }
 0x11f   : > { %v1150_v14 = vadd.f32 %v2172_v33, %v1149_v12  ;;  %v992_v18 = vadd.f32 %v2172_v33, %v991_v16 }
 0x120   : > { %v1269_v19 = vmax.f32 %v1070_v13, 0.0  ;;  %v1206_v21 = vmax.f32 %v912_v17, 0.0 }
 0x121   : > { %v1301_v20 = vmax.f32 %v1150_v14, 0.0  ;;  %v1238_v22 = vmax.f32 %v992_v18, 0.0 }
 0x122   : > { %1398 = vst.msk [vmem:[%s2184_s9 + $0x280] sm:$0xff] %vm1317_vm1, %v1269_v19 }
 0x123   : > { %1430 = vst.msk [vmem:[%s2184_s9 + $0x380] sm:$0xff] %vm1317_vm1, %v1301_v20 }
 0x124   : > { %1335 = vst.msk [vmem:[%s2184_s9 + $0x88] sm:$0xff] %vm1317_vm1, %v1206_v21 }
 0x125   : > { %1367 = vst.msk [vmem:[%s2184_s9 + $0x188] sm:$0xff] %vm1317_vm1, %v1238_v22  ;;  %v1071_v23 = vpop.f32.mrf.mxu2  ;;  %v914_v27 = vpop.f32.mrf.mxu0 }
 0x126   : > { %v1151_v24 = vpop.f32.mrf.mxu3  ;;  %v1072_v25 = vadd.f32 %v2172_v33, %v1071_v23  ;;  %v994_v28 = vpop.f32.mrf.mxu1  ;;  %v915_v29 = vadd.f32 %v2172_v33, %v914_v27 }
 0x127   : > { %v1152_v26 = vadd.f32 %v2172_v33, %v1151_v24  ;;  %v995_v30 = vadd.f32 %v2172_v33, %v994_v28 }
 0x128   : > { %v1270_v31 = vmax.f32 %v1072_v25, 0.0  ;;  %v1207_v34 = vmax.f32 %v915_v29, 0.0 }
 0x129   : > { %v1302_v32 = vmax.f32 %v1152_v26, 0.0  ;;  %v1239_v35 = vmax.f32 %v995_v30, 0.0 }
 0x12a   : > { %1399 = vst.msk [vmem:[%s2184_s9 + $0x288] sm:$0xff] %vm1317_vm1, %v1270_v31 }
 0x12b   : > { %1431 = vst.msk [vmem:[%s2184_s9 + $0x388] sm:$0xff] %vm1317_vm1, %v1302_v32 }
 0x12c   : > { %1336 = vst.msk [vmem:[%s2184_s9 + $0x90] sm:$0xff] %vm1317_vm1, %v1207_v34 }
 0x12d   : > { %1368 = vst.msk [vmem:[%s2184_s9 + $0x190] sm:$0xff] %vm1317_vm1, %v1239_v35  ;;  %v1074_v36 = vpop.f32.mrf.mxu2  ;;  %v916_v40 = vpop.f32.mrf.mxu0 }
 0x12e   : > { %v1154_v37 = vpop.f32.mrf.mxu3  ;;  %v1075_v38 = vadd.f32 %v2172_v33, %v1074_v36  ;;  %v996_v41 = vpop.f32.mrf.mxu1  ;;  %v917_v42 = vadd.f32 %v2172_v33, %v916_v40 }
 0x12f   : > { %v1155_v39 = vadd.f32 %v2172_v33, %v1154_v37  ;;  %v997_v43 = vadd.f32 %v2172_v33, %v996_v41 }
 0x130   : > { %v1271_v44 = vmax.f32 %v1075_v38, 0.0  ;;  %v1208_v46 = vmax.f32 %v917_v42, 0.0 }
 0x131   : > { %v1303_v45 = vmax.f32 %v1155_v39, 0.0  ;;  %v1240_v47 = vmax.f32 %v997_v43, 0.0 }
 0x132   : > { %1400 = vst.msk [vmem:[%s2184_s9 + $0x290] sm:$0xff] %vm1317_vm1, %v1271_v44 }
 0x133   : > { %1432 = vst.msk [vmem:[%s2184_s9 + $0x390] sm:$0xff] %vm1317_vm1, %v1303_v45 }
 0x134   : > { %1337 = vst.msk [vmem:[%s2184_s9 + $0x98] sm:$0xff] %vm1317_vm1, %v1208_v46 }
 0x135   : > { %1369 = vst.msk [vmem:[%s2184_s9 + $0x198] sm:$0xff] %vm1317_vm1, %v1240_v47  ;;  %v1076_v48 = vpop.f32.mrf.mxu2  ;;  %v919_v52 = vpop.f32.mrf.mxu0 }
 0x136   : > { %v1156_v49 = vpop.f32.mrf.mxu3  ;;  %v1077_v50 = vadd.f32 %v2172_v33, %v1076_v48  ;;  %v999_v53 = vpop.f32.mrf.mxu1  ;;  %v920_v54 = vadd.f32 %v2172_v33, %v919_v52 }
 0x137   : > { %v1157_v51 = vadd.f32 %v2172_v33, %v1156_v49  ;;  %v1000_v55 = vadd.f32 %v2172_v33, %v999_v53 }
 0x138   : > { %v1272_v56 = vmax.f32 %v1077_v50, 0.0  ;;  %v1209_v58 = vmax.f32 %v920_v54, 0.0 }
 0x139   : > { %v1304_v57 = vmax.f32 %v1157_v51, 0.0  ;;  %v1241_v59 = vmax.f32 %v1000_v55, 0.0 }
 0x13a   : > { %1401 = vst.msk [vmem:[%s2184_s9 + $0x298] sm:$0xff] %vm1317_vm1, %v1272_v56 }
 0x13b   : > { %1433 = vst.msk [vmem:[%s2184_s9 + $0x398] sm:$0xff] %vm1317_vm1, %v1304_v57 }
 0x13c   : > { %1338 = vst.msk [vmem:[%s2184_s9 + $0xa0] sm:$0xff] %vm1317_vm1, %v1209_v58 }
 0x13d   : > { %1370 = vst.msk [vmem:[%s2184_s9 + $0x1a0] sm:$0xff] %vm1317_vm1, %v1241_v59  ;;  %v1079_v60 = vpop.f32.mrf.mxu2  ;;  %v921_v0 = vpop.f32.mrf.mxu0 }
 0x13e   : > { %v1159_v61 = vpop.f32.mrf.mxu3  ;;  %v1080_v62 = vadd.f32 %v2172_v33, %v1079_v60  ;;  %v1001_v1 = vpop.f32.mrf.mxu1  ;;  %v922_v2 = vadd.f32 %v2172_v33, %v921_v0 }
 0x13f   : > { %v1160_v63 = vadd.f32 %v2172_v33, %v1159_v61  ;;  %v1002_v3 = vadd.f32 %v2172_v33, %v1001_v1 }
 0x140   : > { %v1273_v4 = vmax.f32 %v1080_v62, 0.0  ;;  %v1210_v6 = vmax.f32 %v922_v2, 0.0 }
 0x141   : > { %v1305_v5 = vmax.f32 %v1160_v63, 0.0  ;;  %v1242_v7 = vmax.f32 %v1002_v3, 0.0 }
 0x142   : > { %1402 = vst.msk [vmem:[%s2184_s9 + $0x2a0] sm:$0xff] %vm1317_vm1, %v1273_v4 }
 0x143   : > { %1434 = vst.msk [vmem:[%s2184_s9 + $0x3a0] sm:$0xff] %vm1317_vm1, %v1305_v5 }
 0x144   : > { %1339 = vst.msk [vmem:[%s2184_s9 + $0xa8] sm:$0xff] %vm1317_vm1, %v1210_v6 }
 0x145   : > { %1371 = vst.msk [vmem:[%s2184_s9 + $0x1a8] sm:$0xff] %vm1317_vm1, %v1242_v7  ;;  %v1081_v8 = vpop.f32.mrf.mxu2  ;;  %v924_v12 = vpop.f32.mrf.mxu0 }
 0x146   : > { %v1161_v9 = vpop.f32.mrf.mxu3  ;;  %v1082_v10 = vadd.f32 %v2172_v33, %v1081_v8  ;;  %v1004_v13 = vpop.f32.mrf.mxu1  ;;  %v925_v14 = vadd.f32 %v2172_v33, %v924_v12 }
 0x147   : > { %v1162_v11 = vadd.f32 %v2172_v33, %v1161_v9  ;;  %v1005_v15 = vadd.f32 %v2172_v33, %v1004_v13 }
 0x148   : > { %v1274_v16 = vmax.f32 %v1082_v10, 0.0  ;;  %v1211_v18 = vmax.f32 %v925_v14, 0.0 }
 0x149   : > { %v1306_v17 = vmax.f32 %v1162_v11, 0.0  ;;  %v1243_v19 = vmax.f32 %v1005_v15, 0.0 }
 0x14a   : > { %1403 = vst.msk [vmem:[%s2184_s9 + $0x2a8] sm:$0xff] %vm1317_vm1, %v1274_v16 }
 0x14b   : > { %1435 = vst.msk [vmem:[%s2184_s9 + $0x3a8] sm:$0xff] %vm1317_vm1, %v1306_v17 }
 0x14c   : > { %1340 = vst.msk [vmem:[%s2184_s9 + $0xb0] sm:$0xff] %vm1317_vm1, %v1211_v18 }
 0x14d   : > { %1372 = vst.msk [vmem:[%s2184_s9 + $0x1b0] sm:$0xff] %vm1317_vm1, %v1243_v19  ;;  %v1084_v20 = vpop.f32.mrf.mxu2  ;;  %v926_v24 = vpop.f32.mrf.mxu0 }
 0x14e   : > { %v1164_v21 = vpop.f32.mrf.mxu3  ;;  %v1085_v22 = vadd.f32 %v2172_v33, %v1084_v20  ;;  %v1006_v25 = vpop.f32.mrf.mxu1  ;;  %v927_v26 = vadd.f32 %v2172_v33, %v926_v24 }
 0x14f   : > { %v1165_v23 = vadd.f32 %v2172_v33, %v1164_v21  ;;  %v1007_v27 = vadd.f32 %v2172_v33, %v1006_v25 }
 0x150   : > { %v1275_v28 = vmax.f32 %v1085_v22, 0.0  ;;  %v1212_v30 = vmax.f32 %v927_v26, 0.0 }
 0x151   : > { %v1307_v29 = vmax.f32 %v1165_v23, 0.0  ;;  %v1244_v31 = vmax.f32 %v1007_v27, 0.0  ;;  %v1963_v23 = vld [vmem:[#allocation4] ss:$0 sm:$0xff] }
 0x152   : > { %1404 = vst.msk [vmem:[%s2184_s9 + $0x2b0] sm:$0xff] %vm1317_vm1, %v1275_v28 }
 0x153   : > { %1436 = vst.msk [vmem:[%s2184_s9 + $0x3b0] sm:$0xff] %vm1317_vm1, %v1307_v29 }
 0x154   : > { %1341 = vst.msk [vmem:[%s2184_s9 + $0xb8] sm:$0xff] %vm1317_vm1, %v1212_v30 }
 0x155   : > { %1373 = vst.msk [vmem:[%s2184_s9 + $0x1b8] sm:$0xff] %vm1317_vm1, %v1244_v31  ;;  %v1086_v32 = vpop.f32.mrf.mxu2  ;;  %v929_v37 = vpop.f32.mrf.mxu0 }
 0x156   : > { %v1166_v34 = vpop.f32.mrf.mxu3  ;;  %v1087_v35 = vadd.f32 %v2172_v33, %v1086_v32  ;;  %v1009_v38 = vpop.f32.mrf.mxu1  ;;  %v930_v39 = vadd.f32 %v2172_v33, %v929_v37 }
 0x157   : > { %v1167_v36 = vadd.f32 %v2172_v33, %v1166_v34  ;;  %v1010_v40 = vadd.f32 %v2172_v33, %v1009_v38 }
 0x158   : > { %v1276_v41 = vmax.f32 %v1087_v35, 0.0  ;;  %v1213_v43 = vmax.f32 %v930_v39, 0.0 }
 0x159   : > { %v1308_v42 = vmax.f32 %v1167_v36, 0.0  ;;  %v1245_v44 = vmax.f32 %v1010_v40, 0.0 }
 0x15a   : > { %1405 = vst.msk [vmem:[%s2184_s9 + $0x2b8] sm:$0xff] %vm1317_vm1, %v1276_v41 }
 0x15b   : > { %1437 = vst.msk [vmem:[%s2184_s9 + $0x3b8] sm:$0xff] %vm1317_vm1, %v1308_v42 }
 0x15c   : > { %1342 = vst.msk [vmem:[%s2184_s9 + $0xc0] sm:$0xff] %vm1317_vm1, %v1213_v43 }
 0x15d   : > { %1374 = vst.msk [vmem:[%s2184_s9 + $0x1c0] sm:$0xff] %vm1317_vm1, %v1245_v44  ;;  %v1089_v45 = vpop.f32.mrf.mxu2  ;;  %v931_v49 = vpop.f32.mrf.mxu0 }
 0x15e   : > { %v1169_v46 = vpop.f32.mrf.mxu3  ;;  %v1090_v47 = vadd.f32 %v2172_v33, %v1089_v45  ;;  %v1011_v50 = vpop.f32.mrf.mxu1  ;;  %v932_v51 = vadd.f32 %v2172_v33, %v931_v49 }
 0x15f   : > { %v1170_v48 = vadd.f32 %v2172_v33, %v1169_v46  ;;  %v1012_v52 = vadd.f32 %v2172_v33, %v1011_v50 }
 0x160   : > { %v1277_v53 = vmax.f32 %v1090_v47, 0.0  ;;  %v1214_v55 = vmax.f32 %v932_v51, 0.0 }
 0x161   : > { %v1309_v54 = vmax.f32 %v1170_v48, 0.0  ;;  %v1246_v56 = vmax.f32 %v1012_v52, 0.0 }
 0x162   : > { %1406 = vst.msk [vmem:[%s2184_s9 + $0x2c0] sm:$0xff] %vm1317_vm1, %v1277_v53 }
 0x163   : > { %1438 = vst.msk [vmem:[%s2184_s9 + $0x3c0] sm:$0xff] %vm1317_vm1, %v1309_v54 }
 0x164   : > { %1343 = vst.msk [vmem:[%s2184_s9 + $0xc8] sm:$0xff] %vm1317_vm1, %v1214_v55 }
 0x165   : > { %1375 = vst.msk [vmem:[%s2184_s9 + $0x1c8] sm:$0xff] %vm1317_vm1, %v1246_v56  ;;  %v1091_v57 = vpop.f32.mrf.mxu2  ;;  %v934_v61 = vpop.f32.mrf.mxu0 }
 0x166   : > { %v1171_v58 = vpop.f32.mrf.mxu3  ;;  %v1092_v59 = vadd.f32 %v2172_v33, %v1091_v57  ;;  %v1014_v62 = vpop.f32.mrf.mxu1  ;;  %v935_v63 = vadd.f32 %v2172_v33, %v934_v61 }
 0x167   : > { %v1172_v60 = vadd.f32 %v2172_v33, %v1171_v58  ;;  %v1015_v0 = vadd.f32 %v2172_v33, %v1014_v62 }
 0x168   : > { %v1278_v1 = vmax.f32 %v1092_v59, 0.0  ;;  %v1215_v3 = vmax.f32 %v935_v63, 0.0 }
 0x169   : > { %v1310_v2 = vmax.f32 %v1172_v60, 0.0  ;;  %v1247_v4 = vmax.f32 %v1015_v0, 0.0 }
 0x16a   : > { %1407 = vst.msk [vmem:[%s2184_s9 + $0x2c8] sm:$0xff] %vm1317_vm1, %v1278_v1 }
 0x16b   : > { %1439 = vst.msk [vmem:[%s2184_s9 + $0x3c8] sm:$0xff] %vm1317_vm1, %v1310_v2 }
 0x16c   : > { %1344 = vst.msk [vmem:[%s2184_s9 + $0xd0] sm:$0xff] %vm1317_vm1, %v1215_v3 }
 0x16d   : > { %1376 = vst.msk [vmem:[%s2184_s9 + $0x1d0] sm:$0xff] %vm1317_vm1, %v1247_v4  ;;  %v1094_v5 = vpop.f32.mrf.mxu2  ;;  %v936_v9 = vpop.f32.mrf.mxu0 }
 0x16e   : > { %v1174_v6 = vpop.f32.mrf.mxu3  ;;  %v1095_v7 = vadd.f32 %v2172_v33, %v1094_v5  ;;  %v1016_v10 = vpop.f32.mrf.mxu1  ;;  %v937_v11 = vadd.f32 %v2172_v33, %v936_v9 }
 0x16f   : > { %v1175_v8 = vadd.f32 %v2172_v33, %v1174_v6  ;;  %v1017_v12 = vadd.f32 %v2172_v33, %v1016_v10 }
 0x170   : > { %v1279_v13 = vmax.f32 %v1095_v7, 0.0  ;;  %v1216_v15 = vmax.f32 %v937_v11, 0.0 }
 0x171   : > { %v1311_v14 = vmax.f32 %v1175_v8, 0.0  ;;  %v1248_v16 = vmax.f32 %v1017_v12, 0.0 }
 0x172   : > { %1408 = vst.msk [vmem:[%s2184_s9 + $0x2d0] sm:$0xff] %vm1317_vm1, %v1279_v13 }
 0x173   : > { %1440 = vst.msk [vmem:[%s2184_s9 + $0x3d0] sm:$0xff] %vm1317_vm1, %v1311_v14 }
 0x174   : > { %1345 = vst.msk [vmem:[%s2184_s9 + $0xd8] sm:$0xff] %vm1317_vm1, %v1216_v15 }
 0x175   : > { %1377 = vst.msk [vmem:[%s2184_s9 + $0x1d8] sm:$0xff] %vm1317_vm1, %v1248_v16  ;;  %v1096_v17 = vpop.f32.mrf.mxu2  ;;  %v939_v21 = vpop.f32.mrf.mxu0 }
 0x176   : > { %v1176_v18 = vpop.f32.mrf.mxu3  ;;  %v1097_v19 = vadd.f32 %v2172_v33, %v1096_v17  ;;  %v1019_v22 = vpop.f32.mrf.mxu1  ;;  %v940_v24 = vadd.f32 %v1963_v23, %v939_v21 }
 0x177   : > { %v1177_v20 = vadd.f32 %v2172_v33, %v1176_v18  ;;  %v1020_v25 = vadd.f32 %v1963_v23, %v1019_v22 }
 0x178   : > { %v1280_v26 = vmax.f32 %v1097_v19, 0.0  ;;  %v1217_v28 = vmax.f32 %v940_v24, 0.0 }
 0x179   : > { %v1312_v27 = vmax.f32 %v1177_v20, 0.0  ;;  %v1249_v29 = vmax.f32 %v1020_v25, 0.0 }
 0x17a   : > { %1409 = vst.msk [vmem:[%s2184_s9 + $0x2d8] sm:$0xff] %vm1317_vm1, %v1280_v26 }
 0x17b   : > { %1441 = vst.msk [vmem:[%s2184_s9 + $0x3d8] sm:$0xff] %vm1317_vm1, %v1312_v27 }
 0x17c   : > { %1346 = vst.msk [vmem:[%s2184_s9 + $0xe0] sm:$0xff] %vm1317_vm1, %v1217_v28 }
 0x17d   : > { %1378 = vst.msk [vmem:[%s2184_s9 + $0x1e0] sm:$0xff] %vm1317_vm1, %v1249_v29  ;;  %v1099_v33 = vpop.f32.mrf.mxu2  ;;  %v941_v34 = vpop.f32.mrf.mxu0 }
 0x17e   : > { %v1179_v30 = vpop.f32.mrf.mxu3  ;;  %v1100_v31 = vadd.f32 %v1963_v23, %v1099_v33  ;;  %v1021_v35 = vpop.f32.mrf.mxu1  ;;  %v942_v36 = vadd.f32 %v1963_v23, %v941_v34 }
 0x17f   : > { %v1180_v32 = vadd.f32 %v1963_v23, %v1179_v30  ;;  %v1022_v37 = vadd.f32 %v1963_v23, %v1021_v35 }
 0x180   : > { %v1281_v38 = vmax.f32 %v1100_v31, 0.0  ;;  %v1218_v40 = vmax.f32 %v942_v36, 0.0 }
 0x181   : > { %v1313_v39 = vmax.f32 %v1180_v32, 0.0  ;;  %v1250_v41 = vmax.f32 %v1022_v37, 0.0 }
 0x182   : > { %1410 = vst.msk [vmem:[%s2184_s9 + $0x2e0] sm:$0xff] %vm1317_vm1, %v1281_v38 }
 0x183   : > { %1442 = vst.msk [vmem:[%s2184_s9 + $0x3e0] sm:$0xff] %vm1317_vm1, %v1313_v39 }
 0x184   : > { %1347 = vst.msk [vmem:[%s2184_s9 + $0xe8] sm:$0xff] %vm1317_vm1, %v1218_v40 }
 0x185   : > { %1379 = vst.msk [vmem:[%s2184_s9 + $0x1e8] sm:$0xff] %vm1317_vm1, %v1250_v41  ;;  %v1101_v42 = vpop.f32.mrf.mxu2  ;;  %v944_v46 = vpop.f32.mrf.mxu0 }
 0x186   : > { %v1181_v43 = vpop.f32.mrf.mxu3  ;;  %v1102_v44 = vadd.f32 %v1963_v23, %v1101_v42  ;;  %v1024_v47 = vpop.f32.mrf.mxu1  ;;  %v945_v48 = vadd.f32 %v1963_v23, %v944_v46 }
 0x187   : > { %v1182_v45 = vadd.f32 %v1963_v23, %v1181_v43  ;;  %v1025_v49 = vadd.f32 %v1963_v23, %v1024_v47 }
 0x188   : > { %v1282_v50 = vmax.f32 %v1102_v44, 0.0  ;;  %v1219_v52 = vmax.f32 %v945_v48, 0.0 }
 0x189   : > { %v1314_v51 = vmax.f32 %v1182_v45, 0.0  ;;  %v1251_v53 = vmax.f32 %v1025_v49, 0.0 }
 0x18a   : > { %1411 = vst.msk [vmem:[%s2184_s9 + $0x2e8] sm:$0xff] %vm1317_vm1, %v1282_v50 }
 0x18b   : > { %1443 = vst.msk [vmem:[%s2184_s9 + $0x3e8] sm:$0xff] %vm1317_vm1, %v1314_v51 }
 0x18c   : > { %1348 = vst.msk [vmem:[%s2184_s9 + $0xf0] sm:$0xff] %vm1317_vm1, %v1219_v52 }
 0x18d   : > { %1380 = vst.msk [vmem:[%s2184_s9 + $0x1f0] sm:$0xff] %vm1317_vm1, %v1251_v53  ;;  %v1104_v54 = vpop.f32.mrf.mxu2  ;;  %v946_v58 = vpop.f32.mrf.mxu0 }
 0x18e   : > { %v1184_v55 = vpop.f32.mrf.mxu3  ;;  %v1105_v56 = vadd.f32 %v1963_v23, %v1104_v54  ;;  %v1026_v59 = vpop.f32.mrf.mxu1  ;;  %v947_v60 = vadd.f32 %v1963_v23, %v946_v58 }
 0x18f   : > { %v1185_v57 = vadd.f32 %v1963_v23, %v1184_v55  ;;  %v1027_v61 = vadd.f32 %v1963_v23, %v1026_v59 }
 0x190   : > { %v1283_v62 = vmax.f32 %v1105_v56, 0.0  ;;  %v1220_v0 = vmax.f32 %v947_v60, 0.0 }
 0x191   : > { %v1315_v63 = vmax.f32 %v1185_v57, 0.0  ;;  %v1252_v1 = vmax.f32 %v1027_v61, 0.0 }
 0x192   : > { %1412 = vst.msk [vmem:[%s2184_s9 + $0x2f0] sm:$0xff] %vm1317_vm1, %v1283_v62 }
 0x193   : > { %1444 = vst.msk [vmem:[%s2184_s9 + $0x3f0] sm:$0xff] %vm1317_vm1, %v1315_v63 }
 0x194   : > { %1349 = vst.msk [vmem:[%s2184_s9 + $0xf8] sm:$0xff] %vm1317_vm1, %v1220_v0 }
 0x195   : > { %1381 = vst.msk [vmem:[%s2184_s9 + $0x1f8] sm:$0xff] %vm1317_vm1, %v1252_v1  ;;  %v1106_v2 = vpop.f32.mrf.mxu2 }
 0x196   : > { %v1186_v3 = vpop.f32.mrf.mxu3  ;;  %v1107_v4 = vadd.f32 %v1963_v23, %v1106_v2 }
 0x197   : > { %v1187_v5 = vadd.f32 %v1963_v23, %v1186_v3 }
 0x198   : > { %v1284_v6 = vmax.f32 %v1107_v4, 0.0 }
 0x199   : > { %v1316_v7 = vmax.f32 %v1187_v5, 0.0 }
 0x19a   : > { %1413 = vst.msk [vmem:[%s2184_s9 + $0x2f8] sm:$0xff] %vm1317_vm1, %v1284_v6 }
 0x19b   : > { %1445 = vst.msk [vmem:[%s2184_s9 + $0x3f8] sm:$0xff] %vm1317_vm1, %v1316_v7 }
 0x19c PF: > { %s15_s12 = sadd.s32 1, %s2038_s12  }
 0x19d   : > { %p12_p7 = scmp.ge.s32.totalorder %s15_s12, 4  }
 0x19f   :  { %14 = sbr.rel (!%p12_p7) target bundleno = 2 (0x2), region = 71 }
 0x1a4   :  { %1468 = vsyncpa [#allocation3], 1 }
 0x1a5   :  { %1470 = vsyncpa [#allocation3 + $0x1], 1 }
 0x1a6   :  { %1471 = vsyncpa [#allocation5], 1 }

// kernel: beta_vae_b_forward.10
= control target key start
LH: loop header
LB: loop body
LE: loop exit
PB: predicated region body
PF: predicated region fallthrough
CT: control target
= control target key end

     0   :  { %vm1782_vm0 = vcmask 261120   ;;  %s3867_s1 = inlined_call_operand.vmem [shape: bf16[512,32], index: 1, kind: input, shape index: {}]   ;;  %s3868_s2 = inlined_call_operand.vmem [shape: f32[1,32], index: 2, kind: input, shape index: {}]   ;;  %s3869_s0 = inlined_call_operand.vmem [shape: bf16[512,512], index: 0, kind: input, shape index: {}]   ;;  %s3870_s3 = inlined_call_operand.vmem [shape: f32[512,32], index: 3, kind: output, shape index: {}]  }
   0x1   :  { %v2626_v0 = vld [vmem:[%s3867_s1 + $0x38] sm:$0xff]  ;;  %v2625_v4 = vld [vmem:[%s3867_s1 + $0x30] sm:$0xff]  ;;  %v2624_v8 = vld [vmem:[%s3867_s1 + $0x28] sm:$0xff] }
   0x2   :  { %v2634_v1 = vld [vmem:[%s3867_s1 + $0x78] sm:$0xff]  ;;  %1042 = vmatpush.bf16.msra.mxu0 %v2626_v0  ;;  %v2633_v5 = vld [vmem:[%s3867_s1 + $0x70] sm:$0xff]  ;;  %v2632_v9 = vld [vmem:[%s3867_s1 + $0x68] sm:$0xff] }
   0x3   :  { %v2642_v2 = vld [vmem:[%s3867_s1 + $0xb8] sm:$0xff]  ;;  %1211 = vmatpush.bf16.msra.mxu1 %v2634_v1  ;;  %v2641_v6 = vld [vmem:[%s3867_s1 + $0xb0] sm:$0xff]  ;;  %v2640_v10 = vld [vmem:[%s3867_s1 + $0xa8] sm:$0xff] }
   0x4   :  { %v2650_v3 = vld [vmem:[%s3867_s1 + $0xf8] sm:$0xff]  ;;  %1380 = vmatpush.bf16.msra.mxu2 %v2642_v2  ;;  %v2649_v7 = vld [vmem:[%s3867_s1 + $0xf0] sm:$0xff]  ;;  %v2648_v11 = vld [vmem:[%s3867_s1 + $0xe8] sm:$0xff] }
   0x5   :  { %1549 = vmatpush.bf16.msra.mxu3 %v2650_v3  ;;  %v2623_v12 = vld [vmem:[%s3867_s1 + $0x20] sm:$0xff]  ;;  %v2622_v16 = vld [vmem:[%s3867_s1 + $0x18] sm:$0xff]  ;;  %v2621_v20 = vld [vmem:[%s3867_s1 + $0x10] sm:$0xff] }
   0x6   :  { %1043 = vmatpush.bf16.msra.mxu0 %v2625_v4  ;;  %v2631_v13 = vld [vmem:[%s3867_s1 + $0x60] sm:$0xff]  ;;  %v2630_v17 = vld [vmem:[%s3867_s1 + $0x58] sm:$0xff]  ;;  %v2629_v21 = vld [vmem:[%s3867_s1 + $0x50] sm:$0xff] }
   0x7   :  { %1212 = vmatpush.bf16.msra.mxu1 %v2633_v5  ;;  %v2639_v14 = vld [vmem:[%s3867_s1 + $0xa0] sm:$0xff]  ;;  %v2638_v18 = vld [vmem:[%s3867_s1 + $0x98] sm:$0xff]  ;;  %v2637_v22 = vld [vmem:[%s3867_s1 + $0x90] sm:$0xff] }
   0x8   :  { %1381 = vmatpush.bf16.msra.mxu2 %v2641_v6  ;;  %v2647_v15 = vld [vmem:[%s3867_s1 + $0xe0] sm:$0xff]  ;;  %v2646_v19 = vld [vmem:[%s3867_s1 + $0xd8] sm:$0xff]  ;;  %v2645_v23 = vld [vmem:[%s3867_s1 + $0xd0] sm:$0xff] }
   0x9   :  { %1550 = vmatpush.bf16.msra.mxu3 %v2649_v7  ;;  %v2620_v24 = vld [vmem:[%s3867_s1 + $0x8] sm:$0xff]  ;;  %v2619_v28 = vld [vmem:[%s3867_s1] sm:$0xff]  ;;  %v2493_v33 = vld [vmem:[%s3869_s0 + $0xc] sm:$0xf0] }
   0xa   :  { %1044 = vmatpush.bf16.msra.mxu0 %v2624_v8  ;;  %v2628_v25 = vld [vmem:[%s3867_s1 + $0x48] sm:$0xff]  ;;  %v2627_v29 = vld [vmem:[%s3867_s1 + $0x40] sm:$0xff]  ;;  %v1855_v35 = vld [vmem:[%s3869_s0 + $0x10] sm:$0xf0] }
   0xb   :  { %1213 = vmatpush.bf16.msra.mxu1 %v2632_v9  ;;  %v2636_v26 = vld [vmem:[%s3867_s1 + $0x88] sm:$0xff]  ;;  %v2635_v30 = vld [vmem:[%s3867_s1 + $0x80] sm:$0xff]  ;;  %v2494_v37 = vld [vmem:[%s3869_s0 + $0x14] sm:$0xf0] }
   0xc   :  { %1382 = vmatpush.bf16.msra.mxu2 %v2640_v10  ;;  %v2644_v27 = vld [vmem:[%s3867_s1 + $0xc8] sm:$0xff]  ;;  %v2643_v31 = vld [vmem:[%s3867_s1 + $0xc0] sm:$0xff]  ;;  %v1863_v39 = vld [vmem:[%s3869_s0 + $0x18] sm:$0xf0] }
   0xd   :  { %1551 = vmatpush.bf16.msra.mxu3 %v2648_v11  ;;  %v1853_v32 = vld [vmem:[%s3869_s0] sm:$0xf]  ;;  %v2491_v34 = vld [vmem:[%s3869_s0 + $0x4] sm:$0xf]  ;;  %v1861_v36 = vld [vmem:[%s3869_s0 + $0x8] sm:$0xf] }
   0xe   :  { %1045 = vmatpush.bf16.msra.mxu0 %v2623_v12  ;;  %v2492_v38 = vld [vmem:[%s3869_s0 + $0xc] sm:$0xf]  ;;  %v1854_v40 = vor.u32 %v2493_v33, %v1853_v32  ;;  %v1858_v41 = vor.u32 %v2491_v34, %v1855_v35  ;;  %v1862_v42 = vor.u32 %v2494_v37, %v1861_v36  ;;  %v1869_v44 = vld [vmem:[%s3869_s0 + $0x20] sm:$0xf]  ;;  %v2497_v45 = vld [vmem:[%s3869_s0 + $0x2c] sm:$0xf0] }
   0xf   :  { %1214 = vmatpush.bf16.msra.mxu1 %v2631_v13  ;;  %v1866_v43 = vor.u32 %v2492_v38, %v1863_v39  ;;  %v2495_v46 = vld [vmem:[%s3869_s0 + $0x24] sm:$0xf]  ;;  %v1871_v47 = vld [vmem:[%s3869_s0 + $0x30] sm:$0xf0]  ;;  %v1877_v48 = vld [vmem:[%s3869_s0 + $0x28] sm:$0xf]  ;;  %v1870_v52 = vor.u32 %v2497_v45, %v1869_v44 }
  0x10   :  { %1383 = vmatpush.bf16.msra.mxu2 %v2639_v14  ;;  %v2498_v49 = vld [vmem:[%s3869_s0 + $0x34] sm:$0xf0]  ;;  %v2496_v50 = vld [vmem:[%s3869_s0 + $0x2c] sm:$0xf]  ;;  %v1879_v51 = vld [vmem:[%s3869_s0 + $0x38] sm:$0xf0]  ;;  %v1874_v53 = vor.u32 %v2495_v46, %v1871_v47 }
  0x11   :  { %1552 = vmatpush.bf16.msra.mxu3 %v2647_v15  ;;  %v1878_v54 = vor.u32 %v2498_v49, %v1877_v48  ;;  %v1882_v55 = vor.u32 %v2496_v50, %v1879_v51  ;;  %v1885_v56 = vld [vmem:[%s3869_s0 + $0x40] sm:$0xf]  ;;  %v2501_v57 = vld [vmem:[%s3869_s0 + $0x4c] sm:$0xf0]  ;;  %v2499_v58 = vld [vmem:[%s3869_s0 + $0x44] sm:$0xf] }
  0x12   :  { %1046 = vmatpush.bf16.msra.mxu0 %v2622_v16  ;;  %v1887_v59 = vld [vmem:[%s3869_s0 + $0x50] sm:$0xf0]  ;;  %v1893_v60 = vld [vmem:[%s3869_s0 + $0x48] sm:$0xf]  ;;  %v2502_v61 = vld [vmem:[%s3869_s0 + $0x54] sm:$0xf0]  ;;  %v1886_v0 = vor.u32 %v2501_v57, %v1885_v56 }
  0x13   :  { %1215 = vmatpush.bf16.msra.mxu1 %v2630_v17  ;;  %v2500_v62 = vld [vmem:[%s3869_s0 + $0x4c] sm:$0xf]  ;;  %v1895_v63 = vld [vmem:[%s3869_s0 + $0x58] sm:$0xf0]  ;;  %v1890_v1 = vor.u32 %v2499_v58, %v1887_v59  ;;  %v1894_v2 = vor.u32 %v2502_v61, %v1893_v60  ;;  %v1901_v4 = vld [vmem:[%s3869_s0 + $0x60] sm:$0xf] }
  0x14   :  { %1384 = vmatpush.bf16.msra.mxu2 %v2638_v18  ;;  %v1898_v3 = vor.u32 %v2500_v62, %v1895_v63  ;;  %v2505_v5 = vld [vmem:[%s3869_s0 + $0x6c] sm:$0xf0]  ;;  %v2503_v6 = vld [vmem:[%s3869_s0 + $0x64] sm:$0xf]  ;;  %v1903_v7 = vld [vmem:[%s3869_s0 + $0x70] sm:$0xf0] }
  0x15   :  { %1553 = vmatpush.bf16.msra.mxu3 %v2646_v19  ;;  %v1909_v8 = vld [vmem:[%s3869_s0 + $0x68] sm:$0xf]  ;;  %v2506_v9 = vld [vmem:[%s3869_s0 + $0x74] sm:$0xf0]  ;;  %v2504_v10 = vld [vmem:[%s3869_s0 + $0x6c] sm:$0xf]  ;;  %v1902_v12 = vor.u32 %v2505_v5, %v1901_v4  ;;  %v1906_v13 = vor.u32 %v2503_v6, %v1903_v7 }
  0x16   :  { %1047 = vmatpush.bf16.msra.mxu0 %v2621_v20  ;;  %v1911_v11 = vld [vmem:[%s3869_s0 + $0x78] sm:$0xf0]  ;;  %v1910_v14 = vor.u32 %v2506_v9, %v1909_v8  ;;  %v1917_v16 = vld [vmem:[%s3869_s0 + $0x80] sm:$0xf]  ;;  %v2509_v17 = vld [vmem:[%s3869_s0 + $0x8c] sm:$0xf0] }
  0x17   :  { %1216 = vmatpush.bf16.msra.mxu1 %v2629_v21  ;;  %v1914_v15 = vor.u32 %v2504_v10, %v1911_v11  ;;  %v2507_v18 = vld [vmem:[%s3869_s0 + $0x84] sm:$0xf]  ;;  %v1919_v19 = vld [vmem:[%s3869_s0 + $0x90] sm:$0xf0]  ;;  %v1925_v20 = vld [vmem:[%s3869_s0 + $0x88] sm:$0xf] }
  0x18   :  { %1385 = vmatpush.bf16.msra.mxu2 %v2637_v22  ;;  %v2510_v21 = vld [vmem:[%s3869_s0 + $0x94] sm:$0xf0]  ;;  %v2508_v22 = vld [vmem:[%s3869_s0 + $0x8c] sm:$0xf]  ;;  %v1941_v32 = vld [vmem:[%s3869_s0 + $0xa8] sm:$0xf] }
  0x19   :  { %1554 = vmatpush.bf16.msra.mxu3 %v2645_v23  ;;  %v1927_v23 = vld [vmem:[%s3869_s0 + $0x98] sm:$0xf0]  ;;  %v2514_v33 = vld [vmem:[%s3869_s0 + $0xb4] sm:$0xf0]  ;;  %v2512_v34 = vld [vmem:[%s3869_s0 + $0xac] sm:$0xf] }
  0x1a   :  { %1048 = vmatpush.bf16.msra.mxu0 %v2620_v24  ;;  %v1918_v24 = vor.u32 %v2509_v17, %v1917_v16  ;;  %v1943_v35 = vld [vmem:[%s3869_s0 + $0xb8] sm:$0xf0]  ;;  %v1942_v38 = vor.u32 %v2514_v33, %v1941_v32  ;;  %v1957_v44 = vld [vmem:[%s3869_s0 + $0xc8] sm:$0xf]  ;;  %v2518_v45 = vld [vmem:[%s3869_s0 + $0xd4] sm:$0xf0] }
  0x1b   :  { %1217 = vmatpush.bf16.msra.mxu1 %v2628_v25  ;;  %v1922_v25 = vor.u32 %v2507_v18, %v1919_v19  ;;  %v1946_v39 = vor.u32 %v2512_v34, %v1943_v35  ;;  %v2516_v46 = vld [vmem:[%s3869_s0 + $0xcc] sm:$0xf]  ;;  %v1959_v47 = vld [vmem:[%s3869_s0 + $0xd8] sm:$0xf0]  ;;  %v1958_v50 = vor.u32 %v2518_v45, %v1957_v44  ;;  %v1973_v56 = vld [vmem:[%s3869_s0 + $0xe8] sm:$0xf] }
  0x1c   :  { %1386 = vmatpush.bf16.msra.mxu2 %v2636_v26  ;;  %v1926_v26 = vor.u32 %v2510_v21, %v1925_v20  ;;  %v1962_v51 = vor.u32 %v2516_v46, %v1959_v47  ;;  %v2522_v57 = vld [vmem:[%s3869_s0 + $0xf4] sm:$0xf0]  ;;  %v2520_v58 = vld [vmem:[%s3869_s0 + $0xec] sm:$0xf]  ;;  %v1975_v59 = vld [vmem:[%s3869_s0 + $0xf8] sm:$0xf0] }
  0x1d   :  { %1555 = vmatpush.bf16.msra.mxu3 %v2644_v27  ;;  %v1930_v27 = vor.u32 %v2508_v22, %v1927_v23  ;;  %v1974_v62 = vor.u32 %v2522_v57, %v1973_v56  ;;  %v1978_v63 = vor.u32 %v2520_v58, %v1975_v59  ;;  %v1983_v4 = vld [vmem:[%s3869_s0 + $0x110] sm:$0xf0]  ;;  %v1989_v5 = vld [vmem:[%s3869_s0 + $0x108] sm:$0xf]  ;;  %v2526_v6 = vld [vmem:[%s3869_s0 + $0x114] sm:$0xf0] }
  0x1e   :  { %1049 = vmatpush.bf16.msra.mxu0 %v2619_v28  ;;  %v1933_v28 = vld [vmem:[%s3869_s0 + $0xa0] sm:$0xf]  ;;  %v2524_v7 = vld [vmem:[%s3869_s0 + $0x10c] sm:$0xf]  ;;  %v1991_v8 = vld [vmem:[%s3869_s0 + $0x118] sm:$0xf0] }
  0x1f   :  { %1218 = vmatpush.bf16.msra.mxu1 %v2627_v29  ;;  %v2513_v29 = vld [vmem:[%s3869_s0 + $0xac] sm:$0xf0]  ;;  %v2007_v32 = vld [vmem:[%s3869_s0 + $0x138] sm:$0xf0]  ;;  %v2531_v56 = vld [vmem:[%s3869_s0 + $0x144] sm:$0xf] }
  0x20   :  { %1387 = vmatpush.bf16.msra.mxu2 %v2635_v30  ;;  %v2511_v30 = vld [vmem:[%s3869_s0 + $0xa4] sm:$0xf]  ;;  %v1934_v36 = vor.u32 %v2513_v29, %v1933_v28  ;;  %v1999_v28 = vld [vmem:[%s3869_s0 + $0x130] sm:$0xf0]  ;;  %v2005_v29 = vld [vmem:[%s3869_s0 + $0x128] sm:$0xf] }
  0x21   :  { %1556 = vmatpush.bf16.msra.mxu3 %v2643_v31  ;;  %1050 = vmatmul.bf16.vlgmr.msra.gmra.mxu0 %v1854_v40  ;;  %v1935_v31 = vld [vmem:[%s3869_s0 + $0xb0] sm:$0xf0]  ;;  %v1949_v40 = vld [vmem:[%s3869_s0 + $0xc0] sm:$0xf]  ;;  %v2021_v59 = vld [vmem:[%s3869_s0 + $0x148] sm:$0xf] }
  0x22   :  { %1219 = vmatmul.bf16.vlgmr.msra.gmra.mxu1 %v1858_v41  ;;  %v1938_v37 = vor.u32 %v2511_v30, %v1935_v31  ;;  %v2517_v41 = vld [vmem:[%s3869_s0 + $0xcc] sm:$0xf0]  ;;  %v2530_v30 = vld [vmem:[%s3869_s0 + $0x134] sm:$0xf0]  ;;  %v2528_v31 = vld [vmem:[%s3869_s0 + $0x12c] sm:$0xf] }
  0x23   :  { %1388 = vmatmul.bf16.vlgmr.msra.gmra.mxu2 %v1862_v42  ;;  %v2515_v42 = vld [vmem:[%s3869_s0 + $0xc4] sm:$0xf]  ;;  %v1950_v48 = vor.u32 %v2517_v41, %v1949_v40  ;;  %v2006_v41 = vor.u32 %v2530_v30, %v2005_v29  ;;  %v2015_v58 = vld [vmem:[%s3869_s0 + $0x150] sm:$0xf0]  ;;  %v2039_v29 = vld [vmem:[%s3869_s0 + $0x178] sm:$0xf0] }
  0x24   :  { %1557 = vmatmul.bf16.vlgmr.msra.gmra.mxu3 %v1866_v43  ;;  %v1951_v43 = vld [vmem:[%s3869_s0 + $0xd0] sm:$0xf0] }
  0x25   :  { %v1954_v49 = vor.u32 %v2515_v42, %v1951_v43  ;;  %v2010_v42 = vor.u32 %v2528_v31, %v2007_v32 }
  0x31   :  { %1055 = vmatmul.bf16.gmra.mxu0 %v1870_v52  ;;  %v1965_v52 = vld [vmem:[%s3869_s0 + $0xe0] sm:$0xf] }
  0x32   :  { %1224 = vmatmul.bf16.gmra.mxu1 %v1874_v53  ;;  %v2521_v53 = vld [vmem:[%s3869_s0 + $0xec] sm:$0xf0] }
  0x33   :  { %1393 = vmatmul.bf16.gmra.mxu2 %v1878_v54  ;;  %v2519_v54 = vld [vmem:[%s3869_s0 + $0xe4] sm:$0xf]  ;;  %v1966_v60 = vor.u32 %v2521_v53, %v1965_v52 }
  0x34   :  { %1562 = vmatmul.bf16.gmra.mxu3 %v1882_v55  ;;  %v1967_v55 = vld [vmem:[%s3869_s0 + $0xf0] sm:$0xf0] }
  0x35   :  { %v1970_v61 = vor.u32 %v2519_v54, %v1967_v55  ;;  %v2013_v54 = vld [vmem:[%s3869_s0 + $0x140] sm:$0xf]  ;;  %v2533_v55 = vld [vmem:[%s3869_s0 + $0x14c] sm:$0xf0] }
  0x41   :  { %1060 = vmatmul.bf16.gmra.mxu0 %v1886_v0  ;;  %v2964_v0 = vld [vmem:[%s3868_s2] ss:$0 sm:$0xff] }
  0x42   :  { %1229 = vmatmul.bf16.gmra.mxu1 %v1890_v1  ;;  %v1981_v1 = vld [vmem:[%s3869_s0 + $0x100] sm:$0xf] }
  0x43   :  { %1398 = vmatmul.bf16.gmra.mxu2 %v1894_v2  ;;  %v2525_v2 = vld [vmem:[%s3869_s0 + $0x10c] sm:$0xf0] }
  0x44   :  { %1567 = vmatmul.bf16.gmra.mxu3 %v1898_v3  ;;  %v2523_v3 = vld [vmem:[%s3869_s0 + $0x104] sm:$0xf]  ;;  %v1982_v9 = vor.u32 %v2525_v2, %v1981_v1 }
  0x45   :  { %v1986_v10 = vor.u32 %v2523_v3, %v1983_v4  ;;  %v2014_v3 = vor.u32 %v2533_v55, %v2013_v54  ;;  %v2018_v4 = vor.u32 %v2531_v56, %v2015_v58  ;;  %v2047_v55 = vld [vmem:[%s3869_s0 + $0x190] sm:$0xf0]  ;;  %v2053_v56 = vld [vmem:[%s3869_s0 + $0x188] sm:$0xf]  ;;  %v2540_v58 = vld [vmem:[%s3869_s0 + $0x18c] sm:$0xf] }
  0x51   :  { %1065 = vmatmul.bf16.gmra.mxu0 %v1902_v12 }
  0x52   :  { %1234 = vmatmul.bf16.gmra.mxu1 %v1906_v13  ;;  %v1990_v13 = vor.u32 %v2526_v6, %v1989_v5 }
  0x53   :  { %1403 = vmatmul.bf16.gmra.mxu2 %v1910_v14  ;;  %v1994_v14 = vor.u32 %v2524_v7, %v1991_v8 }
  0x54   :  { %1572 = vmatmul.bf16.gmra.mxu3 %v1914_v15 }
  0x61   :  { %1070 = vmatmul.bf16.gmra.mxu0 %v1918_v24  ;;  %v1997_v24 = vld [vmem:[%s3869_s0 + $0x120] sm:$0xf] }
  0x62   :  { %1239 = vmatmul.bf16.gmra.mxu1 %v1922_v25  ;;  %v2529_v25 = vld [vmem:[%s3869_s0 + $0x12c] sm:$0xf0] }
  0x63   :  { %1408 = vmatmul.bf16.gmra.mxu2 %v1926_v26  ;;  %v2527_v26 = vld [vmem:[%s3869_s0 + $0x124] sm:$0xf] }
  0x64   :  { %1577 = vmatmul.bf16.gmra.mxu3 %v1930_v27 }
  0x71   :  { %1075 = vmatmul.bf16.gmra.mxu0 %v1934_v36  ;;  %v1998_v36 = vor.u32 %v2529_v25, %v1997_v24  ;;  %v2031_v25 = vld [vmem:[%s3869_s0 + $0x170] sm:$0xf0] }
  0x72   :  { %1244 = vmatmul.bf16.gmra.mxu1 %v1938_v37  ;;  %v2002_v37 = vor.u32 %v2527_v26, %v1999_v28  ;;  %v2037_v26 = vld [vmem:[%s3869_s0 + $0x168] sm:$0xf]  ;;  %v2536_v28 = vld [vmem:[%s3869_s0 + $0x16c] sm:$0xf] }
  0x73   :  { %1413 = vmatmul.bf16.gmra.mxu2 %v1942_v38 }
  0x74   :  { %1582 = vmatmul.bf16.gmra.mxu3 %v1946_v39 }
  0x81   :  { %1080 = vmatmul.bf16.gmra.mxu0 %v1950_v48 }
  0x82   :  { %1249 = vmatmul.bf16.gmra.mxu1 %v1954_v49 }
  0x83   :  { %1418 = vmatmul.bf16.gmra.mxu2 %v1958_v50 }
  0x84   :  { %1587 = vmatmul.bf16.gmra.mxu3 %v1962_v51 }
  0x91   :  { %1085 = vmatmul.bf16.gmra.mxu0 %v1966_v60  ;;  %v2534_v60 = vld [vmem:[%s3869_s0 + $0x154] sm:$0xf0] }
  0x92   :  { %1254 = vmatmul.bf16.gmra.mxu1 %v1970_v61  ;;  %v2532_v61 = vld [vmem:[%s3869_s0 + $0x14c] sm:$0xf]  ;;  %v2022_v8 = vor.u32 %v2534_v60, %v2021_v59  ;;  %v2055_v59 = vld [vmem:[%s3869_s0 + $0x198] sm:$0xf0] }
  0x93   :  { %1423 = vmatmul.bf16.gmra.mxu2 %v1974_v62  ;;  %v2023_v62 = vld [vmem:[%s3869_s0 + $0x158] sm:$0xf0] }
  0x94   :  { %1592 = vmatmul.bf16.gmra.mxu3 %v1978_v63 }
  0x9e   :  { %v1051_v11 = vpop.f32.mrf.mxu0 }
  0x9f   :  { %v1220_v12 = vpop.f32.mrf.mxu1  ;;  %v1052_v15 = vadd.f32 %v2964_v0, %v1051_v11 }
  0xa1   :  { %1090 = vmatmul.bf16.gmra.mxu0 %v1982_v9  ;;  %v1221_v16 = vadd.f32 %v1220_v12, %v1052_v15  ;;  %v2026_v9 = vor.u32 %v2532_v61, %v2023_v62 }
  0xa2   :  { %1259 = vmatmul.bf16.gmra.mxu1 %v1986_v10 }
  0xa3   :  { %1428 = vmatmul.bf16.gmra.mxu2 %v1990_v13 }
  0xa4   :  { %1597 = vmatmul.bf16.gmra.mxu3 %v1994_v14 }
  0xa6   :  { %v1389_v17 = vpop.f32.mrf.mxu2  ;;  %v1053_v20 = vpop.f32.mrf.mxu0 }
  0xa7   :  { %v1558_v18 = vpop.f32.mrf.mxu3  ;;  %v1390_v19 = vadd.f32 %v1389_v17, %v1221_v16  ;;  %v1222_v21 = vpop.f32.mrf.mxu1  ;;  %v1054_v23 = vadd.f32 %v2964_v0, %v1053_v20 }
  0xa9   :  { %v1559_v22 = vadd.f32 %v1558_v18, %v1390_v19  ;;  %v1223_v33 = vadd.f32 %v1222_v21, %v1054_v23  ;;  %v2029_v21 = vld [vmem:[%s3869_s0 + $0x160] sm:$0xf]  ;;  %v2535_v23 = vld [vmem:[%s3869_s0 + $0x164] sm:$0xf] }
  0xab   :  { %v1718_v27 = vmax.f32 %v1559_v22, 0.0  ;;  %v2537_v22 = vld [vmem:[%s3869_s0 + $0x16c] sm:$0xf0] }
  0xad   :  { %1783 = vst.msk [vmem:[%s3870_s3] sm:$0xff] %vm1782_vm0, %v1718_v27  ;;  %v2538_v27 = vld [vmem:[%s3869_s0 + $0x174] sm:$0xf0] }
  0xae   :  { %v1391_v34 = vpop.f32.mrf.mxu2  ;;  %v1056_v39 = vpop.f32.mrf.mxu0 }
  0xaf   :  { %v1560_v35 = vpop.f32.mrf.mxu3  ;;  %v1392_v38 = vadd.f32 %v1391_v34, %v1223_v33  ;;  %v1225_v40 = vpop.f32.mrf.mxu1  ;;  %v1057_v43 = vadd.f32 %v2964_v0, %v1056_v39  ;;  %v2030_v33 = vor.u32 %v2537_v22, %v2029_v21  ;;  %v2034_v34 = vor.u32 %v2535_v23, %v2031_v25  ;;  %v2063_v22 = vld [vmem:[%s3869_s0 + $0x1b0] sm:$0xf0]  ;;  %v2069_v23 = vld [vmem:[%s3869_s0 + $0x1a8] sm:$0xf]  ;;  %v2544_v25 = vld [vmem:[%s3869_s0 + $0x1ac] sm:$0xf] }
  0xb0   :  { %v2042_v39 = vor.u32 %v2536_v28, %v2039_v29 }
  0xb1   :  { %v1561_v44 = vadd.f32 %v1560_v35, %v1392_v38  ;;  %1095 = vmatmul.bf16.gmra.mxu0 %v1998_v36  ;;  %v1226_v46 = vadd.f32 %v1225_v40, %v1057_v43  ;;  %v2038_v38 = vor.u32 %v2538_v27, %v2037_v26  ;;  %v2071_v26 = vld [vmem:[%s3869_s0 + $0x1b8] sm:$0xf0] }
  0xb2   :  { %1264 = vmatmul.bf16.gmra.mxu1 %v2002_v37 }
  0xb3   :  { %v1719_v45 = vmax.f32 %v1561_v44, 0.0  ;;  %1433 = vmatmul.bf16.gmra.mxu2 %v2006_v41 }
  0xb4   :  { %1602 = vmatmul.bf16.gmra.mxu3 %v2010_v42 }
  0xb5   :  { %1784 = vst.msk [vmem:[%s3870_s3 + $0x8] sm:$0xff] %vm1782_vm0, %v1719_v45 }
  0xb6   :  { %v1394_v47 = vpop.f32.mrf.mxu2  ;;  %v1058_v50 = vpop.f32.mrf.mxu0 }
  0xb7   :  { %v1563_v48 = vpop.f32.mrf.mxu3  ;;  %v1395_v49 = vadd.f32 %v1394_v47, %v1226_v46  ;;  %v1227_v51 = vpop.f32.mrf.mxu1  ;;  %v1059_v53 = vadd.f32 %v2964_v0, %v1058_v50 }
  0xb9   :  { %v1564_v52 = vadd.f32 %v1563_v48, %v1395_v49  ;;  %v1228_v63 = vadd.f32 %v1227_v51, %v1059_v53  ;;  %v2045_v51 = vld [vmem:[%s3869_s0 + $0x180] sm:$0xf]  ;;  %v2539_v53 = vld [vmem:[%s3869_s0 + $0x184] sm:$0xf] }
  0xbb   :  { %v1720_v57 = vmax.f32 %v1564_v52, 0.0  ;;  %v2541_v52 = vld [vmem:[%s3869_s0 + $0x18c] sm:$0xf0] }
  0xbd   :  { %1785 = vst.msk [vmem:[%s3870_s3 + $0x10] sm:$0xff] %vm1782_vm0, %v1720_v57  ;;  %v2542_v57 = vld [vmem:[%s3869_s0 + $0x194] sm:$0xf0] }
  0xbe   :  { %v1396_v1 = vpop.f32.mrf.mxu2  ;;  %v1061_v6 = vpop.f32.mrf.mxu0 }
  0xbf   :  { %v1565_v2 = vpop.f32.mrf.mxu3  ;;  %v1397_v5 = vadd.f32 %v1396_v1, %v1228_v63  ;;  %v1230_v7 = vpop.f32.mrf.mxu1  ;;  %v1062_v10 = vadd.f32 %v2964_v0, %v1061_v6  ;;  %v2046_v63 = vor.u32 %v2541_v52, %v2045_v51  ;;  %v2050_v1 = vor.u32 %v2539_v53, %v2047_v55  ;;  %v2079_v52 = vld [vmem:[%s3869_s0 + $0x1d0] sm:$0xf0]  ;;  %v2085_v53 = vld [vmem:[%s3869_s0 + $0x1c8] sm:$0xf]  ;;  %v2548_v55 = vld [vmem:[%s3869_s0 + $0x1cc] sm:$0xf] }
  0xc0   :  { %v2058_v6 = vor.u32 %v2540_v58, %v2055_v59 }
  0xc1   :  { %v1566_v11 = vadd.f32 %v1565_v2, %v1397_v5  ;;  %1100 = vmatmul.bf16.gmra.mxu0 %v2014_v3  ;;  %v1231_v13 = vadd.f32 %v1230_v7, %v1062_v10  ;;  %v2054_v5 = vor.u32 %v2542_v57, %v2053_v56  ;;  %v2087_v56 = vld [vmem:[%s3869_s0 + $0x1d8] sm:$0xf0] }
  0xc2   :  { %1269 = vmatmul.bf16.gmra.mxu1 %v2018_v4 }
  0xc3   :  { %v1721_v12 = vmax.f32 %v1566_v11, 0.0  ;;  %1438 = vmatmul.bf16.gmra.mxu2 %v2022_v8 }
  0xc4   :  { %1607 = vmatmul.bf16.gmra.mxu3 %v2026_v9 }
  0xc5   :  { %1786 = vst.msk [vmem:[%s3870_s3 + $0x18] sm:$0xff] %vm1782_vm0, %v1721_v12 }
  0xc6   :  { %v1399_v14 = vpop.f32.mrf.mxu2  ;;  %v1063_v17 = vpop.f32.mrf.mxu0 }
  0xc7   :  { %v1568_v15 = vpop.f32.mrf.mxu3  ;;  %v1400_v16 = vadd.f32 %v1399_v14, %v1231_v13  ;;  %v1232_v18 = vpop.f32.mrf.mxu1  ;;  %v1064_v20 = vadd.f32 %v2964_v0, %v1063_v17 }
  0xc9   :  { %v1569_v19 = vadd.f32 %v1568_v15, %v1400_v16  ;;  %v1233_v30 = vadd.f32 %v1232_v18, %v1064_v20  ;;  %v2061_v18 = vld [vmem:[%s3869_s0 + $0x1a0] sm:$0xf]  ;;  %v2543_v20 = vld [vmem:[%s3869_s0 + $0x1a4] sm:$0xf] }
  0xcb   :  { %v1722_v24 = vmax.f32 %v1569_v19, 0.0  ;;  %v2545_v19 = vld [vmem:[%s3869_s0 + $0x1ac] sm:$0xf0] }
  0xcd   :  { %1787 = vst.msk [vmem:[%s3870_s3 + $0x20] sm:$0xff] %vm1782_vm0, %v1722_v24  ;;  %v2546_v24 = vld [vmem:[%s3869_s0 + $0x1b4] sm:$0xf0] }
  0xce   :  { %v1401_v31 = vpop.f32.mrf.mxu2  ;;  %v1066_v36 = vpop.f32.mrf.mxu0 }
  0xcf   :  { %v1570_v32 = vpop.f32.mrf.mxu3  ;;  %v1402_v35 = vadd.f32 %v1401_v31, %v1233_v30  ;;  %v1235_v37 = vpop.f32.mrf.mxu1  ;;  %v1067_v40 = vadd.f32 %v2964_v0, %v1066_v36  ;;  %v2062_v30 = vor.u32 %v2545_v19, %v2061_v18  ;;  %v2066_v31 = vor.u32 %v2543_v20, %v2063_v22  ;;  %v2095_v19 = vld [vmem:[%s3869_s0 + $0x1f0] sm:$0xf0]  ;;  %v2101_v20 = vld [vmem:[%s3869_s0 + $0x1e8] sm:$0xf]  ;;  %v2552_v22 = vld [vmem:[%s3869_s0 + $0x1ec] sm:$0xf] }
  0xd0   :  { %v2074_v36 = vor.u32 %v2544_v25, %v2071_v26 }
  0xd1   :  { %v1571_v41 = vadd.f32 %v1570_v32, %v1402_v35  ;;  %1105 = vmatmul.bf16.gmra.mxu0 %v2030_v33  ;;  %v1236_v43 = vadd.f32 %v1235_v37, %v1067_v40  ;;  %v2070_v35 = vor.u32 %v2546_v24, %v2069_v23  ;;  %v2103_v23 = vld [vmem:[%s3869_s0 + $0x1f8] sm:$0xf0] }
  0xd2   :  { %1274 = vmatmul.bf16.gmra.mxu1 %v2034_v34 }
  0xd3   :  { %v1723_v42 = vmax.f32 %v1571_v41, 0.0  ;;  %1443 = vmatmul.bf16.gmra.mxu2 %v2038_v38 }
  0xd4   :  { %1612 = vmatmul.bf16.gmra.mxu3 %v2042_v39 }
  0xd5   :  { %1788 = vst.msk [vmem:[%s3870_s3 + $0x28] sm:$0xff] %vm1782_vm0, %v1723_v42 }
  0xd6   :  { %v1404_v44 = vpop.f32.mrf.mxu2  ;;  %v1068_v47 = vpop.f32.mrf.mxu0 }
  0xd7   :  { %v1573_v45 = vpop.f32.mrf.mxu3  ;;  %v1405_v46 = vadd.f32 %v1404_v44, %v1236_v43  ;;  %v1237_v48 = vpop.f32.mrf.mxu1  ;;  %v1069_v50 = vadd.f32 %v2964_v0, %v1068_v47 }
  0xd9   :  { %v1574_v49 = vadd.f32 %v1573_v45, %v1405_v46  ;;  %v1238_v60 = vadd.f32 %v1237_v48, %v1069_v50  ;;  %v2077_v48 = vld [vmem:[%s3869_s0 + $0x1c0] sm:$0xf]  ;;  %v2547_v50 = vld [vmem:[%s3869_s0 + $0x1c4] sm:$0xf] }
  0xdb   :  { %v1724_v54 = vmax.f32 %v1574_v49, 0.0  ;;  %v2549_v49 = vld [vmem:[%s3869_s0 + $0x1cc] sm:$0xf0] }
  0xdd   :  { %1789 = vst.msk [vmem:[%s3870_s3 + $0x30] sm:$0xff] %vm1782_vm0, %v1724_v54  ;;  %v2550_v54 = vld [vmem:[%s3869_s0 + $0x1d4] sm:$0xf0] }
  0xde   :  { %v1406_v61 = vpop.f32.mrf.mxu2  ;;  %v1071_v3 = vpop.f32.mrf.mxu0 }
  0xdf   :  { %v1575_v62 = vpop.f32.mrf.mxu3  ;;  %v1407_v2 = vadd.f32 %v1406_v61, %v1238_v60  ;;  %v1240_v4 = vpop.f32.mrf.mxu1  ;;  %v1072_v7 = vadd.f32 %v2964_v0, %v1071_v3  ;;  %v2078_v60 = vor.u32 %v2549_v49, %v2077_v48  ;;  %v2082_v61 = vor.u32 %v2547_v50, %v2079_v52  ;;  %v2111_v49 = vld [vmem:[%s3869_s0 + $0x210] sm:$0xf0]  ;;  %v2117_v50 = vld [vmem:[%s3869_s0 + $0x208] sm:$0xf]  ;;  %v2556_v52 = vld [vmem:[%s3869_s0 + $0x20c] sm:$0xf] }
  0xe0   :  { %v2090_v3 = vor.u32 %v2548_v55, %v2087_v56 }
  0xe1   :  { %v1576_v8 = vadd.f32 %v1575_v62, %v1407_v2  ;;  %1110 = vmatmul.bf16.gmra.mxu0 %v2046_v63  ;;  %v1241_v10 = vadd.f32 %v1240_v4, %v1072_v7  ;;  %v2086_v2 = vor.u32 %v2550_v54, %v2085_v53  ;;  %v2119_v53 = vld [vmem:[%s3869_s0 + $0x218] sm:$0xf0] }
  0xe2   :  { %1279 = vmatmul.bf16.gmra.mxu1 %v2050_v1 }
  0xe3   :  { %v1725_v9 = vmax.f32 %v1576_v8, 0.0  ;;  %1448 = vmatmul.bf16.gmra.mxu2 %v2054_v5 }
  0xe4   :  { %1617 = vmatmul.bf16.gmra.mxu3 %v2058_v6 }
  0xe5   :  { %1790 = vst.msk [vmem:[%s3870_s3 + $0x38] sm:$0xff] %vm1782_vm0, %v1725_v9 }
  0xe6   :  { %v1409_v11 = vpop.f32.mrf.mxu2  ;;  %v1073_v14 = vpop.f32.mrf.mxu0 }
  0xe7   :  { %v1578_v12 = vpop.f32.mrf.mxu3  ;;  %v1410_v13 = vadd.f32 %v1409_v11, %v1241_v10  ;;  %v1242_v15 = vpop.f32.mrf.mxu1  ;;  %v1074_v17 = vadd.f32 %v2964_v0, %v1073_v14 }
  0xe9   :  { %v1579_v16 = vadd.f32 %v1578_v12, %v1410_v13  ;;  %v1243_v27 = vadd.f32 %v1242_v15, %v1074_v17  ;;  %v2093_v15 = vld [vmem:[%s3869_s0 + $0x1e0] sm:$0xf]  ;;  %v2551_v17 = vld [vmem:[%s3869_s0 + $0x1e4] sm:$0xf] }
  0xeb   :  { %v1726_v21 = vmax.f32 %v1579_v16, 0.0  ;;  %v2553_v16 = vld [vmem:[%s3869_s0 + $0x1ec] sm:$0xf0] }
  0xed   :  { %1791 = vst.msk [vmem:[%s3870_s3 + $0x40] sm:$0xff] %vm1782_vm0, %v1726_v21  ;;  %v2554_v21 = vld [vmem:[%s3869_s0 + $0x1f4] sm:$0xf0] }
  0xee   :  { %v1411_v28 = vpop.f32.mrf.mxu2  ;;  %v1076_v33 = vpop.f32.mrf.mxu0 }
  0xef   :  { %v1580_v29 = vpop.f32.mrf.mxu3  ;;  %v1412_v32 = vadd.f32 %v1411_v28, %v1243_v27  ;;  %v1245_v34 = vpop.f32.mrf.mxu1  ;;  %v1077_v37 = vadd.f32 %v2964_v0, %v1076_v33  ;;  %v2094_v27 = vor.u32 %v2553_v16, %v2093_v15  ;;  %v2098_v28 = vor.u32 %v2551_v17, %v2095_v19  ;;  %v2127_v16 = vld [vmem:[%s3869_s0 + $0x230] sm:$0xf0]  ;;  %v2133_v17 = vld [vmem:[%s3869_s0 + $0x228] sm:$0xf]  ;;  %v2560_v19 = vld [vmem:[%s3869_s0 + $0x22c] sm:$0xf] }
  0xf0   :  { %v2106_v33 = vor.u32 %v2552_v22, %v2103_v23 }
  0xf1   :  { %v1581_v38 = vadd.f32 %v1580_v29, %v1412_v32  ;;  %1115 = vmatmul.bf16.gmra.mxu0 %v2062_v30  ;;  %v1246_v40 = vadd.f32 %v1245_v34, %v1077_v37  ;;  %v2102_v32 = vor.u32 %v2554_v21, %v2101_v20  ;;  %v2135_v20 = vld [vmem:[%s3869_s0 + $0x238] sm:$0xf0] }
  0xf2   :  { %1284 = vmatmul.bf16.gmra.mxu1 %v2066_v31 }
  0xf3   :  { %v1727_v39 = vmax.f32 %v1581_v38, 0.0  ;;  %1453 = vmatmul.bf16.gmra.mxu2 %v2070_v35 }
  0xf4   :  { %1622 = vmatmul.bf16.gmra.mxu3 %v2074_v36 }
  0xf5   :  { %1792 = vst.msk [vmem:[%s3870_s3 + $0x48] sm:$0xff] %vm1782_vm0, %v1727_v39 }
  0xf6   :  { %v1414_v41 = vpop.f32.mrf.mxu2  ;;  %v1078_v44 = vpop.f32.mrf.mxu0 }
  0xf7   :  { %v1583_v42 = vpop.f32.mrf.mxu3  ;;  %v1415_v43 = vadd.f32 %v1414_v41, %v1246_v40  ;;  %v1247_v45 = vpop.f32.mrf.mxu1  ;;  %v1079_v47 = vadd.f32 %v2964_v0, %v1078_v44 }
  0xf9   :  { %v1584_v46 = vadd.f32 %v1583_v42, %v1415_v43  ;;  %v1248_v57 = vadd.f32 %v1247_v45, %v1079_v47  ;;  %v2109_v45 = vld [vmem:[%s3869_s0 + $0x200] sm:$0xf]  ;;  %v2555_v47 = vld [vmem:[%s3869_s0 + $0x204] sm:$0xf] }
  0xfb   :  { %v1728_v51 = vmax.f32 %v1584_v46, 0.0  ;;  %v2557_v46 = vld [vmem:[%s3869_s0 + $0x20c] sm:$0xf0] }
  0xfd   :  { %1793 = vst.msk [vmem:[%s3870_s3 + $0x50] sm:$0xff] %vm1782_vm0, %v1728_v51  ;;  %v2558_v51 = vld [vmem:[%s3869_s0 + $0x214] sm:$0xf0] }
  0xfe   :  { %v1416_v58 = vpop.f32.mrf.mxu2  ;;  %v1081_v63 = vpop.f32.mrf.mxu0 }
  0xff   :  { %v1585_v59 = vpop.f32.mrf.mxu3  ;;  %v1417_v62 = vadd.f32 %v1416_v58, %v1248_v57  ;;  %v1250_v1 = vpop.f32.mrf.mxu1  ;;  %v1082_v4 = vadd.f32 %v2964_v0, %v1081_v63  ;;  %v2110_v57 = vor.u32 %v2557_v46, %v2109_v45  ;;  %v2114_v58 = vor.u32 %v2555_v47, %v2111_v49  ;;  %v2143_v46 = vld [vmem:[%s3869_s0 + $0x250] sm:$0xf0]  ;;  %v2149_v47 = vld [vmem:[%s3869_s0 + $0x248] sm:$0xf]  ;;  %v2564_v49 = vld [vmem:[%s3869_s0 + $0x24c] sm:$0xf] }
 0x100   :  { %v2122_v63 = vor.u32 %v2556_v52, %v2119_v53 }
 0x101   :  { %v1586_v5 = vadd.f32 %v1585_v59, %v1417_v62  ;;  %1120 = vmatmul.bf16.gmra.mxu0 %v2078_v60  ;;  %v1251_v7 = vadd.f32 %v1250_v1, %v1082_v4  ;;  %v2118_v62 = vor.u32 %v2558_v51, %v2117_v50  ;;  %v2151_v50 = vld [vmem:[%s3869_s0 + $0x258] sm:$0xf0] }
 0x102   :  { %1289 = vmatmul.bf16.gmra.mxu1 %v2082_v61 }
 0x103   :  { %v1729_v6 = vmax.f32 %v1586_v5, 0.0  ;;  %1458 = vmatmul.bf16.gmra.mxu2 %v2086_v2 }
 0x104   :  { %1627 = vmatmul.bf16.gmra.mxu3 %v2090_v3 }
 0x105   :  { %1794 = vst.msk [vmem:[%s3870_s3 + $0x58] sm:$0xff] %vm1782_vm0, %v1729_v6 }
 0x106   :  { %v1419_v8 = vpop.f32.mrf.mxu2  ;;  %v1083_v11 = vpop.f32.mrf.mxu0 }
 0x107   :  { %v1588_v9 = vpop.f32.mrf.mxu3  ;;  %v1420_v10 = vadd.f32 %v1419_v8, %v1251_v7  ;;  %v1252_v12 = vpop.f32.mrf.mxu1  ;;  %v1084_v14 = vadd.f32 %v2964_v0, %v1083_v11 }
 0x109   :  { %v1589_v13 = vadd.f32 %v1588_v9, %v1420_v10  ;;  %v1253_v24 = vadd.f32 %v1252_v12, %v1084_v14  ;;  %v2125_v12 = vld [vmem:[%s3869_s0 + $0x220] sm:$0xf]  ;;  %v2559_v14 = vld [vmem:[%s3869_s0 + $0x224] sm:$0xf] }
 0x10b   :  { %v1730_v18 = vmax.f32 %v1589_v13, 0.0  ;;  %v2561_v13 = vld [vmem:[%s3869_s0 + $0x22c] sm:$0xf0] }
 0x10d   :  { %1795 = vst.msk [vmem:[%s3870_s3 + $0x60] sm:$0xff] %vm1782_vm0, %v1730_v18  ;;  %v2562_v18 = vld [vmem:[%s3869_s0 + $0x234] sm:$0xf0] }
 0x10e   :  { %v1421_v25 = vpop.f32.mrf.mxu2  ;;  %v1086_v30 = vpop.f32.mrf.mxu0 }
 0x10f   :  { %v1590_v26 = vpop.f32.mrf.mxu3  ;;  %v1422_v29 = vadd.f32 %v1421_v25, %v1253_v24  ;;  %v1255_v31 = vpop.f32.mrf.mxu1  ;;  %v1087_v34 = vadd.f32 %v2964_v0, %v1086_v30  ;;  %v2126_v24 = vor.u32 %v2561_v13, %v2125_v12  ;;  %v2130_v25 = vor.u32 %v2559_v14, %v2127_v16  ;;  %v2159_v13 = vld [vmem:[%s3869_s0 + $0x270] sm:$0xf0]  ;;  %v2165_v14 = vld [vmem:[%s3869_s0 + $0x268] sm:$0xf]  ;;  %v2568_v16 = vld [vmem:[%s3869_s0 + $0x26c] sm:$0xf] }
 0x110   :  { %v2138_v30 = vor.u32 %v2560_v19, %v2135_v20 }
 0x111   :  { %v1591_v35 = vadd.f32 %v1590_v26, %v1422_v29  ;;  %1125 = vmatmul.bf16.gmra.mxu0 %v2094_v27  ;;  %v1256_v37 = vadd.f32 %v1255_v31, %v1087_v34  ;;  %v2134_v29 = vor.u32 %v2562_v18, %v2133_v17  ;;  %v2167_v17 = vld [vmem:[%s3869_s0 + $0x278] sm:$0xf0] }
 0x112   :  { %1294 = vmatmul.bf16.gmra.mxu1 %v2098_v28 }
 0x113   :  { %v1731_v36 = vmax.f32 %v1591_v35, 0.0  ;;  %1463 = vmatmul.bf16.gmra.mxu2 %v2102_v32 }
 0x114   :  { %1632 = vmatmul.bf16.gmra.mxu3 %v2106_v33 }
 0x115   :  { %1796 = vst.msk [vmem:[%s3870_s3 + $0x68] sm:$0xff] %vm1782_vm0, %v1731_v36 }
 0x116   :  { %v1424_v38 = vpop.f32.mrf.mxu2  ;;  %v1088_v41 = vpop.f32.mrf.mxu0 }
 0x117   :  { %v1593_v39 = vpop.f32.mrf.mxu3  ;;  %v1425_v40 = vadd.f32 %v1424_v38, %v1256_v37  ;;  %v1257_v42 = vpop.f32.mrf.mxu1  ;;  %v1089_v44 = vadd.f32 %v2964_v0, %v1088_v41 }
 0x119   :  { %v1594_v43 = vadd.f32 %v1593_v39, %v1425_v40  ;;  %v1258_v54 = vadd.f32 %v1257_v42, %v1089_v44  ;;  %v2141_v42 = vld [vmem:[%s3869_s0 + $0x240] sm:$0xf]  ;;  %v2563_v44 = vld [vmem:[%s3869_s0 + $0x244] sm:$0xf] }
 0x11b   :  { %v1732_v48 = vmax.f32 %v1594_v43, 0.0  ;;  %v2565_v43 = vld [vmem:[%s3869_s0 + $0x24c] sm:$0xf0] }
 0x11d   :  { %1797 = vst.msk [vmem:[%s3870_s3 + $0x70] sm:$0xff] %vm1782_vm0, %v1732_v48  ;;  %v2566_v48 = vld [vmem:[%s3869_s0 + $0x254] sm:$0xf0] }
 0x11e   :  { %v1426_v55 = vpop.f32.mrf.mxu2  ;;  %v1091_v60 = vpop.f32.mrf.mxu0 }
 0x11f   :  { %v1595_v56 = vpop.f32.mrf.mxu3  ;;  %v1427_v59 = vadd.f32 %v1426_v55, %v1258_v54  ;;  %v1260_v61 = vpop.f32.mrf.mxu1  ;;  %v1092_v1 = vadd.f32 %v2964_v0, %v1091_v60  ;;  %v2142_v54 = vor.u32 %v2565_v43, %v2141_v42  ;;  %v2146_v55 = vor.u32 %v2563_v44, %v2143_v46  ;;  %v2175_v43 = vld [vmem:[%s3869_s0 + $0x290] sm:$0xf0]  ;;  %v2181_v44 = vld [vmem:[%s3869_s0 + $0x288] sm:$0xf]  ;;  %v2572_v46 = vld [vmem:[%s3869_s0 + $0x28c] sm:$0xf] }
 0x120   :  { %v2154_v60 = vor.u32 %v2564_v49, %v2151_v50 }
 0x121   :  { %v1596_v2 = vadd.f32 %v1595_v56, %v1427_v59  ;;  %1130 = vmatmul.bf16.gmra.mxu0 %v2110_v57  ;;  %v1261_v4 = vadd.f32 %v1260_v61, %v1092_v1  ;;  %v2150_v59 = vor.u32 %v2566_v48, %v2149_v47  ;;  %v2183_v47 = vld [vmem:[%s3869_s0 + $0x298] sm:$0xf0] }
 0x122   :  { %1299 = vmatmul.bf16.gmra.mxu1 %v2114_v58 }
 0x123   :  { %v1733_v3 = vmax.f32 %v1596_v2, 0.0  ;;  %1468 = vmatmul.bf16.gmra.mxu2 %v2118_v62 }
 0x124   :  { %1637 = vmatmul.bf16.gmra.mxu3 %v2122_v63 }
 0x125   :  { %1798 = vst.msk [vmem:[%s3870_s3 + $0x78] sm:$0xff] %vm1782_vm0, %v1733_v3 }
 0x126   :  { %v1429_v5 = vpop.f32.mrf.mxu2  ;;  %v1093_v8 = vpop.f32.mrf.mxu0 }
 0x127   :  { %v1598_v6 = vpop.f32.mrf.mxu3  ;;  %v1430_v7 = vadd.f32 %v1429_v5, %v1261_v4  ;;  %v1262_v9 = vpop.f32.mrf.mxu1  ;;  %v1094_v11 = vadd.f32 %v2964_v0, %v1093_v8 }
 0x129   :  { %v1599_v10 = vadd.f32 %v1598_v6, %v1430_v7  ;;  %v1263_v21 = vadd.f32 %v1262_v9, %v1094_v11  ;;  %v2157_v9 = vld [vmem:[%s3869_s0 + $0x260] sm:$0xf]  ;;  %v2567_v11 = vld [vmem:[%s3869_s0 + $0x264] sm:$0xf] }
 0x12b   :  { %v1734_v15 = vmax.f32 %v1599_v10, 0.0  ;;  %v2569_v10 = vld [vmem:[%s3869_s0 + $0x26c] sm:$0xf0] }
 0x12d   :  { %1799 = vst.msk [vmem:[%s3870_s3 + $0x80] sm:$0xff] %vm1782_vm0, %v1734_v15  ;;  %v2570_v15 = vld [vmem:[%s3869_s0 + $0x274] sm:$0xf0] }
 0x12e   :  { %v1431_v22 = vpop.f32.mrf.mxu2  ;;  %v1096_v27 = vpop.f32.mrf.mxu0 }
 0x12f   :  { %v1600_v23 = vpop.f32.mrf.mxu3  ;;  %v1432_v26 = vadd.f32 %v1431_v22, %v1263_v21  ;;  %v1265_v28 = vpop.f32.mrf.mxu1  ;;  %v1097_v31 = vadd.f32 %v2964_v0, %v1096_v27  ;;  %v2158_v21 = vor.u32 %v2569_v10, %v2157_v9  ;;  %v2162_v22 = vor.u32 %v2567_v11, %v2159_v13  ;;  %v2191_v10 = vld [vmem:[%s3869_s0 + $0x2b0] sm:$0xf0]  ;;  %v2197_v11 = vld [vmem:[%s3869_s0 + $0x2a8] sm:$0xf]  ;;  %v2576_v13 = vld [vmem:[%s3869_s0 + $0x2ac] sm:$0xf] }
 0x130   :  { %v2170_v27 = vor.u32 %v2568_v16, %v2167_v17 }
 0x131   :  { %v1601_v32 = vadd.f32 %v1600_v23, %v1432_v26  ;;  %1135 = vmatmul.bf16.gmra.mxu0 %v2126_v24  ;;  %v1266_v34 = vadd.f32 %v1265_v28, %v1097_v31  ;;  %v2166_v26 = vor.u32 %v2570_v15, %v2165_v14  ;;  %v2199_v14 = vld [vmem:[%s3869_s0 + $0x2b8] sm:$0xf0] }
 0x132   :  { %1304 = vmatmul.bf16.gmra.mxu1 %v2130_v25 }
 0x133   :  { %v1735_v33 = vmax.f32 %v1601_v32, 0.0  ;;  %1473 = vmatmul.bf16.gmra.mxu2 %v2134_v29 }
 0x134   :  { %1642 = vmatmul.bf16.gmra.mxu3 %v2138_v30 }
 0x135   :  { %1800 = vst.msk [vmem:[%s3870_s3 + $0x88] sm:$0xff] %vm1782_vm0, %v1735_v33 }
 0x136   :  { %v1434_v35 = vpop.f32.mrf.mxu2  ;;  %v1098_v38 = vpop.f32.mrf.mxu0 }
 0x137   :  { %v1603_v36 = vpop.f32.mrf.mxu3  ;;  %v1435_v37 = vadd.f32 %v1434_v35, %v1266_v34  ;;  %v1267_v39 = vpop.f32.mrf.mxu1  ;;  %v1099_v41 = vadd.f32 %v2964_v0, %v1098_v38 }
 0x139   :  { %v1604_v40 = vadd.f32 %v1603_v36, %v1435_v37  ;;  %v1268_v51 = vadd.f32 %v1267_v39, %v1099_v41  ;;  %v2173_v39 = vld [vmem:[%s3869_s0 + $0x280] sm:$0xf]  ;;  %v2571_v41 = vld [vmem:[%s3869_s0 + $0x284] sm:$0xf] }
 0x13b   :  { %v1736_v45 = vmax.f32 %v1604_v40, 0.0  ;;  %v2573_v40 = vld [vmem:[%s3869_s0 + $0x28c] sm:$0xf0] }
 0x13d   :  { %1801 = vst.msk [vmem:[%s3870_s3 + $0x90] sm:$0xff] %vm1782_vm0, %v1736_v45  ;;  %v2574_v45 = vld [vmem:[%s3869_s0 + $0x294] sm:$0xf0] }
 0x13e   :  { %v1436_v52 = vpop.f32.mrf.mxu2  ;;  %v1101_v57 = vpop.f32.mrf.mxu0 }
 0x13f   :  { %v1605_v53 = vpop.f32.mrf.mxu3  ;;  %v1437_v56 = vadd.f32 %v1436_v52, %v1268_v51  ;;  %v1270_v58 = vpop.f32.mrf.mxu1  ;;  %v1102_v61 = vadd.f32 %v2964_v0, %v1101_v57  ;;  %v2174_v51 = vor.u32 %v2573_v40, %v2173_v39  ;;  %v2178_v52 = vor.u32 %v2571_v41, %v2175_v43  ;;  %v2207_v40 = vld [vmem:[%s3869_s0 + $0x2d0] sm:$0xf0]  ;;  %v2582_v41 = vld [vmem:[%s3869_s0 + $0x2d4] sm:$0xf0]  ;;  %v2215_v43 = vld [vmem:[%s3869_s0 + $0x2d8] sm:$0xf0] }
 0x140   :  { %v2186_v57 = vor.u32 %v2572_v46, %v2183_v47 }
 0x141   :  { %v1606_v62 = vadd.f32 %v1605_v53, %v1437_v56  ;;  %1140 = vmatmul.bf16.gmra.mxu0 %v2142_v54  ;;  %v1271_v1 = vadd.f32 %v1270_v58, %v1102_v61  ;;  %v2182_v56 = vor.u32 %v2574_v45, %v2181_v44 }
 0x142   :  { %1309 = vmatmul.bf16.gmra.mxu1 %v2146_v55 }
 0x143   :  { %v1737_v63 = vmax.f32 %v1606_v62, 0.0  ;;  %1478 = vmatmul.bf16.gmra.mxu2 %v2150_v59 }
 0x144   :  { %1647 = vmatmul.bf16.gmra.mxu3 %v2154_v60 }
 0x145   :  { %1802 = vst.msk [vmem:[%s3870_s3 + $0x98] sm:$0xff] %vm1782_vm0, %v1737_v63 }
 0x146   :  { %v1439_v2 = vpop.f32.mrf.mxu2  ;;  %v1103_v5 = vpop.f32.mrf.mxu0 }
 0x147   :  { %v1608_v3 = vpop.f32.mrf.mxu3  ;;  %v1440_v4 = vadd.f32 %v1439_v2, %v1271_v1  ;;  %v1272_v6 = vpop.f32.mrf.mxu1  ;;  %v1104_v8 = vadd.f32 %v2964_v0, %v1103_v5 }
 0x149   :  { %v1609_v7 = vadd.f32 %v1608_v3, %v1440_v4  ;;  %v1273_v18 = vadd.f32 %v1272_v6, %v1104_v8  ;;  %v2189_v6 = vld [vmem:[%s3869_s0 + $0x2a0] sm:$0xf]  ;;  %v2575_v8 = vld [vmem:[%s3869_s0 + $0x2a4] sm:$0xf] }
 0x14b   :  { %v1738_v12 = vmax.f32 %v1609_v7, 0.0  ;;  %v2577_v7 = vld [vmem:[%s3869_s0 + $0x2ac] sm:$0xf0] }
 0x14d   :  { %1803 = vst.msk [vmem:[%s3870_s3 + $0xa0] sm:$0xff] %vm1782_vm0, %v1738_v12  ;;  %v2578_v12 = vld [vmem:[%s3869_s0 + $0x2b4] sm:$0xf0] }
 0x14e   :  { %v1441_v19 = vpop.f32.mrf.mxu2  ;;  %v1106_v24 = vpop.f32.mrf.mxu0 }
 0x14f   :  { %v1610_v20 = vpop.f32.mrf.mxu3  ;;  %v1442_v23 = vadd.f32 %v1441_v19, %v1273_v18  ;;  %v1275_v25 = vpop.f32.mrf.mxu1  ;;  %v1107_v28 = vadd.f32 %v2964_v0, %v1106_v24  ;;  %v2190_v18 = vor.u32 %v2577_v7, %v2189_v6  ;;  %v2194_v19 = vor.u32 %v2575_v8, %v2191_v10  ;;  %v2223_v7 = vld [vmem:[%s3869_s0 + $0x2f0] sm:$0xf0]  ;;  %v2229_v8 = vld [vmem:[%s3869_s0 + $0x2e8] sm:$0xf]  ;;  %v2584_v10 = vld [vmem:[%s3869_s0 + $0x2ec] sm:$0xf] }
 0x150   :  { %v2202_v24 = vor.u32 %v2576_v13, %v2199_v14 }
 0x151   :  { %v1611_v29 = vadd.f32 %v1610_v20, %v1442_v23  ;;  %1145 = vmatmul.bf16.gmra.mxu0 %v2158_v21  ;;  %v1276_v31 = vadd.f32 %v1275_v25, %v1107_v28  ;;  %v2198_v23 = vor.u32 %v2578_v12, %v2197_v11  ;;  %v2231_v11 = vld [vmem:[%s3869_s0 + $0x2f8] sm:$0xf0] }
 0x152   :  { %1314 = vmatmul.bf16.gmra.mxu1 %v2162_v22 }
 0x153   :  { %v1739_v30 = vmax.f32 %v1611_v29, 0.0  ;;  %1483 = vmatmul.bf16.gmra.mxu2 %v2166_v26 }
 0x154   :  { %1652 = vmatmul.bf16.gmra.mxu3 %v2170_v27 }
 0x155   :  { %1804 = vst.msk [vmem:[%s3870_s3 + $0xa8] sm:$0xff] %vm1782_vm0, %v1739_v30 }
 0x156   :  { %v1444_v32 = vpop.f32.mrf.mxu2  ;;  %v1108_v35 = vpop.f32.mrf.mxu0 }
 0x157   :  { %v1613_v33 = vpop.f32.mrf.mxu3  ;;  %v1445_v34 = vadd.f32 %v1444_v32, %v1276_v31  ;;  %v1277_v36 = vpop.f32.mrf.mxu1  ;;  %v1109_v38 = vadd.f32 %v2964_v0, %v1108_v35 }
 0x159   :  { %v1614_v37 = vadd.f32 %v1613_v33, %v1445_v34  ;;  %v1278_v48 = vadd.f32 %v1277_v36, %v1109_v38  ;;  %v2205_v36 = vld [vmem:[%s3869_s0 + $0x2c0] sm:$0xf]  ;;  %v2579_v38 = vld [vmem:[%s3869_s0 + $0x2c4] sm:$0xf] }
 0x15b   :  { %v1740_v42 = vmax.f32 %v1614_v37, 0.0  ;;  %v2581_v37 = vld [vmem:[%s3869_s0 + $0x2cc] sm:$0xf0] }
 0x15c   :  { %v2206_v47 = vor.u32 %v2581_v37, %v2205_v36  ;;  %v2239_v37 = vld [vmem:[%s3869_s0 + $0x310] sm:$0xf0] }
 0x15d   :  { %1805 = vst.msk [vmem:[%s3870_s3 + $0xb0] sm:$0xff] %vm1782_vm0, %v1740_v42  ;;  %v2580_v42 = vld [vmem:[%s3869_s0 + $0x2cc] sm:$0xf] }
 0x15e   :  { %v1446_v49 = vpop.f32.mrf.mxu2  ;;  %v1111_v54 = vpop.f32.mrf.mxu0 }
 0x15f   :  { %v1615_v50 = vpop.f32.mrf.mxu3  ;;  %v1447_v53 = vadd.f32 %v1446_v49, %v1278_v48  ;;  %v1280_v55 = vpop.f32.mrf.mxu1  ;;  %v1112_v58 = vadd.f32 %v2964_v0, %v1111_v54  ;;  %v2210_v48 = vor.u32 %v2579_v38, %v2207_v40  ;;  %v3465_v54 = vld [vmem:[%s3868_s2] ss:$0 sm:$0xff]  ;;  %v2245_v38 = vld [vmem:[%s3869_s0 + $0x308] sm:$0xf]  ;;  %v2588_v40 = vld [vmem:[%s3869_s0 + $0x30c] sm:$0xf] }
 0x161   :  { %v1616_v59 = vadd.f32 %v1615_v50, %v1447_v53  ;;  %1150 = vmatmul.bf16.gmra.mxu0 %v2174_v51  ;;  %v1281_v61 = vadd.f32 %v1280_v55, %v1112_v58  ;;  %v2218_v53 = vor.u32 %v2580_v42, %v2215_v43 }
 0x162   :  { %1319 = vmatmul.bf16.gmra.mxu1 %v2178_v52 }
 0x163   :  { %v1741_v60 = vmax.f32 %v1616_v59, 0.0  ;;  %1488 = vmatmul.bf16.gmra.mxu2 %v2182_v56 }
 0x164   :  { %1657 = vmatmul.bf16.gmra.mxu3 %v2186_v57 }
 0x165   :  { %1806 = vst.msk [vmem:[%s3870_s3 + $0xb8] sm:$0xff] %vm1782_vm0, %v1741_v60 }
 0x166   :  { %v1449_v62 = vpop.f32.mrf.mxu2  ;;  %v1113_v2 = vpop.f32.mrf.mxu0 }
 0x167   :  { %v1618_v63 = vpop.f32.mrf.mxu3  ;;  %v1450_v1 = vadd.f32 %v1449_v62, %v1281_v61  ;;  %v1282_v3 = vpop.f32.mrf.mxu1  ;;  %v1114_v5 = vadd.f32 %v2964_v0, %v1113_v2 }
 0x169   :  { %v1619_v4 = vadd.f32 %v1618_v63, %v1450_v1  ;;  %v1283_v15 = vadd.f32 %v1282_v3, %v1114_v5  ;;  %v2221_v3 = vld [vmem:[%s3869_s0 + $0x2e0] sm:$0xf]  ;;  %v2583_v5 = vld [vmem:[%s3869_s0 + $0x2e4] sm:$0xf] }
 0x16b   :  { %v1742_v9 = vmax.f32 %v1619_v4, 0.0  ;;  %v2585_v4 = vld [vmem:[%s3869_s0 + $0x2ec] sm:$0xf0] }
 0x16d   :  { %1807 = vst.msk [vmem:[%s3870_s3 + $0xc0] sm:$0xff] %vm1782_vm0, %v1742_v9  ;;  %v2586_v9 = vld [vmem:[%s3869_s0 + $0x2f4] sm:$0xf0] }
 0x16e   :  { %v1451_v16 = vpop.f32.mrf.mxu2  ;;  %v1116_v21 = vpop.f32.mrf.mxu0 }
 0x16f   :  { %v1620_v17 = vpop.f32.mrf.mxu3  ;;  %v1452_v20 = vadd.f32 %v1451_v16, %v1283_v15  ;;  %v1285_v22 = vpop.f32.mrf.mxu1  ;;  %v1117_v25 = vadd.f32 %v2964_v0, %v1116_v21  ;;  %v2222_v15 = vor.u32 %v2585_v4, %v2221_v3  ;;  %v2226_v16 = vor.u32 %v2583_v5, %v2223_v7  ;;  %v2255_v4 = vld [vmem:[%s3869_s0 + $0x330] sm:$0xf0]  ;;  %v2261_v5 = vld [vmem:[%s3869_s0 + $0x328] sm:$0xf]  ;;  %v2592_v7 = vld [vmem:[%s3869_s0 + $0x32c] sm:$0xf] }
 0x170   :  { %v2234_v21 = vor.u32 %v2584_v10, %v2231_v11 }
 0x171   :  { %v1621_v26 = vadd.f32 %v1620_v17, %v1452_v20  ;;  %1155 = vmatmul.bf16.gmra.mxu0 %v2190_v18  ;;  %v1286_v28 = vadd.f32 %v1285_v22, %v1117_v25  ;;  %v2230_v20 = vor.u32 %v2586_v9, %v2229_v8  ;;  %v2263_v8 = vld [vmem:[%s3869_s0 + $0x338] sm:$0xf0] }
 0x172   :  { %1324 = vmatmul.bf16.gmra.mxu1 %v2194_v19 }
 0x173   :  { %v1743_v27 = vmax.f32 %v1621_v26, 0.0  ;;  %1493 = vmatmul.bf16.gmra.mxu2 %v2198_v23 }
 0x174   :  { %1662 = vmatmul.bf16.gmra.mxu3 %v2202_v24 }
 0x175   :  { %1808 = vst.msk [vmem:[%s3870_s3 + $0xc8] sm:$0xff] %vm1782_vm0, %v1743_v27 }
 0x176   :  { %v1454_v29 = vpop.f32.mrf.mxu2  ;;  %v1118_v32 = vpop.f32.mrf.mxu0 }
 0x177   :  { %v1623_v30 = vpop.f32.mrf.mxu3  ;;  %v1455_v31 = vadd.f32 %v1454_v29, %v1286_v28  ;;  %v1287_v33 = vpop.f32.mrf.mxu1  ;;  %v1119_v35 = vadd.f32 %v2964_v0, %v1118_v32  ;;  %v2213_v0 = vld [vmem:[%s3869_s0 + $0x2c8] sm:$0xf] }
 0x178   :  { %v2214_v52 = vor.u32 %v2582_v41, %v2213_v0  ;;  %v2247_v0 = vld [vmem:[%s3869_s0 + $0x318] sm:$0xf0] }
 0x179   :  { %v1624_v34 = vadd.f32 %v1623_v30, %v1455_v31  ;;  %v1288_v44 = vadd.f32 %v1287_v33, %v1119_v35  ;;  %v2237_v33 = vld [vmem:[%s3869_s0 + $0x300] sm:$0xf]  ;;  %v2587_v35 = vld [vmem:[%s3869_s0 + $0x304] sm:$0xf] }
 0x17b   :  { %v1744_v39 = vmax.f32 %v1624_v34, 0.0  ;;  %v2589_v34 = vld [vmem:[%s3869_s0 + $0x30c] sm:$0xf0] }
 0x17d   :  { %1809 = vst.msk [vmem:[%s3870_s3 + $0xd0] sm:$0xff] %vm1782_vm0, %v1744_v39  ;;  %v2590_v39 = vld [vmem:[%s3869_s0 + $0x314] sm:$0xf0] }
 0x17e   :  { %v1456_v45 = vpop.f32.mrf.mxu2  ;;  %v1121_v50 = vpop.f32.mrf.mxu0 }
 0x17f   :  { %v1625_v46 = vpop.f32.mrf.mxu3  ;;  %v1457_v49 = vadd.f32 %v1456_v45, %v1288_v44  ;;  %v1290_v51 = vpop.f32.mrf.mxu1  ;;  %v1122_v55 = vadd.f32 %v3465_v54, %v1121_v50  ;;  %v2238_v44 = vor.u32 %v2589_v34, %v2237_v33  ;;  %v2242_v45 = vor.u32 %v2587_v35, %v2239_v37  ;;  %v2271_v34 = vld [vmem:[%s3869_s0 + $0x350] sm:$0xf0]  ;;  %v2277_v35 = vld [vmem:[%s3869_s0 + $0x348] sm:$0xf]  ;;  %v2596_v37 = vld [vmem:[%s3869_s0 + $0x34c] sm:$0xf] }
 0x180   :  { %v2250_v50 = vor.u32 %v2588_v40, %v2247_v0 }
 0x181   :  { %v1626_v56 = vadd.f32 %v1625_v46, %v1457_v49  ;;  %1160 = vmatmul.bf16.gmra.mxu0 %v2206_v47  ;;  %v1291_v58 = vadd.f32 %v1290_v51, %v1122_v55  ;;  %v2246_v49 = vor.u32 %v2590_v39, %v2245_v38  ;;  %v2279_v38 = vld [vmem:[%s3869_s0 + $0x358] sm:$0xf0] }
 0x182   :  { %1329 = vmatmul.bf16.gmra.mxu1 %v2210_v48 }
 0x183   :  { %v1745_v57 = vmax.f32 %v1626_v56, 0.0  ;;  %1498 = vmatmul.bf16.gmra.mxu2 %v2214_v52 }
 0x184   :  { %1667 = vmatmul.bf16.gmra.mxu3 %v2218_v53 }
 0x185   :  { %1810 = vst.msk [vmem:[%s3870_s3 + $0xd8] sm:$0xff] %vm1782_vm0, %v1745_v57 }
 0x186   :  { %v1459_v59 = vpop.f32.mrf.mxu2  ;;  %v1123_v62 = vpop.f32.mrf.mxu0 }
 0x187   :  { %v1628_v60 = vpop.f32.mrf.mxu3  ;;  %v1460_v61 = vadd.f32 %v1459_v59, %v1291_v58  ;;  %v1292_v63 = vpop.f32.mrf.mxu1  ;;  %v1124_v2 = vadd.f32 %v3465_v54, %v1123_v62 }
 0x189   :  { %v1629_v1 = vadd.f32 %v1628_v60, %v1460_v61  ;;  %v1293_v12 = vadd.f32 %v1292_v63, %v1124_v2  ;;  %v2253_v63 = vld [vmem:[%s3869_s0 + $0x320] sm:$0xf]  ;;  %v2591_v2 = vld [vmem:[%s3869_s0 + $0x324] sm:$0xf] }
 0x18b   :  { %v1746_v6 = vmax.f32 %v1629_v1, 0.0  ;;  %v2593_v1 = vld [vmem:[%s3869_s0 + $0x32c] sm:$0xf0] }
 0x18d   :  { %1811 = vst.msk [vmem:[%s3870_s3 + $0xe0] sm:$0xff] %vm1782_vm0, %v1746_v6  ;;  %v2594_v6 = vld [vmem:[%s3869_s0 + $0x334] sm:$0xf0] }
 0x18e   :  { %v1461_v13 = vpop.f32.mrf.mxu2  ;;  %v1126_v18 = vpop.f32.mrf.mxu0 }
 0x18f   :  { %v1630_v14 = vpop.f32.mrf.mxu3  ;;  %v1462_v17 = vadd.f32 %v1461_v13, %v1293_v12  ;;  %v1295_v19 = vpop.f32.mrf.mxu1  ;;  %v1127_v22 = vadd.f32 %v3465_v54, %v1126_v18  ;;  %v2254_v12 = vor.u32 %v2593_v1, %v2253_v63  ;;  %v2258_v13 = vor.u32 %v2591_v2, %v2255_v4  ;;  %v2287_v1 = vld [vmem:[%s3869_s0 + $0x370] sm:$0xf0]  ;;  %v2293_v2 = vld [vmem:[%s3869_s0 + $0x368] sm:$0xf]  ;;  %v2600_v4 = vld [vmem:[%s3869_s0 + $0x36c] sm:$0xf] }
 0x190   :  { %v2266_v18 = vor.u32 %v2592_v7, %v2263_v8 }
 0x191   :  { %v1631_v23 = vadd.f32 %v1630_v14, %v1462_v17  ;;  %1165 = vmatmul.bf16.gmra.mxu0 %v2222_v15  ;;  %v1296_v25 = vadd.f32 %v1295_v19, %v1127_v22  ;;  %v2262_v17 = vor.u32 %v2594_v6, %v2261_v5  ;;  %v2295_v5 = vld [vmem:[%s3869_s0 + $0x378] sm:$0xf0] }
 0x192   :  { %1334 = vmatmul.bf16.gmra.mxu1 %v2226_v16 }
 0x193   :  { %v1747_v24 = vmax.f32 %v1631_v23, 0.0  ;;  %1503 = vmatmul.bf16.gmra.mxu2 %v2230_v20 }
 0x194   :  { %1672 = vmatmul.bf16.gmra.mxu3 %v2234_v21 }
 0x195   :  { %1812 = vst.msk [vmem:[%s3870_s3 + $0xe8] sm:$0xff] %vm1782_vm0, %v1747_v24 }
 0x196   :  { %v1464_v26 = vpop.f32.mrf.mxu2  ;;  %v1128_v29 = vpop.f32.mrf.mxu0 }
 0x197   :  { %v1633_v27 = vpop.f32.mrf.mxu3  ;;  %v1465_v28 = vadd.f32 %v1464_v26, %v1296_v25  ;;  %v1297_v30 = vpop.f32.mrf.mxu1  ;;  %v1129_v32 = vadd.f32 %v3465_v54, %v1128_v29 }
 0x199   :  { %v1634_v31 = vadd.f32 %v1633_v27, %v1465_v28  ;;  %v1298_v41 = vadd.f32 %v1297_v30, %v1129_v32  ;;  %v2269_v30 = vld [vmem:[%s3869_s0 + $0x340] sm:$0xf]  ;;  %v2595_v32 = vld [vmem:[%s3869_s0 + $0x344] sm:$0xf] }
 0x19b   :  { %v1748_v36 = vmax.f32 %v1634_v31, 0.0  ;;  %v2597_v31 = vld [vmem:[%s3869_s0 + $0x34c] sm:$0xf0] }
 0x19d   :  { %1813 = vst.msk [vmem:[%s3870_s3 + $0xf0] sm:$0xff] %vm1782_vm0, %v1748_v36  ;;  %v2598_v36 = vld [vmem:[%s3869_s0 + $0x354] sm:$0xf0] }
 0x19e   :  { %v1466_v42 = vpop.f32.mrf.mxu2  ;;  %v1131_v47 = vpop.f32.mrf.mxu0 }
 0x19f   :  { %v1635_v43 = vpop.f32.mrf.mxu3  ;;  %v1467_v46 = vadd.f32 %v1466_v42, %v1298_v41  ;;  %v1300_v48 = vpop.f32.mrf.mxu1  ;;  %v1132_v51 = vadd.f32 %v3465_v54, %v1131_v47  ;;  %v2270_v41 = vor.u32 %v2597_v31, %v2269_v30  ;;  %v2274_v42 = vor.u32 %v2595_v32, %v2271_v34  ;;  %v2303_v31 = vld [vmem:[%s3869_s0 + $0x390] sm:$0xf0]  ;;  %v2309_v32 = vld [vmem:[%s3869_s0 + $0x388] sm:$0xf]  ;;  %v2604_v34 = vld [vmem:[%s3869_s0 + $0x38c] sm:$0xf] }
 0x1a0   :  { %v2282_v47 = vor.u32 %v2596_v37, %v2279_v38 }
 0x1a1   :  { %v1636_v52 = vadd.f32 %v1635_v43, %v1467_v46  ;;  %1170 = vmatmul.bf16.gmra.mxu0 %v2238_v44  ;;  %v1301_v55 = vadd.f32 %v1300_v48, %v1132_v51  ;;  %v2278_v46 = vor.u32 %v2598_v36, %v2277_v35  ;;  %v2311_v35 = vld [vmem:[%s3869_s0 + $0x398] sm:$0xf0] }
 0x1a2   :  { %1339 = vmatmul.bf16.gmra.mxu1 %v2242_v45 }
 0x1a3   :  { %v1749_v53 = vmax.f32 %v1636_v52, 0.0  ;;  %1508 = vmatmul.bf16.gmra.mxu2 %v2246_v49 }
 0x1a4   :  { %1677 = vmatmul.bf16.gmra.mxu3 %v2250_v50 }
 0x1a5   :  { %1814 = vst.msk [vmem:[%s3870_s3 + $0xf8] sm:$0xff] %vm1782_vm0, %v1749_v53 }
 0x1a6   :  { %v1469_v56 = vpop.f32.mrf.mxu2  ;;  %v1133_v59 = vpop.f32.mrf.mxu0 }
 0x1a7   :  { %v1638_v57 = vpop.f32.mrf.mxu3  ;;  %v1470_v58 = vadd.f32 %v1469_v56, %v1301_v55  ;;  %v1302_v60 = vpop.f32.mrf.mxu1  ;;  %v1134_v62 = vadd.f32 %v3465_v54, %v1133_v59 }
 0x1a9   :  { %v1639_v61 = vadd.f32 %v1638_v57, %v1470_v58  ;;  %v1303_v9 = vadd.f32 %v1302_v60, %v1134_v62  ;;  %v2285_v60 = vld [vmem:[%s3869_s0 + $0x360] sm:$0xf]  ;;  %v2599_v62 = vld [vmem:[%s3869_s0 + $0x364] sm:$0xf] }
 0x1ab   :  { %v1750_v3 = vmax.f32 %v1639_v61, 0.0  ;;  %v2601_v61 = vld [vmem:[%s3869_s0 + $0x36c] sm:$0xf0] }
 0x1ad   :  { %1815 = vst.msk [vmem:[%s3870_s3 + $0x100] sm:$0xff] %vm1782_vm0, %v1750_v3  ;;  %v2602_v3 = vld [vmem:[%s3869_s0 + $0x374] sm:$0xf0] }
 0x1ae   :  { %v1471_v10 = vpop.f32.mrf.mxu2  ;;  %v1136_v15 = vpop.f32.mrf.mxu0 }
 0x1af   :  { %v1640_v11 = vpop.f32.mrf.mxu3  ;;  %v1472_v14 = vadd.f32 %v1471_v10, %v1303_v9  ;;  %v1305_v16 = vpop.f32.mrf.mxu1  ;;  %v1137_v19 = vadd.f32 %v3465_v54, %v1136_v15  ;;  %v2286_v9 = vor.u32 %v2601_v61, %v2285_v60  ;;  %v2290_v10 = vor.u32 %v2599_v62, %v2287_v1  ;;  %v2319_v61 = vld [vmem:[%s3869_s0 + $0x3b0] sm:$0xf0]  ;;  %v2325_v62 = vld [vmem:[%s3869_s0 + $0x3a8] sm:$0xf]  ;;  %v2608_v1 = vld [vmem:[%s3869_s0 + $0x3ac] sm:$0xf] }
 0x1b0   :  { %v2298_v15 = vor.u32 %v2600_v4, %v2295_v5 }
 0x1b1   :  { %v1641_v20 = vadd.f32 %v1640_v11, %v1472_v14  ;;  %1175 = vmatmul.bf16.gmra.mxu0 %v2254_v12  ;;  %v1306_v22 = vadd.f32 %v1305_v16, %v1137_v19  ;;  %v2294_v14 = vor.u32 %v2602_v3, %v2293_v2  ;;  %v2327_v2 = vld [vmem:[%s3869_s0 + $0x3b8] sm:$0xf0] }
 0x1b2   :  { %1344 = vmatmul.bf16.gmra.mxu1 %v2258_v13 }
 0x1b3   :  { %v1751_v21 = vmax.f32 %v1641_v20, 0.0  ;;  %1513 = vmatmul.bf16.gmra.mxu2 %v2262_v17 }
 0x1b4   :  { %1682 = vmatmul.bf16.gmra.mxu3 %v2266_v18 }
 0x1b5   :  { %1816 = vst.msk [vmem:[%s3870_s3 + $0x108] sm:$0xff] %vm1782_vm0, %v1751_v21 }
 0x1b6   :  { %v1474_v23 = vpop.f32.mrf.mxu2  ;;  %v1138_v26 = vpop.f32.mrf.mxu0 }
 0x1b7   :  { %v1643_v24 = vpop.f32.mrf.mxu3  ;;  %v1475_v25 = vadd.f32 %v1474_v23, %v1306_v22  ;;  %v1307_v27 = vpop.f32.mrf.mxu1  ;;  %v1139_v29 = vadd.f32 %v3465_v54, %v1138_v26 }
 0x1b9   :  { %v1644_v28 = vadd.f32 %v1643_v24, %v1475_v25  ;;  %v1308_v39 = vadd.f32 %v1307_v27, %v1139_v29  ;;  %v2301_v27 = vld [vmem:[%s3869_s0 + $0x380] sm:$0xf]  ;;  %v2603_v29 = vld [vmem:[%s3869_s0 + $0x384] sm:$0xf] }
 0x1bb   :  { %v1752_v33 = vmax.f32 %v1644_v28, 0.0  ;;  %v2605_v28 = vld [vmem:[%s3869_s0 + $0x38c] sm:$0xf0] }
 0x1bd   :  { %1817 = vst.msk [vmem:[%s3870_s3 + $0x110] sm:$0xff] %vm1782_vm0, %v1752_v33  ;;  %v2606_v33 = vld [vmem:[%s3869_s0 + $0x394] sm:$0xf0] }
 0x1be   :  { %v1476_v40 = vpop.f32.mrf.mxu2  ;;  %v1141_v44 = vpop.f32.mrf.mxu0 }
 0x1bf   :  { %v1645_v0 = vpop.f32.mrf.mxu3  ;;  %v1477_v43 = vadd.f32 %v1476_v40, %v1308_v39  ;;  %v1310_v45 = vpop.f32.mrf.mxu1  ;;  %v1142_v48 = vadd.f32 %v3465_v54, %v1141_v44  ;;  %v2302_v39 = vor.u32 %v2605_v28, %v2301_v27  ;;  %v2306_v40 = vor.u32 %v2603_v29, %v2303_v31  ;;  %v2335_v28 = vld [vmem:[%s3869_s0 + $0x3d0] sm:$0xf0]  ;;  %v2341_v29 = vld [vmem:[%s3869_s0 + $0x3c8] sm:$0xf]  ;;  %v2612_v31 = vld [vmem:[%s3869_s0 + $0x3cc] sm:$0xf] }
 0x1c0   :  { %v2314_v44 = vor.u32 %v2604_v34, %v2311_v35 }
 0x1c1   :  { %v1646_v49 = vadd.f32 %v1645_v0, %v1477_v43  ;;  %1180 = vmatmul.bf16.gmra.mxu0 %v2270_v41  ;;  %v1311_v51 = vadd.f32 %v1310_v45, %v1142_v48  ;;  %v2310_v43 = vor.u32 %v2606_v33, %v2309_v32  ;;  %v2343_v32 = vld [vmem:[%s3869_s0 + $0x3d8] sm:$0xf0] }
 0x1c2   :  { %1349 = vmatmul.bf16.gmra.mxu1 %v2274_v42 }
 0x1c3   :  { %v1753_v50 = vmax.f32 %v1646_v49, 0.0  ;;  %1518 = vmatmul.bf16.gmra.mxu2 %v2278_v46 }
 0x1c4   :  { %1687 = vmatmul.bf16.gmra.mxu3 %v2282_v47 }
 0x1c5   :  { %1818 = vst.msk [vmem:[%s3870_s3 + $0x118] sm:$0xff] %vm1782_vm0, %v1753_v50 }
 0x1c6   :  { %v1479_v52 = vpop.f32.mrf.mxu2  ;;  %v1143_v56 = vpop.f32.mrf.mxu0 }
 0x1c7   :  { %v1648_v53 = vpop.f32.mrf.mxu3  ;;  %v1480_v55 = vadd.f32 %v1479_v52, %v1311_v51  ;;  %v1312_v57 = vpop.f32.mrf.mxu1  ;;  %v1144_v59 = vadd.f32 %v3465_v54, %v1143_v56 }
 0x1c9   :  { %v1649_v58 = vadd.f32 %v1648_v53, %v1480_v55  ;;  %v1313_v6 = vadd.f32 %v1312_v57, %v1144_v59  ;;  %v2317_v57 = vld [vmem:[%s3869_s0 + $0x3a0] sm:$0xf]  ;;  %v2607_v59 = vld [vmem:[%s3869_s0 + $0x3a4] sm:$0xf] }
 0x1cb   :  { %v1754_v63 = vmax.f32 %v1649_v58, 0.0  ;;  %v2609_v58 = vld [vmem:[%s3869_s0 + $0x3ac] sm:$0xf0] }
 0x1cd   :  { %1819 = vst.msk [vmem:[%s3870_s3 + $0x120] sm:$0xff] %vm1782_vm0, %v1754_v63  ;;  %v2610_v63 = vld [vmem:[%s3869_s0 + $0x3b4] sm:$0xf0] }
 0x1ce   :  { %v1481_v7 = vpop.f32.mrf.mxu2  ;;  %v1146_v12 = vpop.f32.mrf.mxu0 }
 0x1cf   :  { %v1650_v8 = vpop.f32.mrf.mxu3  ;;  %v1482_v11 = vadd.f32 %v1481_v7, %v1313_v6  ;;  %v1315_v13 = vpop.f32.mrf.mxu1  ;;  %v1147_v16 = vadd.f32 %v3465_v54, %v1146_v12  ;;  %v2318_v6 = vor.u32 %v2609_v58, %v2317_v57  ;;  %v2322_v7 = vor.u32 %v2607_v59, %v2319_v61  ;;  %v2351_v58 = vld [vmem:[%s3869_s0 + $0x3f0] sm:$0xf0]  ;;  %v2357_v59 = vld [vmem:[%s3869_s0 + $0x3e8] sm:$0xf]  ;;  %v2616_v61 = vld [vmem:[%s3869_s0 + $0x3ec] sm:$0xf] }
 0x1d0   :  { %v2330_v12 = vor.u32 %v2608_v1, %v2327_v2 }
 0x1d1   :  { %v1651_v17 = vadd.f32 %v1650_v8, %v1482_v11  ;;  %1185 = vmatmul.bf16.gmra.mxu0 %v2286_v9  ;;  %v1316_v19 = vadd.f32 %v1315_v13, %v1147_v16  ;;  %v2326_v11 = vor.u32 %v2610_v63, %v2325_v62  ;;  %v2359_v62 = vld [vmem:[%s3869_s0 + $0x3f8] sm:$0xf0] }
 0x1d2   :  { %1354 = vmatmul.bf16.gmra.mxu1 %v2290_v10 }
 0x1d3   :  { %v1755_v18 = vmax.f32 %v1651_v17, 0.0  ;;  %1523 = vmatmul.bf16.gmra.mxu2 %v2294_v14 }
 0x1d4   :  { %1692 = vmatmul.bf16.gmra.mxu3 %v2298_v15 }
 0x1d5   :  { %1820 = vst.msk [vmem:[%s3870_s3 + $0x128] sm:$0xff] %vm1782_vm0, %v1755_v18 }
 0x1d6   :  { %v1484_v20 = vpop.f32.mrf.mxu2  ;;  %v1148_v23 = vpop.f32.mrf.mxu0 }
 0x1d7   :  { %v1653_v21 = vpop.f32.mrf.mxu3  ;;  %v1485_v22 = vadd.f32 %v1484_v20, %v1316_v19  ;;  %v1317_v24 = vpop.f32.mrf.mxu1  ;;  %v1149_v26 = vadd.f32 %v3465_v54, %v1148_v23 }
 0x1d9   :  { %v1654_v25 = vadd.f32 %v1653_v21, %v1485_v22  ;;  %v1318_v36 = vadd.f32 %v1317_v24, %v1149_v26  ;;  %v2333_v24 = vld [vmem:[%s3869_s0 + $0x3c0] sm:$0xf]  ;;  %v2611_v26 = vld [vmem:[%s3869_s0 + $0x3c4] sm:$0xf] }
 0x1db   :  { %v1756_v30 = vmax.f32 %v1654_v25, 0.0  ;;  %v2613_v25 = vld [vmem:[%s3869_s0 + $0x3cc] sm:$0xf0] }
 0x1dd   :  { %1821 = vst.msk [vmem:[%s3870_s3 + $0x130] sm:$0xff] %vm1782_vm0, %v1756_v30  ;;  %v2614_v30 = vld [vmem:[%s3869_s0 + $0x3d4] sm:$0xf0] }
 0x1de   :  { %v1486_v37 = vpop.f32.mrf.mxu2  ;;  %v1151_v41 = vpop.f32.mrf.mxu0 }
 0x1df   :  { %v1655_v38 = vpop.f32.mrf.mxu3  ;;  %v1487_v0 = vadd.f32 %v1486_v37, %v1318_v36  ;;  %v1320_v42 = vpop.f32.mrf.mxu1  ;;  %v1152_v45 = vadd.f32 %v3465_v54, %v1151_v41  ;;  %v2334_v36 = vor.u32 %v2613_v25, %v2333_v24  ;;  %v2338_v37 = vor.u32 %v2611_v26, %v2335_v28 }
 0x1e0   :  { %v2346_v41 = vor.u32 %v2612_v31, %v2343_v32 }
 0x1e1   :  { %v1656_v46 = vadd.f32 %v1655_v38, %v1487_v0  ;;  %1190 = vmatmul.bf16.gmra.mxu0 %v2302_v39  ;;  %v1321_v48 = vadd.f32 %v1320_v42, %v1152_v45  ;;  %v2342_v0 = vor.u32 %v2614_v30, %v2341_v29 }
 0x1e2   :  { %1359 = vmatmul.bf16.gmra.mxu1 %v2306_v40 }
 0x1e3   :  { %v1757_v47 = vmax.f32 %v1656_v46, 0.0  ;;  %1528 = vmatmul.bf16.gmra.mxu2 %v2310_v43 }
 0x1e4   :  { %1697 = vmatmul.bf16.gmra.mxu3 %v2314_v44 }
 0x1e5   :  { %1822 = vst.msk [vmem:[%s3870_s3 + $0x138] sm:$0xff] %vm1782_vm0, %v1757_v47 }
 0x1e6   :  { %v1489_v49 = vpop.f32.mrf.mxu2  ;;  %v1153_v52 = vpop.f32.mrf.mxu0 }
 0x1e7   :  { %v1658_v50 = vpop.f32.mrf.mxu3  ;;  %v1490_v51 = vadd.f32 %v1489_v49, %v1321_v48  ;;  %v1322_v53 = vpop.f32.mrf.mxu1  ;;  %v1154_v56 = vadd.f32 %v3465_v54, %v1153_v52 }
 0x1e9   :  { %v1659_v55 = vadd.f32 %v1658_v50, %v1490_v51  ;;  %v1323_v3 = vadd.f32 %v1322_v53, %v1154_v56  ;;  %v2349_v53 = vld [vmem:[%s3869_s0 + $0x3e0] sm:$0xf]  ;;  %v2615_v56 = vld [vmem:[%s3869_s0 + $0x3e4] sm:$0xf] }
 0x1eb   :  { %v1758_v60 = vmax.f32 %v1659_v55, 0.0  ;;  %v2617_v55 = vld [vmem:[%s3869_s0 + $0x3ec] sm:$0xf0] }
 0x1ed   :  { %1823 = vst.msk [vmem:[%s3870_s3 + $0x140] sm:$0xff] %vm1782_vm0, %v1758_v60  ;;  %v2618_v60 = vld [vmem:[%s3869_s0 + $0x3f4] sm:$0xf0] }
 0x1ee   :  { %v1491_v4 = vpop.f32.mrf.mxu2  ;;  %v1156_v9 = vpop.f32.mrf.mxu0 }
 0x1ef   :  { %v1660_v5 = vpop.f32.mrf.mxu3  ;;  %v1492_v8 = vadd.f32 %v1491_v4, %v1323_v3  ;;  %v1325_v10 = vpop.f32.mrf.mxu1  ;;  %v1157_v13 = vadd.f32 %v3465_v54, %v1156_v9  ;;  %v2350_v3 = vor.u32 %v2617_v55, %v2349_v53  ;;  %v2354_v4 = vor.u32 %v2615_v56, %v2351_v58 }
 0x1f0   :  { %v2362_v9 = vor.u32 %v2616_v61, %v2359_v62 }
 0x1f1   :  { %v1661_v14 = vadd.f32 %v1660_v5, %v1492_v8  ;;  %1195 = vmatmul.bf16.gmra.mxu0 %v2318_v6  ;;  %v1326_v16 = vadd.f32 %v1325_v10, %v1157_v13  ;;  %v2358_v8 = vor.u32 %v2618_v60, %v2357_v59 }
 0x1f2   :  { %1364 = vmatmul.bf16.gmra.mxu1 %v2322_v7 }
 0x1f3   :  { %v1759_v15 = vmax.f32 %v1661_v14, 0.0  ;;  %1533 = vmatmul.bf16.gmra.mxu2 %v2326_v11 }
 0x1f4   :  { %1702 = vmatmul.bf16.gmra.mxu3 %v2330_v12 }
 0x1f5   :  { %1824 = vst.msk [vmem:[%s3870_s3 + $0x148] sm:$0xff] %vm1782_vm0, %v1759_v15 }
 0x1f6   :  { %v1494_v17 = vpop.f32.mrf.mxu2  ;;  %v1158_v20 = vpop.f32.mrf.mxu0 }
 0x1f7   :  { %v1663_v18 = vpop.f32.mrf.mxu3  ;;  %v1495_v19 = vadd.f32 %v1494_v17, %v1326_v16  ;;  %v1327_v21 = vpop.f32.mrf.mxu1  ;;  %v1159_v23 = vadd.f32 %v3465_v54, %v1158_v20 }
 0x1f9   :  { %v1664_v22 = vadd.f32 %v1663_v18, %v1495_v19  ;;  %v1328_v33 = vadd.f32 %v1327_v21, %v1159_v23 }
 0x1fb   :  { %v1760_v27 = vmax.f32 %v1664_v22, 0.0 }
 0x1fd   :  { %1825 = vst.msk [vmem:[%s3870_s3 + $0x150] sm:$0xff] %vm1782_vm0, %v1760_v27 }
 0x1fe   :  { %v1496_v34 = vpop.f32.mrf.mxu2  ;;  %v1161_v39 = vpop.f32.mrf.mxu0 }
 0x1ff   :  { %v1665_v35 = vpop.f32.mrf.mxu3  ;;  %v1497_v38 = vadd.f32 %v1496_v34, %v1328_v33  ;;  %v1330_v40 = vpop.f32.mrf.mxu1  ;;  %v1162_v42 = vadd.f32 %v3465_v54, %v1161_v39 }
 0x201   :  { %v1666_v43 = vadd.f32 %v1665_v35, %v1497_v38  ;;  %1200 = vmatmul.bf16.gmra.mxu0 %v2334_v36  ;;  %v1331_v45 = vadd.f32 %v1330_v40, %v1162_v42 }
 0x202   :  { %1369 = vmatmul.bf16.gmra.mxu1 %v2338_v37 }
 0x203   :  { %v1761_v44 = vmax.f32 %v1666_v43, 0.0  ;;  %1538 = vmatmul.bf16.gmra.mxu2 %v2342_v0 }
 0x204   :  { %1707 = vmatmul.bf16.gmra.mxu3 %v2346_v41 }
 0x205   :  { %1826 = vst.msk [vmem:[%s3870_s3 + $0x158] sm:$0xff] %vm1782_vm0, %v1761_v44 }
 0x206   :  { %v1499_v46 = vpop.f32.mrf.mxu2  ;;  %v1163_v49 = vpop.f32.mrf.mxu0 }
 0x207   :  { %v1668_v47 = vpop.f32.mrf.mxu3  ;;  %v1500_v48 = vadd.f32 %v1499_v46, %v1331_v45  ;;  %v1332_v50 = vpop.f32.mrf.mxu1  ;;  %v1164_v52 = vadd.f32 %v3465_v54, %v1163_v49 }
 0x209   :  { %v1669_v51 = vadd.f32 %v1668_v47, %v1500_v48  ;;  %v1333_v63 = vadd.f32 %v1332_v50, %v1164_v52 }
 0x20b   :  { %v1762_v57 = vmax.f32 %v1669_v51, 0.0 }
 0x20d   :  { %1827 = vst.msk [vmem:[%s3870_s3 + $0x160] sm:$0xff] %vm1782_vm0, %v1762_v57 }
 0x20e   :  { %v1501_v1 = vpop.f32.mrf.mxu2  ;;  %v1166_v6 = vpop.f32.mrf.mxu0 }
 0x20f   :  { %v1670_v2 = vpop.f32.mrf.mxu3  ;;  %v1502_v5 = vadd.f32 %v1501_v1, %v1333_v63  ;;  %v1335_v7 = vpop.f32.mrf.mxu1  ;;  %v1167_v10 = vadd.f32 %v3465_v54, %v1166_v6 }
 0x211   :  { %v1671_v11 = vadd.f32 %v1670_v2, %v1502_v5  ;;  %1205 = vmatmul.bf16.gmra.mxu0 %v2350_v3  ;;  %v1336_v13 = vadd.f32 %v1335_v7, %v1167_v10 }
 0x212   :  { %1374 = vmatmul.bf16.gmra.mxu1 %v2354_v4 }
 0x213   :  { %v1763_v12 = vmax.f32 %v1671_v11, 0.0  ;;  %1543 = vmatmul.bf16.gmra.mxu2 %v2358_v8 }
 0x214   :  { %1712 = vmatmul.bf16.gmra.mxu3 %v2362_v9 }
 0x215   :  { %1828 = vst.msk [vmem:[%s3870_s3 + $0x168] sm:$0xff] %vm1782_vm0, %v1763_v12 }
 0x216   :  { %v1504_v14 = vpop.f32.mrf.mxu2  ;;  %v1168_v17 = vpop.f32.mrf.mxu0 }
 0x217   :  { %v1673_v15 = vpop.f32.mrf.mxu3  ;;  %v1505_v16 = vadd.f32 %v1504_v14, %v1336_v13  ;;  %v1337_v18 = vpop.f32.mrf.mxu1  ;;  %v1169_v20 = vadd.f32 %v3465_v54, %v1168_v17 }
 0x219   :  { %v1674_v19 = vadd.f32 %v1673_v15, %v1505_v16  ;;  %v1338_v22 = vadd.f32 %v1337_v18, %v1169_v20 }
 0x21b   :  { %v1764_v21 = vmax.f32 %v1674_v19, 0.0 }
 0x21d   :  { %1829 = vst.msk [vmem:[%s3870_s3 + $0x170] sm:$0xff] %vm1782_vm0, %v1764_v21 }
 0x21e   :  { %v1506_v23 = vpop.f32.mrf.mxu2  ;;  %v1171_v26 = vpop.f32.mrf.mxu0 }
 0x21f   :  { %v1675_v24 = vpop.f32.mrf.mxu3  ;;  %v1507_v25 = vadd.f32 %v1506_v23, %v1338_v22  ;;  %v1340_v27 = vpop.f32.mrf.mxu1  ;;  %v1172_v28 = vadd.f32 %v3465_v54, %v1171_v26 }
 0x221   :  { %v1676_v29 = vadd.f32 %v1675_v24, %v1507_v25  ;;  %v1341_v31 = vadd.f32 %v1340_v27, %v1172_v28 }
 0x223   :  { %v1765_v30 = vmax.f32 %v1676_v29, 0.0 }
 0x225   :  { %1830 = vst.msk [vmem:[%s3870_s3 + $0x178] sm:$0xff] %vm1782_vm0, %v1765_v30 }
 0x226   :  { %v1509_v32 = vpop.f32.mrf.mxu2  ;;  %v1173_v35 = vpop.f32.mrf.mxu0 }
 0x227   :  { %v1678_v33 = vpop.f32.mrf.mxu3  ;;  %v1510_v34 = vadd.f32 %v1509_v32, %v1341_v31  ;;  %v1342_v36 = vpop.f32.mrf.mxu1  ;;  %v1174_v38 = vadd.f32 %v3465_v54, %v1173_v35 }
 0x229   :  { %v1679_v37 = vadd.f32 %v1678_v33, %v1510_v34  ;;  %v1343_v40 = vadd.f32 %v1342_v36, %v1174_v38 }
 0x22b   :  { %v1766_v39 = vmax.f32 %v1679_v37, 0.0 }
 0x22d   :  { %1831 = vst.msk [vmem:[%s3870_s3 + $0x180] sm:$0xff] %vm1782_vm0, %v1766_v39 }
 0x22e   :  { %v1511_v0 = vpop.f32.mrf.mxu2  ;;  %v1176_v43 = vpop.f32.mrf.mxu0 }
 0x22f   :  { %v1680_v41 = vpop.f32.mrf.mxu3  ;;  %v1512_v42 = vadd.f32 %v1511_v0, %v1343_v40  ;;  %v1345_v44 = vpop.f32.mrf.mxu1  ;;  %v1177_v45 = vadd.f32 %v3465_v54, %v1176_v43 }
 0x231   :  { %v1681_v46 = vadd.f32 %v1680_v41, %v1512_v42  ;;  %v1346_v48 = vadd.f32 %v1345_v44, %v1177_v45 }
 0x233   :  { %v1767_v47 = vmax.f32 %v1681_v46, 0.0 }
 0x235   :  { %1832 = vst.msk [vmem:[%s3870_s3 + $0x188] sm:$0xff] %vm1782_vm0, %v1767_v47 }
 0x236   :  { %v1514_v49 = vpop.f32.mrf.mxu2  ;;  %v1178_v52 = vpop.f32.mrf.mxu0 }
 0x237   :  { %v1683_v50 = vpop.f32.mrf.mxu3  ;;  %v1515_v51 = vadd.f32 %v1514_v49, %v1346_v48  ;;  %v1347_v53 = vpop.f32.mrf.mxu1  ;;  %v1179_v56 = vadd.f32 %v3465_v54, %v1178_v52 }
 0x239   :  { %v1684_v55 = vadd.f32 %v1683_v50, %v1515_v51  ;;  %v1348_v58 = vadd.f32 %v1347_v53, %v1179_v56 }
 0x23b   :  { %v1768_v57 = vmax.f32 %v1684_v55, 0.0 }
 0x23d   :  { %1833 = vst.msk [vmem:[%s3870_s3 + $0x190] sm:$0xff] %vm1782_vm0, %v1768_v57 }
 0x23e   :  { %v1516_v59 = vpop.f32.mrf.mxu2  ;;  %v1181_v62 = vpop.f32.mrf.mxu0 }
 0x23f   :  { %v1685_v60 = vpop.f32.mrf.mxu3  ;;  %v1517_v61 = vadd.f32 %v1516_v59, %v1348_v58  ;;  %v1350_v63 = vpop.f32.mrf.mxu1  ;;  %v1182_v1 = vadd.f32 %v3465_v54, %v1181_v62 }
 0x241   :  { %v1686_v2 = vadd.f32 %v1685_v60, %v1517_v61  ;;  %v1351_v4 = vadd.f32 %v1350_v63, %v1182_v1 }
 0x243   :  { %v1769_v3 = vmax.f32 %v1686_v2, 0.0 }
 0x245   :  { %1834 = vst.msk [vmem:[%s3870_s3 + $0x198] sm:$0xff] %vm1782_vm0, %v1769_v3 }
 0x246   :  { %v1519_v5 = vpop.f32.mrf.mxu2  ;;  %v1183_v8 = vpop.f32.mrf.mxu0 }
 0x247   :  { %v1688_v6 = vpop.f32.mrf.mxu3  ;;  %v1520_v7 = vadd.f32 %v1519_v5, %v1351_v4  ;;  %v1352_v9 = vpop.f32.mrf.mxu1  ;;  %v1184_v11 = vadd.f32 %v3465_v54, %v1183_v8 }
 0x249   :  { %v1689_v10 = vadd.f32 %v1688_v6, %v1520_v7  ;;  %v1353_v13 = vadd.f32 %v1352_v9, %v1184_v11 }
 0x24b   :  { %v1770_v12 = vmax.f32 %v1689_v10, 0.0 }
 0x24d   :  { %1835 = vst.msk [vmem:[%s3870_s3 + $0x1a0] sm:$0xff] %vm1782_vm0, %v1770_v12 }
 0x24e   :  { %v1521_v14 = vpop.f32.mrf.mxu2  ;;  %v1186_v17 = vpop.f32.mrf.mxu0 }
 0x24f   :  { %v1690_v15 = vpop.f32.mrf.mxu3  ;;  %v1522_v16 = vadd.f32 %v1521_v14, %v1353_v13  ;;  %v1355_v18 = vpop.f32.mrf.mxu1  ;;  %v1187_v19 = vadd.f32 %v3465_v54, %v1186_v17 }
 0x251   :  { %v1691_v20 = vadd.f32 %v1690_v15, %v1522_v16  ;;  %v1356_v22 = vadd.f32 %v1355_v18, %v1187_v19 }
 0x253   :  { %v1771_v21 = vmax.f32 %v1691_v20, 0.0 }
 0x255   :  { %1836 = vst.msk [vmem:[%s3870_s3 + $0x1a8] sm:$0xff] %vm1782_vm0, %v1771_v21 }
 0x256   :  { %v1524_v23 = vpop.f32.mrf.mxu2  ;;  %v1188_v26 = vpop.f32.mrf.mxu0 }
 0x257   :  { %v1693_v24 = vpop.f32.mrf.mxu3  ;;  %v1525_v25 = vadd.f32 %v1524_v23, %v1356_v22  ;;  %v1357_v27 = vpop.f32.mrf.mxu1  ;;  %v1189_v29 = vadd.f32 %v3465_v54, %v1188_v26 }
 0x259   :  { %v1694_v28 = vadd.f32 %v1693_v24, %v1525_v25  ;;  %v1358_v31 = vadd.f32 %v1357_v27, %v1189_v29 }
 0x25b   :  { %v1772_v30 = vmax.f32 %v1694_v28, 0.0 }
 0x25d   :  { %1837 = vst.msk [vmem:[%s3870_s3 + $0x1b0] sm:$0xff] %vm1782_vm0, %v1772_v30 }
 0x25e   :  { %v1526_v32 = vpop.f32.mrf.mxu2  ;;  %v1191_v35 = vpop.f32.mrf.mxu0 }
 0x25f   :  { %v1695_v33 = vpop.f32.mrf.mxu3  ;;  %v1527_v34 = vadd.f32 %v1526_v32, %v1358_v31  ;;  %v1360_v36 = vpop.f32.mrf.mxu1  ;;  %v1192_v37 = vadd.f32 %v3465_v54, %v1191_v35 }
 0x261   :  { %v1696_v38 = vadd.f32 %v1695_v33, %v1527_v34  ;;  %v1361_v40 = vadd.f32 %v1360_v36, %v1192_v37 }
 0x263   :  { %v1773_v39 = vmax.f32 %v1696_v38, 0.0 }
 0x265   :  { %1838 = vst.msk [vmem:[%s3870_s3 + $0x1b8] sm:$0xff] %vm1782_vm0, %v1773_v39 }
 0x266   :  { %v1529_v0 = vpop.f32.mrf.mxu2  ;;  %v1193_v43 = vpop.f32.mrf.mxu0 }
 0x267   :  { %v1698_v41 = vpop.f32.mrf.mxu3  ;;  %v1530_v42 = vadd.f32 %v1529_v0, %v1361_v40  ;;  %v1362_v44 = vpop.f32.mrf.mxu1  ;;  %v1194_v46 = vadd.f32 %v3465_v54, %v1193_v43 }
 0x269   :  { %v1699_v45 = vadd.f32 %v1698_v41, %v1530_v42  ;;  %v1363_v48 = vadd.f32 %v1362_v44, %v1194_v46 }
 0x26b   :  { %v1774_v47 = vmax.f32 %v1699_v45, 0.0 }
 0x26d   :  { %1839 = vst.msk [vmem:[%s3870_s3 + $0x1c0] sm:$0xff] %vm1782_vm0, %v1774_v47 }
 0x26e   :  { %v1531_v49 = vpop.f32.mrf.mxu2  ;;  %v1196_v52 = vpop.f32.mrf.mxu0 }
 0x26f   :  { %v1700_v50 = vpop.f32.mrf.mxu3  ;;  %v1532_v51 = vadd.f32 %v1531_v49, %v1363_v48  ;;  %v1365_v53 = vpop.f32.mrf.mxu1  ;;  %v1197_v55 = vadd.f32 %v3465_v54, %v1196_v52 }
 0x271   :  { %v1701_v56 = vadd.f32 %v1700_v50, %v1532_v51  ;;  %v1366_v58 = vadd.f32 %v1365_v53, %v1197_v55 }
 0x273   :  { %v1775_v57 = vmax.f32 %v1701_v56, 0.0 }
 0x275   :  { %1840 = vst.msk [vmem:[%s3870_s3 + $0x1c8] sm:$0xff] %vm1782_vm0, %v1775_v57 }
 0x276   :  { %v1534_v59 = vpop.f32.mrf.mxu2  ;;  %v1198_v62 = vpop.f32.mrf.mxu0 }
 0x277   :  { %v1703_v60 = vpop.f32.mrf.mxu3  ;;  %v1535_v61 = vadd.f32 %v1534_v59, %v1366_v58  ;;  %v1367_v63 = vpop.f32.mrf.mxu1  ;;  %v1199_v2 = vadd.f32 %v3465_v54, %v1198_v62 }
 0x279   :  { %v1704_v1 = vadd.f32 %v1703_v60, %v1535_v61  ;;  %v1368_v4 = vadd.f32 %v1367_v63, %v1199_v2 }
 0x27b   :  { %v1776_v3 = vmax.f32 %v1704_v1, 0.0 }
 0x27d   :  { %1841 = vst.msk [vmem:[%s3870_s3 + $0x1d0] sm:$0xff] %vm1782_vm0, %v1776_v3 }
 0x27e   :  { %v1536_v5 = vpop.f32.mrf.mxu2  ;;  %v1201_v8 = vpop.f32.mrf.mxu0 }
 0x27f   :  { %v1705_v6 = vpop.f32.mrf.mxu3  ;;  %v1537_v7 = vadd.f32 %v1536_v5, %v1368_v4  ;;  %v1370_v9 = vpop.f32.mrf.mxu1  ;;  %v1202_v10 = vadd.f32 %v3465_v54, %v1201_v8 }
 0x281   :  { %v1706_v11 = vadd.f32 %v1705_v6, %v1537_v7  ;;  %v1371_v13 = vadd.f32 %v1370_v9, %v1202_v10 }
 0x283   :  { %v1777_v12 = vmax.f32 %v1706_v11, 0.0 }
 0x285   :  { %1842 = vst.msk [vmem:[%s3870_s3 + $0x1d8] sm:$0xff] %vm1782_vm0, %v1777_v12 }
 0x286   :  { %v1539_v14 = vpop.f32.mrf.mxu2  ;;  %v1203_v17 = vpop.f32.mrf.mxu0 }
 0x287   :  { %v1708_v15 = vpop.f32.mrf.mxu3  ;;  %v1540_v16 = vadd.f32 %v1539_v14, %v1371_v13  ;;  %v1372_v18 = vpop.f32.mrf.mxu1  ;;  %v1204_v20 = vadd.f32 %v3465_v54, %v1203_v17 }
 0x289   :  { %v1709_v19 = vadd.f32 %v1708_v15, %v1540_v16  ;;  %v1373_v22 = vadd.f32 %v1372_v18, %v1204_v20 }
 0x28b   :  { %v1778_v21 = vmax.f32 %v1709_v19, 0.0 }
 0x28d   :  { %1843 = vst.msk [vmem:[%s3870_s3 + $0x1e0] sm:$0xff] %vm1782_vm0, %v1778_v21 }
 0x28e   :  { %v1541_v23 = vpop.f32.mrf.mxu2  ;;  %v1206_v26 = vpop.f32.mrf.mxu0 }
 0x28f   :  { %v1710_v24 = vpop.f32.mrf.mxu3  ;;  %v1542_v25 = vadd.f32 %v1541_v23, %v1373_v22  ;;  %v1207_v27 = vadd.f32 %v3465_v54, %v1206_v26  ;;  %v1375_v29 = vpop.f32.mrf.mxu1 }
 0x291   :  { %v1711_v28 = vadd.f32 %v1710_v24, %v1542_v25  ;;  %v1376_v31 = vadd.f32 %v1375_v29, %v1207_v27 }
 0x293   :  { %v1779_v30 = vmax.f32 %v1711_v28, 0.0 }
 0x295   :  { %1844 = vst.msk [vmem:[%s3870_s3 + $0x1e8] sm:$0xff] %vm1782_vm0, %v1779_v30 }
 0x296   :  { %v1544_v32 = vpop.f32.mrf.mxu2  ;;  %v1208_v35 = vpop.f32.mrf.mxu0 }
 0x297   :  { %v1713_v33 = vpop.f32.mrf.mxu3  ;;  %v1545_v34 = vadd.f32 %v1544_v32, %v1376_v31  ;;  %v1209_v37 = vadd.f32 %v3465_v54, %v1208_v35  ;;  %v1377_v39 = vpop.f32.mrf.mxu1 }
 0x299   :  { %v1714_v36 = vadd.f32 %v1713_v33, %v1545_v34  ;;  %v1378_v40 = vadd.f32 %v1377_v39, %v1209_v37 }
 0x29b   :  { %v1780_v38 = vmax.f32 %v1714_v36, 0.0 }
 0x29d   :  { %1845 = vst.msk [vmem:[%s3870_s3 + $0x1f0] sm:$0xff] %vm1782_vm0, %v1780_v38 }
 0x29e   :  { %v1546_v0 = vpop.f32.mrf.mxu2 }
 0x29f   :  { %v1547_v41 = vadd.f32 %v1546_v0, %v1378_v40  ;;  %v1715_v42 = vpop.f32.mrf.mxu3 }
 0x2a1   :  { %v1716_v43 = vadd.f32 %v1715_v42, %v1547_v41 }
 0x2a3   :  { %v1781_v44 = vmax.f32 %v1716_v43, 0.0 }
 0x2a5   :  { %1846 = vst.msk [vmem:[%s3870_s3 + $0x1f8] sm:$0xff] %vm1782_vm0, %v1781_v44 }

// kernel: beta_vae_b_forward.11
= control target key start
LH: loop header
LB: loop body
LE: loop exit
PB: predicated region body
PF: predicated region fallthrough
CT: control target
= control target key end

     0   :  { %vm678_vm0 = vcmask 261120   ;;  %s1413_s1 = inlined_call_operand.vmem [shape: bf16[512,32], index: 1, kind: input, shape index: {}]   ;;  %s1414_s2 = inlined_call_operand.vmem [shape: f32[1,32], index: 2, kind: input, shape index: {}]   ;;  %s1415_s0 = inlined_call_operand.vmem [shape: bf16[128,512], index: 0, kind: input, shape index: {}]   ;;  %s1416_s3 = inlined_call_operand.vmem [shape: f32[128,32], index: 3, kind: output, shape index: {}]  }
   0x1   :  { %v994_v0 = vld [vmem:[%s1413_s1 + $0x38] sm:$0xff]  ;;  %v993_v4 = vld [vmem:[%s1413_s1 + $0x30] sm:$0xff]  ;;  %v992_v8 = vld [vmem:[%s1413_s1 + $0x28] sm:$0xff] }
   0x2   :  { %v1002_v1 = vld [vmem:[%s1413_s1 + $0x78] sm:$0xff]  ;;  %466 = vmatpush.bf16.msra.mxu0 %v994_v0  ;;  %v1001_v5 = vld [vmem:[%s1413_s1 + $0x70] sm:$0xff]  ;;  %v1000_v9 = vld [vmem:[%s1413_s1 + $0x68] sm:$0xff] }
   0x3   :  { %v1010_v2 = vld [vmem:[%s1413_s1 + $0xb8] sm:$0xff]  ;;  %515 = vmatpush.bf16.msra.mxu1 %v1002_v1  ;;  %v1009_v6 = vld [vmem:[%s1413_s1 + $0xb0] sm:$0xff]  ;;  %v1008_v10 = vld [vmem:[%s1413_s1 + $0xa8] sm:$0xff] }
   0x4   :  { %v1018_v3 = vld [vmem:[%s1413_s1 + $0xf8] sm:$0xff]  ;;  %564 = vmatpush.bf16.msra.mxu2 %v1010_v2  ;;  %v1017_v7 = vld [vmem:[%s1413_s1 + $0xf0] sm:$0xff]  ;;  %v1016_v11 = vld [vmem:[%s1413_s1 + $0xe8] sm:$0xff] }
   0x5   :  { %613 = vmatpush.bf16.msra.mxu3 %v1018_v3  ;;  %v991_v12 = vld [vmem:[%s1413_s1 + $0x20] sm:$0xff]  ;;  %v990_v16 = vld [vmem:[%s1413_s1 + $0x18] sm:$0xff]  ;;  %v989_v20 = vld [vmem:[%s1413_s1 + $0x10] sm:$0xff] }
   0x6   :  { %467 = vmatpush.bf16.msra.mxu0 %v993_v4  ;;  %v999_v13 = vld [vmem:[%s1413_s1 + $0x60] sm:$0xff]  ;;  %v998_v17 = vld [vmem:[%s1413_s1 + $0x58] sm:$0xff]  ;;  %v997_v21 = vld [vmem:[%s1413_s1 + $0x50] sm:$0xff] }
   0x7   :  { %516 = vmatpush.bf16.msra.mxu1 %v1001_v5  ;;  %v1007_v14 = vld [vmem:[%s1413_s1 + $0xa0] sm:$0xff]  ;;  %v1006_v18 = vld [vmem:[%s1413_s1 + $0x98] sm:$0xff]  ;;  %v1005_v22 = vld [vmem:[%s1413_s1 + $0x90] sm:$0xff] }
   0x8   :  { %565 = vmatpush.bf16.msra.mxu2 %v1009_v6  ;;  %v1015_v15 = vld [vmem:[%s1413_s1 + $0xe0] sm:$0xff]  ;;  %v1014_v19 = vld [vmem:[%s1413_s1 + $0xd8] sm:$0xff]  ;;  %v1013_v23 = vld [vmem:[%s1413_s1 + $0xd0] sm:$0xff] }
   0x9   :  { %614 = vmatpush.bf16.msra.mxu3 %v1017_v7  ;;  %v988_v24 = vld [vmem:[%s1413_s1 + $0x8] sm:$0xff]  ;;  %v987_v28 = vld [vmem:[%s1413_s1] sm:$0xff]  ;;  %v957_v33 = vld [vmem:[%s1415_s0 + $0xc] sm:$0xf0] }
   0xa   :  { %468 = vmatpush.bf16.msra.mxu0 %v992_v8  ;;  %v996_v25 = vld [vmem:[%s1413_s1 + $0x48] sm:$0xff]  ;;  %v995_v29 = vld [vmem:[%s1413_s1 + $0x40] sm:$0xff]  ;;  %v703_v35 = vld [vmem:[%s1415_s0 + $0x10] sm:$0xf0] }
   0xb   :  { %517 = vmatpush.bf16.msra.mxu1 %v1000_v9  ;;  %v1004_v26 = vld [vmem:[%s1413_s1 + $0x88] sm:$0xff]  ;;  %v1003_v30 = vld [vmem:[%s1413_s1 + $0x80] sm:$0xff]  ;;  %v958_v37 = vld [vmem:[%s1415_s0 + $0x14] sm:$0xf0] }
   0xc   :  { %566 = vmatpush.bf16.msra.mxu2 %v1008_v10  ;;  %v1012_v27 = vld [vmem:[%s1413_s1 + $0xc8] sm:$0xff]  ;;  %v1011_v31 = vld [vmem:[%s1413_s1 + $0xc0] sm:$0xff]  ;;  %v711_v39 = vld [vmem:[%s1415_s0 + $0x18] sm:$0xf0] }
   0xd   :  { %615 = vmatpush.bf16.msra.mxu3 %v1016_v11  ;;  %v701_v32 = vld [vmem:[%s1415_s0] sm:$0xf]  ;;  %v955_v34 = vld [vmem:[%s1415_s0 + $0x4] sm:$0xf]  ;;  %v709_v36 = vld [vmem:[%s1415_s0 + $0x8] sm:$0xf] }
   0xe   :  { %469 = vmatpush.bf16.msra.mxu0 %v991_v12  ;;  %v956_v38 = vld [vmem:[%s1415_s0 + $0xc] sm:$0xf]  ;;  %v702_v40 = vor.u32 %v957_v33, %v701_v32  ;;  %v706_v41 = vor.u32 %v955_v34, %v703_v35  ;;  %v710_v42 = vor.u32 %v958_v37, %v709_v36  ;;  %v717_v44 = vld [vmem:[%s1415_s0 + $0x20] sm:$0xf]  ;;  %v961_v45 = vld [vmem:[%s1415_s0 + $0x2c] sm:$0xf0] }
   0xf   :  { %518 = vmatpush.bf16.msra.mxu1 %v999_v13  ;;  %v714_v43 = vor.u32 %v956_v38, %v711_v39  ;;  %v959_v46 = vld [vmem:[%s1415_s0 + $0x24] sm:$0xf]  ;;  %v719_v47 = vld [vmem:[%s1415_s0 + $0x30] sm:$0xf0]  ;;  %v725_v48 = vld [vmem:[%s1415_s0 + $0x28] sm:$0xf]  ;;  %v718_v52 = vor.u32 %v961_v45, %v717_v44 }
  0x10   :  { %567 = vmatpush.bf16.msra.mxu2 %v1007_v14  ;;  %v962_v49 = vld [vmem:[%s1415_s0 + $0x34] sm:$0xf0]  ;;  %v960_v50 = vld [vmem:[%s1415_s0 + $0x2c] sm:$0xf]  ;;  %v727_v51 = vld [vmem:[%s1415_s0 + $0x38] sm:$0xf0]  ;;  %v722_v53 = vor.u32 %v959_v46, %v719_v47 }
  0x11   :  { %616 = vmatpush.bf16.msra.mxu3 %v1015_v15  ;;  %v726_v54 = vor.u32 %v962_v49, %v725_v48  ;;  %v730_v55 = vor.u32 %v960_v50, %v727_v51  ;;  %v733_v56 = vld [vmem:[%s1415_s0 + $0x40] sm:$0xf]  ;;  %v965_v57 = vld [vmem:[%s1415_s0 + $0x4c] sm:$0xf0]  ;;  %v963_v58 = vld [vmem:[%s1415_s0 + $0x44] sm:$0xf] }
  0x12   :  { %470 = vmatpush.bf16.msra.mxu0 %v990_v16  ;;  %v735_v59 = vld [vmem:[%s1415_s0 + $0x50] sm:$0xf0]  ;;  %v741_v60 = vld [vmem:[%s1415_s0 + $0x48] sm:$0xf]  ;;  %v966_v61 = vld [vmem:[%s1415_s0 + $0x54] sm:$0xf0]  ;;  %v734_v0 = vor.u32 %v965_v57, %v733_v56 }
  0x13   :  { %519 = vmatpush.bf16.msra.mxu1 %v998_v17  ;;  %v964_v62 = vld [vmem:[%s1415_s0 + $0x4c] sm:$0xf]  ;;  %v743_v63 = vld [vmem:[%s1415_s0 + $0x58] sm:$0xf0]  ;;  %v738_v1 = vor.u32 %v963_v58, %v735_v59  ;;  %v742_v2 = vor.u32 %v966_v61, %v741_v60  ;;  %v749_v4 = vld [vmem:[%s1415_s0 + $0x60] sm:$0xf] }
  0x14   :  { %568 = vmatpush.bf16.msra.mxu2 %v1006_v18  ;;  %v746_v3 = vor.u32 %v964_v62, %v743_v63  ;;  %v969_v5 = vld [vmem:[%s1415_s0 + $0x6c] sm:$0xf0]  ;;  %v967_v6 = vld [vmem:[%s1415_s0 + $0x64] sm:$0xf]  ;;  %v751_v7 = vld [vmem:[%s1415_s0 + $0x70] sm:$0xf0] }
  0x15   :  { %617 = vmatpush.bf16.msra.mxu3 %v1014_v19  ;;  %v757_v8 = vld [vmem:[%s1415_s0 + $0x68] sm:$0xf]  ;;  %v970_v9 = vld [vmem:[%s1415_s0 + $0x74] sm:$0xf0]  ;;  %v968_v10 = vld [vmem:[%s1415_s0 + $0x6c] sm:$0xf]  ;;  %v750_v12 = vor.u32 %v969_v5, %v749_v4  ;;  %v754_v13 = vor.u32 %v967_v6, %v751_v7 }
  0x16   :  { %471 = vmatpush.bf16.msra.mxu0 %v989_v20  ;;  %v759_v11 = vld [vmem:[%s1415_s0 + $0x78] sm:$0xf0]  ;;  %v758_v14 = vor.u32 %v970_v9, %v757_v8  ;;  %v765_v16 = vld [vmem:[%s1415_s0 + $0x80] sm:$0xf]  ;;  %v973_v17 = vld [vmem:[%s1415_s0 + $0x8c] sm:$0xf0] }
  0x17   :  { %520 = vmatpush.bf16.msra.mxu1 %v997_v21  ;;  %v762_v15 = vor.u32 %v968_v10, %v759_v11  ;;  %v971_v18 = vld [vmem:[%s1415_s0 + $0x84] sm:$0xf]  ;;  %v767_v19 = vld [vmem:[%s1415_s0 + $0x90] sm:$0xf0]  ;;  %v773_v20 = vld [vmem:[%s1415_s0 + $0x88] sm:$0xf] }
  0x18   :  { %569 = vmatpush.bf16.msra.mxu2 %v1005_v22  ;;  %v974_v21 = vld [vmem:[%s1415_s0 + $0x94] sm:$0xf0]  ;;  %v972_v22 = vld [vmem:[%s1415_s0 + $0x8c] sm:$0xf]  ;;  %v789_v32 = vld [vmem:[%s1415_s0 + $0xa8] sm:$0xf] }
  0x19   :  { %618 = vmatpush.bf16.msra.mxu3 %v1013_v23  ;;  %v775_v23 = vld [vmem:[%s1415_s0 + $0x98] sm:$0xf0]  ;;  %v978_v33 = vld [vmem:[%s1415_s0 + $0xb4] sm:$0xf0]  ;;  %v976_v34 = vld [vmem:[%s1415_s0 + $0xac] sm:$0xf] }
  0x1a   :  { %472 = vmatpush.bf16.msra.mxu0 %v988_v24  ;;  %v766_v24 = vor.u32 %v973_v17, %v765_v16  ;;  %v791_v35 = vld [vmem:[%s1415_s0 + $0xb8] sm:$0xf0]  ;;  %v790_v38 = vor.u32 %v978_v33, %v789_v32  ;;  %v805_v44 = vld [vmem:[%s1415_s0 + $0xc8] sm:$0xf]  ;;  %v982_v45 = vld [vmem:[%s1415_s0 + $0xd4] sm:$0xf0] }
  0x1b   :  { %521 = vmatpush.bf16.msra.mxu1 %v996_v25  ;;  %v770_v25 = vor.u32 %v971_v18, %v767_v19  ;;  %v794_v39 = vor.u32 %v976_v34, %v791_v35  ;;  %v980_v46 = vld [vmem:[%s1415_s0 + $0xcc] sm:$0xf]  ;;  %v807_v47 = vld [vmem:[%s1415_s0 + $0xd8] sm:$0xf0]  ;;  %v806_v50 = vor.u32 %v982_v45, %v805_v44  ;;  %v821_v56 = vld [vmem:[%s1415_s0 + $0xe8] sm:$0xf] }
  0x1c   :  { %570 = vmatpush.bf16.msra.mxu2 %v1004_v26  ;;  %v774_v26 = vor.u32 %v974_v21, %v773_v20  ;;  %v810_v51 = vor.u32 %v980_v46, %v807_v47  ;;  %v986_v57 = vld [vmem:[%s1415_s0 + $0xf4] sm:$0xf0]  ;;  %v984_v58 = vld [vmem:[%s1415_s0 + $0xec] sm:$0xf]  ;;  %v823_v59 = vld [vmem:[%s1415_s0 + $0xf8] sm:$0xf0] }
  0x1d   :  { %619 = vmatpush.bf16.msra.mxu3 %v1012_v27  ;;  %v778_v27 = vor.u32 %v972_v22, %v775_v23  ;;  %v822_v62 = vor.u32 %v986_v57, %v821_v56  ;;  %v826_v63 = vor.u32 %v984_v58, %v823_v59 }
  0x1e   :  { %473 = vmatpush.bf16.msra.mxu0 %v987_v28  ;;  %v781_v28 = vld [vmem:[%s1415_s0 + $0xa0] sm:$0xf] }
  0x1f   :  { %522 = vmatpush.bf16.msra.mxu1 %v995_v29  ;;  %v977_v29 = vld [vmem:[%s1415_s0 + $0xac] sm:$0xf0] }
  0x20   :  { %571 = vmatpush.bf16.msra.mxu2 %v1003_v30  ;;  %v975_v30 = vld [vmem:[%s1415_s0 + $0xa4] sm:$0xf]  ;;  %v782_v36 = vor.u32 %v977_v29, %v781_v28 }
  0x21   :  { %620 = vmatpush.bf16.msra.mxu3 %v1011_v31  ;;  %474 = vmatmul.bf16.vlgmr.msra.gmra.mxu0 %v702_v40  ;;  %v783_v31 = vld [vmem:[%s1415_s0 + $0xb0] sm:$0xf0]  ;;  %v797_v40 = vld [vmem:[%s1415_s0 + $0xc0] sm:$0xf] }
  0x22   :  { %523 = vmatmul.bf16.vlgmr.msra.gmra.mxu1 %v706_v41  ;;  %v786_v37 = vor.u32 %v975_v30, %v783_v31  ;;  %v981_v41 = vld [vmem:[%s1415_s0 + $0xcc] sm:$0xf0] }
  0x23   :  { %572 = vmatmul.bf16.vlgmr.msra.gmra.mxu2 %v710_v42  ;;  %v979_v42 = vld [vmem:[%s1415_s0 + $0xc4] sm:$0xf]  ;;  %v798_v48 = vor.u32 %v981_v41, %v797_v40 }
  0x24   :  { %621 = vmatmul.bf16.vlgmr.msra.gmra.mxu3 %v714_v43  ;;  %v799_v43 = vld [vmem:[%s1415_s0 + $0xd0] sm:$0xf0] }
  0x25   :  { %v802_v49 = vor.u32 %v979_v42, %v799_v43 }
  0x31   :  { %479 = vmatmul.bf16.gmra.mxu0 %v718_v52  ;;  %v813_v52 = vld [vmem:[%s1415_s0 + $0xe0] sm:$0xf] }
  0x32   :  { %528 = vmatmul.bf16.gmra.mxu1 %v722_v53  ;;  %v985_v53 = vld [vmem:[%s1415_s0 + $0xec] sm:$0xf0] }
  0x33   :  { %577 = vmatmul.bf16.gmra.mxu2 %v726_v54  ;;  %v983_v54 = vld [vmem:[%s1415_s0 + $0xe4] sm:$0xf]  ;;  %v814_v60 = vor.u32 %v985_v53, %v813_v52 }
  0x34   :  { %626 = vmatmul.bf16.gmra.mxu3 %v730_v55  ;;  %v815_v55 = vld [vmem:[%s1415_s0 + $0xf0] sm:$0xf0] }
  0x35   :  { %v818_v61 = vor.u32 %v983_v54, %v815_v55 }
  0x41   :  { %484 = vmatmul.bf16.gmra.mxu0 %v734_v0  ;;  %v1331_v0 = vld [vmem:[%s1414_s2] ss:$0 sm:$0xff] }
  0x42   :  { %533 = vmatmul.bf16.gmra.mxu1 %v738_v1 }
  0x43   :  { %582 = vmatmul.bf16.gmra.mxu2 %v742_v2 }
  0x44   :  { %631 = vmatmul.bf16.gmra.mxu3 %v746_v3 }
  0x51   :  { %489 = vmatmul.bf16.gmra.mxu0 %v750_v12 }
  0x52   :  { %538 = vmatmul.bf16.gmra.mxu1 %v754_v13 }
  0x53   :  { %587 = vmatmul.bf16.gmra.mxu2 %v758_v14 }
  0x54   :  { %636 = vmatmul.bf16.gmra.mxu3 %v762_v15 }
  0x61   :  { %494 = vmatmul.bf16.gmra.mxu0 %v766_v24 }
  0x62   :  { %543 = vmatmul.bf16.gmra.mxu1 %v770_v25 }
  0x63   :  { %592 = vmatmul.bf16.gmra.mxu2 %v774_v26 }
  0x64   :  { %641 = vmatmul.bf16.gmra.mxu3 %v778_v27 }
  0x71   :  { %499 = vmatmul.bf16.gmra.mxu0 %v782_v36 }
  0x72   :  { %548 = vmatmul.bf16.gmra.mxu1 %v786_v37 }
  0x73   :  { %597 = vmatmul.bf16.gmra.mxu2 %v790_v38 }
  0x74   :  { %646 = vmatmul.bf16.gmra.mxu3 %v794_v39 }
  0x81   :  { %504 = vmatmul.bf16.gmra.mxu0 %v798_v48 }
  0x82   :  { %553 = vmatmul.bf16.gmra.mxu1 %v802_v49 }
  0x83   :  { %602 = vmatmul.bf16.gmra.mxu2 %v806_v50 }
  0x84   :  { %651 = vmatmul.bf16.gmra.mxu3 %v810_v51 }
  0x91   :  { %509 = vmatmul.bf16.gmra.mxu0 %v814_v60 }
  0x92   :  { %558 = vmatmul.bf16.gmra.mxu1 %v818_v61 }
  0x93   :  { %607 = vmatmul.bf16.gmra.mxu2 %v822_v62 }
  0x94   :  { %656 = vmatmul.bf16.gmra.mxu3 %v826_v63 }
  0x9e   :  { %v475_v1 = vpop.f32.mrf.mxu0 }
  0x9f   :  { %v524_v2 = vpop.f32.mrf.mxu1  ;;  %v476_v3 = vadd.f32 %v1331_v0, %v475_v1 }
  0xa1   :  { %v525_v4 = vadd.f32 %v524_v2, %v476_v3 }
  0xa6   :  { %v573_v5 = vpop.f32.mrf.mxu2  ;;  %v477_v8 = vpop.f32.mrf.mxu0 }
  0xa7   :  { %v622_v6 = vpop.f32.mrf.mxu3  ;;  %v574_v7 = vadd.f32 %v573_v5, %v525_v4  ;;  %v526_v9 = vpop.f32.mrf.mxu1  ;;  %v478_v11 = vadd.f32 %v1331_v0, %v477_v8 }
  0xa9   :  { %v623_v10 = vadd.f32 %v622_v6, %v574_v7  ;;  %v527_v13 = vadd.f32 %v526_v9, %v478_v11 }
  0xab   :  { %v662_v12 = vmax.f32 %v623_v10, 0.0 }
  0xad   :  { %679 = vst.msk [vmem:[%s1416_s3] sm:$0xff] %vm678_vm0, %v662_v12 }
  0xae   :  { %v575_v14 = vpop.f32.mrf.mxu2  ;;  %v480_v17 = vpop.f32.mrf.mxu0 }
  0xaf   :  { %v624_v15 = vpop.f32.mrf.mxu3  ;;  %v576_v16 = vadd.f32 %v575_v14, %v527_v13  ;;  %v529_v18 = vpop.f32.mrf.mxu1  ;;  %v481_v19 = vadd.f32 %v1331_v0, %v480_v17 }
  0xb1   :  { %v625_v20 = vadd.f32 %v624_v15, %v576_v16  ;;  %v530_v22 = vadd.f32 %v529_v18, %v481_v19 }
  0xb3   :  { %v663_v21 = vmax.f32 %v625_v20, 0.0 }
  0xb5   :  { %680 = vst.msk [vmem:[%s1416_s3 + $0x8] sm:$0xff] %vm678_vm0, %v663_v21 }
  0xb6   :  { %v578_v23 = vpop.f32.mrf.mxu2  ;;  %v482_v26 = vpop.f32.mrf.mxu0 }
  0xb7   :  { %v627_v24 = vpop.f32.mrf.mxu3  ;;  %v579_v25 = vadd.f32 %v578_v23, %v530_v22  ;;  %v531_v27 = vpop.f32.mrf.mxu1  ;;  %v483_v29 = vadd.f32 %v1331_v0, %v482_v26 }
  0xb9   :  { %v628_v28 = vadd.f32 %v627_v24, %v579_v25  ;;  %v532_v31 = vadd.f32 %v531_v27, %v483_v29 }
  0xbb   :  { %v664_v30 = vmax.f32 %v628_v28, 0.0 }
  0xbd   :  { %681 = vst.msk [vmem:[%s1416_s3 + $0x10] sm:$0xff] %vm678_vm0, %v664_v30 }
  0xbe   :  { %v580_v32 = vpop.f32.mrf.mxu2  ;;  %v485_v35 = vpop.f32.mrf.mxu0 }
  0xbf   :  { %v629_v33 = vpop.f32.mrf.mxu3  ;;  %v581_v34 = vadd.f32 %v580_v32, %v532_v31  ;;  %v534_v36 = vpop.f32.mrf.mxu1  ;;  %v486_v37 = vadd.f32 %v1331_v0, %v485_v35 }
  0xc1   :  { %v630_v38 = vadd.f32 %v629_v33, %v581_v34  ;;  %v535_v40 = vadd.f32 %v534_v36, %v486_v37 }
  0xc3   :  { %v665_v39 = vmax.f32 %v630_v38, 0.0 }
  0xc5   :  { %682 = vst.msk [vmem:[%s1416_s3 + $0x18] sm:$0xff] %vm678_vm0, %v665_v39 }
  0xc6   :  { %v583_v41 = vpop.f32.mrf.mxu2  ;;  %v487_v44 = vpop.f32.mrf.mxu0 }
  0xc7   :  { %v632_v42 = vpop.f32.mrf.mxu3  ;;  %v584_v43 = vadd.f32 %v583_v41, %v535_v40  ;;  %v536_v45 = vpop.f32.mrf.mxu1  ;;  %v488_v47 = vadd.f32 %v1331_v0, %v487_v44 }
  0xc9   :  { %v633_v46 = vadd.f32 %v632_v42, %v584_v43  ;;  %v537_v49 = vadd.f32 %v536_v45, %v488_v47 }
  0xcb   :  { %v666_v48 = vmax.f32 %v633_v46, 0.0 }
  0xcd   :  { %683 = vst.msk [vmem:[%s1416_s3 + $0x20] sm:$0xff] %vm678_vm0, %v666_v48 }
  0xce   :  { %v585_v50 = vpop.f32.mrf.mxu2  ;;  %v490_v53 = vpop.f32.mrf.mxu0 }
  0xcf   :  { %v634_v51 = vpop.f32.mrf.mxu3  ;;  %v586_v52 = vadd.f32 %v585_v50, %v537_v49  ;;  %v539_v54 = vpop.f32.mrf.mxu1  ;;  %v491_v55 = vadd.f32 %v1331_v0, %v490_v53 }
  0xd1   :  { %v635_v56 = vadd.f32 %v634_v51, %v586_v52  ;;  %v540_v58 = vadd.f32 %v539_v54, %v491_v55 }
  0xd3   :  { %v667_v57 = vmax.f32 %v635_v56, 0.0 }
  0xd5   :  { %684 = vst.msk [vmem:[%s1416_s3 + $0x28] sm:$0xff] %vm678_vm0, %v667_v57 }
  0xd6   :  { %v588_v59 = vpop.f32.mrf.mxu2  ;;  %v492_v62 = vpop.f32.mrf.mxu0 }
  0xd7   :  { %v637_v60 = vpop.f32.mrf.mxu3  ;;  %v589_v61 = vadd.f32 %v588_v59, %v540_v58  ;;  %v541_v63 = vpop.f32.mrf.mxu1  ;;  %v493_v2 = vadd.f32 %v1331_v0, %v492_v62 }
  0xd9   :  { %v638_v1 = vadd.f32 %v637_v60, %v589_v61  ;;  %v542_v4 = vadd.f32 %v541_v63, %v493_v2 }
  0xdb   :  { %v668_v3 = vmax.f32 %v638_v1, 0.0 }
  0xdd   :  { %685 = vst.msk [vmem:[%s1416_s3 + $0x30] sm:$0xff] %vm678_vm0, %v668_v3 }
  0xde   :  { %v590_v5 = vpop.f32.mrf.mxu2  ;;  %v495_v8 = vpop.f32.mrf.mxu0 }
  0xdf   :  { %v639_v6 = vpop.f32.mrf.mxu3  ;;  %v591_v7 = vadd.f32 %v590_v5, %v542_v4  ;;  %v544_v9 = vpop.f32.mrf.mxu1  ;;  %v496_v10 = vadd.f32 %v1331_v0, %v495_v8 }
  0xe1   :  { %v640_v11 = vadd.f32 %v639_v6, %v591_v7  ;;  %v545_v13 = vadd.f32 %v544_v9, %v496_v10 }
  0xe3   :  { %v669_v12 = vmax.f32 %v640_v11, 0.0 }
  0xe5   :  { %686 = vst.msk [vmem:[%s1416_s3 + $0x38] sm:$0xff] %vm678_vm0, %v669_v12 }
  0xe6   :  { %v593_v14 = vpop.f32.mrf.mxu2  ;;  %v497_v17 = vpop.f32.mrf.mxu0 }
  0xe7   :  { %v642_v15 = vpop.f32.mrf.mxu3  ;;  %v594_v16 = vadd.f32 %v593_v14, %v545_v13  ;;  %v546_v18 = vpop.f32.mrf.mxu1  ;;  %v498_v20 = vadd.f32 %v1331_v0, %v497_v17 }
  0xe9   :  { %v643_v19 = vadd.f32 %v642_v15, %v594_v16  ;;  %v547_v22 = vadd.f32 %v546_v18, %v498_v20 }
  0xeb   :  { %v670_v21 = vmax.f32 %v643_v19, 0.0 }
  0xed   :  { %687 = vst.msk [vmem:[%s1416_s3 + $0x40] sm:$0xff] %vm678_vm0, %v670_v21 }
  0xee   :  { %v595_v23 = vpop.f32.mrf.mxu2  ;;  %v500_v26 = vpop.f32.mrf.mxu0 }
  0xef   :  { %v644_v24 = vpop.f32.mrf.mxu3  ;;  %v596_v25 = vadd.f32 %v595_v23, %v547_v22  ;;  %v549_v27 = vpop.f32.mrf.mxu1  ;;  %v501_v28 = vadd.f32 %v1331_v0, %v500_v26 }
  0xf1   :  { %v645_v29 = vadd.f32 %v644_v24, %v596_v25  ;;  %v550_v31 = vadd.f32 %v549_v27, %v501_v28 }
  0xf3   :  { %v671_v30 = vmax.f32 %v645_v29, 0.0 }
  0xf5   :  { %688 = vst.msk [vmem:[%s1416_s3 + $0x48] sm:$0xff] %vm678_vm0, %v671_v30 }
  0xf6   :  { %v598_v32 = vpop.f32.mrf.mxu2  ;;  %v502_v35 = vpop.f32.mrf.mxu0 }
  0xf7   :  { %v647_v33 = vpop.f32.mrf.mxu3  ;;  %v599_v34 = vadd.f32 %v598_v32, %v550_v31  ;;  %v551_v36 = vpop.f32.mrf.mxu1  ;;  %v503_v38 = vadd.f32 %v1331_v0, %v502_v35 }
  0xf9   :  { %v648_v37 = vadd.f32 %v647_v33, %v599_v34  ;;  %v552_v40 = vadd.f32 %v551_v36, %v503_v38 }
  0xfb   :  { %v672_v39 = vmax.f32 %v648_v37, 0.0 }
  0xfd   :  { %689 = vst.msk [vmem:[%s1416_s3 + $0x50] sm:$0xff] %vm678_vm0, %v672_v39 }
  0xfe   :  { %v600_v41 = vpop.f32.mrf.mxu2  ;;  %v505_v44 = vpop.f32.mrf.mxu0 }
  0xff   :  { %v649_v42 = vpop.f32.mrf.mxu3  ;;  %v601_v43 = vadd.f32 %v600_v41, %v552_v40  ;;  %v554_v45 = vpop.f32.mrf.mxu1  ;;  %v506_v46 = vadd.f32 %v1331_v0, %v505_v44 }
 0x101   :  { %v650_v47 = vadd.f32 %v649_v42, %v601_v43  ;;  %v555_v49 = vadd.f32 %v554_v45, %v506_v46 }
 0x103   :  { %v673_v48 = vmax.f32 %v650_v47, 0.0 }
 0x105   :  { %690 = vst.msk [vmem:[%s1416_s3 + $0x58] sm:$0xff] %vm678_vm0, %v673_v48 }
 0x106   :  { %v603_v50 = vpop.f32.mrf.mxu2  ;;  %v507_v53 = vpop.f32.mrf.mxu0 }
 0x107   :  { %v652_v51 = vpop.f32.mrf.mxu3  ;;  %v604_v52 = vadd.f32 %v603_v50, %v555_v49  ;;  %v556_v54 = vpop.f32.mrf.mxu1  ;;  %v508_v56 = vadd.f32 %v1331_v0, %v507_v53 }
 0x109   :  { %v653_v55 = vadd.f32 %v652_v51, %v604_v52  ;;  %v557_v58 = vadd.f32 %v556_v54, %v508_v56 }
 0x10b   :  { %v674_v57 = vmax.f32 %v653_v55, 0.0 }
 0x10d   :  { %691 = vst.msk [vmem:[%s1416_s3 + $0x60] sm:$0xff] %vm678_vm0, %v674_v57 }
 0x10e   :  { %v605_v59 = vpop.f32.mrf.mxu2  ;;  %v510_v62 = vpop.f32.mrf.mxu0 }
 0x10f   :  { %v654_v60 = vpop.f32.mrf.mxu3  ;;  %v606_v61 = vadd.f32 %v605_v59, %v557_v58  ;;  %v511_v63 = vadd.f32 %v1331_v0, %v510_v62  ;;  %v559_v2 = vpop.f32.mrf.mxu1 }
 0x111   :  { %v655_v1 = vadd.f32 %v654_v60, %v606_v61  ;;  %v560_v4 = vadd.f32 %v559_v2, %v511_v63 }
 0x113   :  { %v675_v3 = vmax.f32 %v655_v1, 0.0 }
 0x115   :  { %692 = vst.msk [vmem:[%s1416_s3 + $0x68] sm:$0xff] %vm678_vm0, %v675_v3 }
 0x116   :  { %v608_v5 = vpop.f32.mrf.mxu2  ;;  %v512_v8 = vpop.f32.mrf.mxu0 }
 0x117   :  { %v657_v6 = vpop.f32.mrf.mxu3  ;;  %v609_v7 = vadd.f32 %v608_v5, %v560_v4  ;;  %v513_v10 = vadd.f32 %v1331_v0, %v512_v8  ;;  %v561_v12 = vpop.f32.mrf.mxu1 }
 0x119   :  { %v658_v9 = vadd.f32 %v657_v6, %v609_v7  ;;  %v562_v13 = vadd.f32 %v561_v12, %v513_v10 }
 0x11b   :  { %v676_v11 = vmax.f32 %v658_v9, 0.0 }
 0x11d   :  { %693 = vst.msk [vmem:[%s1416_s3 + $0x70] sm:$0xff] %vm678_vm0, %v676_v11 }
 0x11e   :  { %v610_v14 = vpop.f32.mrf.mxu2 }
 0x11f   :  { %v611_v15 = vadd.f32 %v610_v14, %v562_v13  ;;  %v659_v16 = vpop.f32.mrf.mxu3 }
 0x121   :  { %v660_v17 = vadd.f32 %v659_v16, %v611_v15 }
 0x123   :  { %v677_v18 = vmax.f32 %v660_v17, 0.0 }
 0x125   :  { %694 = vst.msk [vmem:[%s1416_s3 + $0x78] sm:$0xff] %vm678_vm0, %v677_v18 }

// kernel: beta_vae_b_forward.12
= control target key start
LH: loop header
LB: loop body
LE: loop exit
PB: predicated region body
PF: predicated region fallthrough
CT: control target
= control target key end

     0   :  { %vm402_vm0 = vcmask 261120   ;;  %s795_s1 = inlined_call_operand.vmem [shape: bf16[512,32], index: 1, kind: input, shape index: {}]   ;;  %s796_s2 = inlined_call_operand.vmem [shape: f32[1,32], index: 2, kind: input, shape index: {}]   ;;  %s797_s0 = inlined_call_operand.vmem [shape: bf16[32,512], index: 0, kind: input, shape index: {}]   ;;  %s798_s3 = inlined_call_operand.vmem [shape: f32[32,32], index: 3, kind: output, shape index: {}]  }
   0x1   :  { %v586_v0 = vld [vmem:[%s795_s1 + $0x38] sm:$0xff]  ;;  %v585_v4 = vld [vmem:[%s795_s1 + $0x30] sm:$0xff]  ;;  %v584_v8 = vld [vmem:[%s795_s1 + $0x28] sm:$0xff] }
   0x2   :  { %v594_v1 = vld [vmem:[%s795_s1 + $0x78] sm:$0xff]  ;;  %322 = vmatpush.bf16.msra.mxu0 %v586_v0  ;;  %v593_v5 = vld [vmem:[%s795_s1 + $0x70] sm:$0xff]  ;;  %v592_v9 = vld [vmem:[%s795_s1 + $0x68] sm:$0xff] }
   0x3   :  { %v602_v2 = vld [vmem:[%s795_s1 + $0xb8] sm:$0xff]  ;;  %341 = vmatpush.bf16.msra.mxu1 %v594_v1  ;;  %v601_v6 = vld [vmem:[%s795_s1 + $0xb0] sm:$0xff]  ;;  %v600_v10 = vld [vmem:[%s795_s1 + $0xa8] sm:$0xff] }
   0x4   :  { %v610_v3 = vld [vmem:[%s795_s1 + $0xf8] sm:$0xff]  ;;  %360 = vmatpush.bf16.msra.mxu2 %v602_v2  ;;  %v609_v7 = vld [vmem:[%s795_s1 + $0xf0] sm:$0xff]  ;;  %v608_v11 = vld [vmem:[%s795_s1 + $0xe8] sm:$0xff] }
   0x5   :  { %379 = vmatpush.bf16.msra.mxu3 %v610_v3  ;;  %v583_v12 = vld [vmem:[%s795_s1 + $0x20] sm:$0xff]  ;;  %v582_v16 = vld [vmem:[%s795_s1 + $0x18] sm:$0xff]  ;;  %v581_v20 = vld [vmem:[%s795_s1 + $0x10] sm:$0xff] }
   0x6   :  { %323 = vmatpush.bf16.msra.mxu0 %v585_v4  ;;  %v591_v13 = vld [vmem:[%s795_s1 + $0x60] sm:$0xff]  ;;  %v590_v17 = vld [vmem:[%s795_s1 + $0x58] sm:$0xff]  ;;  %v589_v21 = vld [vmem:[%s795_s1 + $0x50] sm:$0xff] }
   0x7   :  { %342 = vmatpush.bf16.msra.mxu1 %v593_v5  ;;  %v599_v14 = vld [vmem:[%s795_s1 + $0xa0] sm:$0xff]  ;;  %v598_v18 = vld [vmem:[%s795_s1 + $0x98] sm:$0xff]  ;;  %v597_v22 = vld [vmem:[%s795_s1 + $0x90] sm:$0xff] }
   0x8   :  { %361 = vmatpush.bf16.msra.mxu2 %v601_v6  ;;  %v607_v15 = vld [vmem:[%s795_s1 + $0xe0] sm:$0xff]  ;;  %v606_v19 = vld [vmem:[%s795_s1 + $0xd8] sm:$0xff]  ;;  %v605_v23 = vld [vmem:[%s795_s1 + $0xd0] sm:$0xff] }
   0x9   :  { %380 = vmatpush.bf16.msra.mxu3 %v609_v7  ;;  %v580_v24 = vld [vmem:[%s795_s1 + $0x8] sm:$0xff]  ;;  %v579_v28 = vld [vmem:[%s795_s1] sm:$0xff]  ;;  %v573_v33 = vld [vmem:[%s797_s0 + $0xc] sm:$0xf0] }
   0xa   :  { %324 = vmatpush.bf16.msra.mxu0 %v584_v8  ;;  %v588_v25 = vld [vmem:[%s795_s1 + $0x48] sm:$0xff]  ;;  %v587_v29 = vld [vmem:[%s795_s1 + $0x40] sm:$0xff]  ;;  %v415_v35 = vld [vmem:[%s797_s0 + $0x10] sm:$0xf0] }
   0xb   :  { %343 = vmatpush.bf16.msra.mxu1 %v592_v9  ;;  %v596_v26 = vld [vmem:[%s795_s1 + $0x88] sm:$0xff]  ;;  %v595_v30 = vld [vmem:[%s795_s1 + $0x80] sm:$0xff]  ;;  %v574_v37 = vld [vmem:[%s797_s0 + $0x14] sm:$0xf0] }
   0xc   :  { %362 = vmatpush.bf16.msra.mxu2 %v600_v10  ;;  %v604_v27 = vld [vmem:[%s795_s1 + $0xc8] sm:$0xff]  ;;  %v603_v31 = vld [vmem:[%s795_s1 + $0xc0] sm:$0xff]  ;;  %v423_v39 = vld [vmem:[%s797_s0 + $0x18] sm:$0xf0] }
   0xd   :  { %381 = vmatpush.bf16.msra.mxu3 %v608_v11  ;;  %v413_v32 = vld [vmem:[%s797_s0] sm:$0xf]  ;;  %v571_v34 = vld [vmem:[%s797_s0 + $0x4] sm:$0xf]  ;;  %v421_v36 = vld [vmem:[%s797_s0 + $0x8] sm:$0xf] }
   0xe   :  { %325 = vmatpush.bf16.msra.mxu0 %v583_v12  ;;  %v572_v38 = vld [vmem:[%s797_s0 + $0xc] sm:$0xf]  ;;  %v414_v40 = vor.u32 %v573_v33, %v413_v32  ;;  %v418_v41 = vor.u32 %v571_v34, %v415_v35  ;;  %v422_v42 = vor.u32 %v574_v37, %v421_v36  ;;  %v429_v44 = vld [vmem:[%s797_s0 + $0x20] sm:$0xf]  ;;  %v577_v45 = vld [vmem:[%s797_s0 + $0x2c] sm:$0xf0] }
   0xf   :  { %344 = vmatpush.bf16.msra.mxu1 %v591_v13  ;;  %v426_v43 = vor.u32 %v572_v38, %v423_v39  ;;  %v575_v46 = vld [vmem:[%s797_s0 + $0x24] sm:$0xf]  ;;  %v431_v47 = vld [vmem:[%s797_s0 + $0x30] sm:$0xf0]  ;;  %v437_v48 = vld [vmem:[%s797_s0 + $0x28] sm:$0xf]  ;;  %v430_v52 = vor.u32 %v577_v45, %v429_v44 }
  0x10   :  { %363 = vmatpush.bf16.msra.mxu2 %v599_v14  ;;  %v578_v49 = vld [vmem:[%s797_s0 + $0x34] sm:$0xf0]  ;;  %v576_v50 = vld [vmem:[%s797_s0 + $0x2c] sm:$0xf]  ;;  %v439_v51 = vld [vmem:[%s797_s0 + $0x38] sm:$0xf0]  ;;  %v434_v53 = vor.u32 %v575_v46, %v431_v47 }
  0x11   :  { %382 = vmatpush.bf16.msra.mxu3 %v607_v15  ;;  %v438_v54 = vor.u32 %v578_v49, %v437_v48  ;;  %v442_v55 = vor.u32 %v576_v50, %v439_v51  ;;  %v611_v56 = vld [vmem:[%s796_s2] ss:$0 sm:$0xff] }
  0x12   :  { %326 = vmatpush.bf16.msra.mxu0 %v582_v16 }
  0x13   :  { %345 = vmatpush.bf16.msra.mxu1 %v590_v17 }
  0x14   :  { %364 = vmatpush.bf16.msra.mxu2 %v598_v18 }
  0x15   :  { %383 = vmatpush.bf16.msra.mxu3 %v606_v19 }
  0x16   :  { %327 = vmatpush.bf16.msra.mxu0 %v581_v20 }
  0x17   :  { %346 = vmatpush.bf16.msra.mxu1 %v589_v21 }
  0x18   :  { %365 = vmatpush.bf16.msra.mxu2 %v597_v22 }
  0x19   :  { %384 = vmatpush.bf16.msra.mxu3 %v605_v23 }
  0x1a   :  { %328 = vmatpush.bf16.msra.mxu0 %v580_v24 }
  0x1b   :  { %347 = vmatpush.bf16.msra.mxu1 %v588_v25 }
  0x1c   :  { %366 = vmatpush.bf16.msra.mxu2 %v596_v26 }
  0x1d   :  { %385 = vmatpush.bf16.msra.mxu3 %v604_v27 }
  0x1e   :  { %329 = vmatpush.bf16.msra.mxu0 %v579_v28 }
  0x1f   :  { %348 = vmatpush.bf16.msra.mxu1 %v587_v29 }
  0x20   :  { %367 = vmatpush.bf16.msra.mxu2 %v595_v30 }
  0x21   :  { %386 = vmatpush.bf16.msra.mxu3 %v603_v31  ;;  %330 = vmatmul.bf16.vlgmr.msra.gmra.mxu0 %v414_v40 }
  0x22   :  { %349 = vmatmul.bf16.vlgmr.msra.gmra.mxu1 %v418_v41 }
  0x23   :  { %368 = vmatmul.bf16.vlgmr.msra.gmra.mxu2 %v422_v42 }
  0x24   :  { %387 = vmatmul.bf16.vlgmr.msra.gmra.mxu3 %v426_v43 }
  0x31   :  { %335 = vmatmul.bf16.gmra.mxu0 %v430_v52 }
  0x32   :  { %354 = vmatmul.bf16.gmra.mxu1 %v434_v53 }
  0x33   :  { %373 = vmatmul.bf16.gmra.mxu2 %v438_v54 }
  0x34   :  { %392 = vmatmul.bf16.gmra.mxu3 %v442_v55 }
  0x9e   :  { %v331_v57 = vpop.f32.mrf.mxu0 }
  0x9f   :  { %v350_v58 = vpop.f32.mrf.mxu1  ;;  %v332_v59 = vadd.f32 %v611_v56, %v331_v57 }
  0xa1   :  { %v351_v60 = vadd.f32 %v350_v58, %v332_v59 }
  0xa6   :  { %v369_v61 = vpop.f32.mrf.mxu2  ;;  %v333_v0 = vpop.f32.mrf.mxu0 }
  0xa7   :  { %v388_v62 = vpop.f32.mrf.mxu3  ;;  %v370_v63 = vadd.f32 %v369_v61, %v351_v60  ;;  %v352_v1 = vpop.f32.mrf.mxu1  ;;  %v334_v3 = vadd.f32 %v611_v56, %v333_v0 }
  0xa9   :  { %v389_v2 = vadd.f32 %v388_v62, %v370_v63  ;;  %v353_v5 = vadd.f32 %v352_v1, %v334_v3 }
  0xab   :  { %v398_v4 = vmax.f32 %v389_v2, 0.0 }
  0xad   :  { %403 = vst.msk [vmem:[%s798_s3] sm:$0xff] %vm402_vm0, %v398_v4 }
  0xae   :  { %v371_v6 = vpop.f32.mrf.mxu2  ;;  %v336_v9 = vpop.f32.mrf.mxu0 }
  0xaf   :  { %v390_v7 = vpop.f32.mrf.mxu3  ;;  %v372_v8 = vadd.f32 %v371_v6, %v353_v5  ;;  %v337_v10 = vadd.f32 %v611_v56, %v336_v9  ;;  %v355_v12 = vpop.f32.mrf.mxu1 }
  0xb1   :  { %v391_v11 = vadd.f32 %v390_v7, %v372_v8  ;;  %v356_v14 = vadd.f32 %v355_v12, %v337_v10 }
  0xb3   :  { %v399_v13 = vmax.f32 %v391_v11, 0.0 }
  0xb5   :  { %404 = vst.msk [vmem:[%s798_s3 + $0x8] sm:$0xff] %vm402_vm0, %v399_v13 }
  0xb6   :  { %v374_v15 = vpop.f32.mrf.mxu2  ;;  %v338_v18 = vpop.f32.mrf.mxu0 }
  0xb7   :  { %v393_v16 = vpop.f32.mrf.mxu3  ;;  %v375_v17 = vadd.f32 %v374_v15, %v356_v14  ;;  %v339_v20 = vadd.f32 %v611_v56, %v338_v18  ;;  %v357_v22 = vpop.f32.mrf.mxu1 }
  0xb9   :  { %v394_v19 = vadd.f32 %v393_v16, %v375_v17  ;;  %v358_v23 = vadd.f32 %v357_v22, %v339_v20 }
  0xbb   :  { %v400_v21 = vmax.f32 %v394_v19, 0.0 }
  0xbd   :  { %405 = vst.msk [vmem:[%s798_s3 + $0x10] sm:$0xff] %vm402_vm0, %v400_v21 }
  0xbe   :  { %v376_v24 = vpop.f32.mrf.mxu2 }
  0xbf   :  { %v377_v25 = vadd.f32 %v376_v24, %v358_v23  ;;  %v395_v26 = vpop.f32.mrf.mxu3 }
  0xc1   :  { %v396_v27 = vadd.f32 %v395_v26, %v377_v25 }
  0xc3   :  { %v401_v28 = vmax.f32 %v396_v27, 0.0 }
  0xc5   :  { %406 = vst.msk [vmem:[%s798_s3 + $0x18] sm:$0xff] %vm402_vm0, %v401_v28 }

// kernel: beta_vae_b_forward.13
= control target key start
LH: loop header
LB: loop body
LE: loop exit
PB: predicated region body
PF: predicated region fallthrough
CT: control target
= control target key end

     0   :  { %s2805_s0 = inlined_call_operand.vmem [shape: f32[2,512], index: 0, kind: input, shape index: {}]   ;;  %s2806_s1 = inlined_call_operand.vmem [shape: f32[2,10], index: 1, kind: input, shape index: {}]   ;;  %s2807_s2 = inlined_call_operand.vmem [shape: f32[512,256], index: 2, kind: input, shape index: {}]   ;;  %s2808_s3 = inlined_call_operand.vmem [shape: f32[1,256], index: 3, kind: input, shape index: {}]   ;;  %s2809_s4 = inlined_call_operand.vmem [shape: f32[256,256], index: 4, kind: input, shape index: {}]   ;;  %s2810_s5 = inlined_call_operand.vmem [shape: f32[1,256], index: 5, kind: input, shape index: {}]   ;;  %s2811_s6 = inlined_call_operand.vmem [shape: f32[256,10], index: 6, kind: input, shape index: {}]   ;;  %s2812_s7 = inlined_call_operand.vmem [shape: f32[1,10], index: 7, kind: input, shape index: {}]   ;;  %s2813_s8 = inlined_call_operand.vmem [shape: f32[256,10], index: 8, kind: input, shape index: {}]   ;;  %s2814_s9 = inlined_call_operand.vmem [shape: f32[1,10], index: 9, kind: input, shape index: {}]   ;;  %s2815_s10 = inlined_call_operand.vmem [shape: f32[10,256], index: 10, kind: input, shape index: {}]   ;;  %s2816_s11 = inlined_call_operand.vmem [shape: f32[1,256], index: 11, kind: input, shape index: {}]   ;;  %s2817_s12 = inlined_call_operand.vmem [shape: f32[256,256], index: 12, kind: input, shape index: {}]   ;;  %s2818_s13 = inlined_call_operand.vmem [shape: f32[1,256], index: 13, kind: input, shape index: {}]   ;;  %s2819_s14 = inlined_call_operand.vmem [shape: f32[256,512], index: 14, kind: input, shape index: {}]   ;;  %s2820_s15 = inlined_call_operand.vmem [shape: f32[1,512], index: 15, kind: input, shape index: {}]   ;;  %s2821_s16 = inlined_call_operand.hbm [shape: f32[2,10], index: 16, kind: output, shape index: {0}]   ;;  %s2822_s17 = inlined_call_operand.hbm [shape: f32[2,10], index: 17, kind: output, shape index: {1}]   ;;  %s2823_s18 = inlined_call_operand.vmem [shape: f32[2,512], index: 18, kind: output, shape index: {2}]  }
   0x1   :  { %2825 = sst [smem:[#allocation8_spill]] %s2805_s0 }
   0x2   :  { %2826 = sst [smem:[#allocation9_spill]] %s2806_s1 }
   0x3   :  { %2827 = sst [smem:[#allocation10_spill]] %s2807_s2 }
   0x4   :  { %24 = vsyncpa [#allocation3], 0  ;;  %s2828_s29 = sld [smem:[#allocation10_spill]] }
   0x5   :  { %s2829_s19 = sld [smem:[#allocation8_spill]] }
   0xa   :  { %v153_v0 = vld [vmem:[%s2828_s29 + $0x2f0] sm:$0xff]  ;;  %v151_v2 = vld [vmem:[%s2828_s29 + $0x2e0] sm:$0xff]  ;;  %v154_v62 = vld [vmem:[%s2828_s29 + $0x2f8] sm:$0xff] }
   0xb   :  { %v89_v1 = vld [vmem:[%s2828_s29 + $0xf0] sm:$0xff]  ;;  %243 = vmatpush.msra.mxu2 %v153_v0  ;;  %v87_v4 = vld [vmem:[%s2828_s29 + $0xe0] sm:$0xff]  ;;  %v90_v0 = vld [vmem:[%s2828_s29 + $0xf8] sm:$0xff] }
   0xc   :  { %203 = vmatpush.msra.mxu0 %v89_v1  ;;  %v185_v3 = vld [vmem:[%s2828_s29 + $0x3f0] sm:$0xff]  ;;  %v183_v7 = vld [vmem:[%s2828_s29 + $0x3e0] sm:$0xff]  ;;  %v186_v1 = vld [vmem:[%s2828_s29 + $0x3f8] sm:$0xff] }
   0xd   :  { %v121_v5 = vld [vmem:[%s2828_s29 + $0x1f0] sm:$0xff]  ;;  %263 = vmatpush.msra.mxu3 %v185_v3  ;;  %244 = vmatpush.msra.mxu2 %v151_v2  ;;  %v119_v9 = vld [vmem:[%s2828_s29 + $0x1e0] sm:$0xff]  ;;  %v152_v2 = vld [vmem:[%s2828_s29 + $0x2e8] sm:$0xff] }
   0xe   :  { %223 = vmatpush.msra.mxu1 %v121_v5  ;;  %v149_v6 = vld [vmem:[%s2828_s29 + $0x2d0] sm:$0xff]  ;;  %204 = vmatpush.msra.mxu0 %v87_v4  ;;  %v147_v11 = vld [vmem:[%s2828_s29 + $0x2c0] sm:$0xff]  ;;  %v88_v4 = vld [vmem:[%s2828_s29 + $0xe8] sm:$0xff] }
   0xf   :  { %v85_v8 = vld [vmem:[%s2828_s29 + $0xd0] sm:$0xff]  ;;  %264 = vmatpush.msra.mxu3 %v183_v7  ;;  %v83_v12 = vld [vmem:[%s2828_s29 + $0xc0] sm:$0xff]  ;;  %245 = vmatpush.msra.mxu2 %v149_v6  ;;  %v122_v5 = vld [vmem:[%s2828_s29 + $0x1f8] sm:$0xff] }
  0x10   :  { %v181_v10 = vld [vmem:[%s2828_s29 + $0x3d0] sm:$0xff]  ;;  %224 = vmatpush.msra.mxu1 %v119_v9  ;;  %205 = vmatpush.msra.mxu0 %v85_v8  ;;  %v179_v14 = vld [vmem:[%s2828_s29 + $0x3c0] sm:$0xff]  ;;  %v150_v6 = vld [vmem:[%s2828_s29 + $0x2d8] sm:$0xff] }
  0x11   :  { %v117_v13 = vld [vmem:[%s2828_s29 + $0x1d0] sm:$0xff]  ;;  %v115_v15 = vld [vmem:[%s2828_s29 + $0x1c0] sm:$0xff]  ;;  %265 = vmatpush.msra.mxu3 %v181_v10  ;;  %246 = vmatpush.msra.mxu2 %v147_v11  ;;  %v184_v7 = vld [vmem:[%s2828_s29 + $0x3e8] sm:$0xff] }
  0x12   :  { %225 = vmatpush.msra.mxu1 %v117_v13  ;;  %v145_v16 = vld [vmem:[%s2828_s29 + $0x2b0] sm:$0xff]  ;;  %206 = vmatpush.msra.mxu0 %v83_v12  ;;  %v143_v20 = vld [vmem:[%s2828_s29 + $0x2a0] sm:$0xff]  ;;  %v86_v8 = vld [vmem:[%s2828_s29 + $0xd8] sm:$0xff] }
  0x13   :  { %v81_v17 = vld [vmem:[%s2828_s29 + $0xb0] sm:$0xff]  ;;  %266 = vmatpush.msra.mxu3 %v179_v14  ;;  %v79_v21 = vld [vmem:[%s2828_s29 + $0xa0] sm:$0xff]  ;;  %247 = vmatpush.msra.mxu2 %v145_v16  ;;  %v120_v9 = vld [vmem:[%s2828_s29 + $0x1e8] sm:$0xff] }
  0x14   :  { %v177_v18 = vld [vmem:[%s2828_s29 + $0x3b0] sm:$0xff]  ;;  %226 = vmatpush.msra.mxu1 %v115_v15  ;;  %207 = vmatpush.msra.mxu0 %v81_v17  ;;  %v175_v22 = vld [vmem:[%s2828_s29 + $0x3a0] sm:$0xff]  ;;  %v148_v10 = vld [vmem:[%s2828_s29 + $0x2c8] sm:$0xff] }
  0x15   :  { %v113_v19 = vld [vmem:[%s2828_s29 + $0x1b0] sm:$0xff]  ;;  %v111_v23 = vld [vmem:[%s2828_s29 + $0x1a0] sm:$0xff]  ;;  %267 = vmatpush.msra.mxu3 %v177_v18  ;;  %248 = vmatpush.msra.mxu2 %v143_v20  ;;  %v182_v11 = vld [vmem:[%s2828_s29 + $0x3d8] sm:$0xff] }
  0x16   :  { %227 = vmatpush.msra.mxu1 %v113_v19  ;;  %v141_v24 = vld [vmem:[%s2828_s29 + $0x290] sm:$0xff]  ;;  %208 = vmatpush.msra.mxu0 %v79_v21  ;;  %v139_v28 = vld [vmem:[%s2828_s29 + $0x280] sm:$0xff]  ;;  %v84_v12 = vld [vmem:[%s2828_s29 + $0xc8] sm:$0xff] }
  0x17   :  { %v77_v25 = vld [vmem:[%s2828_s29 + $0x90] sm:$0xff]  ;;  %268 = vmatpush.msra.mxu3 %v175_v22  ;;  %v75_v29 = vld [vmem:[%s2828_s29 + $0x80] sm:$0xff]  ;;  %249 = vmatpush.msra.mxu2 %v141_v24  ;;  %v118_v13 = vld [vmem:[%s2828_s29 + $0x1d8] sm:$0xff] }
  0x18   :  { %v173_v26 = vld [vmem:[%s2828_s29 + $0x390] sm:$0xff]  ;;  %228 = vmatpush.msra.mxu1 %v111_v23  ;;  %209 = vmatpush.msra.mxu0 %v77_v25  ;;  %v171_v30 = vld [vmem:[%s2828_s29 + $0x380] sm:$0xff]  ;;  %v146_v15 = vld [vmem:[%s2828_s29 + $0x2b8] sm:$0xff] }
  0x19   :  { %v109_v27 = vld [vmem:[%s2828_s29 + $0x190] sm:$0xff]  ;;  %v107_v31 = vld [vmem:[%s2828_s29 + $0x180] sm:$0xff]  ;;  %269 = vmatpush.msra.mxu3 %v173_v26  ;;  %250 = vmatpush.msra.mxu2 %v139_v28  ;;  %v180_v16 = vld [vmem:[%s2828_s29 + $0x3c8] sm:$0xff] }
  0x1a   :  { %229 = vmatpush.msra.mxu1 %v109_v27  ;;  %v137_v32 = vld [vmem:[%s2828_s29 + $0x270] sm:$0xff]  ;;  %210 = vmatpush.msra.mxu0 %v75_v29  ;;  %v135_v36 = vld [vmem:[%s2828_s29 + $0x260] sm:$0xff]  ;;  %v82_v17 = vld [vmem:[%s2828_s29 + $0xb8] sm:$0xff] }
  0x1b   :  { %v73_v33 = vld [vmem:[%s2828_s29 + $0x70] sm:$0xff]  ;;  %270 = vmatpush.msra.mxu3 %v171_v30  ;;  %v71_v37 = vld [vmem:[%s2828_s29 + $0x60] sm:$0xff]  ;;  %251 = vmatpush.msra.mxu2 %v137_v32  ;;  %v116_v18 = vld [vmem:[%s2828_s29 + $0x1c8] sm:$0xff] }
  0x1c   :  { %v169_v34 = vld [vmem:[%s2828_s29 + $0x370] sm:$0xff]  ;;  %230 = vmatpush.msra.mxu1 %v107_v31  ;;  %211 = vmatpush.msra.mxu0 %v73_v33  ;;  %v167_v38 = vld [vmem:[%s2828_s29 + $0x360] sm:$0xff]  ;;  %v144_v19 = vld [vmem:[%s2828_s29 + $0x2a8] sm:$0xff] }
  0x1d   :  { %v105_v35 = vld [vmem:[%s2828_s29 + $0x170] sm:$0xff]  ;;  %v103_v39 = vld [vmem:[%s2828_s29 + $0x160] sm:$0xff]  ;;  %271 = vmatpush.msra.mxu3 %v169_v34  ;;  %252 = vmatpush.msra.mxu2 %v135_v36  ;;  %v178_v20 = vld [vmem:[%s2828_s29 + $0x3b8] sm:$0xff] }
  0x1e   :  { %231 = vmatpush.msra.mxu1 %v105_v35  ;;  %v133_v40 = vld [vmem:[%s2828_s29 + $0x250] sm:$0xff]  ;;  %212 = vmatpush.msra.mxu0 %v71_v37  ;;  %v131_v44 = vld [vmem:[%s2828_s29 + $0x240] sm:$0xff]  ;;  %v80_v21 = vld [vmem:[%s2828_s29 + $0xa8] sm:$0xff] }
  0x1f   :  { %v69_v41 = vld [vmem:[%s2828_s29 + $0x50] sm:$0xff]  ;;  %272 = vmatpush.msra.mxu3 %v167_v38  ;;  %v67_v45 = vld [vmem:[%s2828_s29 + $0x40] sm:$0xff]  ;;  %253 = vmatpush.msra.mxu2 %v133_v40  ;;  %v114_v22 = vld [vmem:[%s2828_s29 + $0x1b8] sm:$0xff] }
  0x20   :  { %v165_v42 = vld [vmem:[%s2828_s29 + $0x350] sm:$0xff]  ;;  %232 = vmatpush.msra.mxu1 %v103_v39  ;;  %213 = vmatpush.msra.mxu0 %v69_v41  ;;  %v163_v46 = vld [vmem:[%s2828_s29 + $0x340] sm:$0xff]  ;;  %v142_v23 = vld [vmem:[%s2828_s29 + $0x298] sm:$0xff] }
  0x21   :  { %v101_v43 = vld [vmem:[%s2828_s29 + $0x150] sm:$0xff]  ;;  %v99_v47 = vld [vmem:[%s2828_s29 + $0x140] sm:$0xff]  ;;  %273 = vmatpush.msra.mxu3 %v165_v42  ;;  %254 = vmatpush.msra.mxu2 %v131_v44  ;;  %v176_v24 = vld [vmem:[%s2828_s29 + $0x3a8] sm:$0xff] }
  0x22   :  { %233 = vmatpush.msra.mxu1 %v101_v43  ;;  %v129_v48 = vld [vmem:[%s2828_s29 + $0x230] sm:$0xff]  ;;  %214 = vmatpush.msra.mxu0 %v67_v45  ;;  %v127_v52 = vld [vmem:[%s2828_s29 + $0x220] sm:$0xff]  ;;  %v78_v25 = vld [vmem:[%s2828_s29 + $0x98] sm:$0xff] }
  0x23   :  { %v65_v49 = vld [vmem:[%s2828_s29 + $0x30] sm:$0xff]  ;;  %274 = vmatpush.msra.mxu3 %v163_v46  ;;  %v63_v53 = vld [vmem:[%s2828_s29 + $0x20] sm:$0xff]  ;;  %255 = vmatpush.msra.mxu2 %v129_v48  ;;  %v112_v26 = vld [vmem:[%s2828_s29 + $0x1a8] sm:$0xff] }
  0x24   :  { %v161_v50 = vld [vmem:[%s2828_s29 + $0x330] sm:$0xff]  ;;  %234 = vmatpush.msra.mxu1 %v99_v47  ;;  %215 = vmatpush.msra.mxu0 %v65_v49  ;;  %v159_v54 = vld [vmem:[%s2828_s29 + $0x320] sm:$0xff]  ;;  %v140_v27 = vld [vmem:[%s2828_s29 + $0x288] sm:$0xff] }
  0x25   :  { %v97_v51 = vld [vmem:[%s2828_s29 + $0x130] sm:$0xff]  ;;  %v95_v55 = vld [vmem:[%s2828_s29 + $0x120] sm:$0xff]  ;;  %275 = vmatpush.msra.mxu3 %v161_v50  ;;  %256 = vmatpush.msra.mxu2 %v127_v52  ;;  %v174_v28 = vld [vmem:[%s2828_s29 + $0x398] sm:$0xff] }
  0x26   :  { %235 = vmatpush.msra.mxu1 %v97_v51  ;;  %v125_v56 = vld [vmem:[%s2828_s29 + $0x210] sm:$0xff]  ;;  %216 = vmatpush.msra.mxu0 %v63_v53  ;;  %v123_v60 = vld [vmem:[%s2828_s29 + $0x200] sm:$0xff]  ;;  %v76_v29 = vld [vmem:[%s2828_s29 + $0x88] sm:$0xff] }
  0x27   :  { %v61_v57 = vld [vmem:[%s2828_s29 + $0x10] sm:$0xff]  ;;  %276 = vmatpush.msra.mxu3 %v159_v54  ;;  %v59_v61 = vld [vmem:[%s2828_s29] sm:$0xff]  ;;  %257 = vmatpush.msra.mxu2 %v125_v56  ;;  %v110_v30 = vld [vmem:[%s2828_s29 + $0x198] sm:$0xff] }
  0x28   :  { %v157_v58 = vld [vmem:[%s2828_s29 + $0x310] sm:$0xff]  ;;  %236 = vmatpush.msra.mxu1 %v95_v55  ;;  %217 = vmatpush.msra.mxu0 %v61_v57  ;;  %v155_v63 = vld [vmem:[%s2828_s29 + $0x300] sm:$0xff]  ;;  %v138_v31 = vld [vmem:[%s2828_s29 + $0x278] sm:$0xff] }
  0x29   :  { %v93_v59 = vld [vmem:[%s2828_s29 + $0x110] sm:$0xff]  ;;  %277 = vmatpush.msra.mxu3 %v157_v58  ;;  %258 = vmatpush.msra.mxu2 %v123_v60  ;;  %v91_v3 = vld [vmem:[%s2828_s29 + $0x100] sm:$0xff]  ;;  %v172_v32 = vld [vmem:[%s2828_s29 + $0x388] sm:$0xff] }
  0x2a   :  { %237 = vmatpush.msra.mxu1 %v93_v59  ;;  %218 = vmatpush.msra.mxu0 %v59_v61  ;;  %v58_v14 = vld [vmem:[%s2829_s19] sm:$0xff]  ;;  %v74_v33 = vld [vmem:[%s2828_s29 + $0x78] sm:$0xff]  ;;  %v108_v34 = vld [vmem:[%s2828_s29 + $0x188] sm:$0xff] }
  0x2b   :  { %323 = vmatpush.msrb.mxu2 %v154_v62  ;;  %278 = vmatpush.msra.mxu3 %v155_v63  ;;  %194 = vst [vmem:[#allocation1] ss:$4 sm:$0xff] %v58_v14  ;;  %v136_v35 = vld [vmem:[%s2828_s29 + $0x268] sm:$0xff]  ;;  %v170_v36 = vld [vmem:[%s2828_s29 + $0x378] sm:$0xff] }
  0x2c   :  { %283 = vmatpush.msrb.mxu0 %v90_v0  ;;  %238 = vmatpush.msra.mxu1 %v91_v3  ;;  %v72_v37 = vld [vmem:[%s2828_s29 + $0x68] sm:$0xff]  ;;  %v106_v38 = vld [vmem:[%s2828_s29 + $0x178] sm:$0xff] }
  0x2d   :  { %343 = vmatpush.msrb.mxu3 %v186_v1  ;;  %324 = vmatpush.msrb.mxu2 %v152_v2  ;;  %v134_v39 = vld [vmem:[%s2828_s29 + $0x258] sm:$0xff]  ;;  %v168_v40 = vld [vmem:[%s2828_s29 + $0x368] sm:$0xff] }
  0x2e   :  { %284 = vmatpush.msrb.mxu0 %v88_v4  ;;  %303 = vmatpush.msrb.mxu1 %v122_v5  ;;  %v70_v41 = vld [vmem:[%s2828_s29 + $0x58] sm:$0xff]  ;;  %v104_v42 = vld [vmem:[%s2828_s29 + $0x168] sm:$0xff] }
  0x2f   :  { %325 = vmatpush.msrb.mxu2 %v150_v6  ;;  %344 = vmatpush.msrb.mxu3 %v184_v7  ;;  %v132_v43 = vld [vmem:[%s2828_s29 + $0x248] sm:$0xff]  ;;  %v166_v44 = vld [vmem:[%s2828_s29 + $0x358] sm:$0xff] }
  0x30   :  { %285 = vmatpush.msrb.mxu0 %v86_v8  ;;  %304 = vmatpush.msrb.mxu1 %v120_v9  ;;  %v68_v46 = vld [vmem:[%s2828_s29 + $0x48] sm:$0xff]  ;;  %v102_v47 = vld [vmem:[%s2828_s29 + $0x158] sm:$0xff] }
  0x31   :  { %326 = vmatpush.msrb.mxu2 %v148_v10  ;;  %345 = vmatpush.msrb.mxu3 %v182_v11  ;;  %v130_v48 = vld [vmem:[%s2828_s29 + $0x238] sm:$0xff]  ;;  %v164_v49 = vld [vmem:[%s2828_s29 + $0x348] sm:$0xff] }
  0x32   :  { %286 = vmatpush.msrb.mxu0 %v84_v12  ;;  %305 = vmatpush.msrb.mxu1 %v118_v13  ;;  %v197_v45 = vld.sshfl [vmem:[#allocation1 + $0x10] sm:$0xff pattern:$0x73625140]  ;;  %v195_v50 = vld.sshfl [vmem:[#allocation1] sm:$0xff pattern:$0x73625140] }
  0x33   :  { %327 = vmatpush.msrb.mxu2 %v146_v15  ;;  %346 = vmatpush.msrb.mxu3 %v180_v16  ;;  %v198_v51 = vld.sshfl [vmem:[#allocation1 + $0x18] sm:$0xff pattern:$0x73625140]  ;;  %v100_v53 = vld [vmem:[%s2828_s29 + $0x148] sm:$0xff] }
  0x34   :  { %287 = vmatpush.msrb.mxu0 %v82_v17  ;;  %306 = vmatpush.msrb.mxu1 %v116_v18  ;;  %v66_v52 = vld [vmem:[%s2828_s29 + $0x38] sm:$0xff]  ;;  %v128_v54 = vld [vmem:[%s2828_s29 + $0x228] sm:$0xff] }
  0x35   :  { %328 = vmatpush.msrb.mxu2 %v144_v19  ;;  %347 = vmatpush.msrb.mxu3 %v178_v20  ;;  %v162_v55 = vld [vmem:[%s2828_s29 + $0x338] sm:$0xff]  ;;  %v196_v56 = vld.sshfl [vmem:[#allocation1 + $0x8] sm:$0xff pattern:$0x73625140] }
  0x36   :  { %288 = vmatpush.msrb.mxu0 %v80_v21  ;;  %307 = vmatpush.msrb.mxu1 %v114_v22 }
  0x37   :  { %329 = vmatpush.msrb.mxu2 %v142_v23  ;;  %348 = vmatpush.msrb.mxu3 %v176_v24 }
  0x38   :  { %289 = vmatpush.msrb.mxu0 %v78_v25  ;;  %308 = vmatpush.msrb.mxu1 %v112_v26 }
  0x39   :  { %330 = vmatpush.msrb.mxu2 %v140_v27  ;;  %349 = vmatpush.msrb.mxu3 %v174_v28 }
  0x3a   :  { %290 = vmatpush.msrb.mxu0 %v76_v29  ;;  %309 = vmatpush.msrb.mxu1 %v110_v30 }
  0x3b   :  { %331 = vmatpush.msrb.mxu2 %v138_v31  ;;  %350 = vmatpush.msrb.mxu3 %v172_v32 }
  0x3c   :  { %291 = vmatpush.msrb.mxu0 %v74_v33  ;;  %310 = vmatpush.msrb.mxu1 %v108_v34 }
  0x3d   :  { %332 = vmatpush.msrb.mxu2 %v136_v35  ;;  %351 = vmatpush.msrb.mxu3 %v170_v36 }
  0x3e   :  { %292 = vmatpush.msrb.mxu0 %v72_v37  ;;  %311 = vmatpush.msrb.mxu1 %v106_v38 }
  0x3f   :  { %333 = vmatpush.msrb.mxu2 %v134_v39  ;;  %352 = vmatpush.msrb.mxu3 %v168_v40 }
  0x40   :  { %293 = vmatpush.msrb.mxu0 %v70_v41  ;;  %312 = vmatpush.msrb.mxu1 %v104_v42 }
  0x41   :  { %334 = vmatpush.msrb.mxu2 %v132_v43  ;;  %353 = vmatpush.msrb.mxu3 %v166_v44 }
  0x42   :  { %259 = vmatmul.f32.vlgmr.msra.gmra.mxu2 %v197_v45  ;;  %294 = vmatpush.msrb.mxu0 %v68_v46 }
  0x43   :  { %313 = vmatpush.msrb.mxu1 %v102_v47  ;;  %335 = vmatpush.msrb.mxu2 %v130_v48 }
  0x44   :  { %354 = vmatpush.msrb.mxu3 %v164_v49  ;;  %219 = vmatmul.f32.vlgmr.msra.gmra.mxu0 %v195_v50 }
  0x45   :  { %25 = vsyncpa [#allocation5], 0  ;;  %279 = vmatmul.f32.vlgmr.msra.gmra.mxu3 %v198_v51  ;;  %295 = vmatpush.msrb.mxu0 %v66_v52  ;;  %v64_v57 = vld [vmem:[%s2828_s29 + $0x28] sm:$0xff]  ;;  %v98_v58 = vld [vmem:[%s2828_s29 + $0x138] sm:$0xff]  ;;  %vm692_vm0 = vcmask 1041408   ;;  %vm669_vm1 = vcmask 74752  }
  0x46   :  { %314 = vmatpush.msrb.mxu1 %v100_v53  ;;  %336 = vmatpush.msrb.mxu2 %v128_v54  ;;  %v126_v59 = vld [vmem:[%s2828_s29 + $0x218] sm:$0xff]  ;;  %v160_v60 = vld [vmem:[%s2828_s29 + $0x328] sm:$0xff]  ;;  %v395_v5 = vld [vmem:[%s2809_s4 + $0xf0] sm:$0xff]  ;;  %vm688_vm2 = vcmask 80896   ;;  %s1216_s25 = sshll.u32 %s2821_s16, 4  ;;  %s1227_s26 = sshll.u32 %s2822_s17, 4  ;;  %s1217_s25 = int_to_ptr.hbm [resolvable:$true] %s1216_s25  ;;  %s1228_s26 = int_to_ptr.hbm [resolvable:$true] %s1227_s26 }
  0x47   :  { %355 = vmatpush.msrb.mxu3 %v162_v55  ;;  %239 = vmatmul.f32.vlgmr.msra.gmra.mxu1 %v196_v56  ;;  %v62_v61 = vld [vmem:[%s2828_s29 + $0x18] sm:$0xff]  ;;  %v96_v62 = vld [vmem:[%s2828_s29 + $0x128] sm:$0xff]  ;;  %v393_v7 = vld [vmem:[%s2809_s4 + $0xe0] sm:$0xff]  ;;  %vm1203_vm3 = vcmask 1045508   ;;  %vm1205_vm4 = vcmask 1043456  }
  0x48   :  { %296 = vmatpush.msrb.mxu0 %v64_v57  ;;  %315 = vmatpush.msrb.mxu1 %v98_v58  ;;  %v124_v63 = vld [vmem:[%s2828_s29 + $0x208] sm:$0xff]  ;;  %v158_v0 = vld [vmem:[%s2828_s29 + $0x318] sm:$0xff]  ;;  %v427_v8 = vld [vmem:[%s2809_s4 + $0x1f0] sm:$0xff] }
  0x49   :  { %337 = vmatpush.msrb.mxu2 %v126_v59  ;;  %356 = vmatpush.msrb.mxu3 %v160_v60  ;;  %v60_v1 = vld [vmem:[%s2828_s29 + $0x8] sm:$0xff]  ;;  %v94_v2 = vld [vmem:[%s2828_s29 + $0x118] sm:$0xff]  ;;  %v391_v11 = vld [vmem:[%s2809_s4 + $0xd0] sm:$0xff] }
  0x4a   :  { %297 = vmatpush.msrb.mxu0 %v62_v61  ;;  %316 = vmatpush.msrb.mxu1 %v96_v62  ;;  %v156_v3 = vld [vmem:[%s2828_s29 + $0x308] sm:$0xff]  ;;  %v396_v6 = vld [vmem:[%s2809_s4 + $0xf8] sm:$0xff]  ;;  %v425_v12 = vld [vmem:[%s2809_s4 + $0x1e0] sm:$0xff] }
  0x4b   :  { %338 = vmatpush.msrb.mxu2 %v124_v63  ;;  %357 = vmatpush.msrb.mxu3 %v158_v0  ;;  %v92_v4 = vld [vmem:[%s2828_s29 + $0x108] sm:$0xff]  ;;  %v428_v10 = vld [vmem:[%s2809_s4 + $0x1f8] sm:$0xff]  ;;  %v389_v15 = vld [vmem:[%s2809_s4 + $0xc0] sm:$0xff]  ;;  %s2830_s29 = sld [smem:[#allocation9_spill]] }
  0x4c   :  { %339 = vmatmul.f32.vlgmr.msrb.gmra.mxu2 %v197_v45  ;;  %298 = vmatpush.msrb.mxu0 %v60_v1  ;;  %v394_v9 = vld [vmem:[%s2809_s4 + $0xe8] sm:$0xff]  ;;  %v392_v13 = vld [vmem:[%s2809_s4 + $0xd8] sm:$0xff]  ;;  %v423_v16 = vld [vmem:[%s2809_s4 + $0x1d0] sm:$0xff] }
  0x4d   :  { %317 = vmatpush.msrb.mxu1 %v94_v2  ;;  %358 = vmatpush.msrb.mxu3 %v156_v3  ;;  %v426_v14 = vld [vmem:[%s2809_s4 + $0x1e8] sm:$0xff]  ;;  %v424_v18 = vld [vmem:[%s2809_s4 + $0x1d8] sm:$0xff]  ;;  %v387_v19 = vld [vmem:[%s2809_s4 + $0xb0] sm:$0xff] }
  0x4e   :  { %299 = vmatmul.f32.vlgmr.msrb.gmra.mxu0 %v195_v50  ;;  %359 = vmatmul.f32.vlgmr.msrb.gmra.mxu3 %v198_v51  ;;  %v390_v17 = vld [vmem:[%s2809_s4 + $0xc8] sm:$0xff]  ;;  %v421_v20 = vld [vmem:[%s2809_s4 + $0x1c0] sm:$0xff]  ;;  %v388_v21 = vld [vmem:[%s2809_s4 + $0xb8] sm:$0xff] }
  0x4f   :  { %318 = vmatpush.msrb.mxu1 %v92_v4  ;;  %435 = vmatpush.msra.mxu0 %v395_v5  ;;  %v422_v22 = vld [vmem:[%s2809_s4 + $0x1c8] sm:$0xff]  ;;  %v385_v23 = vld [vmem:[%s2809_s4 + $0xa0] sm:$0xff]  ;;  %v419_v24 = vld [vmem:[%s2809_s4 + $0x1b0] sm:$0xff] }
  0x50   :  { %319 = vmatmul.f32.vlgmr.msrb.gmra.mxu1 %v196_v56  ;;  %475 = vmatpush.msra.mxu2 %v396_v6  ;;  %v386_v25 = vld [vmem:[%s2809_s4 + $0xa8] sm:$0xff]  ;;  %v420_v26 = vld [vmem:[%s2809_s4 + $0x1b8] sm:$0xff]  ;;  %v383_v27 = vld [vmem:[%s2809_s4 + $0x90] sm:$0xff] }
  0x51   :  { %436 = vmatpush.msra.mxu0 %v393_v7  ;;  %455 = vmatpush.msra.mxu1 %v427_v8  ;;  %v417_v28 = vld [vmem:[%s2809_s4 + $0x1a0] sm:$0xff]  ;;  %v384_v29 = vld [vmem:[%s2809_s4 + $0x98] sm:$0xff]  ;;  %v418_v30 = vld [vmem:[%s2809_s4 + $0x1a8] sm:$0xff] }
  0x52   :  { %476 = vmatpush.msra.mxu2 %v394_v9  ;;  %495 = vmatpush.msra.mxu3 %v428_v10  ;;  %v381_v31 = vld [vmem:[%s2809_s4 + $0x80] sm:$0xff]  ;;  %v382_v32 = vld [vmem:[%s2809_s4 + $0x88] sm:$0xff]  ;;  %v379_v33 = vld [vmem:[%s2809_s4 + $0x70] sm:$0xff] }
  0x53   :  { %437 = vmatpush.msra.mxu0 %v391_v11  ;;  %456 = vmatpush.msra.mxu1 %v425_v12  ;;  %v380_v34 = vld [vmem:[%s2809_s4 + $0x78] sm:$0xff]  ;;  %v377_v35 = vld [vmem:[%s2809_s4 + $0x60] sm:$0xff]  ;;  %v378_v36 = vld [vmem:[%s2809_s4 + $0x68] sm:$0xff] }
  0x54   :  { %477 = vmatpush.msra.mxu2 %v392_v13  ;;  %496 = vmatpush.msra.mxu3 %v426_v14  ;;  %v375_v37 = vld [vmem:[%s2809_s4 + $0x50] sm:$0xff]  ;;  %v376_v39 = vld [vmem:[%s2809_s4 + $0x58] sm:$0xff]  ;;  %v373_v41 = vld [vmem:[%s2809_s4 + $0x40] sm:$0xff] }
  0x55   :  { %438 = vmatpush.msra.mxu0 %v389_v15  ;;  %457 = vmatpush.msra.mxu1 %v423_v16  ;;  %v415_v38 = vld [vmem:[%s2809_s4 + $0x190] sm:$0xff]  ;;  %v416_v40 = vld [vmem:[%s2809_s4 + $0x198] sm:$0xff]  ;;  %v413_v42 = vld [vmem:[%s2809_s4 + $0x180] sm:$0xff] }
  0x56   :  { %478 = vmatpush.msra.mxu2 %v390_v17  ;;  %497 = vmatpush.msra.mxu3 %v424_v18  ;;  %v374_v43 = vld [vmem:[%s2809_s4 + $0x48] sm:$0xff]  ;;  %v371_v45 = vld [vmem:[%s2809_s4 + $0x30] sm:$0xff]  ;;  %v372_v47 = vld [vmem:[%s2809_s4 + $0x38] sm:$0xff] }
  0x57   :  { %439 = vmatpush.msra.mxu0 %v387_v19  ;;  %458 = vmatpush.msra.mxu1 %v421_v20  ;;  %v414_v44 = vld [vmem:[%s2809_s4 + $0x188] sm:$0xff]  ;;  %v411_v46 = vld [vmem:[%s2809_s4 + $0x170] sm:$0xff]  ;;  %v412_v48 = vld [vmem:[%s2809_s4 + $0x178] sm:$0xff] }
  0x58   :  { %479 = vmatpush.msra.mxu2 %v388_v21  ;;  %498 = vmatpush.msra.mxu3 %v422_v22  ;;  %v369_v49 = vld [vmem:[%s2809_s4 + $0x20] sm:$0xff]  ;;  %v370_v51 = vld [vmem:[%s2809_s4 + $0x28] sm:$0xff]  ;;  %v367_v53 = vld [vmem:[%s2809_s4 + $0x10] sm:$0xff] }
  0x59   :  { %440 = vmatpush.msra.mxu0 %v385_v23  ;;  %459 = vmatpush.msra.mxu1 %v419_v24  ;;  %v409_v50 = vld [vmem:[%s2809_s4 + $0x160] sm:$0xff]  ;;  %v410_v52 = vld [vmem:[%s2809_s4 + $0x168] sm:$0xff]  ;;  %v407_v54 = vld [vmem:[%s2809_s4 + $0x150] sm:$0xff] }
  0x5a   :  { %480 = vmatpush.msra.mxu2 %v386_v25  ;;  %499 = vmatpush.msra.mxu3 %v420_v26  ;;  %v368_v55 = vld [vmem:[%s2809_s4 + $0x18] sm:$0xff]  ;;  %v365_v57 = vld [vmem:[%s2809_s4] sm:$0xff]  ;;  %v366_v59 = vld [vmem:[%s2809_s4 + $0x8] sm:$0xff] }
  0x5b   :  { %441 = vmatpush.msra.mxu0 %v383_v27  ;;  %460 = vmatpush.msra.mxu1 %v417_v28  ;;  %v408_v56 = vld [vmem:[%s2809_s4 + $0x158] sm:$0xff]  ;;  %v405_v58 = vld [vmem:[%s2809_s4 + $0x140] sm:$0xff]  ;;  %v406_v60 = vld [vmem:[%s2809_s4 + $0x148] sm:$0xff] }
  0x5c   :  { %481 = vmatpush.msra.mxu2 %v384_v29  ;;  %500 = vmatpush.msra.mxu3 %v418_v30  ;;  %v403_v61 = vld [vmem:[%s2809_s4 + $0x130] sm:$0xff]  ;;  %v404_v62 = vld [vmem:[%s2809_s4 + $0x138] sm:$0xff]  ;;  %v401_v63 = vld [vmem:[%s2809_s4 + $0x120] sm:$0xff] }
  0x5d   :  { %442 = vmatpush.msra.mxu0 %v381_v31  ;;  %461 = vmatpush.msra.mxu1 %v415_v38  ;;  %v402_v0 = vld [vmem:[%s2809_s4 + $0x128] sm:$0xff]  ;;  %v399_v1 = vld [vmem:[%s2809_s4 + $0x110] sm:$0xff]  ;;  %v400_v2 = vld [vmem:[%s2809_s4 + $0x118] sm:$0xff] }
  0x5e   :  { %482 = vmatpush.msra.mxu2 %v382_v32  ;;  %501 = vmatpush.msra.mxu3 %v416_v40  ;;  %v397_v3 = vld [vmem:[%s2809_s4 + $0x100] sm:$0xff]  ;;  %v398_v4 = vld [vmem:[%s2809_s4 + $0x108] sm:$0xff]  ;;  %v532_v5 = vld [vmem:[%s2811_s6 + $0x78] sm:$0xff] }
  0x5f   :  { %443 = vmatpush.msra.mxu0 %v379_v33  ;;  %462 = vmatpush.msra.mxu1 %v413_v42  ;;  %v608_v6 = vld [vmem:[%s2813_s8 + $0x78] sm:$0xff]  ;;  %v531_v7 = vld [vmem:[%s2811_s6 + $0x70] sm:$0xff]  ;;  %v530_v9 = vld [vmem:[%s2811_s6 + $0x68] sm:$0xff] }
  0x60   :  { %483 = vmatpush.msra.mxu2 %v380_v34  ;;  %502 = vmatpush.msra.mxu3 %v414_v44  ;;  %v607_v8 = vld [vmem:[%s2813_s8 + $0x70] sm:$0xff]  ;;  %v606_v10 = vld [vmem:[%s2813_s8 + $0x68] sm:$0xff]  ;;  %v548_v11 = vld [vmem:[%s2811_s6 + $0xf8] sm:$0xff] }
  0x61   :  { %444 = vmatpush.msra.mxu0 %v377_v35  ;;  %463 = vmatpush.msra.mxu1 %v411_v46  ;;  %v624_v12 = vld [vmem:[%s2813_s8 + $0xf8] sm:$0xff]  ;;  %v547_v13 = vld [vmem:[%s2811_s6 + $0xf0] sm:$0xff]  ;;  %v529_v14 = vld [vmem:[%s2811_s6 + $0x60] sm:$0xff] }
  0x62   :  { %484 = vmatpush.msra.mxu2 %v378_v36  ;;  %503 = vmatpush.msra.mxu3 %v412_v48  ;;  %v605_v15 = vld [vmem:[%s2813_s8 + $0x60] sm:$0xff]  ;;  %v623_v16 = vld [vmem:[%s2813_s8 + $0xf0] sm:$0xff]  ;;  %v546_v18 = vld [vmem:[%s2811_s6 + $0xe8] sm:$0xff] }
  0x63   :  { %445 = vmatpush.msra.mxu0 %v375_v37  ;;  %464 = vmatpush.msra.mxu1 %v409_v50  ;;  %v187_v17 = vld [vmem:[%s2808_s3] sm:$0x3]  ;;  %v622_v19 = vld [vmem:[%s2813_s8 + $0xe8] sm:$0xff]  ;;  %v528_v20 = vld [vmem:[%s2811_s6 + $0x58] sm:$0xff] }
  0x64   :  { %485 = vmatpush.msra.mxu2 %v376_v39  ;;  %504 = vmatpush.msra.mxu3 %v410_v52  ;;  %v604_v21 = vld [vmem:[%s2813_s8 + $0x58] sm:$0xff]  ;;  %v545_v22 = vld [vmem:[%s2811_s6 + $0xe0] sm:$0xff]  ;;  %v189_v24 = vperm.slane %v187_v17, 0  ;;  %v527_v25 = vld [vmem:[%s2811_s6 + $0x50] sm:$0xff]  ;;  %v190_v44 = vperm.slane %v187_v17, 1 }
  0x65   :  { %446 = vmatpush.msra.mxu0 %v373_v41  ;;  %465 = vmatpush.msra.mxu1 %v407_v54  ;;  %v621_v23 = vld [vmem:[%s2813_s8 + $0xe0] sm:$0xff]  ;;  %v603_v26 = vld [vmem:[%s2813_s8 + $0x50] sm:$0xff]  ;;  %v544_v27 = vld [vmem:[%s2811_s6 + $0xd8] sm:$0xff] }
  0x66   :  { %486 = vmatpush.msra.mxu2 %v374_v43  ;;  %505 = vmatpush.msra.mxu3 %v408_v56  ;;  %v620_v28 = vld [vmem:[%s2813_s8 + $0xd8] sm:$0xff]  ;;  %v526_v29 = vld [vmem:[%s2811_s6 + $0x48] sm:$0xff]  ;;  %v543_v32 = vld [vmem:[%s2811_s6 + $0xd0] sm:$0xff] }
  0x67   :  { %447 = vmatpush.msra.mxu0 %v371_v45  ;;  %466 = vmatpush.msra.mxu1 %v405_v58  ;;  %v602_v30 = vld [vmem:[%s2813_s8 + $0x48] sm:$0xff]  ;;  %v619_v33 = vld [vmem:[%s2813_s8 + $0xd0] sm:$0xff]  ;;  %v525_v35 = vld [vmem:[%s2811_s6 + $0x40] sm:$0xff] }
  0x68   :  { %487 = vmatpush.msra.mxu2 %v372_v47  ;;  %506 = vmatpush.msra.mxu3 %v406_v60  ;;  %v601_v36 = vld [vmem:[%s2813_s8 + $0x40] sm:$0xff]  ;;  %v524_v38 = vld [vmem:[%s2811_s6 + $0x38] sm:$0xff]  ;;  %v523_v56 = vld [vmem:[%s2811_s6 + $0x30] sm:$0xff] }
  0x69   :  { %448 = vmatpush.msra.mxu0 %v369_v49  ;;  %467 = vmatpush.msra.mxu1 %v403_v61  ;;  %v600_v39 = vld [vmem:[%s2813_s8 + $0x38] sm:$0xff]  ;;  %v599_v58 = vld [vmem:[%s2813_s8 + $0x30] sm:$0xff]  ;;  %v522_v60 = vld [vmem:[%s2811_s6 + $0x28] sm:$0xff] }
  0x6a   :  { %488 = vmatpush.msra.mxu2 %v370_v51  ;;  %507 = vmatpush.msra.mxu3 %v404_v62  ;;  %v541_v61 = vld [vmem:[%s2811_s6 + $0xc0] sm:$0xff]  ;;  %v598_v62 = vld [vmem:[%s2813_s8 + $0x28] sm:$0xff]  ;;  %v536_v17 = vld [vmem:[%s2811_s6 + $0x98] sm:$0xff] }
  0x6b   :  { %449 = vmatpush.msra.mxu0 %v367_v53  ;;  %468 = vmatpush.msra.mxu1 %v401_v63  ;;  %v617_v63 = vld [vmem:[%s2813_s8 + $0xc0] sm:$0xff] }
  0x6c   :  { %489 = vmatpush.msra.mxu2 %v368_v55  ;;  %508 = vmatpush.msra.mxu3 %v402_v0  ;;  %v521_v0 = vld [vmem:[%s2811_s6 + $0x20] sm:$0xff] }
  0x6d   :  { %450 = vmatpush.msra.mxu0 %v365_v57  ;;  %469 = vmatpush.msra.mxu1 %v399_v1  ;;  %v542_v57 = vld [vmem:[%s2811_s6 + $0xc8] sm:$0xff]  ;;  %v540_v1 = vld [vmem:[%s2811_s6 + $0xb8] sm:$0xff] }
  0x6e   :  { %490 = vmatpush.msra.mxu2 %v366_v59  ;;  %509 = vmatpush.msra.mxu3 %v400_v2  ;;  %v618_v59 = vld [vmem:[%s2813_s8 + $0xc8] sm:$0xff]  ;;  %v597_v2 = vld [vmem:[%s2813_s8 + $0x20] sm:$0xff] }
  0x6f   :  { %470 = vmatpush.msra.mxu1 %v397_v3  ;;  %553 = vmatpush.msrb.mxu0 %v532_v5  ;;  %v616_v3 = vld [vmem:[%s2813_s8 + $0xb8] sm:$0xff]  ;;  %v539_v5 = vld [vmem:[%s2811_s6 + $0xb0] sm:$0xff] }
  0x70   :  { %510 = vmatpush.msra.mxu3 %v398_v4  ;;  %629 = vmatpush.msrb.mxu2 %v608_v6  ;;  %v520_v4 = vld [vmem:[%s2811_s6 + $0x18] sm:$0xff] }
  0x71   :  { %554 = vmatpush.msrb.mxu0 %v531_v7  ;;  %573 = vmatpush.msrb.mxu1 %v548_v11  ;;  %v596_v6 = vld [vmem:[%s2813_s8 + $0x18] sm:$0xff]  ;;  %v615_v7 = vld [vmem:[%s2813_s8 + $0xb0] sm:$0xff]  ;;  %v614_v11 = vld [vmem:[%s2813_s8 + $0xa8] sm:$0xff] }
  0x72   :  { %630 = vmatpush.msrb.mxu2 %v607_v8  ;;  %649 = vmatpush.msrb.mxu3 %v624_v12  ;;  %v519_v8 = vld [vmem:[%s2811_s6 + $0x10] sm:$0xff]  ;;  %v518_v12 = vld [vmem:[%s2811_s6 + $0x8] sm:$0xff] }
  0x73   :  { %555 = vmatpush.msrb.mxu0 %v530_v9  ;;  %574 = vmatpush.msrb.mxu1 %v547_v13  ;;  %v538_v9 = vld [vmem:[%s2811_s6 + $0xa8] sm:$0xff]  ;;  %v537_v13 = vld [vmem:[%s2811_s6 + $0xa0] sm:$0xff] }
  0x74   :  { %631 = vmatpush.msrb.mxu2 %v606_v10  ;;  %650 = vmatpush.msrb.mxu3 %v623_v16  ;;  %v595_v10 = vld [vmem:[%s2813_s8 + $0x10] sm:$0xff]  ;;  %v517_v16 = vld [vmem:[%s2811_s6] sm:$0xff] }
  0x75   :  { %556 = vmatpush.msrb.mxu0 %v529_v14  ;;  %575 = vmatpush.msrb.mxu1 %v546_v18  ;;  %v594_v14 = vld [vmem:[%s2813_s8 + $0x8] sm:$0xff]  ;;  %v593_v18 = vld [vmem:[%s2813_s8] sm:$0xff] }
  0x76   :  { %632 = vmatpush.msrb.mxu2 %v605_v15  ;;  %651 = vmatpush.msrb.mxu3 %v622_v19  ;;  %v613_v15 = vld [vmem:[%s2813_s8 + $0xa0] sm:$0xff]  ;;  %v612_v19 = vld [vmem:[%s2813_s8 + $0x98] sm:$0xff] }
  0x77   :  { %557 = vmatpush.msrb.mxu0 %v528_v20  ;;  %576 = vmatpush.msrb.mxu1 %v545_v22  ;;  %v535_v20 = vld [vmem:[%s2811_s6 + $0x90] sm:$0xff]  ;;  %v534_v22 = vld [vmem:[%s2811_s6 + $0x88] sm:$0xff] }
  0x78   :  { %633 = vmatpush.msrb.mxu2 %v604_v21  ;;  %652 = vmatpush.msrb.mxu3 %v621_v23  ;;  %v611_v21 = vld [vmem:[%s2813_s8 + $0x90] sm:$0xff]  ;;  %v610_v23 = vld [vmem:[%s2813_s8 + $0x88] sm:$0xff] }
  0x79   :  { %558 = vmatpush.msrb.mxu0 %v527_v25  ;;  %577 = vmatpush.msrb.mxu1 %v544_v27  ;;  %v609_v25 = vld [vmem:[%s2813_s8 + $0x80] sm:$0xff] }
  0x7a   :  { %634 = vmatpush.msrb.mxu2 %v603_v26  ;;  %653 = vmatpush.msrb.mxu3 %v620_v28  ;;  %v429_v26 = vld [vmem:[%s2810_s5] sm:$0x3] }
  0x7b   :  { %559 = vmatpush.msrb.mxu0 %v526_v29  ;;  %578 = vmatpush.msrb.mxu1 %v543_v32  ;;  %v431_v27 = vperm.slane %v429_v26, 0 }
  0x7c   :  { %635 = vmatpush.msrb.mxu2 %v602_v30  ;;  %654 = vmatpush.msrb.mxu3 %v619_v33 }
  0x7d   :  { %560 = vmatpush.msrb.mxu0 %v525_v35  ;;  %579 = vmatpush.msrb.mxu1 %v542_v57  ;;  %v765_v57 = vld [vmem:[%s2817_s12 + $0xc0] sm:$0xff] }
  0x7e   :  { %636 = vmatpush.msrb.mxu2 %v601_v36  ;;  %655 = vmatpush.msrb.mxu3 %v618_v59  ;;  %v766_v59 = vld [vmem:[%s2817_s12 + $0xc8] sm:$0xff] }
  0x7f   :  { %561 = vmatpush.msrb.mxu0 %v524_v38  ;;  %580 = vmatpush.msrb.mxu1 %v541_v61  ;;  %v763_v61 = vld [vmem:[%s2817_s12 + $0xb0] sm:$0xff] }
  0x80   :  { %637 = vmatpush.msrb.mxu2 %v600_v39  ;;  %656 = vmatpush.msrb.mxu3 %v617_v63  ;;  %v680_v39 = vld [vmem:[%s2815_s10 + $0x10] sm:$0x3] }
  0x81   :  { %562 = vmatpush.msrb.mxu0 %v523_v56  ;;  %581 = vmatpush.msrb.mxu1 %v540_v1  ;;  %v796_v1 = vld [vmem:[%s2817_s12 + $0x1b8] sm:$0xff] }
  0x82   :  { %638 = vmatpush.msrb.mxu2 %v599_v58  ;;  %657 = vmatpush.msrb.mxu3 %v616_v3  ;;  %v797_v58 = vld [vmem:[%s2817_s12 + $0x1c0] sm:$0xff] }
  0x83   :  { %563 = vmatpush.msrb.mxu0 %v522_v60  ;;  %582 = vmatpush.msrb.mxu1 %v539_v5  ;;  %v798_v60 = vld [vmem:[%s2817_s12 + $0x1c8] sm:$0xff]  ;;  %v761_v3 = vld [vmem:[%s2817_s12 + $0xa0] sm:$0xff] }
  0x84   :  { %639 = vmatpush.msrb.mxu2 %v598_v62  ;;  %658 = vmatpush.msrb.mxu3 %v615_v7  ;;  %v795_v62 = vld [vmem:[%s2817_s12 + $0x1b0] sm:$0xff]  ;;  %v762_v7 = vld [vmem:[%s2817_s12 + $0xa8] sm:$0xff] }
  0x85   :  { %564 = vmatpush.msrb.mxu0 %v521_v0  ;;  %583 = vmatpush.msrb.mxu1 %v538_v9  ;;  %v764_v0 = vld [vmem:[%s2817_s12 + $0xb8] sm:$0xff] }
  0x86   :  { %640 = vmatpush.msrb.mxu2 %v597_v2  ;;  %659 = vmatpush.msrb.mxu3 %v614_v11  ;;  %v791_v11 = vld [vmem:[%s2817_s12 + $0x190] sm:$0xff] }
  0x87   :  { %565 = vmatpush.msrb.mxu0 %v520_v4  ;;  %584 = vmatpush.msrb.mxu1 %v537_v13  ;;  %v793_v4 = vld [vmem:[%s2817_s12 + $0x1a0] sm:$0xff]  ;;  %v792_v13 = vld [vmem:[%s2817_s12 + $0x198] sm:$0xff] }
  0x88   :  { %641 = vmatpush.msrb.mxu2 %v596_v6  ;;  %660 = vmatpush.msrb.mxu3 %v613_v15  ;;  %v1252_v6 = vld [vmem:[%s2814_s9] ss:$0 sm:$0xff] }
  0x89   :  { %566 = vmatpush.msrb.mxu0 %v519_v8  ;;  %585 = vmatpush.msrb.mxu1 %v536_v17  ;;  %v794_v8 = vld [vmem:[%s2817_s12 + $0x1a8] sm:$0xff]  ;;  %v789_v15 = vld [vmem:[%s2817_s12 + $0x180] sm:$0xff] }
  0x8a   :  { %642 = vmatpush.msrb.mxu2 %v595_v10  ;;  %661 = vmatpush.msrb.mxu3 %v612_v19  ;;  %v759_v10 = vld [vmem:[%s2817_s12 + $0x90] sm:$0xff]  ;;  %v758_v17 = vld [vmem:[%s2817_s12 + $0x88] sm:$0xff] }
  0x8b   :  { %567 = vmatpush.msrb.mxu0 %v518_v12  ;;  %586 = vmatpush.msrb.mxu1 %v535_v20  ;;  %v760_v12 = vld [vmem:[%s2817_s12 + $0x98] sm:$0xff]  ;;  %v755_v20 = vld [vmem:[%s2817_s12 + $0x70] sm:$0xff] }
  0x8c   :  { %643 = vmatpush.msrb.mxu2 %v594_v14  ;;  %662 = vmatpush.msrb.mxu3 %v611_v21  ;;  %v757_v14 = vld [vmem:[%s2817_s12 + $0x80] sm:$0xff]  ;;  %v787_v21 = vld [vmem:[%s2817_s12 + $0x170] sm:$0xff] }
  0x8d   :  { %568 = vmatpush.msrb.mxu0 %v517_v16  ;;  %587 = vmatpush.msrb.mxu1 %v534_v22 }
  0x8e   :  { %644 = vmatpush.msrb.mxu2 %v593_v18  ;;  %663 = vmatpush.msrb.mxu3 %v610_v23  ;;  %v790_v18 = vld [vmem:[%s2817_s12 + $0x188] sm:$0xff]  ;;  %v756_v23 = vld [vmem:[%s2817_s12 + $0x78] sm:$0xff] }
  0x90   :  { %664 = vmatpush.msrb.mxu3 %v609_v25  ;;  %v753_v25 = vld [vmem:[%s2817_s12 + $0x60] sm:$0xff] }
  0xc1   :  { %v220_v31 = vpop.f32.mrf.mxu0 }
  0xc2   :  { %v221_v34 = vadd.f32 %v220_v31, %v189_v24  ;;  %v533_v24 = vld [vmem:[%s2811_s6 + $0x80] sm:$0xff]  ;;  %v432_v31 = vperm.slane %v429_v26, 1  ;;  %s1308_s6 = smov [#allocation4]  }
  0xc3   :  { %588 = vmatpush.msrb.mxu1 %v533_v24  ;;  %v788_v24 = vld [vmem:[%s2817_s12 + $0x178] sm:$0xff]  ;;  %v785_v26 = vld [vmem:[%s2817_s12 + $0x160] sm:$0xff]  ;;  %s1225_s8 = sshll.u32 %s1308_s6, 4  ;;  %s1226_s8 = int_to_ptr.vmem [resolvable:$true] %s1225_s8 }
  0xc4   :  { %v240_v37 = vpop.f32.mrf.mxu1 }
  0xc5   :  { %v241_v40 = vadd.f32 %v240_v37, %v221_v34  ;;  %v260_v41 = vpop.f32.mrf.mxu2 }
  0xc7   :  { %v261_v42 = vadd.f32 %v260_v41, %v241_v40  ;;  %v681_v40 = vld [vmem:[%s2815_s10 + $0x18] sm:$0x3]  ;;  %v678_v41 = vld [vmem:[%s2815_s10] sm:$0xff] }
  0xc8   :  { %v280_v43 = vpop.f32.mrf.mxu3 }
  0xc9   :  { %v281_v45 = vadd.f32 %v280_v43, %v261_v42  ;;  %v679_v42 = vld [vmem:[%s2815_s10 + $0x8] sm:$0xff]  ;;  %v771_v43 = vld [vmem:[%s2817_s12 + $0xf0] sm:$0xff] }
  0xcb   :  { %v363_v46 = vmax.f32 %v281_v45, 0.0  ;;  %v300_v47 = vpop.f32.mrf.mxu0  ;;  %v772_v45 = vld [vmem:[%s2817_s12 + $0xf8] sm:$0xff] }
  0xcc   :  { %v301_v48 = vadd.f32 %v300_v47, %v190_v44  ;;  %v803_v44 = vld [vmem:[%s2817_s12 + $0x1f0] sm:$0xff]  ;;  %v804_v47 = vld [vmem:[%s2817_s12 + $0x1f8] sm:$0xff] }
  0xcd   :  { %v320_v49 = vpop.f32.mrf.mxu1  ;;  %451 = vmatmul.f32.vlgmr.msra.gmra.mxu0 %v363_v46  ;;  %491 = vmatmul.f32.vlgmr.msra.gmra.mxu2 %v363_v46  ;;  %v1251_v46 = vld [vmem:[%s2812_s7] ss:$0 sm:$0xff] }
  0xce   :  { %v321_v50 = vadd.f32 %v320_v49, %v301_v48  ;;  %1245 = vmatpush.msk.msra.mxu0 %vm692_vm0, %v680_v39  ;;  %811 = vmatpush.msra.mxu2 %v771_v43  ;;  %v769_v48 = vld [vmem:[%s2817_s12 + $0xe0] sm:$0xff]  ;;  %v747_v39 = vld [vmem:[%s2817_s12 + $0x30] sm:$0xff] }
  0xcf   :  { %v340_v51 = vpop.f32.mrf.mxu2  ;;  %v801_v49 = vld [vmem:[%s2817_s12 + $0x1e0] sm:$0xff] }
  0xd0   :  { %v341_v52 = vadd.f32 %v340_v51, %v321_v50  ;;  %714 = vmatpush.msra.mxu0 %v678_v41  ;;  %v770_v50 = vld [vmem:[%s2817_s12 + $0xe8] sm:$0xff]  ;;  %812 = vmatpush.msra.mxu2 %v769_v48  ;;  %v748_v41 = vld [vmem:[%s2817_s12 + $0x38] sm:$0xff]  ;;  %v675_v43 = vld [vmem:[%s2830_s29] sm:$0x3] }
  0xd1   :  { %v360_v53 = vpop.f32.mrf.mxu3  ;;  %v802_v51 = vld [vmem:[%s2817_s12 + $0x1e8] sm:$0xff]  ;;  %v777_v48 = vld [vmem:[%s2817_s12 + $0x120] sm:$0xff] }
  0xd2   :  { %v361_v54 = vadd.f32 %v360_v53, %v341_v52  ;;  %v767_v52 = vld [vmem:[%s2817_s12 + $0xd0] sm:$0xff] }
  0xd3   :  { %v799_v53 = vld [vmem:[%s2817_s12 + $0x1d0] sm:$0xff]  ;;  %813 = vmatpush.msra.mxu2 %v767_v52 }
  0xd4   :  { %v364_v55 = vmax.f32 %v361_v54, 0.0  ;;  %v768_v54 = vld [vmem:[%s2817_s12 + $0xd8] sm:$0xff]  ;;  %v775_v52 = vld [vmem:[%s2817_s12 + $0x110] sm:$0xff] }
  0xd5   :  { %814 = vmatpush.msra.mxu2 %v765_v57  ;;  %v742_v57 = vld [vmem:[%s2817_s12 + $0x8] sm:$0xff] }
  0xd6   :  { %471 = vmatmul.f32.vlgmr.msra.gmra.mxu1 %v364_v55  ;;  %511 = vmatmul.f32.vlgmr.msra.gmra.mxu3 %v364_v55  ;;  %v800_v55 = vld [vmem:[%s2817_s12 + $0x1d8] sm:$0xff] }
  0xd7   :  { %1247 = vmatpush.msk.msra.mxu1 %vm692_vm0, %v681_v40  ;;  %831 = vmatpush.msra.mxu3 %v803_v44  ;;  %v779_v40 = vld [vmem:[%s2817_s12 + $0x130] sm:$0xff] }
  0xd8   :  { %815 = vmatpush.msra.mxu2 %v763_v61  ;;  %v1013_v61 = vld [vmem:[%s2819_s14 + $0x3c0] sm:$0xff] }
  0xd9   :  { %734 = vmatpush.msra.mxu1 %v679_v42  ;;  %832 = vmatpush.msra.mxu3 %v801_v49  ;;  %v780_v42 = vld [vmem:[%s2817_s12 + $0x138] sm:$0xff]  ;;  %v746_v49 = vld [vmem:[%s2817_s12 + $0x28] sm:$0xff] }
  0xda   :  { %816 = vmatpush.msra.mxu2 %v761_v3  ;;  %v949_v3 = vld [vmem:[%s2819_s14 + $0x1c0] sm:$0xff] }
  0xdb   :  { %833 = vmatpush.msra.mxu3 %v799_v53  ;;  %v744_v53 = vld [vmem:[%s2817_s12 + $0x18] sm:$0xff] }
  0xdc   :  { %817 = vmatpush.msra.mxu2 %v759_v10  ;;  %v1002_v10 = vld [vmem:[%s2819_s14 + $0x368] sm:$0xff] }
  0xdd   :  { %834 = vmatpush.msra.mxu3 %v797_v58  ;;  %v774_v58 = vld [vmem:[%s2817_s12 + $0x108] sm:$0xff] }
  0xde   :  { %818 = vmatpush.msra.mxu2 %v757_v14  ;;  %v998_v14 = vld [vmem:[%s2819_s14 + $0x348] sm:$0xff] }
  0xdf   :  { %835 = vmatpush.msra.mxu3 %v795_v62  ;;  %v1014_v62 = vld [vmem:[%s2819_s14 + $0x3c8] sm:$0xff] }
  0xe0   :  { %819 = vmatpush.msra.mxu2 %v755_v20  ;;  %v934_v20 = vld [vmem:[%s2819_s14 + $0x148] sm:$0xff] }
  0xe1   :  { %836 = vmatpush.msra.mxu3 %v793_v4  ;;  %v1005_v4 = vld [vmem:[%s2819_s14 + $0x380] sm:$0xff] }
  0xe2   :  { %820 = vmatpush.msra.mxu2 %v753_v25  ;;  %v985_v25 = vld [vmem:[%s2819_s14 + $0x2e0] sm:$0xff] }
  0xe3   :  { %837 = vmatpush.msra.mxu3 %v791_v11  ;;  %v941_v11 = vld [vmem:[%s2819_s14 + $0x180] sm:$0xff] }
  0xe5   :  { %838 = vmatpush.msra.mxu3 %v789_v15  ;;  %v937_v15 = vld [vmem:[%s2819_s14 + $0x160] sm:$0xff] }
  0xe7   :  { %839 = vmatpush.msra.mxu3 %v787_v21  ;;  %v989_v21 = vld [vmem:[%s2819_s14 + $0x300] sm:$0xff] }
  0xe9   :  { %840 = vmatpush.msra.mxu3 %v785_v26  ;;  %v986_v26 = vld [vmem:[%s2819_s14 + $0x2e8] sm:$0xff] }
 0x14a   :  { %v452_v28 = vpop.f32.mrf.mxu0 }
 0x14b   :  { %v453_v29 = vadd.f32 %v452_v28, %v431_v27  ;;  %v754_v28 = vld [vmem:[%s2817_s12 + $0x68] sm:$0xff] }
 0x150   :  { %v492_v33 = vpop.f32.mrf.mxu2 }
 0x151   :  { %v493_v35 = vadd.f32 %v492_v33, %v432_v31  ;;  %v783_v31 = vld [vmem:[%s2817_s12 + $0x150] sm:$0xff]  ;;  %v752_v33 = vld [vmem:[%s2817_s12 + $0x58] sm:$0xff] }
 0x152   :  { %841 = vmatpush.msra.mxu3 %v783_v31  ;;  %v921_v31 = vld [vmem:[%s2819_s14 + $0xe0] sm:$0xff] }
 0x153   :  { %v472_v30 = vpop.f32.mrf.mxu1 }
 0x154   :  { %v473_v32 = vadd.f32 %v472_v30, %v453_v29  ;;  %v786_v29 = vld [vmem:[%s2817_s12 + $0x168] sm:$0xff]  ;;  %v751_v30 = vld [vmem:[%s2817_s12 + $0x50] sm:$0xff] }
 0x155   :  { %821 = vmatpush.msra.mxu2 %v751_v30  ;;  %v982_v30 = vld [vmem:[%s2819_s14 + $0x2c8] sm:$0xff] }
 0x156   :  { %v515_v34 = vmax.f32 %v473_v32, 0.0 }
 0x158   :  { %569 = vmatmul.f32.vlgmr.msrb.gmra.mxu0 %v515_v34  ;;  %645 = vmatmul.f32.vlgmr.msrb.gmra.mxu2 %v515_v34  ;;  %v784_v34 = vld [vmem:[%s2817_s12 + $0x158] sm:$0xff] }
 0x159   :  { %v512_v36 = vpop.f32.mrf.mxu3  ;;  %851 = vmatpush.msrb.mxu0 %v772_v45 }
 0x15a   :  { %v513_v37 = vadd.f32 %v512_v36, %v493_v35  ;;  %v749_v35 = vld [vmem:[%s2817_s12 + $0x40] sm:$0xff] }
 0x15b   :  { %852 = vmatpush.msrb.mxu0 %v770_v50  ;;  %v781_v36 = vld [vmem:[%s2817_s12 + $0x140] sm:$0xff]  ;;  %822 = vmatpush.msra.mxu2 %v749_v35  ;;  %v778_v50 = vld [vmem:[%s2817_s12 + $0x128] sm:$0xff] }
 0x15c   :  { %v516_v38 = vmax.f32 %v513_v37, 0.0  ;;  %v750_v37 = vld [vmem:[%s2817_s12 + $0x48] sm:$0xff]  ;;  %842 = vmatpush.msra.mxu3 %v781_v36  ;;  %v917_v35 = vld [vmem:[%s2819_s14 + $0xc0] sm:$0xff] }
 0x15d   :  { %853 = vmatpush.msrb.mxu0 %v768_v54  ;;  %823 = vmatpush.msra.mxu2 %v747_v39  ;;  %v776_v54 = vld [vmem:[%s2817_s12 + $0x118] sm:$0xff]  ;;  %v918_v36 = vld [vmem:[%s2819_s14 + $0xc8] sm:$0xff] }
 0x15e   :  { %589 = vmatmul.f32.vlgmr.msrb.gmra.mxu1 %v516_v38  ;;  %665 = vmatmul.f32.vlgmr.msrb.gmra.mxu3 %v516_v38  ;;  %v782_v38 = vld [vmem:[%s2817_s12 + $0x148] sm:$0xff] }
 0x15f   :  { %871 = vmatpush.msrb.mxu1 %v804_v47  ;;  %854 = vmatpush.msrb.mxu0 %v766_v59  ;;  %v745_v47 = vld [vmem:[%s2817_s12 + $0x20] sm:$0xff]  ;;  %v974_v39 = vld [vmem:[%s2819_s14 + $0x288] sm:$0xff] }
 0x160   :  { %843 = vmatpush.msra.mxu3 %v779_v40  ;;  %824 = vmatpush.msra.mxu2 %v745_v47  ;;  %v1017_v59 = vld [vmem:[%s2819_s14 + $0x3e0] sm:$0xff]  ;;  %v910_v47 = vld [vmem:[%s2819_s14 + $0x88] sm:$0xff] }
 0x161   :  { %872 = vmatpush.msrb.mxu1 %v802_v51  ;;  %855 = vmatpush.msrb.mxu0 %v764_v0  ;;  %v743_v51 = vld [vmem:[%s2817_s12 + $0x10] sm:$0xff]  ;;  %v1010_v0 = vld [vmem:[%s2819_s14 + $0x3a8] sm:$0xff]  ;;  %v913_v40 = vld [vmem:[%s2819_s14 + $0xa0] sm:$0xff] }
 0x162   :  { %844 = vmatpush.msra.mxu3 %v777_v48  ;;  %825 = vmatpush.msra.mxu2 %v743_v51  ;;  %v965_v48 = vld [vmem:[%s2819_s14 + $0x240] sm:$0xff]  ;;  %v906_v51 = vld [vmem:[%s2819_s14 + $0x68] sm:$0xff] }
 0x163   :  { %873 = vmatpush.msrb.mxu1 %v800_v55  ;;  %856 = vmatpush.msrb.mxu0 %v762_v7  ;;  %v741_v55 = vld [vmem:[%s2817_s12] sm:$0xff] }
 0x164   :  { %845 = vmatpush.msra.mxu3 %v775_v52  ;;  %826 = vmatpush.msra.mxu2 %v741_v55  ;;  %v945_v7 = vld [vmem:[%s2819_s14 + $0x1a0] sm:$0xff]  ;;  %v962_v55 = vld [vmem:[%s2819_s14 + $0x228] sm:$0xff] }
 0x165   :  { %874 = vmatpush.msrb.mxu1 %v798_v60  ;;  %857 = vmatpush.msrb.mxu0 %v760_v12  ;;  %v1018_v60 = vld [vmem:[%s2819_s14 + $0x3e8] sm:$0xff] }
 0x166   :  { %v942_v12 = vld [vmem:[%s2819_s14 + $0x188] sm:$0xff] }
 0x167   :  { %875 = vmatpush.msrb.mxu1 %v796_v1  ;;  %858 = vmatpush.msrb.mxu0 %v758_v17  ;;  %v953_v1 = vld [vmem:[%s2819_s14 + $0x1e0] sm:$0xff] }
 0x168   :  { %1031 = vmatpush.msrb.mxu2 %v953_v1  ;;  %v993_v17 = vld [vmem:[%s2819_s14 + $0x320] sm:$0xff]  ;;  %v1020_v1 = vld [vmem:[%s2819_s14 + $0x3f8] sm:$0xff] }
 0x169   :  { %876 = vmatpush.msrb.mxu1 %v794_v8  ;;  %859 = vmatpush.msrb.mxu0 %v756_v23  ;;  %v946_v8 = vld [vmem:[%s2819_s14 + $0x1a8] sm:$0xff]  ;;  %v929_v23 = vld [vmem:[%s2819_s14 + $0x120] sm:$0xff] }
 0x16a   :  { %1032 = vmatpush.msrb.mxu2 %v949_v3  ;;  %v898_v3 = vld [vmem:[%s2819_s14 + $0x28] sm:$0xff] }
 0x16b   :  { %877 = vmatpush.msrb.mxu1 %v792_v13  ;;  %860 = vmatpush.msrb.mxu0 %v754_v28  ;;  %v997_v13 = vld [vmem:[%s2819_s14 + $0x340] sm:$0xff]  ;;  %v926_v28 = vld [vmem:[%s2819_s14 + $0x108] sm:$0xff] }
 0x16c   :  { %1033 = vmatpush.msrb.mxu2 %v945_v7  ;;  %v894_v7 = vld [vmem:[%s2819_s14 + $0x8] sm:$0xff] }
 0x16d   :  { %878 = vmatpush.msrb.mxu1 %v790_v18  ;;  %861 = vmatpush.msrb.mxu0 %v752_v33  ;;  %v994_v18 = vld [vmem:[%s2819_s14 + $0x328] sm:$0xff]  ;;  %v977_v33 = vld [vmem:[%s2819_s14 + $0x2a0] sm:$0xff] }
 0x16e   :  { %1034 = vmatpush.msrb.mxu2 %v941_v11  ;;  %v956_v11 = vld [vmem:[%s2819_s14 + $0x1f8] sm:$0xff] }
 0x16f   :  { %879 = vmatpush.msrb.mxu1 %v788_v24  ;;  %862 = vmatpush.msrb.mxu0 %v750_v37  ;;  %v930_v24 = vld [vmem:[%s2819_s14 + $0x128] sm:$0xff]  ;;  %v682_v37 = vld [vmem:[%s2816_s11] sm:$0x3] }
 0x170   :  { %1035 = vmatpush.msrb.mxu2 %v937_v15  ;;  %v952_v15 = vld [vmem:[%s2819_s14 + $0x1d8] sm:$0xff] }
 0x171   :  { %880 = vmatpush.msrb.mxu1 %v786_v29  ;;  %863 = vmatpush.msrb.mxu0 %v748_v41  ;;  %v981_v29 = vld [vmem:[%s2819_s14 + $0x2c0] sm:$0xff]  ;;  %v914_v41 = vld [vmem:[%s2819_s14 + $0xa8] sm:$0xff] }
 0x173   :  { %881 = vmatpush.msrb.mxu1 %v784_v34  ;;  %864 = vmatpush.msrb.mxu0 %v746_v49  ;;  %v978_v34 = vld [vmem:[%s2819_s14 + $0x2a8] sm:$0xff] }
 0x174   :  { %v966_v49 = vld [vmem:[%s2819_s14 + $0x248] sm:$0xff] }
 0x175   :  { %882 = vmatpush.msrb.mxu1 %v782_v38  ;;  %865 = vmatpush.msrb.mxu0 %v744_v53  ;;  %v973_v38 = vld [vmem:[%s2819_s14 + $0x280] sm:$0xff] }
 0x177   :  { %883 = vmatpush.msrb.mxu1 %v780_v42  ;;  %866 = vmatpush.msrb.mxu0 %v742_v57  ;;  %v969_v42 = vld [vmem:[%s2819_s14 + $0x260] sm:$0xff] }
 0x179   :  { %884 = vmatpush.msrb.mxu1 %v778_v50  ;;  %v905_v50 = vld [vmem:[%s2819_s14 + $0x60] sm:$0xff] }
 0x17b   :  { %885 = vmatpush.msrb.mxu1 %v776_v54  ;;  %v961_v54 = vld [vmem:[%s2819_s14 + $0x220] sm:$0xff] }
 0x17d   :  { %886 = vmatpush.msrb.mxu1 %v774_v58  ;;  %v901_v58 = vld [vmem:[%s2819_s14 + $0x40] sm:$0xff] }
 0x1d5   :  { %v570_v56 = vpop.f32.mrf.mxu0 }
 0x1d6   :  { %v571_v63 = vadd.f32 %v1251_v46, %v570_v56  ;;  %v773_v56 = vld [vmem:[%s2817_s12 + $0x100] sm:$0xff] }
 0x1d7   :  { %846 = vmatpush.msra.mxu3 %v773_v56 }
 0x1d9   :  { %1051 = vmatpush.msrb.mxu3 %v1017_v59  ;;  %v902_v59 = vld [vmem:[%s2819_s14 + $0x48] sm:$0xff] }
 0x1db   :  { %v590_v2 = vpop.f32.mrf.mxu1  ;;  %v646_v9 = vpop.f32.mrf.mxu2  ;;  %1052 = vmatpush.msrb.mxu3 %v1013_v61 }
 0x1dc   :  { %v2264_v5 = vadd.f32 %v590_v2, %v571_v63  ;;  %v647_v16 = vadd.f32 %v1252_v6, %v646_v9  ;;  %v1009_v63 = vld [vmem:[%s2819_s14 + $0x3a0] sm:$0xff]  ;;  %v954_v2 = vld [vmem:[%s2819_s14 + $0x1e8] sm:$0xff] }
 0x1dd   :  { %v950_v6 = vld [vmem:[%s2819_s14 + $0x1c8] sm:$0xff]  ;;  %1053 = vmatpush.msrb.mxu3 %v1009_v63  ;;  %v1001_v9 = vld [vmem:[%s2819_s14 + $0x360] sm:$0xff] }
 0x1de   :  { %670 = vst.msk [vmem:[#allocation2] sm:$0x3] %vm669_vm1, %v2264_v5  ;;  %v958_v63 = vld [vmem:[%s2819_s14 + $0x208] sm:$0xff] }
 0x1df   :  { %1054 = vmatpush.msrb.mxu3 %v1005_v4  ;;  %v1015_v4 = vld [vmem:[%s2819_s14 + $0x3d0] sm:$0xff] }
 0x1e1   :  { %v666_v19 = vpop.f32.mrf.mxu3  ;;  %1055 = vmatpush.msrb.mxu3 %v1001_v9  ;;  %v1012_v9 = vld [vmem:[%s2819_s14 + $0x3b8] sm:$0xff] }
 0x1e2   :  { %v667_v22 = vadd.f32 %v666_v19, %v647_v16  ;;  %v938_v16 = vld [vmem:[%s2819_s14 + $0x168] sm:$0xff]  ;;  %v933_v19 = vld [vmem:[%s2819_s14 + $0x140] sm:$0xff] }
 0x1e3   :  { %1056 = vmatpush.msrb.mxu3 %v997_v13  ;;  %1036 = vmatpush.msrb.mxu2 %v933_v19  ;;  %v1008_v13 = vld [vmem:[%s2819_s14 + $0x398] sm:$0xff] }
 0x1e4   :  { %671 = vst.msk [vmem:[#allocation4] sm:$0x3] %vm669_vm1, %v667_v22  ;;  %v672_v27 = vmul.f32 0.5, %v667_v22  ;;  %v990_v22 = vld [vmem:[%s2819_s14 + $0x308] sm:$0xff]  ;;  %v948_v19 = vld [vmem:[%s2819_s14 + $0x1b8] sm:$0xff] }
 0x1e5   :  { %1057 = vmatpush.msrb.mxu3 %v993_v17  ;;  %1037 = vmatpush.msrb.mxu2 %v929_v23  ;;  %v1004_v17 = vld [vmem:[%s2819_s14 + $0x378] sm:$0xff]  ;;  %1230 = dma.vmem_to_hbm [thread:$0]  %s1226_s8, 32, %s1228_s26, [#allocation5]  }
 0x1e6   :  { %v673_v32 = vmul.f32 1.442695, %v672_v27  ;;  %v925_v27 = vld [vmem:[%s2819_s14 + $0x100] sm:$0xff]  ;;  %v944_v23 = vld [vmem:[%s2819_s14 + $0x198] sm:$0xff] }
 0x1e7   :  { %1058 = vmatpush.msrb.mxu3 %v989_v21  ;;  %1038 = vmatpush.msrb.mxu2 %v925_v27  ;;  %v1000_v21 = vld [vmem:[%s2819_s14 + $0x358] sm:$0xff] }
 0x1e8   :  { %1253 = vpow2.f32 %v673_v32  ;;  %v922_v32 = vld [vmem:[%s2819_s14 + $0xe8] sm:$0xff]  ;;  %v940_v27 = vld [vmem:[%s2819_s14 + $0x178] sm:$0xff] }
 0x1e9   :  { %1059 = vmatpush.msrb.mxu3 %v985_v25  ;;  %1039 = vmatpush.msrb.mxu2 %v921_v31  ;;  %v996_v25 = vld [vmem:[%s2819_s14 + $0x338] sm:$0xff]  ;;  %v987_v31 = vld [vmem:[%s2819_s14 + $0x2f0] sm:$0xff] }
 0x1eb   :  { %1060 = vmatpush.msrb.mxu3 %v981_v29  ;;  %1040 = vmatpush.msrb.mxu2 %v917_v35  ;;  %v992_v29 = vld [vmem:[%s2819_s14 + $0x318] sm:$0xff]  ;;  %v983_v35 = vld [vmem:[%s2819_s14 + $0x2d0] sm:$0xff] }
 0x1ed   :  { %1061 = vmatpush.msrb.mxu3 %v977_v33  ;;  %1041 = vmatpush.msrb.mxu2 %v913_v40  ;;  %v988_v33 = vld [vmem:[%s2819_s14 + $0x2f8] sm:$0xff] }
 0x1ee   :  { %v1254_v44 = vpop.eup %1253  ;;  %v928_v40 = vld [vmem:[%s2819_s14 + $0x118] sm:$0xff] }
 0x1ef   :  { %v676_v45 = vmul.f32 %v1254_v44, %v675_v43  ;;  %v970_v43 = vld [vmem:[%s2819_s14 + $0x268] sm:$0xff]  ;;  %v684_v44 = vperm.slane %v682_v37, 0  ;;  %1062 = vmatpush.msrb.mxu3 %v973_v38  ;;  %v927_v38 = vld [vmem:[%s2819_s14 + $0x110] sm:$0xff] }
 0x1f1   :  { %v677_v46 = vadd.f32 %v676_v45, %v2264_v5  ;;  %v1006_v5 = vld [vmem:[%s2819_s14 + $0x388] sm:$0xff]  ;;  %v685_v45 = vperm.slane %v682_v37, 1  ;;  %1063 = vmatpush.msrb.mxu3 %v969_v42  ;;  %v984_v37 = vld [vmem:[%s2819_s14 + $0x2d8] sm:$0xff]  ;;  %v923_v42 = vld [vmem:[%s2819_s14 + $0xf0] sm:$0xff] }
 0x1f3   :  { %1246 = vmatmul.msk.f32.vlgmr.msra.gmra.mxu0 %vm688_vm2, %v677_v46  ;;  %1248 = vmatmul.msk.f32.vlgmr.msra.gmra.mxu1 %vm688_vm2, %v677_v46  ;;  %v909_v46 = vld [vmem:[%s2819_s14 + $0x80] sm:$0xff] }
 0x1f4   :  { %1091 = vmatpush.msra.mxu1 %v1018_v60  ;;  %1071 = vmatpush.msra.mxu0 %v954_v2  ;;  %v897_v2 = vld [vmem:[%s2819_s14 + $0x20] sm:$0xff] }
 0x1f5   :  { %1042 = vmatpush.msrb.mxu2 %v909_v46  ;;  %1064 = vmatpush.msrb.mxu3 %v965_v48  ;;  %v919_v46 = vld [vmem:[%s2819_s14 + $0xd0] sm:$0xff]  ;;  %v920_v48 = vld [vmem:[%s2819_s14 + $0xd8] sm:$0xff] }
 0x1f6   :  { %1092 = vmatpush.msra.mxu1 %v1014_v62  ;;  %1072 = vmatpush.msra.mxu0 %v950_v6  ;;  %v957_v62 = vld [vmem:[%s2819_s14 + $0x200] sm:$0xff] }
 0x1f7   :  { %1043 = vmatpush.msrb.mxu2 %v905_v50  ;;  %1065 = vmatpush.msrb.mxu3 %v961_v54  ;;  %v893_v6 = vld [vmem:[%s2819_s14] sm:$0xff]  ;;  %v915_v50 = vld [vmem:[%s2819_s14 + $0xb0] sm:$0xff] }
 0x1f8   :  { %1093 = vmatpush.msra.mxu1 %v1010_v0  ;;  %1073 = vmatpush.msra.mxu0 %v946_v8  ;;  %v1019_v0 = vld [vmem:[%s2819_s14 + $0x3f0] sm:$0xff] }
 0x1f9   :  { %1044 = vmatpush.msrb.mxu2 %v901_v58  ;;  %1066 = vmatpush.msrb.mxu3 %v957_v62  ;;  %v1011_v8 = vld [vmem:[%s2819_s14 + $0x3b0] sm:$0xff] }
 0x1fa   :  { %1094 = vmatpush.msra.mxu1 %v1006_v5  ;;  %1074 = vmatpush.msra.mxu0 %v942_v12  ;;  %v1016_v5 = vld [vmem:[%s2819_s14 + $0x3d8] sm:$0xff]  ;;  %v1007_v12 = vld [vmem:[%s2819_s14 + $0x390] sm:$0xff] }
 0x1fb   :  { %1045 = vmatpush.msrb.mxu2 %v897_v2  ;;  %v911_v54 = vld [vmem:[%s2819_s14 + $0x90] sm:$0xff] }
 0x1fc   :  { %1095 = vmatpush.msra.mxu1 %v1002_v10  ;;  %1075 = vmatpush.msra.mxu0 %v938_v16  ;;  %v955_v10 = vld [vmem:[%s2819_s14 + $0x1f0] sm:$0xff] }
 0x1fd   :  { %1046 = vmatpush.msrb.mxu2 %v893_v6  ;;  %v1003_v16 = vld [vmem:[%s2819_s14 + $0x370] sm:$0xff] }
 0x1fe   :  { %1096 = vmatpush.msra.mxu1 %v998_v14  ;;  %1076 = vmatpush.msra.mxu0 %v934_v20  ;;  %v951_v14 = vld [vmem:[%s2819_s14 + $0x1d0] sm:$0xff] }
 0x1ff   :  { %v999_v20 = vld [vmem:[%s2819_s14 + $0x350] sm:$0xff] }
 0x200   :  { %1097 = vmatpush.msra.mxu1 %v994_v18  ;;  %1077 = vmatpush.msra.mxu0 %v930_v24  ;;  %v947_v18 = vld [vmem:[%s2819_s14 + $0x1b0] sm:$0xff] }
 0x201   :  { %v995_v24 = vld [vmem:[%s2819_s14 + $0x330] sm:$0xff] }
 0x202   :  { %1098 = vmatpush.msra.mxu1 %v990_v22  ;;  %1078 = vmatpush.msra.mxu0 %v926_v28  ;;  %v943_v22 = vld [vmem:[%s2819_s14 + $0x190] sm:$0xff] }
 0x203   :  { %v991_v28 = vld [vmem:[%s2819_s14 + $0x310] sm:$0xff] }
 0x204   :  { %1099 = vmatpush.msra.mxu1 %v986_v26  ;;  %1079 = vmatpush.msra.mxu0 %v922_v32  ;;  %v939_v26 = vld [vmem:[%s2819_s14 + $0x170] sm:$0xff]  ;;  %v936_v32 = vld [vmem:[%s2819_s14 + $0x158] sm:$0xff] }
 0x205   :  { %v907_v58 = vld [vmem:[%s2819_s14 + $0x70] sm:$0xff] }
 0x206   :  { %1100 = vmatpush.msra.mxu1 %v982_v30  ;;  %1080 = vmatpush.msra.mxu0 %v918_v36  ;;  %v935_v30 = vld [vmem:[%s2819_s14 + $0x150] sm:$0xff]  ;;  %v932_v36 = vld [vmem:[%s2819_s14 + $0x138] sm:$0xff] }
 0x207   :  { %v903_v62 = vld [vmem:[%s2819_s14 + $0x50] sm:$0xff] }
 0x208   :  { %1101 = vmatpush.msra.mxu1 %v978_v34  ;;  %1081 = vmatpush.msra.mxu0 %v914_v41  ;;  %v931_v34 = vld [vmem:[%s2819_s14 + $0x130] sm:$0xff]  ;;  %v980_v41 = vld [vmem:[%s2819_s14 + $0x2b8] sm:$0xff] }
 0x209   :  { %v895_v2 = vld [vmem:[%s2819_s14 + $0x10] sm:$0xff] }
 0x20a   :  { %1102 = vmatpush.msra.mxu1 %v974_v39  ;;  %1082 = vmatpush.msra.mxu0 %v910_v47  ;;  %v979_v39 = vld [vmem:[%s2819_s14 + $0x2b0] sm:$0xff] }
 0x20b   :  { %v971_v47 = vld [vmem:[%s2819_s14 + $0x270] sm:$0xff] }
 0x20c   :  { %1103 = vmatpush.msra.mxu1 %v970_v43  ;;  %1083 = vmatpush.msra.mxu0 %v906_v51  ;;  %v975_v43 = vld [vmem:[%s2819_s14 + $0x290] sm:$0xff] }
 0x20d   :  { %v967_v51 = vld [vmem:[%s2819_s14 + $0x250] sm:$0xff] }
 0x20e   :  { %1104 = vmatpush.msra.mxu1 %v966_v49  ;;  %1084 = vmatpush.msra.mxu0 %v902_v59  ;;  %v972_v49 = vld [vmem:[%s2819_s14 + $0x278] sm:$0xff]  ;;  %v959_v59 = vld [vmem:[%s2819_s14 + $0x210] sm:$0xff] }
 0x210   :  { %1105 = vmatpush.msra.mxu1 %v962_v55  ;;  %1085 = vmatpush.msra.mxu0 %v898_v3  ;;  %v963_v55 = vld [vmem:[%s2819_s14 + $0x230] sm:$0xff]  ;;  %v896_v3 = vld [vmem:[%s2819_s14 + $0x18] sm:$0xff] }
 0x212   :  { %1106 = vmatpush.msra.mxu1 %v958_v63  ;;  %1086 = vmatpush.msra.mxu0 %v894_v7  ;;  %v904_v63 = vld [vmem:[%s2819_s14 + $0x58] sm:$0xff] }
 0x270   :  { %v716_v52 = vpop.f32.mrf.mxu0  ;;  %v736_v53 = vpop.f32.mrf.mxu1 }
 0x271   :  { %v717_v56 = vadd.f32 %v716_v52, %v684_v44  ;;  %v737_v57 = vadd.f32 %v736_v53, %v685_v45  ;;  %v924_v44 = vld [vmem:[%s2819_s14 + $0xf8] sm:$0xff] }
 0x272   :  { %v976_v45 = vld [vmem:[%s2819_s14 + $0x298] sm:$0xff] }
 0x273   :  { %v739_v60 = vmax.f32 %v717_v56, 0.0  ;;  %v740_v61 = vmax.f32 %v737_v57, 0.0  ;;  %v916_v52 = vld [vmem:[%s2819_s14 + $0xb8] sm:$0xff] }
 0x274   :  { %v968_v53 = vld [vmem:[%s2819_s14 + $0x258] sm:$0xff] }
 0x275   :  { %827 = vmatmul.f32.vlgmr.msra.gmra.mxu2 %v739_v60  ;;  %847 = vmatmul.f32.vlgmr.msra.gmra.mxu3 %v740_v61  ;;  %v912_v56 = vld [vmem:[%s2819_s14 + $0x98] sm:$0xff] }
 0x276   :  { %867 = vmatmul.f32.vlgmr.msrb.gmra.mxu0 %v739_v60  ;;  %887 = vmatmul.f32.vlgmr.msrb.gmra.mxu1 %v740_v61  ;;  %v964_v57 = vld [vmem:[%s2819_s14 + $0x238] sm:$0xff] }
 0x277   :  { %1131 = vmatpush.msra.mxu3 %v1019_v0  ;;  %1171 = vmatpush.msrb.mxu1 %v1020_v1  ;;  %v908_v60 = vld [vmem:[%s2819_s14 + $0x78] sm:$0xff]  ;;  %v899_v0 = vld [vmem:[%s2819_s14 + $0x30] sm:$0xff] }
 0x278   :  { %1111 = vmatpush.msra.mxu2 %v955_v10  ;;  %1151 = vmatpush.msrb.mxu0 %v956_v11  ;;  %v960_v61 = vld [vmem:[%s2819_s14 + $0x218] sm:$0xff] }
 0x279   :  { %1132 = vmatpush.msra.mxu3 %v1015_v4  ;;  %1172 = vmatpush.msrb.mxu1 %v1016_v5  ;;  %v900_v1 = vld [vmem:[%s2819_s14 + $0x38] sm:$0xff]  ;;  %v805_v4 = vld [vmem:[%s2818_s13] sm:$0x3]  ;;  %s1307_s13 = smov [#allocation2]  }
 0x27a   :  { %1112 = vmatpush.msra.mxu2 %v951_v14  ;;  %1152 = vmatpush.msrb.mxu0 %v952_v15  ;;  %v808_v5 = vperm.slane %v805_v4, 1  ;;  %s1214_s14 = sshll.u32 %s1307_s13, 4  ;;  %s1215_s14 = int_to_ptr.vmem [resolvable:$true] %s1214_s14 }
 0x27b   :  { %1133 = vmatpush.msra.mxu3 %v1011_v8  ;;  %1173 = vmatpush.msrb.mxu1 %v1012_v9  ;;  %v807_v9 = vperm.slane %v805_v4, 0  ;;  %1219 = dma.vmem_to_hbm [thread:$0]  %s1215_s14, 32, %s1217_s25, [#allocation3]  }
 0x27c   :  { %1113 = vmatpush.msra.mxu2 %v947_v18  ;;  %1153 = vmatpush.msrb.mxu0 %v948_v19  ;;  %v1021_v19 = vld [vmem:[%s2820_s15] sm:$0xf] }
 0x27d   :  { %1134 = vmatpush.msra.mxu3 %v1007_v12  ;;  %1174 = vmatpush.msrb.mxu1 %v1008_v13 }
 0x27e   :  { %1114 = vmatpush.msra.mxu2 %v943_v22  ;;  %1154 = vmatpush.msrb.mxu0 %v944_v23 }
 0x27f   :  { %1135 = vmatpush.msra.mxu3 %v1003_v16  ;;  %1175 = vmatpush.msrb.mxu1 %v1004_v17 }
 0x280   :  { %1115 = vmatpush.msra.mxu2 %v939_v26  ;;  %1155 = vmatpush.msrb.mxu0 %v940_v27 }
 0x281   :  { %1136 = vmatpush.msra.mxu3 %v999_v20  ;;  %1176 = vmatpush.msrb.mxu1 %v1000_v21  ;;  %v1024_v20 = vperm.slane %v1021_v19, 1  ;;  %v1026_v21 = vperm.slane %v1021_v19, 3 }
 0x282   :  { %1116 = vmatpush.msra.mxu2 %v935_v30  ;;  %1156 = vmatpush.msrb.mxu0 %v936_v32 }
 0x283   :  { %1137 = vmatpush.msra.mxu3 %v995_v24  ;;  %1177 = vmatpush.msrb.mxu1 %v996_v25  ;;  %v1023_v24 = vperm.slane %v1021_v19, 0 }
 0x284   :  { %1117 = vmatpush.msra.mxu2 %v931_v34  ;;  %1157 = vmatpush.msrb.mxu0 %v932_v36 }
 0x285   :  { %1138 = vmatpush.msra.mxu3 %v991_v28  ;;  %1178 = vmatpush.msrb.mxu1 %v992_v29  ;;  %v1025_v29 = vperm.slane %v1021_v19, 2 }
 0x286   :  { %1118 = vmatpush.msra.mxu2 %v927_v38  ;;  %1158 = vmatpush.msrb.mxu0 %v928_v40 }
 0x287   :  { %1139 = vmatpush.msra.mxu3 %v987_v31  ;;  %1179 = vmatpush.msrb.mxu1 %v988_v33 }
 0x288   :  { %1119 = vmatpush.msra.mxu2 %v923_v42  ;;  %1159 = vmatpush.msrb.mxu0 %v924_v44 }
 0x289   :  { %1140 = vmatpush.msra.mxu3 %v983_v35  ;;  %1180 = vmatpush.msrb.mxu1 %v984_v37 }
 0x28a   :  { %1120 = vmatpush.msra.mxu2 %v919_v46  ;;  %1160 = vmatpush.msrb.mxu0 %v920_v48 }
 0x28b   :  { %1141 = vmatpush.msra.mxu3 %v979_v39  ;;  %1181 = vmatpush.msrb.mxu1 %v980_v41 }
 0x28c   :  { %1121 = vmatpush.msra.mxu2 %v915_v50  ;;  %1161 = vmatpush.msrb.mxu0 %v916_v52 }
 0x28d   :  { %1142 = vmatpush.msra.mxu3 %v975_v43  ;;  %1182 = vmatpush.msrb.mxu1 %v976_v45 }
 0x28e   :  { %1122 = vmatpush.msra.mxu2 %v911_v54  ;;  %1162 = vmatpush.msrb.mxu0 %v912_v56 }
 0x28f   :  { %1143 = vmatpush.msra.mxu3 %v971_v47  ;;  %1183 = vmatpush.msrb.mxu1 %v972_v49 }
 0x290   :  { %1123 = vmatpush.msra.mxu2 %v907_v58  ;;  %1163 = vmatpush.msrb.mxu0 %v908_v60 }
 0x291   :  { %1144 = vmatpush.msra.mxu3 %v967_v51  ;;  %1184 = vmatpush.msrb.mxu1 %v968_v53 }
 0x292   :  { %1124 = vmatpush.msra.mxu2 %v903_v62  ;;  %1164 = vmatpush.msrb.mxu0 %v904_v63 }
 0x293   :  { %1145 = vmatpush.msra.mxu3 %v963_v55  ;;  %1185 = vmatpush.msrb.mxu1 %v964_v57 }
 0x294   :  { %1125 = vmatpush.msra.mxu2 %v899_v0  ;;  %1165 = vmatpush.msrb.mxu0 %v900_v1 }
 0x295   :  { %1146 = vmatpush.msra.mxu3 %v959_v59  ;;  %1186 = vmatpush.msrb.mxu1 %v960_v61 }
 0x296   :  { %1126 = vmatpush.msra.mxu2 %v895_v2  ;;  %1166 = vmatpush.msrb.mxu0 %v896_v3 }
 0x2f3   :  { %v868_v6 = vpop.f32.mrf.mxu0  ;;  %v888_v8 = vpop.f32.mrf.mxu1 }
 0x2f4   :  { %v869_v7 = vadd.f32 %v868_v6, %v808_v5 }
 0x2f6   :  { %v889_v10 = vadd.f32 %v888_v8, %v869_v7 }
 0x2f8   :  { %v892_v11 = vmax.f32 %v889_v10, 0.0  ;;  %v828_v12 = vpop.f32.mrf.mxu2  ;;  %v848_v14 = vpop.f32.mrf.mxu3 }
 0x2f9   :  { %v829_v13 = vadd.f32 %v828_v12, %v807_v9 }
 0x2fa   :  { %1067 = vmatmul.f32.vlgmr.msrb.gmra.mxu3 %v892_v11  ;;  %1107 = vmatmul.f32.vlgmr.msra.gmra.mxu1 %v892_v11 }
 0x2fb   :  { %v849_v15 = vadd.f32 %v848_v14, %v829_v13 }
 0x2fd   :  { %v891_v16 = vmax.f32 %v849_v15, 0.0 }
 0x2ff   :  { %1047 = vmatmul.f32.vlgmr.msrb.gmra.mxu2 %v891_v16  ;;  %1087 = vmatmul.f32.vlgmr.msra.gmra.mxu0 %v891_v16 }
 0x302   :  { %1147 = vmatmul.f32.vlgmr.msra.gmra.mxu3 %v892_v11  ;;  %1187 = vmatmul.f32.vlgmr.msrb.gmra.mxu1 %v892_v11 }
 0x307   :  { %1127 = vmatmul.f32.vlgmr.msra.gmra.mxu2 %v891_v16  ;;  %1167 = vmatmul.f32.vlgmr.msrb.gmra.mxu0 %v891_v16 }
 0x377   :  { %v1108_v18 = vpop.f32.mrf.mxu1 }
 0x37c   :  { %v1088_v17 = vpop.f32.mrf.mxu0 }
 0x37d   :  { %v1068_v22 = vpop.f32.mrf.mxu3  ;;  %v1089_v26 = vadd.f32 %v1088_v17, %v1024_v20 }
 0x37f   :  { %v1188_v30 = vpop.f32.mrf.mxu1  ;;  %v1109_v31 = vadd.f32 %v1108_v18, %v1089_v26 }
 0x381   :  { %v1192_v37 = vmax.f32 %v1109_v31, 0.0 }
 0x382   :  { %v1048_v23 = vpop.f32.mrf.mxu2 }
 0x383   :  { %v1049_v28 = vadd.f32 %v1048_v23, %v1023_v24  ;;  %v1199_v42 = vrot.slane %v1192_v37, 6 }
 0x384   :  { %v1168_v25 = vpop.f32.mrf.mxu0 }
 0x385   :  { %v1169_v27 = vadd.f32 %v1168_v25, %v1026_v21  ;;  %v1069_v34 = vadd.f32 %v1068_v22, %v1049_v28  ;;  %v1148_v36 = vpop.f32.mrf.mxu3 }
 0x387   :  { %v1189_v32 = vadd.f32 %v1188_v30, %v1169_v27  ;;  %v1191_v40 = vmax.f32 %v1069_v34, 0.0 }
 0x389   :  { %v1194_v38 = vmax.f32 %v1189_v32, 0.0  ;;  %v1202_v45 = vsel %vm692_vm0, %v1191_v40, %v1199_v42 }
 0x38a   :  { %v1128_v33 = vpop.f32.mrf.mxu2 }
 0x38b   :  { %v1129_v35 = vadd.f32 %v1128_v33, %v1025_v29  ;;  %v1201_v43 = vrot.slane %v1194_v38, 2 }
 0x38d   :  { %v1149_v39 = vadd.f32 %v1148_v36, %v1129_v35 }
 0x38f   :  { %v1193_v41 = vmax.f32 %v1149_v39, 0.0 }
 0x391   :  { %v1200_v44 = vrot.slane %v1193_v41, 4 }
 0x393   :  { %v1204_v46 = vsel %vm1203_vm3, %v1200_v44, %v1201_v43 }
 0x394   :  { %v1206_v47 = vsel %vm1205_vm4, %v1202_v45, %v1204_v46 }
 0x395   :  { %1208 = vst [vmem:[%s2823_s18] sm:$0xff] %v1206_v47 }
 0x396   :  { %1303 = dma.done.wait [#allocation3], 32  }
 0x397   :  { %1304 = vsyncadd [#allocation3], 4294967264 }
 0x398   :  { %1305 = dma.done.wait [#allocation5], 32  }
 0x399   :  { %1306 = vsyncadd [#allocation5], 4294967264 }
 0x39a   :  { %1243 = vsyncpa [#allocation3], 1 }
 0x39b   :  { %1244 = vsyncpa [#allocation5], 1 }

// kernel: beta_vae_b_forward.14
= control target key start
LH: loop header
LB: loop body
LE: loop exit
PB: predicated region body
PF: predicated region fallthrough
CT: control target
= control target key end

     0   :  { %vm201_vm0 = vcmask 261120   ;;  %s535_s1 = inlined_call_operand.vmem [shape: bf16[288,128], index: 1, kind: input, shape index: {}]   ;;  %s536_s0 = inlined_call_operand.vmem [shape: bf16[32,288], index: 0, kind: input, shape index: {}]   ;;  %s537_s2 = inlined_call_operand.vmem [shape: f32[1,128], index: 2, kind: input, shape index: {}]   ;;  %s538_s3 = inlined_call_operand.vmem [shape: f32[32,128], index: 3, kind: output, shape index: {}]  }
   0x1   :  { %v388_v0 = vld [vmem:[%s535_s1 + $0x38] sm:$0xff]  ;;  %v387_v2 = vld [vmem:[%s535_s1 + $0x30] sm:$0xff]  ;;  %v398_v3 = vld [vmem:[%s535_s1 + $0x88] sm:$0xff] }
   0x2   :  { %v396_v1 = vld [vmem:[%s535_s1 + $0x78] sm:$0xff]  ;;  %208 = vmatpush.bf16.msra.mxu0 %v388_v0  ;;  %399 = vmatpush.bf16.msra.mxu3 %v388_v0  ;;  %v395_v4 = vld [vmem:[%s535_s1 + $0x70] sm:$0xff]  ;;  %v397_v5 = vld [vmem:[%s535_s1 + $0x80] sm:$0xff] }
   0x3   :  { %227 = vmatpush.bf16.msra.mxu1 %v396_v1  ;;  %252 = vmatpush.bf16.msra.mxu2 %v398_v3  ;;  %v287_v6 = vld [vmem:[%s536_s0 + $0x8] sm:$0xf]  ;;  %v377_v7 = vld [vmem:[%s536_s0 + $0x10] sm:$0xf0]  ;;  %v385_v11 = vld [vmem:[%s535_s1 + $0x20] sm:$0xff] }
   0x4   :  { %v386_v8 = vld [vmem:[%s535_s1 + $0x28] sm:$0xff]  ;;  %v288_v10 = vor.u32 %v377_v7, %v287_v6  ;;  %v393_v12 = vld [vmem:[%s535_s1 + $0x60] sm:$0xff]  ;;  %v384_v13 = vld [vmem:[%s535_s1 + $0x18] sm:$0xff] }
   0x5   :  { %v394_v9 = vld [vmem:[%s535_s1 + $0x68] sm:$0xff]  ;;  %v392_v14 = vld [vmem:[%s535_s1 + $0x58] sm:$0xff]  ;;  %v383_v15 = vld [vmem:[%s535_s1 + $0x10] sm:$0xff] }
   0x6   :  { %209 = vmatpush.bf16.msra.mxu0 %v387_v2  ;;  %400 = vmatpush.bf16.msra.mxu3 %v387_v2  ;;  %v391_v16 = vld [vmem:[%s535_s1 + $0x50] sm:$0xff]  ;;  %v299_v17 = vld [vmem:[%s536_s0 + $0x20] sm:$0xf]  ;;  %v380_v18 = vld [vmem:[%s536_s0 + $0x28] sm:$0xf0] }
   0x7   :  { %228 = vmatpush.bf16.msra.mxu1 %v395_v4  ;;  %253 = vmatpush.bf16.msra.mxu2 %v397_v5  ;;  %v382_v19 = vld [vmem:[%s535_s1 + $0x8] sm:$0xff]  ;;  %v300_v21 = vor.u32 %v380_v18, %v299_v17  ;;  %v381_v22 = vld [vmem:[%s535_s1] sm:$0xff]  ;;  %v291_v25 = vld [vmem:[%s536_s0 + $0x18] sm:$0xf] }
   0x8   :  { %v390_v20 = vld [vmem:[%s535_s1 + $0x48] sm:$0xff]  ;;  %v279_v23 = vld [vmem:[%s536_s0] sm:$0xf]  ;;  %v379_v26 = vld [vmem:[%s536_s0 + $0x20] sm:$0xf0] }
   0x9   :  { %v376_v24 = vld [vmem:[%s536_s0 + $0x8] sm:$0xf0]  ;;  %v389_v27 = vld [vmem:[%s535_s1 + $0x40] sm:$0xff]  ;;  %v281_v29 = vld [vmem:[%s536_s0 + $0xc] sm:$0xf0]  ;;  %v292_v31 = vor.u32 %v379_v26, %v291_v25 }
   0xa   :  { %210 = vmatpush.bf16.msra.mxu0 %v386_v8  ;;  %401 = vmatpush.bf16.msra.mxu3 %v386_v8  ;;  %v375_v28 = vld [vmem:[%s536_s0 + $0x4] sm:$0xf]  ;;  %v280_v30 = vor.u32 %v376_v24, %v279_v23  ;;  %v378_v33 = vld [vmem:[%s536_s0 + $0x1c] sm:$0xf]  ;;  %v293_v34 = vld [vmem:[%s536_s0 + $0x24] sm:$0xf0] }
   0xb   :  { %229 = vmatpush.bf16.msra.mxu1 %v394_v9  ;;  %373 = vmatmul.msk.bf16.vlgmr.msra.gmra.mxu2 %vm201_vm0, %v288_v10  ;;  %v284_v32 = vor.u32 %v375_v28, %v281_v29  ;;  %v296_v35 = vor.u32 %v378_v33, %v293_v34  ;;  %v407_v37 = vld [vmem:[%s537_s2] ss:$0 sm:$0xff] }
   0xe   :  { %211 = vmatpush.bf16.msra.mxu0 %v385_v11  ;;  %402 = vmatpush.bf16.msra.mxu3 %v385_v11 }
   0xf   :  { %230 = vmatpush.bf16.msra.mxu1 %v393_v12 }
  0x12   :  { %212 = vmatpush.bf16.msra.mxu0 %v384_v13  ;;  %403 = vmatpush.bf16.msra.mxu3 %v384_v13 }
  0x13   :  { %231 = vmatpush.bf16.msra.mxu1 %v392_v14 }
  0x16   :  { %213 = vmatpush.bf16.msra.mxu0 %v383_v15  ;;  %404 = vmatpush.bf16.msra.mxu3 %v383_v15 }
  0x17   :  { %232 = vmatpush.bf16.msra.mxu1 %v391_v16 }
  0x1a   :  { %214 = vmatpush.bf16.msra.mxu0 %v382_v19  ;;  %405 = vmatpush.bf16.msra.mxu3 %v382_v19 }
  0x1b   :  { %233 = vmatpush.bf16.msra.mxu1 %v390_v20  ;;  %374 = vmatmul.msk.bf16.gmra.mxu2 %vm201_vm0, %v300_v21 }
  0x1e   :  { %215 = vmatpush.bf16.msra.mxu0 %v381_v22  ;;  %406 = vmatpush.bf16.msra.mxu3 %v381_v22 }
  0x1f   :  { %234 = vmatpush.bf16.msra.mxu1 %v389_v27 }
  0x21   :  { %216 = vmatmul.bf16.vlgmr.msra.gmra.mxu0 %v280_v30  ;;  %221 = vmatmul.bf16.vlgmr.msra.gmra.mxu3 %v292_v31 }
  0x22   :  { %235 = vmatmul.bf16.vlgmr.msra.gmra.mxu1 %v284_v32 }
  0x32   :  { %240 = vmatmul.bf16.gmra.mxu1 %v296_v35 }
  0x8e   :  { %v255_v36 = vpop.f32.mrf.mxu2 }
  0x96   :  { %v257_v44 = vpop.f32.mrf.mxu2 }
  0x9e   :  { %v217_v38 = vpop.f32.mrf.mxu0  ;;  %v260_v53 = vpop.f32.mrf.mxu2 }
  0x9f   :  { %v218_v39 = vadd.f32 %v407_v37, %v217_v38  ;;  %v236_v40 = vpop.f32.mrf.mxu1 }
  0xa1   :  { %v237_v41 = vadd.f32 %v236_v40, %v218_v39 }
  0xa3   :  { %v256_v42 = vadd.f32 %v255_v36, %v237_v41 }
  0xa4   :  { %v222_v48 = vpop.f32.mrf.mxu3 }
  0xa5   :  { %v265_v43 = vmax.f32 %v256_v42, 0.0  ;;  %v223_v51 = vadd.f32 %v407_v37, %v222_v48 }
  0xa6   :  { %v219_v45 = vpop.f32.mrf.mxu0  ;;  %v262_v62 = vpop.f32.mrf.mxu2 }
  0xa7   :  { %269 = vst [vmem:[%s538_s3] sm:$0xff] %v265_v43  ;;  %v220_v46 = vadd.f32 %v407_v37, %v219_v45  ;;  %v238_v47 = vpop.f32.mrf.mxu1 }
  0xa9   :  { %v239_v49 = vadd.f32 %v238_v47, %v220_v46 }
  0xab   :  { %v258_v50 = vadd.f32 %v257_v44, %v239_v49 }
  0xac   :  { %v224_v57 = vpop.f32.mrf.mxu3 }
  0xad   :  { %v266_v52 = vmax.f32 %v258_v50, 0.0  ;;  %v225_v59 = vadd.f32 %v407_v37, %v224_v57 }
  0xaf   :  { %270 = vst [vmem:[%s538_s3 + $0x8] sm:$0xff] %v266_v52  ;;  %v241_v54 = vpop.f32.mrf.mxu1 }
  0xb0   :  { %v242_v55 = vadd.f32 %v241_v54, %v223_v51 }
  0xb2   :  { %v261_v56 = vadd.f32 %v260_v53, %v242_v55 }
  0xb4   :  { %v267_v58 = vmax.f32 %v261_v56, 0.0 }
  0xb6   :  { %271 = vst [vmem:[%s538_s3 + $0x10] sm:$0xff] %v267_v58 }
  0xb7   :  { %v243_v60 = vpop.f32.mrf.mxu1 }
  0xb8   :  { %v244_v61 = vadd.f32 %v243_v60, %v225_v59 }
  0xba   :  { %v263_v63 = vadd.f32 %v262_v62, %v244_v61 }
  0xbc   :  { %v268_v0 = vmax.f32 %v263_v63, 0.0 }
  0xbe   :  { %272 = vst [vmem:[%s538_s3 + $0x18] sm:$0xff] %v268_v0 }

// kernel: beta_vae_b_forward.15
= control target key start
LH: loop header
LB: loop body
LE: loop exit
PB: predicated region body
PF: predicated region fallthrough
CT: control target
= control target key end

     0   :  { %vm315_vm0 = vcmask 261120   ;;  %s1053_s1 = inlined_call_operand.vmem [shape: bf16[288,128], index: 1, kind: input, shape index: {}]   ;;  %s1054_s0 = inlined_call_operand.vmem [shape: bf16[128,288], index: 0, kind: input, shape index: {}]   ;;  %s1055_s2 = inlined_call_operand.vmem [shape: f32[1,128], index: 2, kind: input, shape index: {}]   ;;  %s1056_s3 = inlined_call_operand.vmem [shape: f32[128,128], index: 3, kind: output, shape index: {}]  }
   0x1   :  { %v730_v0 = vld [vmem:[%s1053_s1 + $0x38] sm:$0xff]  ;;  %v740_v1 = vld [vmem:[%s1053_s1 + $0x88] sm:$0xff]  ;;  %v729_v3 = vld [vmem:[%s1053_s1 + $0x30] sm:$0xff] }
   0x2   :  { %v738_v2 = vld [vmem:[%s1053_s1 + $0x78] sm:$0xff]  ;;  %340 = vmatpush.bf16.msra.mxu0 %v730_v0  ;;  %741 = vmatpush.bf16.msra.mxu3 %v730_v0  ;;  %v739_v4 = vld [vmem:[%s1053_s1 + $0x80] sm:$0xff]  ;;  %v737_v5 = vld [vmem:[%s1053_s1 + $0x70] sm:$0xff] }
   0x3   :  { %444 = vmatpush.bf16.msra.mxu2 %v740_v1  ;;  %389 = vmatpush.bf16.msra.mxu1 %v738_v2  ;;  %v533_v6 = vld [vmem:[%s1054_s0 + $0x8] sm:$0xf]  ;;  %v701_v7 = vld [vmem:[%s1054_s0 + $0x10] sm:$0xf0]  ;;  %v727_v11 = vld [vmem:[%s1053_s1 + $0x20] sm:$0xff] }
   0x4   :  { %v534_v8 = vor.u32 %v701_v7, %v533_v6  ;;  %v728_v9 = vld [vmem:[%s1053_s1 + $0x28] sm:$0xff]  ;;  %v735_v12 = vld [vmem:[%s1053_s1 + $0x60] sm:$0xff]  ;;  %v726_v13 = vld [vmem:[%s1053_s1 + $0x18] sm:$0xff] }
   0x5   :  { %v736_v10 = vld [vmem:[%s1053_s1 + $0x68] sm:$0xff]  ;;  %v734_v14 = vld [vmem:[%s1053_s1 + $0x58] sm:$0xff]  ;;  %v725_v15 = vld [vmem:[%s1053_s1 + $0x10] sm:$0xff] }
   0x6   :  { %341 = vmatpush.bf16.msra.mxu0 %v729_v3  ;;  %742 = vmatpush.bf16.msra.mxu3 %v729_v3  ;;  %v733_v16 = vld [vmem:[%s1053_s1 + $0x50] sm:$0xff]  ;;  %v545_v17 = vld [vmem:[%s1054_s0 + $0x20] sm:$0xf]  ;;  %v704_v18 = vld [vmem:[%s1054_s0 + $0x28] sm:$0xf0] }
   0x7   :  { %445 = vmatpush.bf16.msra.mxu2 %v739_v4  ;;  %390 = vmatpush.bf16.msra.mxu1 %v737_v5  ;;  %v546_v19 = vor.u32 %v704_v18, %v545_v17  ;;  %v724_v20 = vld [vmem:[%s1053_s1 + $0x8] sm:$0xff]  ;;  %v723_v22 = vld [vmem:[%s1053_s1] sm:$0xff]  ;;  %v597_v26 = vld [vmem:[%s1054_s0 + $0x90] sm:$0xf] }
   0x8   :  { %v732_v21 = vld [vmem:[%s1053_s1 + $0x48] sm:$0xff]  ;;  %v731_v23 = vld [vmem:[%s1053_s1 + $0x40] sm:$0xff]  ;;  %v718_v27 = vld [vmem:[%s1054_s0 + $0x98] sm:$0xf0] }
   0x9   :  { %v525_v24 = vld [vmem:[%s1054_s0] sm:$0xf]  ;;  %v700_v25 = vld [vmem:[%s1054_s0 + $0x8] sm:$0xf0]  ;;  %v699_v28 = vld [vmem:[%s1054_s0 + $0x4] sm:$0xf]  ;;  %v598_v31 = vor.u32 %v718_v27, %v597_v26 }
   0xa   :  { %691 = vmatmul.msk.bf16.vlgmr.msra.gmra.mxu2 %vm315_vm0, %v534_v8  ;;  %342 = vmatpush.bf16.msra.mxu0 %v728_v9  ;;  %v527_v29 = vld [vmem:[%s1054_s0 + $0xc] sm:$0xf0]  ;;  %v526_v30 = vor.u32 %v700_v25, %v525_v24  ;;  %v557_v33 = vld [vmem:[%s1054_s0 + $0x38] sm:$0xf]  ;;  %v707_v34 = vld [vmem:[%s1054_s0 + $0x40] sm:$0xf0] }
   0xb   :  { %743 = vmatpush.bf16.msra.mxu3 %v728_v9  ;;  %391 = vmatpush.bf16.msra.mxu1 %v736_v10  ;;  %v530_v32 = vor.u32 %v699_v28, %v527_v29  ;;  %v558_v35 = vor.u32 %v707_v34, %v557_v33  ;;  %v537_v36 = vld [vmem:[%s1054_s0 + $0x18] sm:$0xf]  ;;  %v703_v37 = vld [vmem:[%s1054_s0 + $0x20] sm:$0xf0]  ;;  %v609_v38 = vld [vmem:[%s1054_s0 + $0xa8] sm:$0xf] }
   0xc   :  { %v721_v39 = vld [vmem:[%s1054_s0 + $0xb0] sm:$0xf0]  ;;  %v702_v40 = vld [vmem:[%s1054_s0 + $0x1c] sm:$0xf]  ;;  %v539_v41 = vld [vmem:[%s1054_s0 + $0x24] sm:$0xf0]  ;;  %v538_v42 = vor.u32 %v703_v37, %v537_v36 }
   0xd   :  { %v610_v43 = vor.u32 %v721_v39, %v609_v38  ;;  %v542_v44 = vor.u32 %v702_v40, %v539_v41  ;;  %v569_v45 = vld [vmem:[%s1054_s0 + $0x50] sm:$0xf]  ;;  %v710_v46 = vld [vmem:[%s1054_s0 + $0x58] sm:$0xf0]  ;;  %v717_v50 = vld [vmem:[%s1054_s0 + $0x94] sm:$0xf] }
   0xe   :  { %343 = vmatpush.bf16.msra.mxu0 %v727_v11  ;;  %v570_v47 = vor.u32 %v710_v46, %v569_v45  ;;  %v549_v48 = vld [vmem:[%s1054_s0 + $0x30] sm:$0xf]  ;;  %v706_v49 = vld [vmem:[%s1054_s0 + $0x38] sm:$0xf0]  ;;  %v599_v51 = vld [vmem:[%s1054_s0 + $0x9c] sm:$0xf0] }
   0xf   :  { %744 = vmatpush.bf16.msra.mxu3 %v727_v11  ;;  %392 = vmatpush.bf16.msra.mxu1 %v735_v12  ;;  %v705_v52 = vld [vmem:[%s1054_s0 + $0x34] sm:$0xf]  ;;  %v551_v53 = vld [vmem:[%s1054_s0 + $0x3c] sm:$0xf0]  ;;  %v550_v54 = vor.u32 %v706_v49, %v549_v48  ;;  %v602_v55 = vor.u32 %v717_v50, %v599_v51  ;;  %v581_v57 = vld [vmem:[%s1054_s0 + $0x68] sm:$0xf] }
  0x10   :  { %v554_v56 = vor.u32 %v705_v52, %v551_v53  ;;  %v713_v58 = vld [vmem:[%s1054_s0 + $0x70] sm:$0xf0]  ;;  %v561_v60 = vld [vmem:[%s1054_s0 + $0x48] sm:$0xf]  ;;  %v720_v62 = vld [vmem:[%s1054_s0 + $0xac] sm:$0xf] }
  0x11   :  { %v582_v59 = vor.u32 %v713_v58, %v581_v57  ;;  %v709_v61 = vld [vmem:[%s1054_s0 + $0x50] sm:$0xf0]  ;;  %v611_v63 = vld [vmem:[%s1054_s0 + $0xb4] sm:$0xf0]  ;;  %v708_v0 = vld [vmem:[%s1054_s0 + $0x4c] sm:$0xf] }
  0x12   :  { %344 = vmatpush.bf16.msra.mxu0 %v726_v13  ;;  %v563_v1 = vld [vmem:[%s1054_s0 + $0x54] sm:$0xf0]  ;;  %v614_v3 = vor.u32 %v720_v62, %v611_v63  ;;  %v716_v6 = vld [vmem:[%s1054_s0 + $0x88] sm:$0xf0]  ;;  %v573_v8 = vld [vmem:[%s1054_s0 + $0x60] sm:$0xf] }
  0x13   :  { %745 = vmatpush.bf16.msra.mxu3 %v726_v13  ;;  %393 = vmatpush.bf16.msra.mxu1 %v734_v14  ;;  %v566_v4 = vor.u32 %v708_v0, %v563_v1  ;;  %v712_v9 = vld [vmem:[%s1054_s0 + $0x68] sm:$0xf0]  ;;  %v575_v11 = vld [vmem:[%s1054_s0 + $0x6c] sm:$0xf0]  ;;  %v585_v17 = vld [vmem:[%s1054_s0 + $0x78] sm:$0xf] }
  0x14   :  { %v715_v18 = vld [vmem:[%s1054_s0 + $0x80] sm:$0xf0]  ;;  %v722_v24 = vld [vmem:[%s1054_s0 + $0xb8] sm:$0xf0]  ;;  %v987_v28 = vld [vmem:[%s1055_s2] ss:$0 sm:$0xff] }
  0x16   :  { %345 = vmatpush.bf16.msra.mxu0 %v725_v15 }
  0x17   :  { %746 = vmatpush.bf16.msra.mxu3 %v725_v15  ;;  %394 = vmatpush.bf16.msra.mxu1 %v733_v16  ;;  %v719_v15 = vld [vmem:[%s1054_s0 + $0xa0] sm:$0xf0] }
  0x1a   :  { %692 = vmatmul.msk.bf16.gmra.mxu2 %vm315_vm0, %v546_v19  ;;  %346 = vmatpush.bf16.msra.mxu0 %v724_v20  ;;  %v714_v19 = vld [vmem:[%s1054_s0 + $0x7c] sm:$0xf] }
  0x1b   :  { %747 = vmatpush.bf16.msra.mxu3 %v724_v20  ;;  %395 = vmatpush.bf16.msra.mxu1 %v732_v21  ;;  %v587_v20 = vld [vmem:[%s1054_s0 + $0x84] sm:$0xf0] }
  0x1e   :  { %347 = vmatpush.bf16.msra.mxu0 %v723_v22 }
  0x1f   :  { %748 = vmatpush.bf16.msra.mxu3 %v723_v22  ;;  %396 = vmatpush.bf16.msra.mxu1 %v731_v23  ;;  %v590_v22 = vor.u32 %v714_v19, %v587_v20 }
  0x21   :  { %348 = vmatmul.bf16.vlgmr.msra.gmra.mxu0 %v526_v30 }
  0x22   :  { %378 = vmatmul.bf16.vlgmr.msra.gmra.mxu3 %v598_v31  ;;  %397 = vmatmul.bf16.vlgmr.msra.gmra.mxu1 %v530_v32 }
  0x23   :  { %749 = vmatpush.bf16.msrb.mxu3 %v738_v2  ;;  %v562_v2 = vor.u32 %v709_v61, %v561_v60 }
  0x27   :  { %750 = vmatpush.bf16.msrb.mxu3 %v737_v5  ;;  %v593_v5 = vld [vmem:[%s1054_s0 + $0x80] sm:$0xf] }
  0x28   :  { %v594_v7 = vor.u32 %v716_v6, %v593_v5 }
  0x2a   :  { %693 = vmatmul.msk.bf16.gmra.mxu2 %vm315_vm0, %v558_v35 }
  0x2b   :  { %751 = vmatpush.bf16.msrb.mxu3 %v736_v10  ;;  %v711_v10 = vld [vmem:[%s1054_s0 + $0x64] sm:$0xf] }
  0x2c   :  { %v578_v13 = vor.u32 %v711_v10, %v575_v11 }
  0x2f   :  { %752 = vmatpush.bf16.msrb.mxu3 %v735_v12  ;;  %v574_v12 = vor.u32 %v712_v9, %v573_v8 }
  0x31   :  { %353 = vmatmul.bf16.gmra.mxu0 %v538_v42 }
  0x32   :  { %383 = vmatmul.bf16.gmra.mxu3 %v610_v43  ;;  %402 = vmatmul.bf16.gmra.mxu1 %v542_v44 }
  0x33   :  { %753 = vmatpush.bf16.msrb.mxu3 %v734_v14  ;;  %v605_v14 = vld [vmem:[%s1054_s0 + $0x98] sm:$0xf] }
  0x37   :  { %754 = vmatpush.bf16.msrb.mxu3 %v733_v16  ;;  %v606_v16 = vor.u32 %v719_v15, %v605_v14 }
  0x3a   :  { %694 = vmatmul.msk.bf16.gmra.mxu2 %vm315_vm0, %v570_v47 }
  0x3b   :  { %755 = vmatpush.bf16.msrb.mxu3 %v732_v21  ;;  %v586_v21 = vor.u32 %v715_v18, %v585_v17 }
  0x3f   :  { %756 = vmatpush.bf16.msrb.mxu3 %v731_v23  ;;  %v617_v23 = vld [vmem:[%s1054_s0 + $0xb0] sm:$0xf] }
  0x40   :  { %v618_v25 = vor.u32 %v722_v24, %v617_v23 }
  0x41   :  { %358 = vmatmul.bf16.gmra.mxu0 %v550_v54 }
  0x42   :  { %427 = vmatmul.bf16.vlgmr.msrb.gmra.mxu3 %v602_v55  ;;  %407 = vmatmul.bf16.gmra.mxu1 %v554_v56 }
  0x4a   :  { %695 = vmatmul.msk.bf16.gmra.mxu2 %vm315_vm0, %v582_v59 }
  0x51   :  { %363 = vmatmul.bf16.gmra.mxu0 %v562_v2 }
  0x52   :  { %432 = vmatmul.bf16.gmra.mxu3 %v614_v3  ;;  %412 = vmatmul.bf16.gmra.mxu1 %v566_v4 }
  0x5a   :  { %696 = vmatmul.msk.bf16.gmra.mxu2 %vm315_vm0, %v594_v7 }
  0x61   :  { %368 = vmatmul.bf16.gmra.mxu0 %v574_v12 }
  0x62   :  { %417 = vmatmul.bf16.gmra.mxu1 %v578_v13 }
  0x6a   :  { %697 = vmatmul.msk.bf16.gmra.mxu2 %vm315_vm0, %v606_v16 }
  0x71   :  { %373 = vmatmul.bf16.gmra.mxu0 %v586_v21 }
  0x72   :  { %422 = vmatmul.bf16.gmra.mxu1 %v590_v22 }
  0x7a   :  { %698 = vmatmul.msk.bf16.gmra.mxu2 %vm315_vm0, %v618_v25 }
  0x8d   :  { %v447_v26 = vpop.f32.mrf.mxu2 }
  0x95   :  { %v449_v27 = vpop.f32.mrf.mxu2 }
  0x9d   :  { %v452_v29 = vpop.f32.mrf.mxu2 }
  0x9e   :  { %v349_v30 = vpop.f32.mrf.mxu0 }
  0x9f   :  { %v350_v31 = vadd.f32 %v987_v28, %v349_v30  ;;  %v398_v32 = vpop.f32.mrf.mxu1 }
  0xa1   :  { %v399_v33 = vadd.f32 %v398_v32, %v350_v31 }
  0xa3   :  { %v448_v34 = vadd.f32 %v447_v26, %v399_v33 }
  0xa5   :  { %v487_v35 = vmax.f32 %v448_v34, 0.0  ;;  %v454_v36 = vpop.f32.mrf.mxu2  ;;  %v379_v55 = vpop.f32.mrf.mxu3 }
  0xa6   :  { %v351_v37 = vpop.f32.mrf.mxu0 }
  0xa7   :  { %503 = vst [vmem:[%s1056_s3] sm:$0xff] %v487_v35  ;;  %v352_v38 = vadd.f32 %v987_v28, %v351_v37  ;;  %v400_v39 = vpop.f32.mrf.mxu1 }
  0xa9   :  { %v401_v40 = vadd.f32 %v400_v39, %v352_v38  ;;  %v380_v38 = vadd.f32 %v987_v28, %v379_v55 }
  0xab   :  { %v450_v41 = vadd.f32 %v449_v27, %v401_v40 }
  0xad   :  { %v488_v42 = vmax.f32 %v450_v41, 0.0  ;;  %v457_v43 = vpop.f32.mrf.mxu2  ;;  %v381_v0 = vpop.f32.mrf.mxu3 }
  0xae   :  { %v354_v44 = vpop.f32.mrf.mxu0 }
  0xaf   :  { %504 = vst [vmem:[%s1056_s3 + $0x8] sm:$0xff] %v488_v42  ;;  %v355_v45 = vadd.f32 %v987_v28, %v354_v44  ;;  %v403_v46 = vpop.f32.mrf.mxu1 }
  0xb1   :  { %v404_v47 = vadd.f32 %v403_v46, %v355_v45 }
  0xb3   :  { %v453_v48 = vadd.f32 %v452_v29, %v404_v47 }
  0xb5   :  { %v489_v49 = vmax.f32 %v453_v48, 0.0  ;;  %v459_v50 = vpop.f32.mrf.mxu2  ;;  %v384_v11 = vpop.f32.mrf.mxu3 }
  0xb6   :  { %v356_v51 = vpop.f32.mrf.mxu0 }
  0xb7   :  { %505 = vst [vmem:[%s1056_s3 + $0x10] sm:$0xff] %v489_v49  ;;  %v357_v52 = vadd.f32 %v987_v28, %v356_v51  ;;  %v405_v53 = vpop.f32.mrf.mxu1  ;;  %v382_v49 = vadd.f32 %v987_v28, %v381_v0 }
  0xb9   :  { %v406_v54 = vadd.f32 %v405_v53, %v357_v52 }
  0xbb   :  { %v455_v56 = vadd.f32 %v454_v36, %v406_v54 }
  0xbd   :  { %v490_v57 = vmax.f32 %v455_v56, 0.0  ;;  %v462_v58 = vpop.f32.mrf.mxu2  ;;  %v386_v21 = vpop.f32.mrf.mxu3 }
  0xbe   :  { %v359_v59 = vpop.f32.mrf.mxu0 }
  0xbf   :  { %506 = vst [vmem:[%s1056_s3 + $0x18] sm:$0xff] %v490_v57  ;;  %v360_v60 = vadd.f32 %v987_v28, %v359_v59  ;;  %v408_v61 = vpop.f32.mrf.mxu1 }
  0xc1   :  { %v409_v62 = vadd.f32 %v408_v61, %v360_v60  ;;  %v385_v61 = vadd.f32 %v987_v28, %v384_v11 }
  0xc3   :  { %v458_v63 = vadd.f32 %v457_v43, %v409_v62 }
  0xc5   :  { %v491_v1 = vmax.f32 %v458_v63, 0.0  ;;  %v464_v2 = vpop.f32.mrf.mxu2  ;;  %v428_v31 = vpop.f32.mrf.mxu3 }
  0xc6   :  { %v361_v3 = vpop.f32.mrf.mxu0  ;;  %v429_v41 = vadd.f32 %v428_v31, %v380_v38 }
  0xc7   :  { %507 = vst [vmem:[%s1056_s3 + $0x20] sm:$0xff] %v491_v1  ;;  %v362_v4 = vadd.f32 %v987_v28, %v361_v3  ;;  %v410_v5 = vpop.f32.mrf.mxu1 }
  0xc9   :  { %v411_v6 = vadd.f32 %v410_v5, %v362_v4  ;;  %v387_v5 = vadd.f32 %v987_v28, %v386_v21 }
  0xcb   :  { %v460_v7 = vadd.f32 %v459_v50, %v411_v6 }
  0xcd   :  { %v492_v8 = vmax.f32 %v460_v7, 0.0  ;;  %v467_v9 = vpop.f32.mrf.mxu2  ;;  %v430_v42 = vpop.f32.mrf.mxu3 }
  0xce   :  { %v364_v10 = vpop.f32.mrf.mxu0  ;;  %v431_v53 = vadd.f32 %v430_v42, %v382_v49 }
  0xcf   :  { %508 = vst [vmem:[%s1056_s3 + $0x28] sm:$0xff] %v492_v8  ;;  %v365_v12 = vadd.f32 %v987_v28, %v364_v10  ;;  %v413_v13 = vpop.f32.mrf.mxu1 }
  0xd1   :  { %v414_v14 = vadd.f32 %v413_v13, %v365_v12 }
  0xd3   :  { %v463_v15 = vadd.f32 %v462_v58, %v414_v14 }
  0xd5   :  { %v493_v16 = vmax.f32 %v463_v15, 0.0  ;;  %v469_v17 = vpop.f32.mrf.mxu2  ;;  %v433_v58 = vpop.f32.mrf.mxu3 }
  0xd6   :  { %v366_v18 = vpop.f32.mrf.mxu0  ;;  %v434_v1 = vadd.f32 %v433_v58, %v385_v61 }
  0xd7   :  { %509 = vst [vmem:[%s1056_s3 + $0x30] sm:$0xff] %v493_v16  ;;  %v367_v19 = vadd.f32 %v987_v28, %v366_v18  ;;  %v415_v20 = vpop.f32.mrf.mxu1 }
  0xd9   :  { %v416_v22 = vadd.f32 %v415_v20, %v367_v19 }
  0xdb   :  { %v465_v23 = vadd.f32 %v464_v2, %v416_v22 }
  0xdd   :  { %v494_v24 = vmax.f32 %v465_v23, 0.0  ;;  %v472_v25 = vpop.f32.mrf.mxu2  ;;  %v435_v7 = vpop.f32.mrf.mxu3 }
  0xde   :  { %v369_v26 = vpop.f32.mrf.mxu0  ;;  %v436_v8 = vadd.f32 %v435_v7, %v387_v5 }
  0xdf   :  { %510 = vst [vmem:[%s1056_s3 + $0x38] sm:$0xff] %v494_v24  ;;  %v370_v27 = vadd.f32 %v987_v28, %v369_v26  ;;  %v418_v29 = vpop.f32.mrf.mxu1 }
  0xe1   :  { %v419_v30 = vadd.f32 %v418_v29, %v370_v27 }
  0xe3   :  { %v468_v32 = vadd.f32 %v467_v9, %v419_v30 }
  0xe5   :  { %v495_v33 = vmax.f32 %v468_v32, 0.0  ;;  %v474_v34 = vpop.f32.mrf.mxu2 }
  0xe6   :  { %v371_v35 = vpop.f32.mrf.mxu0 }
  0xe7   :  { %511 = vst [vmem:[%s1056_s3 + $0x40] sm:$0xff] %v495_v33  ;;  %v372_v36 = vadd.f32 %v987_v28, %v371_v35  ;;  %v420_v37 = vpop.f32.mrf.mxu1 }
  0xe9   :  { %v421_v39 = vadd.f32 %v420_v37, %v372_v36 }
  0xeb   :  { %v470_v40 = vadd.f32 %v469_v17, %v421_v39 }
  0xed   :  { %v496_v43 = vmax.f32 %v470_v40, 0.0  ;;  %v477_v44 = vpop.f32.mrf.mxu2 }
  0xee   :  { %v478_v45 = vadd.f32 %v477_v44, %v429_v41  ;;  %v374_v46 = vpop.f32.mrf.mxu0 }
  0xef   :  { %512 = vst [vmem:[%s1056_s3 + $0x48] sm:$0xff] %v496_v43  ;;  %v375_v47 = vadd.f32 %v987_v28, %v374_v46  ;;  %v423_v48 = vpop.f32.mrf.mxu1 }
  0xf0   :  { %v499_v50 = vmax.f32 %v478_v45, 0.0 }
  0xf1   :  { %v424_v51 = vadd.f32 %v423_v48, %v375_v47 }
  0xf2   :  { %515 = vst [vmem:[%s1056_s3 + $0x60] sm:$0xff] %v499_v50 }
  0xf3   :  { %v473_v52 = vadd.f32 %v472_v25, %v424_v51 }
  0xf5   :  { %v497_v54 = vmax.f32 %v473_v52, 0.0  ;;  %v479_v55 = vpop.f32.mrf.mxu2 }
  0xf6   :  { %v480_v56 = vadd.f32 %v479_v55, %v431_v53  ;;  %v376_v57 = vpop.f32.mrf.mxu0 }
  0xf7   :  { %513 = vst [vmem:[%s1056_s3 + $0x50] sm:$0xff] %v497_v54  ;;  %v377_v59 = vadd.f32 %v987_v28, %v376_v57  ;;  %v425_v60 = vpop.f32.mrf.mxu1 }
  0xf8   :  { %v500_v62 = vmax.f32 %v480_v56, 0.0 }
  0xf9   :  { %v426_v63 = vadd.f32 %v425_v60, %v377_v59 }
  0xfa   :  { %516 = vst [vmem:[%s1056_s3 + $0x68] sm:$0xff] %v500_v62 }
  0xfb   :  { %v475_v0 = vadd.f32 %v474_v34, %v426_v63 }
  0xfd   :  { %v498_v2 = vmax.f32 %v475_v0, 0.0  ;;  %v482_v3 = vpop.f32.mrf.mxu2 }
  0xfe   :  { %v483_v4 = vadd.f32 %v482_v3, %v434_v1 }
  0xff   :  { %514 = vst [vmem:[%s1056_s3 + $0x58] sm:$0xff] %v498_v2 }
 0x100   :  { %v501_v6 = vmax.f32 %v483_v4, 0.0 }
 0x102   :  { %517 = vst [vmem:[%s1056_s3 + $0x70] sm:$0xff] %v501_v6 }
 0x105   :  { %v484_v9 = vpop.f32.mrf.mxu2 }
 0x106   :  { %v485_v10 = vadd.f32 %v484_v9, %v436_v8 }
 0x108   :  { %v502_v11 = vmax.f32 %v485_v10, 0.0 }
 0x10a   :  { %518 = vst [vmem:[%s1056_s3 + $0x78] sm:$0xff] %v502_v11 }

// kernel: beta_vae_b_forward.16
= control target key start
LH: loop header
LB: loop body
LE: loop exit
PB: predicated region body
PF: predicated region fallthrough
CT: control target
= control target key end

     0   :  { %vm771_vm0 = vcmask 261120   ;;  %s3181_s1 = inlined_call_operand.vmem [shape: bf16[288,128], index: 1, kind: input, shape index: {}]   ;;  %s3182_s0 = inlined_call_operand.vmem [shape: bf16[512,288], index: 0, kind: input, shape index: {}]   ;;  %s3183_s2 = inlined_call_operand.vmem [shape: f32[1,128], index: 2, kind: input, shape index: {}]   ;;  %s3184_s3 = inlined_call_operand.vmem [shape: f32[512,128], index: 3, kind: output, shape index: {}]  }
   0x1   :  { %v2098_v0 = vld [vmem:[%s3181_s1 + $0x38] sm:$0xff]  ;;  %v2155_v1 = vld [vmem:[%s3181_s1 + $0x88] sm:$0xff]  ;;  %v2097_v3 = vld [vmem:[%s3181_s1 + $0x30] sm:$0xff] }
   0x2   :  { %v2106_v2 = vld [vmem:[%s3181_s1 + $0x78] sm:$0xff]  ;;  %868 = vmatpush.bf16.msra.mxu0 %v2098_v0  ;;  %2109 = vmatpush.bf16.msra.mxu3 %v2098_v0  ;;  %v2166_v4 = vld [vmem:[%s3181_s1 + $0x80] sm:$0xff]  ;;  %v2105_v5 = vld [vmem:[%s3181_s1 + $0x70] sm:$0xff] }
   0x3   :  { %1212 = vmatpush.bf16.msra.mxu2 %v2155_v1  ;;  %1037 = vmatpush.bf16.msra.mxu1 %v2106_v2  ;;  %v1517_v6 = vld [vmem:[%s3182_s0 + $0x8] sm:$0xf]  ;;  %v1997_v7 = vld [vmem:[%s3182_s0 + $0x10] sm:$0xf0]  ;;  %v2095_v11 = vld [vmem:[%s3181_s1 + $0x20] sm:$0xff] }
   0x4   :  { %v1518_v8 = vor.u32 %v1997_v7, %v1517_v6  ;;  %v2096_v9 = vld [vmem:[%s3181_s1 + $0x28] sm:$0xff]  ;;  %v2103_v12 = vld [vmem:[%s3181_s1 + $0x60] sm:$0xff]  ;;  %v2094_v13 = vld [vmem:[%s3181_s1 + $0x18] sm:$0xff] }
   0x5   :  { %v2104_v10 = vld [vmem:[%s3181_s1 + $0x68] sm:$0xff]  ;;  %v2102_v14 = vld [vmem:[%s3181_s1 + $0x58] sm:$0xff]  ;;  %v2093_v15 = vld [vmem:[%s3181_s1 + $0x10] sm:$0xff] }
   0x6   :  { %869 = vmatpush.bf16.msra.mxu0 %v2097_v3  ;;  %2110 = vmatpush.bf16.msra.mxu3 %v2097_v3  ;;  %v2101_v16 = vld [vmem:[%s3181_s1 + $0x50] sm:$0xff]  ;;  %v1529_v17 = vld [vmem:[%s3182_s0 + $0x20] sm:$0xf]  ;;  %v2000_v18 = vld [vmem:[%s3182_s0 + $0x28] sm:$0xf0] }
   0x7   :  { %1213 = vmatpush.bf16.msra.mxu2 %v2166_v4  ;;  %1038 = vmatpush.bf16.msra.mxu1 %v2105_v5  ;;  %v1530_v19 = vor.u32 %v2000_v18, %v1529_v17  ;;  %v2092_v20 = vld [vmem:[%s3181_s1 + $0x8] sm:$0xff]  ;;  %v2091_v22 = vld [vmem:[%s3181_s1] sm:$0xff]  ;;  %v1511_v29 = vld [vmem:[%s3182_s0 + $0xc] sm:$0xf0] }
   0x8   :  { %v2100_v21 = vld [vmem:[%s3181_s1 + $0x48] sm:$0xff]  ;;  %v2099_v23 = vld [vmem:[%s3181_s1 + $0x40] sm:$0xff]  ;;  %v1541_v33 = vld [vmem:[%s3182_s0 + $0x38] sm:$0xf] }
   0x9   :  { %v1509_v24 = vld [vmem:[%s3182_s0] sm:$0xf]  ;;  %v1996_v25 = vld [vmem:[%s3182_s0 + $0x8] sm:$0xf0]  ;;  %v1995_v28 = vld [vmem:[%s3182_s0 + $0x4] sm:$0xf] }
   0xa   :  { %1963 = vmatmul.msk.bf16.vlgmr.msra.gmra.mxu2 %vm771_vm0, %v1518_v8  ;;  %870 = vmatpush.bf16.msra.mxu0 %v2096_v9  ;;  %v1797_v26 = vld [vmem:[%s3182_s0 + $0x240] sm:$0xf]  ;;  %v2068_v27 = vld [vmem:[%s3182_s0 + $0x248] sm:$0xf0]  ;;  %v1510_v30 = vor.u32 %v1996_v25, %v1509_v24  ;;  %v1514_v32 = vor.u32 %v1995_v28, %v1511_v29  ;;  %v2003_v34 = vld [vmem:[%s3182_s0 + $0x40] sm:$0xf0] }
   0xb   :  { %2111 = vmatpush.bf16.msra.mxu3 %v2096_v9  ;;  %1039 = vmatpush.bf16.msra.mxu1 %v2104_v10  ;;  %v1798_v31 = vor.u32 %v2068_v27, %v1797_v26  ;;  %v1542_v35 = vor.u32 %v2003_v34, %v1541_v33  ;;  %v1521_v36 = vld [vmem:[%s3182_s0 + $0x18] sm:$0xf]  ;;  %v1999_v37 = vld [vmem:[%s3182_s0 + $0x20] sm:$0xf0]  ;;  %v1998_v40 = vld [vmem:[%s3182_s0 + $0x1c] sm:$0xf] }
   0xc   :  { %v1809_v38 = vld [vmem:[%s3182_s0 + $0x258] sm:$0xf]  ;;  %v2071_v39 = vld [vmem:[%s3182_s0 + $0x260] sm:$0xf0]  ;;  %v1523_v41 = vld [vmem:[%s3182_s0 + $0x24] sm:$0xf0]  ;;  %v1522_v42 = vor.u32 %v1999_v37, %v1521_v36 }
   0xd   :  { %v1810_v43 = vor.u32 %v2071_v39, %v1809_v38  ;;  %v1526_v44 = vor.u32 %v1998_v40, %v1523_v41  ;;  %v1553_v45 = vld [vmem:[%s3182_s0 + $0x50] sm:$0xf]  ;;  %v2006_v46 = vld [vmem:[%s3182_s0 + $0x58] sm:$0xf0]  ;;  %v2001_v52 = vld [vmem:[%s3182_s0 + $0x34] sm:$0xf] }
   0xe   :  { %871 = vmatpush.bf16.msra.mxu0 %v2095_v11  ;;  %v1554_v47 = vor.u32 %v2006_v46, %v1553_v45  ;;  %v1533_v48 = vld [vmem:[%s3182_s0 + $0x30] sm:$0xf]  ;;  %v2002_v49 = vld [vmem:[%s3182_s0 + $0x38] sm:$0xf0]  ;;  %v1535_v53 = vld [vmem:[%s3182_s0 + $0x3c] sm:$0xf0] }
   0xf   :  { %2112 = vmatpush.bf16.msra.mxu3 %v2095_v11  ;;  %1040 = vmatpush.bf16.msra.mxu1 %v2103_v12  ;;  %v1821_v50 = vld [vmem:[%s3182_s0 + $0x270] sm:$0xf]  ;;  %v2074_v51 = vld [vmem:[%s3182_s0 + $0x278] sm:$0xf0]  ;;  %v1534_v54 = vor.u32 %v2002_v49, %v1533_v48  ;;  %v1538_v56 = vor.u32 %v2001_v52, %v1535_v53  ;;  %v1565_v57 = vld [vmem:[%s3182_s0 + $0x68] sm:$0xf] }
  0x10   :  { %v1822_v55 = vor.u32 %v2074_v51, %v1821_v50  ;;  %v2009_v58 = vld [vmem:[%s3182_s0 + $0x70] sm:$0xf0]  ;;  %v1545_v60 = vld [vmem:[%s3182_s0 + $0x48] sm:$0xf]  ;;  %v2004_v0 = vld [vmem:[%s3182_s0 + $0x4c] sm:$0xf] }
  0x11   :  { %v1566_v59 = vor.u32 %v2009_v58, %v1565_v57  ;;  %v2005_v61 = vld [vmem:[%s3182_s0 + $0x50] sm:$0xf0]  ;;  %v1833_v62 = vld [vmem:[%s3182_s0 + $0x288] sm:$0xf]  ;;  %v2012_v6 = vld [vmem:[%s3182_s0 + $0x88] sm:$0xf0] }
  0x12   :  { %872 = vmatpush.bf16.msra.mxu0 %v2094_v13  ;;  %v2077_v63 = vld [vmem:[%s3182_s0 + $0x290] sm:$0xf0]  ;;  %v1557_v8 = vld [vmem:[%s3182_s0 + $0x60] sm:$0xf]  ;;  %v2008_v9 = vld [vmem:[%s3182_s0 + $0x68] sm:$0xf0] }
  0x13   :  { %2113 = vmatpush.bf16.msra.mxu3 %v2094_v13  ;;  %1041 = vmatpush.bf16.msra.mxu1 %v2102_v14  ;;  %v1834_v3 = vor.u32 %v2077_v63, %v1833_v62  ;;  %v2080_v11 = vld [vmem:[%s3182_s0 + $0x2a8] sm:$0xf0]  ;;  %v1559_v13 = vld [vmem:[%s3182_s0 + $0x6c] sm:$0xf0]  ;;  %v1589_v17 = vld [vmem:[%s3182_s0 + $0x98] sm:$0xf] }
  0x14   :  { %v2015_v18 = vld [vmem:[%s3182_s0 + $0xa0] sm:$0xf0]  ;;  %v2010_v24 = vld [vmem:[%s3182_s0 + $0x7c] sm:$0xf]  ;;  %v1571_v25 = vld [vmem:[%s3182_s0 + $0x84] sm:$0xf0] }
  0x15   :  { %v1574_v28 = vor.u32 %v2010_v24, %v1571_v25  ;;  %v1601_v29 = vld [vmem:[%s3182_s0 + $0xb0] sm:$0xf]  ;;  %v2014_v33 = vld [vmem:[%s3182_s0 + $0x98] sm:$0xf0]  ;;  %v2013_v36 = vld [vmem:[%s3182_s0 + $0x94] sm:$0xf] }
  0x16   :  { %873 = vmatpush.bf16.msra.mxu0 %v2093_v15  ;;  %v1869_v34 = vld [vmem:[%s3182_s0 + $0x2d0] sm:$0xf]  ;;  %v1583_v37 = vld [vmem:[%s3182_s0 + $0x9c] sm:$0xf0]  ;;  %v1613_v41 = vld [vmem:[%s3182_s0 + $0xc8] sm:$0xf] }
  0x17   :  { %2114 = vmatpush.bf16.msra.mxu3 %v2093_v15  ;;  %1042 = vmatpush.bf16.msra.mxu1 %v2101_v16  ;;  %v1586_v40 = vor.u32 %v2013_v36, %v1583_v37  ;;  %v2017_v45 = vld [vmem:[%s3182_s0 + $0xb0] sm:$0xf0]  ;;  %v1881_v46 = vld [vmem:[%s3182_s0 + $0x2e8] sm:$0xf]  ;;  %v2016_v48 = vld [vmem:[%s3182_s0 + $0xac] sm:$0xf] }
  0x18   :  { %v1595_v49 = vld [vmem:[%s3182_s0 + $0xb4] sm:$0xf0]  ;;  %v2427_v58 = vld [vmem:[%s3183_s2] ss:$0 sm:$0xff]  ;;  %v1799_v62 = vld [vmem:[%s3182_s0 + $0x24c] sm:$0xf0] }
  0x19   :  { %v1598_v53 = vor.u32 %v2016_v48, %v1595_v49  ;;  %v2019_v63 = vld [vmem:[%s3182_s0 + $0xc4] sm:$0xf]  ;;  %v1811_v24 = vld [vmem:[%s3182_s0 + $0x264] sm:$0xf0]  ;;  %v2022_v25 = vld [vmem:[%s3182_s0 + $0xdc] sm:$0xf] }
  0x1a   :  { %1964 = vmatmul.msk.bf16.gmra.mxu2 %vm771_vm0, %v1530_v19  ;;  %874 = vmatpush.bf16.msra.mxu0 %v2092_v20  ;;  %v1590_v19 = vor.u32 %v2015_v18, %v1589_v17  ;;  %v1629_v48 = vld [vmem:[%s3182_s0 + $0xf0] sm:$0xf]  ;;  %v2026_v49 = vld [vmem:[%s3182_s0 + $0xf8] sm:$0xf0] }
  0x1b   :  { %2115 = vmatpush.bf16.msra.mxu3 %v2092_v20  ;;  %1043 = vmatpush.bf16.msra.mxu1 %v2100_v21  ;;  %v1569_v20 = vld [vmem:[%s3182_s0 + $0x78] sm:$0xf] }
  0x1e   :  { %875 = vmatpush.bf16.msra.mxu0 %v2091_v22 }
  0x1f   :  { %2116 = vmatpush.bf16.msra.mxu3 %v2091_v22  ;;  %1044 = vmatpush.bf16.msra.mxu1 %v2099_v23  ;;  %v1857_v22 = vld [vmem:[%s3182_s0 + $0x2b8] sm:$0xf] }
  0x21   :  { %876 = vmatmul.bf16.vlgmr.msra.gmra.mxu0 %v1510_v30  ;;  %v2018_v30 = vld [vmem:[%s3182_s0 + $0xb8] sm:$0xf0] }
  0x22   :  { %996 = vmatmul.bf16.vlgmr.msra.gmra.mxu3 %v1798_v31  ;;  %1045 = vmatmul.bf16.vlgmr.msra.gmra.mxu1 %v1514_v32  ;;  %v1602_v31 = vor.u32 %v2018_v30, %v1601_v29  ;;  %v1581_v32 = vld [vmem:[%s3182_s0 + $0x90] sm:$0xf] }
  0x23   :  { %2117 = vmatpush.bf16.msrb.mxu3 %v2106_v2  ;;  %v1546_v2 = vor.u32 %v2005_v61, %v1545_v60  ;;  %v1582_v38 = vor.u32 %v2014_v33, %v1581_v32  ;;  %v2020_v60 = vld [vmem:[%s3182_s0 + $0xc8] sm:$0xf0]  ;;  %v2067_v61 = vld [vmem:[%s3182_s0 + $0x244] sm:$0xf] }
  0x27   :  { %2118 = vmatpush.bf16.msrb.mxu3 %v2105_v5  ;;  %v1577_v5 = vld [vmem:[%s3182_s0 + $0x80] sm:$0xf] }
  0x28   :  { %v1578_v7 = vor.u32 %v2012_v6, %v1577_v5 }
  0x2a   :  { %1965 = vmatmul.msk.bf16.gmra.mxu2 %vm771_vm0, %v1542_v35  ;;  %v2086_v35 = vld [vmem:[%s3182_s0 + $0x2d8] sm:$0xf0] }
  0x2b   :  { %2119 = vmatpush.bf16.msrb.mxu3 %v2104_v10  ;;  %v1845_v10 = vld [vmem:[%s3182_s0 + $0x2a0] sm:$0xf]  ;;  %v1870_v39 = vor.u32 %v2086_v35, %v1869_v34 }
  0x2c   :  { %v1846_v15 = vor.u32 %v2080_v11, %v1845_v10  ;;  %v1637_v10 = vld [vmem:[%s3182_s0 + $0xf8] sm:$0xf]  ;;  %v2027_v11 = vld [vmem:[%s3182_s0 + $0x100] sm:$0xf0] }
  0x2f   :  { %2120 = vmatpush.bf16.msrb.mxu3 %v2103_v12  ;;  %v2007_v12 = vld [vmem:[%s3182_s0 + $0x64] sm:$0xf] }
  0x31   :  { %881 = vmatmul.bf16.gmra.mxu0 %v1522_v42  ;;  %v2021_v42 = vld [vmem:[%s3182_s0 + $0xd0] sm:$0xf0] }
  0x32   :  { %1001 = vmatmul.bf16.gmra.mxu3 %v1810_v43  ;;  %1050 = vmatmul.bf16.gmra.mxu1 %v1526_v44  ;;  %v1614_v43 = vor.u32 %v2021_v42, %v1613_v41  ;;  %v1593_v44 = vld [vmem:[%s3182_s0 + $0xa8] sm:$0xf] }
  0x33   :  { %2121 = vmatpush.bf16.msrb.mxu3 %v2102_v14  ;;  %v1558_v14 = vor.u32 %v2008_v9, %v1557_v8  ;;  %v1594_v51 = vor.u32 %v2017_v45, %v1593_v44 }
  0x37   :  { %2122 = vmatpush.bf16.msrb.mxu3 %v2101_v16  ;;  %v1562_v16 = vor.u32 %v2007_v12, %v1559_v13 }
  0x3a   :  { %1966 = vmatmul.msk.bf16.gmra.mxu2 %vm771_vm0, %v1554_v47  ;;  %v2089_v47 = vld [vmem:[%s3182_s0 + $0x2f0] sm:$0xf0] }
  0x3b   :  { %2123 = vmatpush.bf16.msrb.mxu3 %v2100_v21  ;;  %v2011_v21 = vld [vmem:[%s3182_s0 + $0x80] sm:$0xf0]  ;;  %v1882_v52 = vor.u32 %v2089_v47, %v1881_v46 }
  0x3c   :  { %v1570_v26 = vor.u32 %v2011_v21, %v1569_v20  ;;  %v1617_v20 = vld [vmem:[%s3182_s0 + $0xd8] sm:$0xf]  ;;  %v2023_v21 = vld [vmem:[%s3182_s0 + $0xe0] sm:$0xf0] }
  0x3d   :  { %v1618_v30 = vor.u32 %v2023_v21, %v1617_v20  ;;  %v1643_v20 = vld [vmem:[%s3182_s0 + $0x114] sm:$0xf0] }
  0x3f   :  { %2124 = vmatpush.bf16.msrb.mxu3 %v2099_v23  ;;  %v2083_v23 = vld [vmem:[%s3182_s0 + $0x2c0] sm:$0xf0] }
  0x40   :  { %v1858_v27 = vor.u32 %v2083_v23, %v1857_v22  ;;  %v2070_v22 = vld [vmem:[%s3182_s0 + $0x25c] sm:$0xf] }
  0x41   :  { %886 = vmatmul.bf16.gmra.mxu0 %v1534_v54  ;;  %v1625_v54 = vld [vmem:[%s3182_s0 + $0xe0] sm:$0xf]  ;;  %v1814_v32 = vor.u32 %v2070_v22, %v1811_v24 }
  0x42   :  { %1006 = vmatmul.bf16.gmra.mxu3 %v1822_v55  ;;  %1055 = vmatmul.bf16.gmra.mxu1 %v1538_v56  ;;  %v2024_v55 = vld [vmem:[%s3182_s0 + $0xe8] sm:$0xf0] }
  0x43   :  { %2125 = vmatpush.bf16.msra.mxu3 %v2155_v1  ;;  %v1547_v1 = vld [vmem:[%s3182_s0 + $0x54] sm:$0xf0]  ;;  %v1626_v57 = vor.u32 %v2024_v55, %v1625_v54  ;;  %v1631_v54 = vld [vmem:[%s3182_s0 + $0xfc] sm:$0xf0] }
  0x47   :  { %2126 = vmatpush.bf16.msra.mxu3 %v2166_v4  ;;  %v1550_v4 = vor.u32 %v2004_v0, %v1547_v1  ;;  %v1607_v0 = vld [vmem:[%s3182_s0 + $0xcc] sm:$0xf0] }
  0x48   :  { %v1610_v5 = vor.u32 %v2019_v63, %v1607_v0 }
  0x4a   :  { %1967 = vmatmul.msk.bf16.gmra.mxu2 %vm771_vm0, %v1566_v59  ;;  %v1605_v59 = vld [vmem:[%s3182_s0 + $0xc0] sm:$0xf] }
  0x51   :  { %891 = vmatmul.bf16.gmra.mxu0 %v1546_v2  ;;  %v1606_v2 = vor.u32 %v2020_v60, %v1605_v59  ;;  %v1630_v59 = vor.u32 %v2026_v49, %v1629_v48  ;;  %v1847_v48 = vld [vmem:[%s3182_s0 + $0x2ac] sm:$0xf0]  ;;  %v2031_v49 = vld [vmem:[%s3182_s0 + $0x124] sm:$0xf] }
  0x52   :  { %1011 = vmatmul.bf16.gmra.mxu3 %v1834_v3  ;;  %1060 = vmatmul.bf16.gmra.mxu1 %v1550_v4  ;;  %v1802_v4 = vor.u32 %v2067_v61, %v1799_v62 }
  0x5a   :  { %1968 = vmatmul.msk.bf16.gmra.mxu2 %vm771_vm0, %v1578_v7 }
  0x61   :  { %896 = vmatmul.bf16.gmra.mxu0 %v1558_v14 }
  0x62   :  { %1016 = vmatmul.bf16.gmra.mxu3 %v1846_v15  ;;  %1065 = vmatmul.bf16.gmra.mxu1 %v1562_v16  ;;  %v1638_v16 = vor.u32 %v2027_v11, %v1637_v10 }
  0x6a   :  { %1969 = vmatmul.msk.bf16.gmra.mxu2 %vm771_vm0, %v1590_v19 }
  0x71   :  { %901 = vmatmul.bf16.gmra.mxu0 %v1570_v26  ;;  %v1619_v26 = vld [vmem:[%s3182_s0 + $0xe4] sm:$0xf0] }
  0x72   :  { %1021 = vmatmul.bf16.gmra.mxu3 %v1858_v27  ;;  %1070 = vmatmul.bf16.gmra.mxu1 %v1574_v28  ;;  %v1622_v33 = vor.u32 %v2022_v25, %v1619_v26 }
  0x7a   :  { %1970 = vmatmul.msk.bf16.gmra.mxu2 %vm771_vm0, %v1602_v31 }
  0x81   :  { %906 = vmatmul.bf16.gmra.mxu0 %v1582_v38  ;;  %v1649_v38 = vld [vmem:[%s3182_s0 + $0x110] sm:$0xf] }
  0x82   :  { %1026 = vmatmul.bf16.gmra.mxu3 %v1870_v39  ;;  %1075 = vmatmul.bf16.gmra.mxu1 %v1586_v40  ;;  %v2030_v39 = vld [vmem:[%s3182_s0 + $0x118] sm:$0xf0] }
  0x83   :  { %v1650_v44 = vor.u32 %v2030_v39, %v1649_v38 }
  0x8a   :  { %1971 = vmatmul.msk.bf16.gmra.mxu2 %vm771_vm0, %v1614_v43 }
  0x8d   :  { %v1215_v50 = vpop.f32.mrf.mxu2 }
  0x91   :  { %911 = vmatmul.bf16.gmra.mxu0 %v1594_v51 }
  0x92   :  { %1031 = vmatmul.bf16.gmra.mxu3 %v1882_v52  ;;  %1080 = vmatmul.bf16.gmra.mxu1 %v1598_v53  ;;  %v1823_v52 = vld [vmem:[%s3182_s0 + $0x27c] sm:$0xf0]  ;;  %v2025_v53 = vld [vmem:[%s3182_s0 + $0xf4] sm:$0xf] }
  0x93   :  { %v1634_v62 = vor.u32 %v2025_v53, %v1631_v54 }
  0x95   :  { %v1217_v56 = vpop.f32.mrf.mxu2 }
  0x9a   :  { %1972 = vmatmul.msk.bf16.gmra.mxu2 %vm771_vm0, %v1626_v57 }
  0x9d   :  { %v1220_v1 = vpop.f32.mrf.mxu2 }
  0x9e   :  { %v877_v3 = vpop.f32.mrf.mxu0 }
  0x9f   :  { %v878_v6 = vadd.f32 %v2427_v58, %v877_v3  ;;  %v1046_v7 = vpop.f32.mrf.mxu1  ;;  %v1661_v3 = vld [vmem:[%s3182_s0 + $0x128] sm:$0xf] }
  0xa1   :  { %v1047_v8 = vadd.f32 %v1046_v7, %v878_v6  ;;  %916 = vmatmul.bf16.gmra.mxu0 %v1606_v2 }
  0xa2   :  { %1165 = vmatmul.bf16.vlgmr.msrb.gmra.mxu3 %v1802_v4  ;;  %1085 = vmatmul.bf16.gmra.mxu1 %v1610_v5  ;;  %v2033_v4 = vld [vmem:[%s3182_s0 + $0x130] sm:$0xf0] }
  0xa3   :  { %v1216_v9 = vadd.f32 %v1215_v50, %v1047_v8  ;;  %v2073_v50 = vld [vmem:[%s3182_s0 + $0x274] sm:$0xf] }
  0xa4   :  { %v1826_v61 = vor.u32 %v2073_v50, %v1823_v52  ;;  %v1655_v50 = vld [vmem:[%s3182_s0 + $0x12c] sm:$0xf0] }
  0xa5   :  { %v1375_v12 = vmax.f32 %v1216_v9, 0.0  ;;  %v2455_v13 = vpop.f32.mrf.mxu3  ;;  %v1222_v14 = vpop.f32.mrf.mxu2  ;;  %v1662_v9 = vor.u32 %v2033_v4, %v1661_v3 }
  0xa6   :  { %v879_v15 = vpop.f32.mrf.mxu0 }
  0xa7   :  { %1439 = vst [vmem:[%s3184_s3] sm:$0xff] %v1375_v12  ;;  %v880_v17 = vadd.f32 %v2427_v58, %v879_v15  ;;  %v1048_v18 = vpop.f32.mrf.mxu1  ;;  %v2029_v15 = vld [vmem:[%s3182_s0 + $0x110] sm:$0xf0] }
  0xa9   :  { %v1049_v19 = vadd.f32 %v1048_v18, %v880_v17  ;;  %v1835_v18 = vld [vmem:[%s3182_s0 + $0x294] sm:$0xf0] }
  0xaa   :  { %1973 = vmatmul.msk.bf16.gmra.mxu2 %vm771_vm0, %v1638_v16  ;;  %v2076_v16 = vld [vmem:[%s3182_s0 + $0x28c] sm:$0xf] }
  0xab   :  { %v1218_v23 = vadd.f32 %v1217_v56, %v1049_v19  ;;  %v2028_v19 = vld [vmem:[%s3182_s0 + $0x10c] sm:$0xf]  ;;  %v1838_v26 = vor.u32 %v2076_v16, %v1835_v18  ;;  %v1859_v16 = vld [vmem:[%s3182_s0 + $0x2c4] sm:$0xf0] }
  0xac   :  { %v1667_v18 = vld [vmem:[%s3182_s0 + $0x144] sm:$0xf0] }
  0xad   :  { %v1376_v27 = vmax.f32 %v1218_v23, 0.0  ;;  %v2480_v28 = vpop.f32.mrf.mxu3  ;;  %v1225_v29 = vpop.f32.mrf.mxu2 }
  0xae   :  { %v882_v31 = vpop.f32.mrf.mxu0 }
  0xaf   :  { %1440 = vst [vmem:[%s3184_s3 + $0x8] sm:$0xff] %v1376_v27  ;;  %v883_v34 = vadd.f32 %v2427_v58, %v882_v31  ;;  %v1051_v35 = vpop.f32.mrf.mxu1  ;;  %v1646_v27 = vor.u32 %v2028_v19, %v1643_v20 }
  0xb1   :  { %v1052_v36 = vadd.f32 %v1051_v35, %v883_v34  ;;  %921 = vmatmul.bf16.gmra.mxu0 %v1618_v30  ;;  %v2036_v34 = vld [vmem:[%s3182_s0 + $0x148] sm:$0xf0] }
  0xb2   :  { %1170 = vmatmul.bf16.gmra.mxu3 %v1814_v32  ;;  %1090 = vmatmul.bf16.gmra.mxu1 %v1622_v33  ;;  %v1673_v33 = vld [vmem:[%s3182_s0 + $0x140] sm:$0xf] }
  0xb3   :  { %v1221_v37 = vadd.f32 %v1220_v1, %v1052_v36  ;;  %v1674_v39 = vor.u32 %v2036_v34, %v1673_v33  ;;  %v2042_v33 = vld [vmem:[%s3182_s0 + $0x178] sm:$0xf0] }
  0xb5   :  { %v1377_v40 = vmax.f32 %v1221_v37, 0.0  ;;  %v2492_v41 = vpop.f32.mrf.mxu3  ;;  %v1227_v42 = vpop.f32.mrf.mxu2 }
  0xb6   :  { %v884_v43 = vpop.f32.mrf.mxu0 }
  0xb7   :  { %1441 = vst [vmem:[%s3184_s3 + $0x10] sm:$0xff] %v1377_v40  ;;  %v885_v45 = vadd.f32 %v2427_v58, %v884_v43  ;;  %v1053_v46 = vpop.f32.mrf.mxu1 }
  0xb9   :  { %v1054_v47 = vadd.f32 %v1053_v46, %v885_v45  ;;  %v2032_v45 = vld [vmem:[%s3182_s0 + $0x128] sm:$0xf0]  ;;  %v2079_v46 = vld [vmem:[%s3182_s0 + $0x2a4] sm:$0xf] }
  0xba   :  { %1974 = vmatmul.msk.bf16.gmra.mxu2 %vm771_vm0, %v1650_v44  ;;  %v1653_v44 = vld [vmem:[%s3182_s0 + $0x120] sm:$0xf] }
  0xbb   :  { %v1223_v51 = vadd.f32 %v1222_v14, %v1054_v47  ;;  %v1641_v14 = vld [vmem:[%s3182_s0 + $0x108] sm:$0xf]  ;;  %v1654_v54 = vor.u32 %v2032_v45, %v1653_v44  ;;  %v1677_v44 = vld [vmem:[%s3182_s0 + $0x150] sm:$0xf]  ;;  %v2038_v45 = vld [vmem:[%s3182_s0 + $0x158] sm:$0xf0] }
  0xbc   :  { %v1642_v24 = vor.u32 %v2029_v15, %v1641_v14  ;;  %v2082_v14 = vld [vmem:[%s3182_s0 + $0x2bc] sm:$0xf] }
  0xbd   :  { %v1378_v55 = vmax.f32 %v1223_v51, 0.0  ;;  %v2517_v56 = vpop.f32.mrf.mxu3  ;;  %v1230_v57 = vpop.f32.mrf.mxu2 }
  0xbe   :  { %v887_v60 = vpop.f32.mrf.mxu0 }
  0xbf   :  { %1442 = vst [vmem:[%s3184_s3 + $0x18] sm:$0xff] %v1378_v55  ;;  %v888_v63 = vadd.f32 %v2427_v58, %v887_v60  ;;  %v1056_v0 = vpop.f32.mrf.mxu1 }
  0xc1   :  { %v1057_v1 = vadd.f32 %v1056_v0, %v888_v63  ;;  %926 = vmatmul.bf16.gmra.mxu0 %v1630_v59  ;;  %v1658_v59 = vor.u32 %v2031_v49, %v1655_v50  ;;  %v1685_v0 = vld [vmem:[%s3182_s0 + $0x158] sm:$0xf]  ;;  %v2037_v49 = vld [vmem:[%s3182_s0 + $0x154] sm:$0xf]  ;;  %v1679_v50 = vld [vmem:[%s3182_s0 + $0x15c] sm:$0xf0] }
  0xc2   :  { %1175 = vmatmul.bf16.gmra.mxu3 %v1826_v61  ;;  %1095 = vmatmul.bf16.gmra.mxu1 %v1634_v62 }
  0xc3   :  { %v1226_v2 = vadd.f32 %v1225_v29, %v1057_v1  ;;  %v2039_v1 = vld [vmem:[%s3182_s0 + $0x160] sm:$0xf0] }
  0xc5   :  { %v1379_v5 = vmax.f32 %v1226_v2, 0.0  ;;  %v2529_v6 = vpop.f32.mrf.mxu3  ;;  %v1232_v7 = vpop.f32.mrf.mxu2 }
  0xc6   :  { %v889_v8 = vpop.f32.mrf.mxu0 }
  0xc7   :  { %1443 = vst [vmem:[%s3184_s3 + $0x20] sm:$0xff] %v1379_v5  ;;  %v890_v10 = vadd.f32 %v2427_v58, %v889_v8  ;;  %v1058_v11 = vpop.f32.mrf.mxu1 }
  0xc9   :  { %v1059_v12 = vadd.f32 %v1058_v11, %v890_v10  ;;  %v1665_v11 = vld [vmem:[%s3182_s0 + $0x138] sm:$0xf] }
  0xca   :  { %1975 = vmatmul.msk.bf16.gmra.mxu2 %vm771_vm0, %v1662_v9 }
  0xcb   :  { %v1228_v17 = vadd.f32 %v1227_v42, %v1059_v12  ;;  %v2035_v12 = vld [vmem:[%s3182_s0 + $0x140] sm:$0xf0] }
  0xcd   :  { %v1380_v21 = vmax.f32 %v1228_v17, 0.0  ;;  %v2554_v22 = vpop.f32.mrf.mxu3  ;;  %v1235_v23 = vpop.f32.mrf.mxu2  ;;  %v2034_v17 = vld [vmem:[%s3182_s0 + $0x13c] sm:$0xf] }
  0xce   :  { %v892_v25 = vpop.f32.mrf.mxu0 }
  0xcf   :  { %1444 = vst [vmem:[%s3184_s3 + $0x28] sm:$0xff] %v1380_v21  ;;  %v893_v29 = vadd.f32 %v2427_v58, %v892_v25  ;;  %v1061_v30 = vpop.f32.mrf.mxu1  ;;  %v1862_v25 = vor.u32 %v2082_v14, %v1859_v16  ;;  %v1689_v14 = vld [vmem:[%s3182_s0 + $0x168] sm:$0xf]  ;;  %v2088_v16 = vld [vmem:[%s3182_s0 + $0x2ec] sm:$0xf] }
  0xd1   :  { %v1062_v31 = vadd.f32 %v1061_v30, %v893_v29  ;;  %931 = vmatmul.bf16.gmra.mxu0 %v1642_v24 }
  0xd2   :  { %1180 = vmatmul.bf16.gmra.mxu3 %v1838_v26  ;;  %1100 = vmatmul.bf16.gmra.mxu1 %v1646_v27  ;;  %v1670_v26 = vor.u32 %v2034_v17, %v1667_v18  ;;  %v1883_v18 = vld [vmem:[%s3182_s0 + $0x2f4] sm:$0xf0] }
  0xd3   :  { %v1231_v32 = vadd.f32 %v1230_v57, %v1062_v31  ;;  %v1850_v57 = vor.u32 %v2079_v46, %v1847_v48  ;;  %v2085_v46 = vld [vmem:[%s3182_s0 + $0x2d4] sm:$0xf]  ;;  %v1871_v48 = vld [vmem:[%s3182_s0 + $0x2dc] sm:$0xf0] }
  0xd5   :  { %v1381_v35 = vmax.f32 %v1231_v32, 0.0  ;;  %v2566_v36 = vpop.f32.mrf.mxu3  ;;  %v1237_v37 = vpop.f32.mrf.mxu2  ;;  %v1697_v32 = vld [vmem:[%s3182_s0 + $0x170] sm:$0xf] }
  0xd6   :  { %v894_v38 = vpop.f32.mrf.mxu0 }
  0xd7   :  { %1445 = vst [vmem:[%s3184_s3 + $0x30] sm:$0xff] %v1381_v35  ;;  %v895_v40 = vadd.f32 %v2427_v58, %v894_v38  ;;  %v1063_v42 = vpop.f32.mrf.mxu1 }
  0xd9   :  { %v1064_v43 = vadd.f32 %v1063_v42, %v895_v40 }
  0xda   :  { %1976 = vmatmul.msk.bf16.gmra.mxu2 %vm771_vm0, %v1674_v39  ;;  %v1698_v39 = vor.u32 %v2042_v33, %v1697_v32 }
  0xdb   :  { %v1233_v47 = vadd.f32 %v1232_v7, %v1064_v43  ;;  %v1686_v7 = vor.u32 %v2039_v1, %v1685_v0  ;;  %v1709_v1 = vld [vmem:[%s3182_s0 + $0x188] sm:$0xf] }
  0xdd   :  { %v1382_v51 = vmax.f32 %v1233_v47, 0.0  ;;  %v2591_v52 = vpop.f32.mrf.mxu3  ;;  %v1240_v53 = vpop.f32.mrf.mxu2 }
  0xde   :  { %v897_v55 = vpop.f32.mrf.mxu0 }
  0xdf   :  { %1446 = vst [vmem:[%s3184_s3 + $0x38] sm:$0xff] %v1382_v51  ;;  %v898_v60 = vadd.f32 %v2427_v58, %v897_v55  ;;  %v1066_v61 = vpop.f32.mrf.mxu1  ;;  %v1678_v55 = vor.u32 %v2038_v45, %v1677_v44 }
  0xe1   :  { %v1067_v62 = vadd.f32 %v1066_v61, %v898_v60  ;;  %936 = vmatmul.bf16.gmra.mxu0 %v1654_v54  ;;  %v1682_v60 = vor.u32 %v2037_v49, %v1679_v50  ;;  %v2044_v49 = vld [vmem:[%s3182_s0 + $0x188] sm:$0xf0]  ;;  %v1829_v50 = vld [vmem:[%s3182_s0 + $0x278] sm:$0xf] }
  0xe2   :  { %1185 = vmatmul.bf16.gmra.mxu3 %v1850_v57  ;;  %1105 = vmatmul.bf16.gmra.mxu1 %v1658_v59  ;;  %v1874_v59 = vor.u32 %v2085_v46, %v1871_v48  ;;  %v1701_v48 = vld [vmem:[%s3182_s0 + $0x180] sm:$0xf] }
  0xe3   :  { %v1236_v63 = vadd.f32 %v1235_v23, %v1067_v62  ;;  %v1666_v23 = vor.u32 %v2035_v12, %v1665_v11 }
  0xe5   :  { %v1383_v2 = vmax.f32 %v1236_v63, 0.0  ;;  %v2603_v3 = vpop.f32.mrf.mxu3  ;;  %v1242_v4 = vpop.f32.mrf.mxu2 }
  0xe6   :  { %v899_v5 = vpop.f32.mrf.mxu0 }
  0xe7   :  { %1447 = vst [vmem:[%s3184_s3 + $0x40] sm:$0xff] %v1383_v2  ;;  %v900_v8 = vadd.f32 %v2427_v58, %v899_v5  ;;  %v1068_v9 = vpop.f32.mrf.mxu1  ;;  %v2045_v2 = vld [vmem:[%s3182_s0 + $0x190] sm:$0xf0] }
  0xe9   :  { %v1069_v10 = vadd.f32 %v1068_v9, %v900_v8  ;;  %v1710_v9 = vor.u32 %v2045_v2, %v1709_v1 }
  0xea   :  { %1977 = vmatmul.msk.bf16.gmra.mxu2 %vm771_vm0, %v1686_v7 }
  0xeb   :  { %v1238_v15 = vadd.f32 %v1237_v37, %v1069_v10 }
  0xed   :  { %v1384_v19 = vmax.f32 %v1238_v15, 0.0  ;;  %v2628_v20 = vpop.f32.mrf.mxu3  ;;  %v1245_v21 = vpop.f32.mrf.mxu2  ;;  %v2041_v15 = vld [vmem:[%s3182_s0 + $0x170] sm:$0xf0] }
  0xee   :  { %v902_v24 = vpop.f32.mrf.mxu0 }
  0xef   :  { %1448 = vst [vmem:[%s3184_s3 + $0x48] sm:$0xff] %v1384_v19  ;;  %v903_v27 = vadd.f32 %v2427_v58, %v902_v24  ;;  %v1071_v29 = vpop.f32.mrf.mxu1  ;;  %v2040_v19 = vld [vmem:[%s3182_s0 + $0x16c] sm:$0xf] }
  0xf1   :  { %v1072_v30 = vadd.f32 %v1071_v29, %v903_v27  ;;  %941 = vmatmul.bf16.gmra.mxu0 %v1666_v23  ;;  %v1886_v29 = vor.u32 %v2088_v16, %v1883_v18 }
  0xf2   :  { %1190 = vmatmul.bf16.gmra.mxu3 %v1862_v25  ;;  %1110 = vmatmul.bf16.gmra.mxu1 %v1670_v26  ;;  %v1690_v26 = vor.u32 %v2041_v15, %v1689_v14 }
  0xf3   :  { %v1241_v31 = vadd.f32 %v1240_v53, %v1072_v30 }
  0xf5   :  { %v1385_v34 = vmax.f32 %v1241_v31, 0.0  ;;  %v2640_v35 = vpop.f32.mrf.mxu3  ;;  %v1247_v37 = vpop.f32.mrf.mxu2 }
  0xf6   :  { %v904_v38 = vpop.f32.mrf.mxu0 }
  0xf7   :  { %1449 = vst [vmem:[%s3184_s3 + $0x50] sm:$0xff] %v1385_v34  ;;  %v905_v40 = vadd.f32 %v2427_v58, %v904_v38  ;;  %v1073_v42 = vpop.f32.mrf.mxu1  ;;  %v2048_v38 = vld [vmem:[%s3182_s0 + $0x1a8] sm:$0xf0] }
  0xf9   :  { %v1074_v43 = vadd.f32 %v1073_v42, %v905_v40 }
  0xfa   :  { %1978 = vmatmul.msk.bf16.gmra.mxu2 %vm771_vm0, %v1698_v39 }
  0xfb   :  { %v1243_v47 = vadd.f32 %v1242_v4, %v1074_v43 }
  0xfd   :  { %v1386_v51 = vmax.f32 %v1243_v47, 0.0  ;;  %v2665_v53 = vpop.f32.mrf.mxu3  ;;  %v1250_v54 = vpop.f32.mrf.mxu2 }
  0xfe   :  { %v907_v57 = vpop.f32.mrf.mxu0 }
  0xff   :  { %1450 = vst [vmem:[%s3184_s3 + $0x58] sm:$0xff] %v1386_v51  ;;  %v908_v61 = vadd.f32 %v2427_v58, %v907_v57  ;;  %v1076_v62 = vpop.f32.mrf.mxu1  ;;  %v1703_v57 = vld [vmem:[%s3182_s0 + $0x18c] sm:$0xf0] }
 0x101   :  { %v1077_v63 = vadd.f32 %v1076_v62, %v908_v61  ;;  %946 = vmatmul.bf16.gmra.mxu0 %v1678_v55  ;;  %v2043_v55 = vld [vmem:[%s3182_s0 + $0x184] sm:$0xf]  ;;  %v1702_v62 = vor.u32 %v2044_v49, %v1701_v48  ;;  %v1745_v48 = vld [vmem:[%s3182_s0 + $0x1d0] sm:$0xf]  ;;  %v2054_v49 = vld [vmem:[%s3182_s0 + $0x1d8] sm:$0xf0] }
 0x102   :  { %1195 = vmatmul.bf16.gmra.mxu3 %v1874_v59  ;;  %1115 = vmatmul.bf16.gmra.mxu1 %v1682_v60  ;;  %v1706_v1 = vor.u32 %v2043_v55, %v1703_v57 }
 0x103   :  { %v1246_v0 = vadd.f32 %v1245_v21, %v1077_v63  ;;  %v1691_v21 = vld [vmem:[%s3182_s0 + $0x174] sm:$0xf0] }
 0x104   :  { %v1694_v30 = vor.u32 %v2040_v19, %v1691_v21 }
 0x105   :  { %v1387_v4 = vmax.f32 %v1246_v0, 0.0  ;;  %v2677_v5 = vpop.f32.mrf.mxu3  ;;  %v1252_v7 = vpop.f32.mrf.mxu2 }
 0x106   :  { %v909_v8 = vpop.f32.mrf.mxu0 }
 0x107   :  { %1451 = vst [vmem:[%s3184_s3 + $0x60] sm:$0xff] %v1387_v4  ;;  %v910_v10 = vadd.f32 %v2427_v58, %v909_v8  ;;  %v1078_v11 = vpop.f32.mrf.mxu1 }
 0x109   :  { %v1079_v12 = vadd.f32 %v1078_v11, %v910_v10  ;;  %v2051_v10 = vld [vmem:[%s3182_s0 + $0x1c0] sm:$0xf0]  ;;  %v998_v11 = vadd.f32 %v2427_v58, %v2455_v13  ;;  %v1713_v13 = vld [vmem:[%s3182_s0 + $0x198] sm:$0xf] }
 0x10a   :  { %1979 = vmatmul.msk.bf16.gmra.mxu2 %vm771_vm0, %v1710_v9  ;;  %v1733_v9 = vld [vmem:[%s3182_s0 + $0x1b8] sm:$0xf] }
 0x10b   :  { %v1248_v17 = vadd.f32 %v1247_v37, %v1079_v12  ;;  %v1721_v37 = vld [vmem:[%s3182_s0 + $0x1a0] sm:$0xf]  ;;  %v1734_v18 = vor.u32 %v2051_v10, %v1733_v9  ;;  %v1005_v10 = vadd.f32 %v2427_v58, %v2517_v56 }
 0x10c   :  { %v1722_v44 = vor.u32 %v2048_v38, %v1721_v37  ;;  %v1727_v9 = vld [vmem:[%s3182_s0 + $0x1bc] sm:$0xf0] }
 0x10d   :  { %v1388_v23 = vmax.f32 %v1248_v17, 0.0  ;;  %v2702_v24 = vpop.f32.mrf.mxu3  ;;  %v1255_v25 = vpop.f32.mrf.mxu2 }
 0x10e   :  { %v912_v27 = vpop.f32.mrf.mxu0 }
 0x10f   :  { %1452 = vst [vmem:[%s3184_s3 + $0x68] sm:$0xff] %v1388_v23  ;;  %v913_v31 = vadd.f32 %v2427_v58, %v912_v27  ;;  %v1081_v32 = vpop.f32.mrf.mxu1 }
 0x111   :  { %v1082_v33 = vadd.f32 %v1081_v32, %v913_v31  ;;  %951 = vmatmul.bf16.gmra.mxu0 %v1690_v26  ;;  %v1841_v26 = vld [vmem:[%s3182_s0 + $0x290] sm:$0xf]  ;;  %v1715_v31 = vld [vmem:[%s3182_s0 + $0x1a4] sm:$0xf0]  ;;  %v1000_v32 = vadd.f32 %v2427_v58, %v2480_v28 }
 0x112   :  { %1200 = vmatmul.bf16.gmra.mxu3 %v1886_v29  ;;  %1120 = vmatmul.bf16.gmra.mxu1 %v1694_v30  ;;  %v2078_v29 = vld [vmem:[%s3182_s0 + $0x298] sm:$0xf0] }
 0x113   :  { %v1251_v34 = vadd.f32 %v1250_v54, %v1082_v33  ;;  %v2075_v54 = vld [vmem:[%s3182_s0 + $0x280] sm:$0xf0]  ;;  %v2046_v30 = vld [vmem:[%s3182_s0 + $0x19c] sm:$0xf] }
 0x114   :  { %v1830_v0 = vor.u32 %v2075_v54, %v1829_v50  ;;  %v1003_v50 = vadd.f32 %v2427_v58, %v2492_v41  ;;  %v1725_v41 = vld [vmem:[%s3182_s0 + $0x1b0] sm:$0xf] }
 0x115   :  { %v1389_v39 = vmax.f32 %v1251_v34, 0.0  ;;  %v2714_v40 = vpop.f32.mrf.mxu3  ;;  %v1257_v42 = vpop.f32.mrf.mxu2 }
 0x116   :  { %v914_v43 = vpop.f32.mrf.mxu0 }
 0x117   :  { %1453 = vst [vmem:[%s3184_s3 + $0x70] sm:$0xff] %v1389_v39  ;;  %v915_v45 = vadd.f32 %v2427_v58, %v914_v43  ;;  %v1083_v46 = vpop.f32.mrf.mxu1  ;;  %v1842_v43 = vor.u32 %v2078_v29, %v1841_v26  ;;  %v1757_v26 = vld [vmem:[%s3182_s0 + $0x1e8] sm:$0xf]  ;;  %v1008_v29 = vadd.f32 %v2427_v58, %v2529_v6 }
 0x118   :  { %v1737_v6 = vld [vmem:[%s3182_s0 + $0x1c8] sm:$0xf] }
 0x119   :  { %v1084_v47 = vadd.f32 %v1083_v46, %v915_v45 }
 0x11a   :  { %1980 = vmatmul.msk.bf16.gmra.mxu2 %vm771_vm0, %v1722_v44  ;;  %v1718_v44 = vor.u32 %v2046_v30, %v1715_v31 }
 0x11b   :  { %v1253_v51 = vadd.f32 %v1252_v7, %v1084_v47 }
 0x11d   :  { %v1390_v59 = vmax.f32 %v1253_v51, 0.0  ;;  %v2739_v60 = vpop.f32.mrf.mxu3  ;;  %v1260_v61 = vpop.f32.mrf.mxu2 }
 0x11e   :  { %v917_v63 = vpop.f32.mrf.mxu0 }
 0x11f   :  { %1454 = vst [vmem:[%s3184_s3 + $0x78] sm:$0xff] %v1390_v59  ;;  %v918_v2 = vadd.f32 %v2427_v58, %v917_v63  ;;  %v1086_v4 = vpop.f32.mrf.mxu1 }
 0x121   :  { %v1087_v7 = vadd.f32 %v1086_v4, %v918_v2  ;;  %956 = vmatmul.bf16.gmra.mxu0 %v1702_v62  ;;  %v1746_v62 = vor.u32 %v2054_v49, %v1745_v48  ;;  %v1853_v2 = vld [vmem:[%s3182_s0 + $0x2a8] sm:$0xf]  ;;  %v1739_v48 = vld [vmem:[%s3182_s0 + $0x1d4] sm:$0xf0]  ;;  %v1010_v49 = vadd.f32 %v2427_v58, %v2554_v22 }
 0x122   :  { %1989 = vmatmul.msk.bf16.vlgmr.msra.gmra.mxu3 %vm771_vm0, %v1830_v0  ;;  %1125 = vmatmul.bf16.gmra.mxu1 %v1706_v1  ;;  %v2050_v1 = vld [vmem:[%s3182_s0 + $0x1b8] sm:$0xf0] }
 0x123   :  { %v1256_v8 = vadd.f32 %v1255_v25, %v1087_v7  ;;  %v2047_v25 = vld [vmem:[%s3182_s0 + $0x1a0] sm:$0xf0]  ;;  %v2081_v7 = vld [vmem:[%s3182_s0 + $0x2b0] sm:$0xf0] }
 0x124   :  { %v1714_v38 = vor.u32 %v2047_v25, %v1713_v13 }
 0x125   :  { %v1391_v12 = vmax.f32 %v1256_v8, 0.0  ;;  %v1166_v14 = vpop.f32.mrf.mxu3  ;;  %v1262_v15 = vpop.f32.mrf.mxu2  ;;  %v2049_v8 = vld [vmem:[%s3182_s0 + $0x1b4] sm:$0xf] }
 0x126   :  { %v2754_v16 = vadd.f32 %v1166_v14, %v998_v11  ;;  %v919_v17 = vpop.f32.mrf.mxu0 }
 0x127   :  { %1455 = vst [vmem:[%s3184_s3 + $0x80] sm:$0xff] %v1391_v12  ;;  %v920_v19 = vadd.f32 %v2427_v58, %v919_v17  ;;  %v1088_v21 = vpop.f32.mrf.mxu1  ;;  %v1726_v17 = vor.u32 %v2050_v1, %v1725_v41 }
 0x129   :  { %v1089_v23 = vadd.f32 %v1088_v21, %v920_v19  ;;  %v1854_v19 = vor.u32 %v2081_v7, %v1853_v2  ;;  %v1730_v21 = vor.u32 %v2049_v8, %v1727_v9  ;;  %v1769_v2 = vld [vmem:[%s3182_s0 + $0x200] sm:$0xf]  ;;  %v1013_v7 = vadd.f32 %v2427_v58, %v2566_v36 }
 0x12a   :  { %1981 = vmatmul.msk.bf16.gmra.mxu2 %vm771_vm0, %v1734_v18  ;;  %v1749_v36 = vld [vmem:[%s3182_s0 + $0x1e0] sm:$0xf] }
 0x12b   :  { %v1258_v27 = vadd.f32 %v1257_v42, %v1089_v23 }
 0x12d   :  { %v1392_v33 = vmax.f32 %v1258_v27, 0.0  ;;  %v1168_v34 = vpop.f32.mrf.mxu3  ;;  %v1265_v37 = vpop.f32.mrf.mxu2  ;;  %v2057_v27 = vld [vmem:[%s3182_s0 + $0x1f0] sm:$0xf0] }
 0x12e   :  { %v2781_v39 = vadd.f32 %v1168_v34, %v1000_v32  ;;  %v922_v42 = vpop.f32.mrf.mxu0 }
 0x12f   :  { %1456 = vst [vmem:[%s3184_s3 + $0x88] sm:$0xff] %v1392_v33  ;;  %v923_v45 = vadd.f32 %v2427_v58, %v922_v42  ;;  %v1091_v46 = vpop.f32.mrf.mxu1 }
 0x131   :  { %v1092_v47 = vadd.f32 %v1091_v46, %v923_v45  ;;  %961 = vmatmul.bf16.gmra.mxu0 %v1714_v38  ;;  %v1758_v38 = vor.u32 %v2057_v27, %v1757_v26  ;;  %v1865_v45 = vld [vmem:[%s3182_s0 + $0x2c0] sm:$0xf]  ;;  %v1751_v26 = vld [vmem:[%s3182_s0 + $0x1ec] sm:$0xf0]  ;;  %v1015_v27 = vadd.f32 %v2427_v58, %v2591_v52 }
 0x132   :  { %1990 = vmatmul.msk.bf16.gmra.mxu3 %vm771_vm0, %v1842_v43  ;;  %1130 = vmatmul.bf16.gmra.mxu1 %v1718_v44  ;;  %v2053_v44 = vld [vmem:[%s3182_s0 + $0x1d0] sm:$0xf0] }
 0x133   :  { %v1261_v28 = vadd.f32 %v1260_v61, %v1092_v47  ;;  %v2084_v47 = vld [vmem:[%s3182_s0 + $0x2c8] sm:$0xf0] }
 0x135   :  { %v1393_v51 = vmax.f32 %v1261_v28, 0.0  ;;  %v1171_v54 = vpop.f32.mrf.mxu3  ;;  %v1267_v55 = vpop.f32.mrf.mxu2  ;;  %v2052_v28 = vld [vmem:[%s3182_s0 + $0x1cc] sm:$0xf] }
 0x136   :  { %v2796_v57 = vadd.f32 %v1171_v54, %v1003_v50  ;;  %v924_v59 = vpop.f32.mrf.mxu0 }
 0x137   :  { %1457 = vst [vmem:[%s3184_s3 + $0x90] sm:$0xff] %v1393_v51  ;;  %v925_v61 = vadd.f32 %v2427_v58, %v924_v59  ;;  %v1093_v63 = vpop.f32.mrf.mxu1  ;;  %v1738_v59 = vor.u32 %v2053_v44, %v1737_v6 }
 0x139   :  { %v1094_v0 = vadd.f32 %v1093_v63, %v925_v61  ;;  %v1866_v61 = vor.u32 %v2084_v47, %v1865_v45  ;;  %v1742_v63 = vor.u32 %v2052_v28, %v1739_v48  ;;  %v1781_v45 = vld [vmem:[%s3182_s0 + $0x218] sm:$0xf]  ;;  %v1018_v47 = vadd.f32 %v2427_v58, %v2603_v3 }
 0x13a   :  { %1982 = vmatmul.msk.bf16.gmra.mxu2 %vm771_vm0, %v1746_v62  ;;  %v1761_v3 = vld [vmem:[%s3182_s0 + $0x1f8] sm:$0xf] }
 0x13b   :  { %v1263_v4 = vadd.f32 %v1262_v15, %v1094_v0 }
 0x13d   :  { %v1394_v11 = vmax.f32 %v1263_v4, 0.0  ;;  %v1173_v12 = vpop.f32.mrf.mxu3  ;;  %v1270_v14 = vpop.f32.mrf.mxu2  ;;  %v2060_v4 = vld [vmem:[%s3182_s0 + $0x208] sm:$0xf0] }
 0x13e   :  { %v2823_v15 = vadd.f32 %v1173_v12, %v1005_v10  ;;  %v927_v18 = vpop.f32.mrf.mxu0 }
 0x13f   :  { %1458 = vst [vmem:[%s3184_s3 + $0x98] sm:$0xff] %v1394_v11  ;;  %v928_v23 = vadd.f32 %v2427_v58, %v927_v18  ;;  %v1096_v13 = vpop.f32.mrf.mxu1 }
 0x141   :  { %v1097_v25 = vadd.f32 %v1096_v13, %v928_v23  ;;  %966 = vmatmul.bf16.gmra.mxu0 %v1726_v17  ;;  %v1770_v17 = vor.u32 %v2060_v4, %v1769_v2  ;;  %v1877_v23 = vld [vmem:[%s3182_s0 + $0x2d8] sm:$0xf]  ;;  %v1763_v2 = vld [vmem:[%s3182_s0 + $0x204] sm:$0xf0]  ;;  %v1020_v4 = vadd.f32 %v2427_v58, %v2628_v20 }
 0x142   :  { %1991 = vmatmul.msk.bf16.gmra.mxu3 %vm771_vm0, %v1854_v19  ;;  %1135 = vmatmul.bf16.gmra.mxu1 %v1730_v21  ;;  %v2056_v21 = vld [vmem:[%s3182_s0 + $0x1e8] sm:$0xf0] }
 0x143   :  { %v1266_v56 = vadd.f32 %v1265_v37, %v1097_v25  ;;  %v2087_v25 = vld [vmem:[%s3182_s0 + $0x2e0] sm:$0xf0] }
 0x145   :  { %v1395_v30 = vmax.f32 %v1266_v56, 0.0  ;;  %v1176_v31 = vpop.f32.mrf.mxu3  ;;  %v1272_v32 = vpop.f32.mrf.mxu2  ;;  %v2055_v56 = vld [vmem:[%s3182_s0 + $0x1e4] sm:$0xf] }
 0x146   :  { %v2838_v33 = vadd.f32 %v1176_v31, %v1008_v29  ;;  %v929_v34 = vpop.f32.mrf.mxu0 }
 0x147   :  { %1459 = vst [vmem:[%s3184_s3 + $0xa0] sm:$0xff] %v1395_v30  ;;  %v930_v37 = vadd.f32 %v2427_v58, %v929_v34  ;;  %v1098_v42 = vpop.f32.mrf.mxu1  ;;  %v1750_v34 = vor.u32 %v2056_v21, %v1749_v36 }
 0x149   :  { %v1099_v43 = vadd.f32 %v1098_v42, %v930_v37  ;;  %v1878_v37 = vor.u32 %v2087_v25, %v1877_v23  ;;  %v1754_v42 = vor.u32 %v2055_v56, %v1751_v26  ;;  %v1793_v23 = vld [vmem:[%s3182_s0 + $0x230] sm:$0xf]  ;;  %v1023_v25 = vadd.f32 %v2427_v58, %v2640_v35 }
 0x14a   :  { %1983 = vmatmul.msk.bf16.gmra.mxu2 %vm771_vm0, %v1758_v38  ;;  %v1773_v35 = vld [vmem:[%s3182_s0 + $0x210] sm:$0xf] }
 0x14b   :  { %v1268_v46 = vadd.f32 %v1267_v55, %v1099_v43 }
 0x14d   :  { %v1396_v50 = vmax.f32 %v1268_v46, 0.0  ;;  %v1178_v51 = vpop.f32.mrf.mxu3  ;;  %v1275_v54 = vpop.f32.mrf.mxu2  ;;  %v2063_v46 = vld [vmem:[%s3182_s0 + $0x220] sm:$0xf0] }
 0x14e   :  { %v2865_v55 = vadd.f32 %v1178_v51, %v1010_v49  ;;  %v932_v62 = vpop.f32.mrf.mxu0 }
 0x14f   :  { %1460 = vst [vmem:[%s3184_s3 + $0xa8] sm:$0xff] %v1396_v50  ;;  %v933_v0 = vadd.f32 %v2427_v58, %v932_v62  ;;  %v1101_v41 = vpop.f32.mrf.mxu1 }
 0x151   :  { %v1102_v1 = vadd.f32 %v1101_v41, %v933_v0  ;;  %971 = vmatmul.bf16.gmra.mxu0 %v1738_v59  ;;  %v1782_v59 = vor.u32 %v2063_v46, %v1781_v45  ;;  %v1889_v0 = vld [vmem:[%s3182_s0 + $0x2f0] sm:$0xf] }
 0x152   :  { %1992 = vmatmul.msk.bf16.gmra.mxu3 %vm771_vm0, %v1866_v61  ;;  %1140 = vmatmul.bf16.gmra.mxu1 %v1742_v63  ;;  %v2059_v63 = vld [vmem:[%s3182_s0 + $0x200] sm:$0xf0] }
 0x153   :  { %v1271_v22 = vadd.f32 %v1270_v14, %v1102_v1  ;;  %v2090_v1 = vld [vmem:[%s3182_s0 + $0x2f8] sm:$0xf0] }
 0x155   :  { %v1397_v8 = vmax.f32 %v1271_v22, 0.0  ;;  %v1181_v9 = vpop.f32.mrf.mxu3  ;;  %v1277_v10 = vpop.f32.mrf.mxu2  ;;  %v2058_v22 = vld [vmem:[%s3182_s0 + $0x1fc] sm:$0xf] }
 0x156   :  { %v2880_v11 = vadd.f32 %v1181_v9, %v1013_v7  ;;  %v934_v12 = vpop.f32.mrf.mxu0 }
 0x157   :  { %1461 = vst [vmem:[%s3184_s3 + $0xb0] sm:$0xff] %v1397_v8  ;;  %v935_v14 = vadd.f32 %v2427_v58, %v934_v12  ;;  %v1103_v18 = vpop.f32.mrf.mxu1  ;;  %v1762_v12 = vor.u32 %v2059_v63, %v1761_v3  ;;  %v2069_v3 = vld [vmem:[%s3182_s0 + $0x250] sm:$0xf0]  ;;  %v3000_v63 = vld [vmem:[%s3183_s2] ss:$0 sm:$0xff] }
 0x159   :  { %v1104_v19 = vadd.f32 %v1103_v18, %v935_v14  ;;  %v1890_v14 = vor.u32 %v2090_v1, %v1889_v0  ;;  %v1766_v18 = vor.u32 %v2058_v22, %v1763_v2 }
 0x15a   :  { %1984 = vmatmul.msk.bf16.gmra.mxu2 %vm771_vm0, %v1770_v17 }
 0x15b   :  { %v1273_v13 = vadd.f32 %v1272_v32, %v1104_v19 }
 0x15d   :  { %v1398_v29 = vmax.f32 %v1273_v13, 0.0  ;;  %v1183_v30 = vpop.f32.mrf.mxu3  ;;  %v1280_v31 = vpop.f32.mrf.mxu2  ;;  %v2066_v13 = vld [vmem:[%s3182_s0 + $0x238] sm:$0xf0] }
 0x15e   :  { %v2907_v32 = vadd.f32 %v1183_v30, %v1015_v27  ;;  %v937_v38 = vpop.f32.mrf.mxu0 }
 0x15f   :  { %1462 = vst [vmem:[%s3184_s3 + $0xb8] sm:$0xff] %v1398_v29  ;;  %v938_v43 = vadd.f32 %v2427_v58, %v937_v38  ;;  %v1106_v6 = vpop.f32.mrf.mxu1 }
 0x161   :  { %v1107_v44 = vadd.f32 %v1106_v6, %v938_v43  ;;  %976 = vmatmul.bf16.gmra.mxu0 %v1750_v34  ;;  %v1794_v34 = vor.u32 %v2066_v13, %v1793_v23  ;;  %v2061_v6 = vld [vmem:[%s3182_s0 + $0x214] sm:$0xf] }
 0x162   :  { %1993 = vmatmul.msk.bf16.gmra.mxu3 %vm771_vm0, %v1878_v37  ;;  %1145 = vmatmul.bf16.gmra.mxu1 %v1754_v42  ;;  %v2062_v42 = vld [vmem:[%s3182_s0 + $0x218] sm:$0xf0] }
 0x163   :  { %v1276_v52 = vadd.f32 %v1275_v54, %v1107_v44  ;;  %v1775_v44 = vld [vmem:[%s3182_s0 + $0x21c] sm:$0xf0] }
 0x165   :  { %v1399_v28 = vmax.f32 %v1276_v52, 0.0  ;;  %v1186_v48 = vpop.f32.mrf.mxu3  ;;  %v1282_v49 = vpop.f32.mrf.mxu2  ;;  %v1025_v52 = vadd.f32 %v2427_v58, %v2665_v53  ;;  %v1805_v53 = vld [vmem:[%s3182_s0 + $0x248] sm:$0xf] }
 0x166   :  { %v2922_v50 = vadd.f32 %v1186_v48, %v1018_v47  ;;  %v939_v51 = vpop.f32.mrf.mxu0 }
 0x167   :  { %1463 = vst [vmem:[%s3184_s3 + $0xc0] sm:$0xff] %v1399_v28  ;;  %v940_v54 = vadd.f32 %v2427_v58, %v939_v51  ;;  %v1108_v62 = vpop.f32.mrf.mxu1  ;;  %v1774_v28 = vor.u32 %v2062_v42, %v1773_v35 }
 0x169   :  { %v1109_v61 = vadd.f32 %v1108_v62, %v940_v54 }
 0x16a   :  { %1985 = vmatmul.msk.bf16.gmra.mxu2 %vm771_vm0, %v1782_v59  ;;  %v1778_v59 = vor.u32 %v2061_v6, %v1775_v44 }
 0x16b   :  { %v1278_v41 = vadd.f32 %v1277_v10, %v1109_v61 }
 0x16d   :  { %v1400_v7 = vmax.f32 %v1278_v41, 0.0  ;;  %v1188_v8 = vpop.f32.mrf.mxu3  ;;  %v1285_v9 = vpop.f32.mrf.mxu2 }
 0x16e   :  { %v2949_v10 = vadd.f32 %v1188_v8, %v1020_v4  ;;  %v942_v17 = vpop.f32.mrf.mxu0  ;;  %v1806_v4 = vor.u32 %v2069_v3, %v1805_v53 }
 0x16f   :  { %1464 = vst [vmem:[%s3184_s3 + $0xc8] sm:$0xff] %v1400_v7  ;;  %v943_v19 = vadd.f32 %v2427_v58, %v942_v17  ;;  %v1111_v36 = vpop.f32.mrf.mxu1 }
 0x171   :  { %v1112_v21 = vadd.f32 %v1111_v36, %v943_v19  ;;  %981 = vmatmul.bf16.gmra.mxu0 %v1762_v12  ;;  %v2065_v12 = vld [vmem:[%s3182_s0 + $0x230] sm:$0xf0]  ;;  %v1030_v19 = vadd.f32 %v3000_v63, %v2702_v24  ;;  %v1817_v24 = vld [vmem:[%s3182_s0 + $0x260] sm:$0xf] }
 0x172   :  { %1994 = vmatmul.msk.bf16.gmra.mxu3 %vm771_vm0, %v1890_v14  ;;  %1150 = vmatmul.bf16.gmra.mxu1 %v1766_v18  ;;  %v2064_v14 = vld [vmem:[%s3182_s0 + $0x22c] sm:$0xf]  ;;  %v1787_v18 = vld [vmem:[%s3182_s0 + $0x234] sm:$0xf0] }
 0x173   :  { %v1281_v20 = vadd.f32 %v1280_v31, %v1112_v21 }
 0x175   :  { %v1401_v56 = vmax.f32 %v1281_v20, 0.0  ;;  %v1191_v26 = vpop.f32.mrf.mxu3  ;;  %v1287_v27 = vpop.f32.mrf.mxu2 }
 0x176   :  { %v2964_v29 = vadd.f32 %v1191_v26, %v1023_v25  ;;  %v944_v30 = vpop.f32.mrf.mxu0 }
 0x177   :  { %1465 = vst [vmem:[%s3184_s3 + $0xd0] sm:$0xff] %v1401_v56  ;;  %v945_v31 = vadd.f32 %v2427_v58, %v944_v30  ;;  %v1113_v38 = vpop.f32.mrf.mxu1  ;;  %v1790_v56 = vor.u32 %v2064_v14, %v1787_v18 }
 0x179   :  { %v1114_v37 = vadd.f32 %v1113_v38, %v945_v31  ;;  %v2072_v31 = vld [vmem:[%s3182_s0 + $0x268] sm:$0xf0]  ;;  %v1033_v38 = vadd.f32 %v3000_v63, %v2714_v40  ;;  %v1035_v40 = vadd.f32 %v3000_v63, %v2739_v60 }
 0x17a   :  { %1986 = vmatmul.msk.bf16.gmra.mxu2 %vm771_vm0, %v1794_v34  ;;  %v1818_v44 = vor.u32 %v2072_v31, %v1817_v24 }
 0x17b   :  { %v1283_v43 = vadd.f32 %v1282_v49, %v1114_v37 }
 0x17d   :  { %v1402_v45 = vmax.f32 %v1283_v43, 0.0  ;;  %v1193_v46 = vpop.f32.mrf.mxu3  ;;  %v1290_v47 = vpop.f32.mrf.mxu2 }
 0x17e   :  { %v2985_v48 = vadd.f32 %v1193_v46, %v1025_v52  ;;  %v947_v51 = vpop.f32.mrf.mxu0 }
 0x17f   :  { %1466 = vst [vmem:[%s3184_s3 + $0xd8] sm:$0xff] %v1402_v45  ;;  %v948_v49 = vadd.f32 %v2427_v58, %v947_v51  ;;  %v1116_v54 = vpop.f32.mrf.mxu1  ;;  %v1028_v58 = vadd.f32 %v3000_v63, %v2677_v5  ;;  %v1785_v5 = vld [vmem:[%s3182_s0 + $0x228] sm:$0xf] }
 0x180   :  { %v1786_v23 = vor.u32 %v2065_v12, %v1785_v5 }
 0x181   :  { %v1117_v62 = vadd.f32 %v1116_v54, %v948_v49  ;;  %986 = vmatmul.bf16.gmra.mxu0 %v1774_v28 }
 0x182   :  { %1155 = vmatmul.bf16.gmra.mxu1 %v1778_v59 }
 0x183   :  { %v1286_v61 = vadd.f32 %v1285_v9, %v1117_v62 }
 0x185   :  { %v1403_v0 = vmax.f32 %v1286_v61, 0.0  ;;  %v1196_v41 = vpop.f32.mrf.mxu3  ;;  %v1292_v1 = vpop.f32.mrf.mxu2 }
 0x186   :  { %v3004_v22 = vadd.f32 %v1196_v41, %v1028_v58  ;;  %v949_v2 = vpop.f32.mrf.mxu0 }
 0x187   :  { %1467 = vst [vmem:[%s3184_s3 + $0xe0] sm:$0xff] %v1403_v0  ;;  %v950_v7 = vadd.f32 %v3000_v63, %v949_v2  ;;  %v1118_v8 = vpop.f32.mrf.mxu1 }
 0x189   :  { %v1119_v9 = vadd.f32 %v1118_v8, %v950_v7 }
 0x18a   :  { %1987 = vmatmul.msk.bf16.gmra.mxu2 %vm771_vm0, %v1806_v4 }
 0x18b   :  { %v1288_v17 = vadd.f32 %v1287_v27, %v1119_v9 }
 0x18d   :  { %v1404_v36 = vmax.f32 %v1288_v17, 0.0  ;;  %v1198_v21 = vpop.f32.mrf.mxu3  ;;  %v1295_v20 = vpop.f32.mrf.mxu2 }
 0x18e   :  { %v3025_v13 = vadd.f32 %v1198_v21, %v1030_v19  ;;  %v952_v25 = vpop.f32.mrf.mxu0 }
 0x18f   :  { %1468 = vst [vmem:[%s3184_s3 + $0xe8] sm:$0xff] %v1404_v36  ;;  %v953_v26 = vadd.f32 %v3000_v63, %v952_v25  ;;  %v1121_v27 = vpop.f32.mrf.mxu1 }
 0x191   :  { %v1122_v30 = vadd.f32 %v1121_v27, %v953_v26  ;;  %991 = vmatmul.bf16.gmra.mxu0 %v1786_v23 }
 0x192   :  { %1160 = vmatmul.bf16.gmra.mxu1 %v1790_v56 }
 0x193   :  { %v1291_v34 = vadd.f32 %v1290_v47, %v1122_v30 }
 0x195   :  { %v1405_v37 = vmax.f32 %v1291_v34, 0.0  ;;  %v1201_v35 = vpop.f32.mrf.mxu3  ;;  %v1297_v42 = vpop.f32.mrf.mxu2 }
 0x196   :  { %v3039_v43 = vadd.f32 %v1201_v35, %v1033_v38  ;;  %v954_v6 = vpop.f32.mrf.mxu0 }
 0x197   :  { %1469 = vst [vmem:[%s3184_s3 + $0xf0] sm:$0xff] %v1405_v37  ;;  %v955_v52 = vadd.f32 %v3000_v63, %v954_v6  ;;  %v1123_v45 = vpop.f32.mrf.mxu1 }
 0x199   :  { %v1124_v46 = vadd.f32 %v1123_v45, %v955_v52 }
 0x19a   :  { %1988 = vmatmul.msk.bf16.gmra.mxu2 %vm771_vm0, %v1818_v44 }
 0x19b   :  { %v1293_v47 = vadd.f32 %v1292_v1, %v1124_v46 }
 0x19d   :  { %v1406_v28 = vmax.f32 %v1293_v47, 0.0  ;;  %v1203_v51 = vpop.f32.mrf.mxu3  ;;  %v1300_v59 = vpop.f32.mrf.mxu2 }
 0x19e   :  { %v3048_v49 = vadd.f32 %v1203_v51, %v1035_v40  ;;  %v957_v54 = vpop.f32.mrf.mxu0 }
 0x19f   :  { %1470 = vst [vmem:[%s3184_s3 + $0xf8] sm:$0xff] %v1406_v28  ;;  %v958_v62 = vadd.f32 %v3000_v63, %v957_v54  ;;  %v1126_v61 = vpop.f32.mrf.mxu1 }
 0x1a1   :  { %v1127_v53 = vadd.f32 %v1126_v61, %v958_v62 }
 0x1a3   :  { %v1296_v3 = vadd.f32 %v1295_v20, %v1127_v53 }
 0x1a5   :  { %v1407_v58 = vmax.f32 %v1296_v3, 0.0  ;;  %v1302_v0 = vpop.f32.mrf.mxu2  ;;  %v1345_v41 = vpop.f32.mrf.mxu3 }
 0x1a6   :  { %v1346_v60 = vadd.f32 %v1345_v41, %v2838_v33  ;;  %v959_v1 = vpop.f32.mrf.mxu0 }
 0x1a7   :  { %1471 = vst [vmem:[%s3184_s3 + $0x100] sm:$0xff] %v1407_v58  ;;  %v960_v2 = vadd.f32 %v3000_v63, %v959_v1  ;;  %v1128_v4 = vpop.f32.mrf.mxu1 }
 0x1a8   :  { %v1427_v7 = vmax.f32 %v1346_v60, 0.0 }
 0x1a9   :  { %v1129_v8 = vadd.f32 %v1128_v4, %v960_v2 }
 0x1aa   :  { %1491 = vst [vmem:[%s3184_s3 + $0x1a0] sm:$0xff] %v1427_v7 }
 0x1ab   :  { %v1298_v9 = vadd.f32 %v1297_v42, %v1129_v8 }
 0x1ad   :  { %v1408_v5 = vmax.f32 %v1298_v9, 0.0  ;;  %v1305_v12 = vpop.f32.mrf.mxu2  ;;  %v1347_v17 = vpop.f32.mrf.mxu3 }
 0x1ae   :  { %v1348_v33 = vadd.f32 %v1347_v17, %v2865_v55  ;;  %v962_v14 = vpop.f32.mrf.mxu0 }
 0x1af   :  { %1472 = vst [vmem:[%s3184_s3 + $0x108] sm:$0xff] %v1408_v5  ;;  %v963_v18 = vadd.f32 %v3000_v63, %v962_v14  ;;  %v1131_v19 = vpop.f32.mrf.mxu1 }
 0x1b0   :  { %v1428_v36 = vmax.f32 %v1348_v33, 0.0 }
 0x1b1   :  { %v1132_v21 = vadd.f32 %v1131_v19, %v963_v18 }
 0x1b2   :  { %1492 = vst [vmem:[%s3184_s3 + $0x1a8] sm:$0xff] %v1428_v36 }
 0x1b3   :  { %v1301_v20 = vadd.f32 %v1300_v59, %v1132_v21 }
 0x1b5   :  { %v1409_v23 = vmax.f32 %v1301_v20, 0.0  ;;  %v1307_v25 = vpop.f32.mrf.mxu2  ;;  %v1350_v56 = vpop.f32.mrf.mxu3 }
 0x1b6   :  { %v1351_v55 = vadd.f32 %v1350_v56, %v2880_v11  ;;  %v964_v26 = vpop.f32.mrf.mxu0 }
 0x1b7   :  { %1473 = vst [vmem:[%s3184_s3 + $0x110] sm:$0xff] %v1409_v23  ;;  %v965_v27 = vadd.f32 %v3000_v63, %v964_v26  ;;  %v1133_v30 = vpop.f32.mrf.mxu1 }
 0x1b8   :  { %v1429_v34 = vmax.f32 %v1351_v55, 0.0 }
 0x1b9   :  { %v1134_v24 = vadd.f32 %v1133_v30, %v965_v27 }
 0x1ba   :  { %1493 = vst [vmem:[%s3184_s3 + $0x1b0] sm:$0xff] %v1429_v34 }
 0x1bb   :  { %v1303_v31 = vadd.f32 %v1302_v0, %v1134_v24 }
 0x1bd   :  { %v1410_v38 = vmax.f32 %v1303_v31, 0.0  ;;  %v1310_v37 = vpop.f32.mrf.mxu2  ;;  %v1352_v35 = vpop.f32.mrf.mxu3 }
 0x1be   :  { %v1353_v11 = vadd.f32 %v1352_v35, %v2907_v32  ;;  %v967_v42 = vpop.f32.mrf.mxu0 }
 0x1bf   :  { %1474 = vst [vmem:[%s3184_s3 + $0x118] sm:$0xff] %v1410_v38  ;;  %v968_v6 = vadd.f32 %v3000_v63, %v967_v42  ;;  %v1136_v44 = vpop.f32.mrf.mxu1 }
 0x1c0   :  { %v1430_v52 = vmax.f32 %v1353_v11, 0.0 }
 0x1c1   :  { %v1137_v45 = vadd.f32 %v1136_v44, %v968_v6 }
 0x1c2   :  { %1494 = vst [vmem:[%s3184_s3 + $0x1b8] sm:$0xff] %v1430_v52 }
 0x1c3   :  { %v1306_v46 = vadd.f32 %v1305_v12, %v1137_v45 }
 0x1c5   :  { %v1411_v47 = vmax.f32 %v1306_v46, 0.0  ;;  %v1312_v40 = vpop.f32.mrf.mxu2  ;;  %v1355_v28 = vpop.f32.mrf.mxu3 }
 0x1c6   :  { %v1356_v32 = vadd.f32 %v1355_v28, %v2922_v50  ;;  %v969_v51 = vpop.f32.mrf.mxu0 }
 0x1c7   :  { %1475 = vst [vmem:[%s3184_s3 + $0x120] sm:$0xff] %v1411_v47  ;;  %v970_v59 = vadd.f32 %v3000_v63, %v969_v51  ;;  %v1138_v54 = vpop.f32.mrf.mxu1 }
 0x1c8   :  { %v1431_v62 = vmax.f32 %v1356_v32, 0.0 }
 0x1c9   :  { %v1139_v61 = vadd.f32 %v1138_v54, %v970_v59 }
 0x1ca   :  { %1495 = vst [vmem:[%s3184_s3 + $0x1c0] sm:$0xff] %v1431_v62 }
 0x1cb   :  { %v1308_v53 = vadd.f32 %v1307_v25, %v1139_v61 }
 0x1cd   :  { %v1412_v3 = vmax.f32 %v1308_v53, 0.0  ;;  %v1315_v58 = vpop.f32.mrf.mxu2  ;;  %v1357_v0 = vpop.f32.mrf.mxu3 }
 0x1ce   :  { %v1358_v50 = vadd.f32 %v1357_v0, %v2949_v10  ;;  %v972_v41 = vpop.f32.mrf.mxu0 }
 0x1cf   :  { %1476 = vst [vmem:[%s3184_s3 + $0x128] sm:$0xff] %v1412_v3  ;;  %v973_v60 = vadd.f32 %v3000_v63, %v972_v41  ;;  %v1141_v1 = vpop.f32.mrf.mxu1 }
 0x1d0   :  { %v1432_v2 = vmax.f32 %v1358_v50, 0.0 }
 0x1d1   :  { %v1142_v4 = vadd.f32 %v1141_v1, %v973_v60 }
 0x1d2   :  { %1496 = vst [vmem:[%s3184_s3 + $0x1c8] sm:$0xff] %v1432_v2 }
 0x1d3   :  { %v1311_v7 = vadd.f32 %v1310_v37, %v1142_v4 }
 0x1d5   :  { %v1413_v8 = vmax.f32 %v1311_v7, 0.0  ;;  %v1317_v9 = vpop.f32.mrf.mxu2  ;;  %v1360_v5 = vpop.f32.mrf.mxu3 }
 0x1d6   :  { %v1361_v10 = vadd.f32 %v1360_v5, %v2964_v29  ;;  %v974_v12 = vpop.f32.mrf.mxu0 }
 0x1d7   :  { %1477 = vst [vmem:[%s3184_s3 + $0x130] sm:$0xff] %v1413_v8  ;;  %v975_v17 = vadd.f32 %v3000_v63, %v974_v12  ;;  %v1143_v33 = vpop.f32.mrf.mxu1 }
 0x1d8   :  { %v1433_v14 = vmax.f32 %v1361_v10, 0.0 }
 0x1d9   :  { %v1144_v18 = vadd.f32 %v1143_v33, %v975_v17 }
 0x1da   :  { %1497 = vst [vmem:[%s3184_s3 + $0x1d0] sm:$0xff] %v1433_v14 }
 0x1db   :  { %v1313_v19 = vadd.f32 %v1312_v40, %v1144_v18 }
 0x1dd   :  { %v1414_v36 = vmax.f32 %v1313_v19, 0.0  ;;  %v1320_v21 = vpop.f32.mrf.mxu2  ;;  %v1362_v20 = vpop.f32.mrf.mxu3 }
 0x1de   :  { %v1363_v29 = vadd.f32 %v1362_v20, %v2985_v48  ;;  %v977_v23 = vpop.f32.mrf.mxu0 }
 0x1df   :  { %1478 = vst [vmem:[%s3184_s3 + $0x138] sm:$0xff] %v1414_v36  ;;  %v978_v25 = vadd.f32 %v3000_v63, %v977_v23  ;;  %v1146_v56 = vpop.f32.mrf.mxu1 }
 0x1e0   :  { %v1434_v55 = vmax.f32 %v1363_v29, 0.0 }
 0x1e1   :  { %v1147_v26 = vadd.f32 %v1146_v56, %v978_v25 }
 0x1e2   :  { %1498 = vst [vmem:[%s3184_s3 + $0x1d8] sm:$0xff] %v1434_v55 }
 0x1e3   :  { %v1316_v27 = vadd.f32 %v1315_v58, %v1147_v26 }
 0x1e5   :  { %v1415_v30 = vmax.f32 %v1316_v27, 0.0  ;;  %v1322_v34 = vpop.f32.mrf.mxu2  ;;  %v1365_v24 = vpop.f32.mrf.mxu3 }
 0x1e6   :  { %v1366_v48 = vadd.f32 %v1365_v24, %v3004_v22  ;;  %v979_v31 = vpop.f32.mrf.mxu0 }
 0x1e7   :  { %1479 = vst [vmem:[%s3184_s3 + $0x140] sm:$0xff] %v1415_v30  ;;  %v980_v38 = vadd.f32 %v3000_v63, %v979_v31  ;;  %v1148_v37 = vpop.f32.mrf.mxu1 }
 0x1e8   :  { %v1435_v35 = vmax.f32 %v1366_v48, 0.0 }
 0x1e9   :  { %v1149_v11 = vadd.f32 %v1148_v37, %v980_v38 }
 0x1ea   :  { %1499 = vst [vmem:[%s3184_s3 + $0x1e0] sm:$0xff] %v1435_v35 }
 0x1eb   :  { %v1318_v42 = vadd.f32 %v1317_v9, %v1149_v11 }
 0x1ed   :  { %v1416_v6 = vmax.f32 %v1318_v42, 0.0  ;;  %v1325_v44 = vpop.f32.mrf.mxu2  ;;  %v1367_v52 = vpop.f32.mrf.mxu3 }
 0x1ee   :  { %v1368_v22 = vadd.f32 %v1367_v52, %v3025_v13  ;;  %v982_v45 = vpop.f32.mrf.mxu0 }
 0x1ef   :  { %1480 = vst [vmem:[%s3184_s3 + $0x148] sm:$0xff] %v1416_v6  ;;  %v983_v46 = vadd.f32 %v3000_v63, %v982_v45  ;;  %v1151_v47 = vpop.f32.mrf.mxu1 }
 0x1f0   :  { %v1436_v40 = vmax.f32 %v1368_v22, 0.0 }
 0x1f1   :  { %v1152_v28 = vadd.f32 %v1151_v47, %v983_v46 }
 0x1f2   :  { %1500 = vst [vmem:[%s3184_s3 + $0x1e8] sm:$0xff] %v1436_v40 }
 0x1f3   :  { %v1321_v32 = vadd.f32 %v1320_v21, %v1152_v28 }
 0x1f5   :  { %v1417_v51 = vmax.f32 %v1321_v32, 0.0  ;;  %v1327_v59 = vpop.f32.mrf.mxu2  ;;  %v1370_v54 = vpop.f32.mrf.mxu3 }
 0x1f6   :  { %v1371_v13 = vadd.f32 %v1370_v54, %v3039_v43  ;;  %v984_v62 = vpop.f32.mrf.mxu0 }
 0x1f7   :  { %1481 = vst [vmem:[%s3184_s3 + $0x150] sm:$0xff] %v1417_v51  ;;  %v985_v61 = vadd.f32 %v3000_v63, %v984_v62  ;;  %v1153_v53 = vpop.f32.mrf.mxu1 }
 0x1f8   :  { %v1437_v3 = vmax.f32 %v1371_v13, 0.0 }
 0x1f9   :  { %v1154_v58 = vadd.f32 %v1153_v53, %v985_v61 }
 0x1fa   :  { %1501 = vst [vmem:[%s3184_s3 + $0x1f0] sm:$0xff] %v1437_v3 }
 0x1fb   :  { %v1323_v0 = vadd.f32 %v1322_v34, %v1154_v58 }
 0x1fd   :  { %v1418_v50 = vmax.f32 %v1323_v0, 0.0  ;;  %v1330_v41 = vpop.f32.mrf.mxu2  ;;  %v1372_v60 = vpop.f32.mrf.mxu3 }
 0x1fe   :  { %v1373_v43 = vadd.f32 %v1372_v60, %v3048_v49  ;;  %v987_v1 = vpop.f32.mrf.mxu0 }
 0x1ff   :  { %1482 = vst [vmem:[%s3184_s3 + $0x158] sm:$0xff] %v1418_v50  ;;  %v988_v2 = vadd.f32 %v3000_v63, %v987_v1  ;;  %v1156_v4 = vpop.f32.mrf.mxu1 }
 0x200   :  { %v1438_v7 = vmax.f32 %v1373_v43, 0.0 }
 0x201   :  { %v1157_v8 = vadd.f32 %v1156_v4, %v988_v2 }
 0x202   :  { %1502 = vst [vmem:[%s3184_s3 + $0x1f8] sm:$0xff] %v1438_v7 }
 0x203   :  { %v1326_v9 = vadd.f32 %v1325_v44, %v1157_v8 }
 0x205   :  { %v1419_v5 = vmax.f32 %v1326_v9, 0.0  ;;  %v1332_v10 = vpop.f32.mrf.mxu2 }
 0x206   :  { %v989_v12 = vpop.f32.mrf.mxu0 }
 0x207   :  { %1483 = vst [vmem:[%s3184_s3 + $0x160] sm:$0xff] %v1419_v5  ;;  %v990_v49 = vadd.f32 %v3000_v63, %v989_v12  ;;  %v1158_v17 = vpop.f32.mrf.mxu1 }
 0x209   :  { %v1159_v33 = vadd.f32 %v1158_v17, %v990_v49 }
 0x20b   :  { %v1328_v14 = vadd.f32 %v1327_v59, %v1159_v33 }
 0x20d   :  { %v1420_v18 = vmax.f32 %v1328_v14, 0.0  ;;  %v1335_v19 = vpop.f32.mrf.mxu2 }
 0x20e   :  { %v1336_v36 = vadd.f32 %v1335_v19, %v2754_v16  ;;  %v992_v21 = vpop.f32.mrf.mxu0 }
 0x20f   :  { %1484 = vst [vmem:[%s3184_s3 + $0x168] sm:$0xff] %v1420_v18  ;;  %v993_v20 = vadd.f32 %v3000_v63, %v992_v21  ;;  %v1161_v29 = vpop.f32.mrf.mxu1 }
 0x210   :  { %v1423_v23 = vmax.f32 %v1336_v36, 0.0 }
 0x211   :  { %v1162_v25 = vadd.f32 %v1161_v29, %v993_v20 }
 0x212   :  { %1487 = vst [vmem:[%s3184_s3 + $0x180] sm:$0xff] %v1423_v23 }
 0x213   :  { %v1331_v56 = vadd.f32 %v1330_v41, %v1162_v25 }
 0x215   :  { %v1421_v55 = vmax.f32 %v1331_v56, 0.0  ;;  %v1337_v26 = vpop.f32.mrf.mxu2 }
 0x216   :  { %v1338_v27 = vadd.f32 %v1337_v26, %v2781_v39  ;;  %v994_v16 = vpop.f32.mrf.mxu0 }
 0x217   :  { %1485 = vst [vmem:[%s3184_s3 + $0x170] sm:$0xff] %v1421_v55  ;;  %v995_v30 = vadd.f32 %v3000_v63, %v994_v16  ;;  %v1163_v34 = vpop.f32.mrf.mxu1 }
 0x218   :  { %v1424_v24 = vmax.f32 %v1338_v27, 0.0 }
 0x219   :  { %v1164_v48 = vadd.f32 %v1163_v34, %v995_v30 }
 0x21a   :  { %1488 = vst [vmem:[%s3184_s3 + $0x188] sm:$0xff] %v1424_v24 }
 0x21b   :  { %v1333_v31 = vadd.f32 %v1332_v10, %v1164_v48 }
 0x21d   :  { %v1422_v38 = vmax.f32 %v1333_v31, 0.0  ;;  %v1340_v37 = vpop.f32.mrf.mxu2 }
 0x21e   :  { %v1341_v35 = vadd.f32 %v1340_v37, %v2796_v57 }
 0x21f   :  { %1486 = vst [vmem:[%s3184_s3 + $0x178] sm:$0xff] %v1422_v38 }
 0x220   :  { %v1425_v39 = vmax.f32 %v1341_v35, 0.0 }
 0x222   :  { %1489 = vst [vmem:[%s3184_s3 + $0x190] sm:$0xff] %v1425_v39 }
 0x225   :  { %v1342_v63 = vpop.f32.mrf.mxu2 }
 0x226   :  { %v1343_v11 = vadd.f32 %v1342_v63, %v2823_v15 }
 0x228   :  { %v1426_v42 = vmax.f32 %v1343_v11, 0.0 }
 0x22a   :  { %1490 = vst [vmem:[%s3184_s3 + $0x198] sm:$0xff] %v1426_v42 }

// kernel: beta_vae_b_forward.17
= control target key start
LH: loop header
LB: loop body
LE: loop exit
PB: predicated region body
PF: predicated region fallthrough
CT: control target
= control target key end

     0   :  { %s4090_s12 = smov 0   ;;  %s5220_s0 = inlined_call_operand.vmem [shape: bf16[2048,288], index: 0, kind: input, shape index: {}]   ;;  %s5221_s1 = inlined_call_operand.vmem [shape: bf16[288,4], index: 1, kind: input, shape index: {}]   ;;  %s5222_s2 = inlined_call_operand.vmem [shape: f32[1,4], index: 2, kind: input, shape index: {}]   ;;  %s5223_s3 = inlined_call_operand.vmem [shape: f32[2048,4], index: 3, kind: output, shape index: {}]  }
   0x1 LB: > { %s2907_s13 = sadd.s32 4294967295, %s4068_s12   ;;  %p2911_p0 = scmp.ge.s32.totalorder %s4068_s12, 1  ;;  %s4068_s12 = sphi %s4090_s12, %s13_s12  }
   0x2   : > { %p139_p1 = scmp.lt.s32.totalorder %s4068_s12, 3 }
   0x4   : > { %p140_p2 = pnand %p2911_p0, %p139_p1 }
   0x5   : > { %s2912_s20 = sshll.u32 (!%p140_p2), %s2907_s13, 7 }
   0x6   : > { %143 = sbr.rel (%p140_p2) target bundleno = 948 (0x3b4), region = 32  ;;  %p165_p3 = scmp.lt.s32.totalorder (!%p140_p2), %s2912_s20, 255 }
   0xb   : > { %v4021_v0 = vld [vmem:[%s5221_s1 + $0x38] sm:$0xff]  ;;  %v4104_v1 = vld [vmem:[%s5221_s1 + $0x88] sm:$0xff]  ;;  %v4020_v3 = vld [vmem:[%s5221_s1 + $0x30] sm:$0xff]  ;;  %s5225_s20 = smov (!%p165_p3, %s2912_s20), 255  ;;  %vm1542_vm0 = vcmask 261120   ;;  %vm2722_vm1 = vcmask 31744  }
   0xc   : > { %v4109_v2 = vld [vmem:[%s5221_s1 + $0x78] sm:$0xff]  ;;  %1735 = vmatpush.bf16.msra.mxu0 %v4021_v0  ;;  %4032 = vmatpush.bf16.msra.mxu3 %v4021_v0  ;;  %v4119_v4 = vld [vmem:[%s5221_s1 + $0x80] sm:$0xff]  ;;  %v4028_v5 = vld [vmem:[%s5221_s1 + $0x70] sm:$0xff]  ;;  %s4050_s27 = smul.u32 12, %s5225_s20  ;;  %s2915_s6 = sshll.u32 %s5225_s20, 3 }
   0xd   : > { %2399 = vmatpush.bf16.msra.mxu2 %v4104_v1  ;;  %2064 = vmatpush.bf16.msra.mxu1 %v4109_v2  ;;  %v4019_v6 = vld [vmem:[%s5221_s1 + $0x28] sm:$0xff]  ;;  %v4018_v11 = vld [vmem:[%s5221_s1 + $0x20] sm:$0xff]  ;;  %v4017_v13 = vld [vmem:[%s5221_s1 + $0x18] sm:$0xff]  ;;  %s4266_s9 = scalar_lea.vmem %s5223_s3, %s2915_s6 }
   0xe   : > { %s4134_s5 = scalar_lea.vmem %s5220_s0, %s4050_s27  ;;  %v4027_v7 = vld [vmem:[%s5221_s1 + $0x68] sm:$0xff]  ;;  %v4026_v12 = vld [vmem:[%s5221_s1 + $0x60] sm:$0xff]  ;;  %v4025_v14 = vld [vmem:[%s5221_s1 + $0x58] sm:$0xff] }
   0xf   : > { %v2926_v8 = vld [vmem:[%s4134_s5 + $0x8] sm:$0xf]  ;;  %v3824_v9 = vld [vmem:[%s4134_s5 + $0x10] sm:$0xf0]  ;;  %v2938_v17 = vld [vmem:[%s4134_s5 + $0x20] sm:$0xf] }
  0x10   : > { %1736 = vmatpush.bf16.msra.mxu0 %v4020_v3  ;;  %4033 = vmatpush.bf16.msra.mxu3 %v4020_v3  ;;  %v2927_v10 = vor.u32 %v3824_v9, %v2926_v8  ;;  %v4016_v15 = vld [vmem:[%s5221_s1 + $0x10] sm:$0xff]  ;;  %v3827_v18 = vld [vmem:[%s4134_s5 + $0x28] sm:$0xf0]  ;;  %v4014_v22 = vld [vmem:[%s5221_s1] sm:$0xff] }
  0x11   : > { %2400 = vmatpush.bf16.msra.mxu2 %v4119_v4  ;;  %2065 = vmatpush.bf16.msra.mxu1 %v4028_v5  ;;  %v4024_v16 = vld [vmem:[%s5221_s1 + $0x50] sm:$0xff]  ;;  %v4015_v19 = vld [vmem:[%s5221_s1 + $0x8] sm:$0xff]  ;;  %v2939_v20 = vor.u32 %v3827_v18, %v2938_v17  ;;  %v2918_v23 = vld [vmem:[%s4134_s5] sm:$0xf] }
  0x12   : > { %v4023_v21 = vld [vmem:[%s5221_s1 + $0x48] sm:$0xff]  ;;  %v3494_v25 = vld [vmem:[%s4134_s5 + $0x480] sm:$0xf]  ;;  %v3822_v28 = vld [vmem:[%s4134_s5 + $0x4] sm:$0xf] }
  0x13   : > { %v3823_v24 = vld [vmem:[%s4134_s5 + $0x8] sm:$0xf0]  ;;  %v4022_v27 = vld [vmem:[%s5221_s1 + $0x40] sm:$0xff]  ;;  %v2920_v29 = vld [vmem:[%s4134_s5 + $0xc] sm:$0xf0] }
  0x14   : > { %1737 = vmatpush.bf16.msra.mxu0 %v4019_v6  ;;  %4034 = vmatpush.bf16.msra.mxu3 %v4019_v6  ;;  %v3967_v26 = vld [vmem:[%s4134_s5 + $0x488] sm:$0xf0]  ;;  %v2919_v30 = vor.u32 %v3823_v24, %v2918_v23  ;;  %v2923_v32 = vor.u32 %v3822_v28, %v2920_v29  ;;  %v2950_v33 = vld [vmem:[%s4134_s5 + $0x38] sm:$0xf]  ;;  %v3830_v34 = vld [vmem:[%s4134_s5 + $0x40] sm:$0xf0] }
  0x15   : > { %3756 = vmatmul.msk.bf16.vlgmr.msra.gmra.mxu2 %vm1542_vm0, %v2927_v10  ;;  %2066 = vmatpush.bf16.msra.mxu1 %v4027_v7  ;;  %v3495_v31 = vor.u32 %v3967_v26, %v3494_v25  ;;  %v2951_v35 = vor.u32 %v3830_v34, %v2950_v33  ;;  %v2930_v36 = vld [vmem:[%s4134_s5 + $0x18] sm:$0xf]  ;;  %v3826_v37 = vld [vmem:[%s4134_s5 + $0x20] sm:$0xf0]  ;;  %v3825_v40 = vld [vmem:[%s4134_s5 + $0x1c] sm:$0xf] }
  0x16   : > { %v3506_v38 = vld [vmem:[%s4134_s5 + $0x498] sm:$0xf]  ;;  %v3970_v39 = vld [vmem:[%s4134_s5 + $0x4a0] sm:$0xf0]  ;;  %v2932_v41 = vld [vmem:[%s4134_s5 + $0x24] sm:$0xf0]  ;;  %v2931_v42 = vor.u32 %v3826_v37, %v2930_v36 }
  0x17   : > { %v3507_v43 = vor.u32 %v3970_v39, %v3506_v38  ;;  %v2935_v44 = vor.u32 %v3825_v40, %v2932_v41  ;;  %v2962_v45 = vld [vmem:[%s4134_s5 + $0x50] sm:$0xf]  ;;  %v3833_v46 = vld [vmem:[%s4134_s5 + $0x58] sm:$0xf0]  ;;  %v3828_v52 = vld [vmem:[%s4134_s5 + $0x34] sm:$0xf] }
  0x18   : > { %1738 = vmatpush.bf16.msra.mxu0 %v4018_v11  ;;  %4035 = vmatpush.bf16.msra.mxu3 %v4018_v11  ;;  %v2963_v47 = vor.u32 %v3833_v46, %v2962_v45  ;;  %v2942_v48 = vld [vmem:[%s4134_s5 + $0x30] sm:$0xf]  ;;  %v3829_v49 = vld [vmem:[%s4134_s5 + $0x38] sm:$0xf0]  ;;  %v2944_v53 = vld [vmem:[%s4134_s5 + $0x3c] sm:$0xf0] }
  0x19   : > { %2067 = vmatpush.bf16.msra.mxu1 %v4026_v12  ;;  %v3518_v50 = vld [vmem:[%s4134_s5 + $0x4b0] sm:$0xf]  ;;  %v3973_v51 = vld [vmem:[%s4134_s5 + $0x4b8] sm:$0xf0]  ;;  %v2943_v54 = vor.u32 %v3829_v49, %v2942_v48  ;;  %v2947_v56 = vor.u32 %v3828_v52, %v2944_v53  ;;  %v2974_v57 = vld [vmem:[%s4134_s5 + $0x68] sm:$0xf] }
  0x1a   : > { %v3519_v55 = vor.u32 %v3973_v51, %v3518_v50  ;;  %v3836_v58 = vld [vmem:[%s4134_s5 + $0x70] sm:$0xf0]  ;;  %v2954_v60 = vld [vmem:[%s4134_s5 + $0x48] sm:$0xf]  ;;  %v3831_v0 = vld [vmem:[%s4134_s5 + $0x4c] sm:$0xf] }
  0x1b   : > { %v2975_v59 = vor.u32 %v3836_v58, %v2974_v57  ;;  %v3832_v61 = vld [vmem:[%s4134_s5 + $0x50] sm:$0xf0]  ;;  %v3530_v62 = vld [vmem:[%s4134_s5 + $0x4c8] sm:$0xf]  ;;  %v3839_v6 = vld [vmem:[%s4134_s5 + $0x88] sm:$0xf0] }
  0x1c   : > { %1739 = vmatpush.bf16.msra.mxu0 %v4017_v13  ;;  %4036 = vmatpush.bf16.msra.mxu3 %v4017_v13  ;;  %v3976_v63 = vld [vmem:[%s4134_s5 + $0x4d0] sm:$0xf0]  ;;  %v2966_v8 = vld [vmem:[%s4134_s5 + $0x60] sm:$0xf]  ;;  %v3835_v9 = vld [vmem:[%s4134_s5 + $0x68] sm:$0xf0] }
  0x1d   : > { %2068 = vmatpush.bf16.msra.mxu1 %v4025_v14  ;;  %v3531_v3 = vor.u32 %v3976_v63, %v3530_v62  ;;  %v3542_v10 = vld [vmem:[%s4134_s5 + $0x4e0] sm:$0xf]  ;;  %v3979_v11 = vld [vmem:[%s4134_s5 + $0x4e8] sm:$0xf0]  ;;  %v2968_v13 = vld [vmem:[%s4134_s5 + $0x6c] sm:$0xf0] }
  0x1e   : > { %v2998_v17 = vld [vmem:[%s4134_s5 + $0x98] sm:$0xf]  ;;  %v3842_v18 = vld [vmem:[%s4134_s5 + $0xa0] sm:$0xf0]  ;;  %v3837_v24 = vld [vmem:[%s4134_s5 + $0x7c] sm:$0xf] }
  0x1f   : > { %v3982_v23 = vld [vmem:[%s4134_s5 + $0x500] sm:$0xf0]  ;;  %v2980_v25 = vld [vmem:[%s4134_s5 + $0x84] sm:$0xf0]  ;;  %v3010_v29 = vld [vmem:[%s4134_s5 + $0xb0] sm:$0xf] }
  0x20   : > { %1740 = vmatpush.bf16.msra.mxu0 %v4016_v15  ;;  %4037 = vmatpush.bf16.msra.mxu3 %v4016_v15  ;;  %v3543_v15 = vor.u32 %v3979_v11, %v3542_v10  ;;  %v2983_v28 = vor.u32 %v3837_v24, %v2980_v25  ;;  %v3841_v33 = vld [vmem:[%s4134_s5 + $0x98] sm:$0xf0]  ;;  %v3566_v34 = vld [vmem:[%s4134_s5 + $0x510] sm:$0xf]  ;;  %v3840_v36 = vld [vmem:[%s4134_s5 + $0x94] sm:$0xf] }
  0x21   : > { %2069 = vmatpush.bf16.msra.mxu1 %v4024_v16  ;;  %v2992_v37 = vld [vmem:[%s4134_s5 + $0x9c] sm:$0xf0]  ;;  %v3022_v41 = vld [vmem:[%s4134_s5 + $0xc8] sm:$0xf]  ;;  %v3844_v45 = vld [vmem:[%s4134_s5 + $0xb0] sm:$0xf0] }
  0x22   : > { %v2995_v40 = vor.u32 %v3840_v36, %v2992_v37  ;;  %v3578_v46 = vld [vmem:[%s4134_s5 + $0x528] sm:$0xf]  ;;  %v3843_v48 = vld [vmem:[%s4134_s5 + $0xac] sm:$0xf]  ;;  %v3004_v49 = vld [vmem:[%s4134_s5 + $0xb4] sm:$0xf0] }
  0x23   : > { %v3007_v53 = vor.u32 %v3843_v48, %v3004_v49  ;;  %v3014_v58 = vld [vmem:[%s4134_s5 + $0xc0] sm:$0xf]  ;;  %v3846_v63 = vld [vmem:[%s4134_s5 + $0xc4] sm:$0xf]  ;;  %v3046_v11 = vld [vmem:[%s4134_s5 + $0xf8] sm:$0xf] }
  0x24   : > { %1741 = vmatpush.bf16.msra.mxu0 %v4015_v19  ;;  %4038 = vmatpush.bf16.msra.mxu3 %v4015_v19  ;;  %v2999_v19 = vor.u32 %v3842_v18, %v2998_v17  ;;  %v4257_v62 = vld [vmem:[%s5222_s2] ss:$0 sm:$0xff]  ;;  %v3849_v24 = vld [vmem:[%s4134_s5 + $0xdc] sm:$0xf]  ;;  %v3028_v25 = vld [vmem:[%s4134_s5 + $0xe4] sm:$0xf0] }
  0x25   : > { %3757 = vmatmul.msk.bf16.gmra.mxu2 %vm1542_vm0, %v2939_v20  ;;  %2070 = vmatpush.bf16.msra.mxu1 %v4023_v21  ;;  %v2978_v20 = vld [vmem:[%s4134_s5 + $0x78] sm:$0xf]  ;;  %v3058_v37 = vld [vmem:[%s4134_s5 + $0x110] sm:$0xf]  ;;  %v3997_v48 = vld [vmem:[%s4134_s5 + $0x578] sm:$0xf0] }
  0x28   : > { %1742 = vmatpush.bf16.msra.mxu0 %v4014_v22  ;;  %4039 = vmatpush.bf16.msra.mxu3 %v4014_v22  ;;  %v3554_v22 = vld [vmem:[%s4134_s5 + $0x4f8] sm:$0xf] }
  0x29   : > { %2071 = vmatpush.bf16.msra.mxu1 %v4022_v27 }
  0x2b   : > { %1743 = vmatmul.bf16.vlgmr.msra.gmra.mxu0 %v2919_v30  ;;  %1983 = vmatmul.bf16.vlgmr.msra.gmra.mxu3 %v3495_v31  ;;  %v3845_v30 = vld [vmem:[%s4134_s5 + $0xb8] sm:$0xf0] }
  0x2c   : > { %4040 = vmatpush.bf16.msrb.mxu3 %v4109_v2  ;;  %2072 = vmatmul.bf16.vlgmr.msra.gmra.mxu1 %v2923_v32  ;;  %v2955_v2 = vor.u32 %v3832_v61, %v2954_v60  ;;  %v3011_v31 = vor.u32 %v3845_v30, %v3010_v29  ;;  %v2990_v32 = vld [vmem:[%s4134_s5 + $0x90] sm:$0xf]  ;;  %v3590_v60 = vld [vmem:[%s4134_s5 + $0x540] sm:$0xf]  ;;  %v3991_v61 = vld [vmem:[%s4134_s5 + $0x548] sm:$0xf0] }
  0x2d   : > { %v2991_v38 = vor.u32 %v3841_v33, %v2990_v32 }
  0x30   : > { %4041 = vmatpush.bf16.msrb.mxu3 %v4028_v5  ;;  %v2986_v5 = vld [vmem:[%s4134_s5 + $0x80] sm:$0xf] }
  0x34   : > { %4042 = vmatpush.bf16.msrb.mxu3 %v4027_v7  ;;  %v2987_v7 = vor.u32 %v3839_v6, %v2986_v5 }
  0x35   : > { %3758 = vmatmul.msk.bf16.gmra.mxu2 %vm1542_vm0, %v2951_v35  ;;  %v3985_v35 = vld [vmem:[%s4134_s5 + $0x518] sm:$0xf0] }
  0x36   : > { %v3567_v39 = vor.u32 %v3985_v35, %v3566_v34 }
  0x38   : > { %4043 = vmatpush.bf16.msrb.mxu3 %v4026_v12  ;;  %v3834_v12 = vld [vmem:[%s4134_s5 + $0x64] sm:$0xf] }
  0x3b   : > { %1748 = vmatmul.bf16.gmra.mxu0 %v2931_v42  ;;  %1988 = vmatmul.bf16.gmra.mxu3 %v3507_v43  ;;  %v3848_v42 = vld [vmem:[%s4134_s5 + $0xd0] sm:$0xf0] }
  0x3c   : > { %4044 = vmatpush.bf16.msrb.mxu3 %v4025_v14  ;;  %2077 = vmatmul.bf16.gmra.mxu1 %v2935_v44  ;;  %v2967_v14 = vor.u32 %v3835_v9, %v2966_v8  ;;  %v3023_v43 = vor.u32 %v3848_v42, %v3022_v41  ;;  %v3002_v44 = vld [vmem:[%s4134_s5 + $0xa8] sm:$0xf] }
  0x3d   : > { %v3003_v50 = vor.u32 %v3844_v45, %v3002_v44  ;;  %v3038_v45 = vld [vmem:[%s4134_s5 + $0xf0] sm:$0xf] }
  0x40   : > { %4045 = vmatpush.bf16.msrb.mxu3 %v4024_v16  ;;  %v2971_v16 = vor.u32 %v3834_v12, %v2968_v13  ;;  %v3854_v12 = vld [vmem:[%s4134_s5 + $0x100] sm:$0xf0] }
  0x41   : > { %v3047_v17 = vor.u32 %v3854_v12, %v3046_v11  ;;  %v3626_v11 = vld [vmem:[%s4134_s5 + $0x588] sm:$0xf]  ;;  %v4000_v12 = vld [vmem:[%s4134_s5 + $0x590] sm:$0xf0] }
  0x44   : > { %4046 = vmatpush.bf16.msrb.mxu3 %v4023_v21  ;;  %v3838_v21 = vld [vmem:[%s4134_s5 + $0x80] sm:$0xf0] }
  0x45   : > { %3759 = vmatmul.msk.bf16.gmra.mxu2 %vm1542_vm0, %v2963_v47  ;;  %v2979_v26 = vor.u32 %v3838_v21, %v2978_v20  ;;  %v3988_v47 = vld [vmem:[%s4134_s5 + $0x530] sm:$0xf0]  ;;  %v3850_v20 = vld [vmem:[%s4134_s5 + $0xe0] sm:$0xf0]  ;;  %v3602_v21 = vld [vmem:[%s4134_s5 + $0x558] sm:$0xf] }
  0x46   : > { %v3579_v51 = vor.u32 %v3988_v47, %v3578_v46  ;;  %v3853_v46 = vld [vmem:[%s4134_s5 + $0xf8] sm:$0xf0]  ;;  %v3614_v47 = vld [vmem:[%s4134_s5 + $0x570] sm:$0xf] }
  0x48   : > { %4047 = vmatpush.bf16.msrb.mxu3 %v4022_v27  ;;  %v3555_v27 = vor.u32 %v3982_v23, %v3554_v22  ;;  %v3994_v22 = vld [vmem:[%s4134_s5 + $0x560] sm:$0xf0] }
  0x4b   : > { %1753 = vmatmul.bf16.gmra.mxu0 %v2943_v54  ;;  %1993 = vmatmul.bf16.gmra.mxu3 %v3519_v55  ;;  %v3034_v54 = vld [vmem:[%s4134_s5 + $0xe0] sm:$0xf]  ;;  %v3851_v55 = vld [vmem:[%s4134_s5 + $0xe8] sm:$0xf0] }
  0x4c   : > { %4048 = vmatpush.bf16.msra.mxu3 %v4104_v1  ;;  %2082 = vmatmul.bf16.gmra.mxu1 %v2947_v56  ;;  %v2956_v1 = vld [vmem:[%s4134_s5 + $0x54] sm:$0xf0]  ;;  %v3035_v57 = vor.u32 %v3851_v55, %v3034_v54  ;;  %v3615_v54 = vor.u32 %v3997_v48, %v3614_v47 }
  0x50   : > { %4049 = vmatpush.bf16.msra.mxu3 %v4119_v4  ;;  %v2959_v4 = vor.u32 %v3831_v0, %v2956_v1  ;;  %v3016_v0 = vld [vmem:[%s4134_s5 + $0xcc] sm:$0xf0] }
  0x51   : > { %v3019_v5 = vor.u32 %v3846_v63, %v3016_v0  ;;  %v3070_v0 = vld [vmem:[%s4134_s5 + $0x128] sm:$0xf] }
  0x55   : > { %3760 = vmatmul.msk.bf16.gmra.mxu2 %vm1542_vm0, %v2975_v59  ;;  %v3847_v59 = vld [vmem:[%s4134_s5 + $0xc8] sm:$0xf0] }
  0x56   : > { %v3015_v1 = vor.u32 %v3847_v59, %v3014_v58 }
  0x5b   : > { %1758 = vmatmul.bf16.gmra.mxu0 %v2955_v2  ;;  %1998 = vmatmul.bf16.gmra.mxu3 %v3531_v3  ;;  %v3591_v2 = vor.u32 %v3991_v61, %v3590_v60 }
  0x5c   : > { %2087 = vmatmul.bf16.gmra.mxu1 %v2959_v4 }
  0x65   : > { %3761 = vmatmul.msk.bf16.gmra.mxu2 %vm1542_vm0, %v2987_v7 }
  0x6b   : > { %1763 = vmatmul.bf16.gmra.mxu0 %v2967_v14  ;;  %2003 = vmatmul.bf16.gmra.mxu3 %v3543_v15 }
  0x6c   : > { %2092 = vmatmul.bf16.gmra.mxu1 %v2971_v16 }
  0x75   : > { %3762 = vmatmul.msk.bf16.gmra.mxu2 %vm1542_vm0, %v2999_v19  ;;  %v3026_v19 = vld [vmem:[%s4134_s5 + $0xd8] sm:$0xf] }
  0x7b   : > { %1768 = vmatmul.bf16.gmra.mxu0 %v2979_v26  ;;  %2008 = vmatmul.bf16.gmra.mxu3 %v3555_v27  ;;  %v3027_v27 = vor.u32 %v3850_v20, %v3026_v19 }
  0x7c   : > { %2097 = vmatmul.bf16.gmra.mxu1 %v2983_v28  ;;  %v3603_v28 = vor.u32 %v3994_v22, %v3602_v21 }
  0x85   : > { %3763 = vmatmul.msk.bf16.gmra.mxu2 %vm1542_vm0, %v3011_v31  ;;  %v3031_v31 = vor.u32 %v3849_v24, %v3028_v25 }
  0x8b   : > { %1773 = vmatmul.bf16.gmra.mxu0 %v2991_v38  ;;  %2013 = vmatmul.bf16.gmra.mxu3 %v3567_v39  ;;  %v3857_v38 = vld [vmem:[%s4134_s5 + $0x118] sm:$0xf0] }
  0x8c   : > { %2102 = vmatmul.bf16.gmra.mxu1 %v2995_v40 }
  0x95   : > { %3764 = vmatmul.msk.bf16.gmra.mxu2 %vm1542_vm0, %v3023_v43  ;;  %v3059_v43 = vor.u32 %v3857_v38, %v3058_v37  ;;  %v3062_v37 = vld [vmem:[%s4134_s5 + $0x120] sm:$0xf]  ;;  %v3859_v38 = vld [vmem:[%s4134_s5 + $0x128] sm:$0xf0] }
  0x98   : > { %v2402_v52 = vpop.f32.mrf.mxu2 }
  0x9b   : > { %1778 = vmatmul.bf16.gmra.mxu0 %v3003_v50  ;;  %2018 = vmatmul.bf16.gmra.mxu3 %v3579_v51  ;;  %v3852_v50 = vld [vmem:[%s4134_s5 + $0xf4] sm:$0xf]  ;;  %v3040_v51 = vld [vmem:[%s4134_s5 + $0xfc] sm:$0xf0] }
  0x9c   : > { %2107 = vmatmul.bf16.gmra.mxu1 %v3007_v53  ;;  %v3039_v53 = vor.u32 %v3853_v46, %v3038_v45  ;;  %v3063_v45 = vor.u32 %v3859_v38, %v3062_v37  ;;  %v3864_v38 = vld [vmem:[%s4134_s5 + $0x154] sm:$0xf] }
  0xa0   : > { %v2404_v56 = vpop.f32.mrf.mxu2 }
  0xa5   : > { %3765 = vmatmul.msk.bf16.gmra.mxu2 %vm1542_vm0, %v3035_v57  ;;  %v3043_v57 = vor.u32 %v3852_v50, %v3040_v51 }
  0xa8   : > { %v2407_v3 = vpop.f32.mrf.mxu2  ;;  %v1744_v4 = vpop.f32.mrf.mxu0 }
  0xa9   : > { %v1745_v6 = vadd.f32 %v4257_v62, %v1744_v4  ;;  %v2073_v7 = vpop.f32.mrf.mxu1 }
  0xab   : > { %v2074_v8 = vadd.f32 %v2073_v7, %v1745_v6  ;;  %1783 = vmatmul.bf16.gmra.mxu0 %v3015_v1  ;;  %2023 = vmatmul.bf16.gmra.mxu3 %v3591_v2  ;;  %v3860_v1 = vld [vmem:[%s4134_s5 + $0x130] sm:$0xf0] }
  0xac   : > { %2112 = vmatmul.bf16.gmra.mxu1 %v3019_v5  ;;  %v3071_v6 = vor.u32 %v3860_v1, %v3070_v0 }
  0xad   : > { %v2403_v9 = vadd.f32 %v2402_v52, %v2074_v8  ;;  %v3050_v8 = vld [vmem:[%s4134_s5 + $0x108] sm:$0xf] }
  0xae   : > { %v4268_v10 = vpop.f32.mrf.mxu3 }
  0xaf   : > { %2723 = vst.msk [vmem:[%s4266_s9] sm:$0xff] %vm2722_vm1, %v2403_v9  ;;  %v3856_v9 = vld [vmem:[%s4134_s5 + $0x110] sm:$0xf0] }
  0xb0   : > { %v2409_v13 = vpop.f32.mrf.mxu2  ;;  %v1746_v14 = vpop.f32.mrf.mxu0 }
  0xb1   : > { %v1747_v15 = vadd.f32 %v4257_v62, %v1746_v14  ;;  %v2075_v16 = vpop.f32.mrf.mxu1  ;;  %v3855_v14 = vld [vmem:[%s4134_s5 + $0x10c] sm:$0xf] }
  0xb3   : > { %v2076_v18 = vadd.f32 %v2075_v16, %v1747_v15  ;;  %v3052_v15 = vld [vmem:[%s4134_s5 + $0x114] sm:$0xf0] }
  0xb4   : > { %v3055_v21 = vor.u32 %v3855_v14, %v3052_v15 }
  0xb5   : > { %v2405_v23 = vadd.f32 %v2404_v56, %v2076_v18  ;;  %3766 = vmatmul.msk.bf16.gmra.mxu2 %vm1542_vm0, %v3047_v17  ;;  %v3051_v17 = vor.u32 %v3856_v9, %v3050_v8  ;;  %v3627_v18 = vor.u32 %v4000_v12, %v3626_v11  ;;  %v3076_v8 = vld [vmem:[%s4134_s5 + $0x144] sm:$0xf0] }
  0xb6   : > { %v4282_v26 = vpop.f32.mrf.mxu3 }
  0xb7   : > { %2724 = vst.msk [vmem:[%s4266_s9 + $0x8] sm:$0xff] %vm2722_vm1, %v2405_v23 }
  0xb8   : > { %v2412_v29 = vpop.f32.mrf.mxu2  ;;  %v1749_v30 = vpop.f32.mrf.mxu0 }
  0xb9   : > { %v1750_v32 = vadd.f32 %v4257_v62, %v1749_v30  ;;  %v2078_v33 = vpop.f32.mrf.mxu1 }
  0xbb   : > { %v2079_v34 = vadd.f32 %v2078_v33, %v1750_v32  ;;  %1788 = vmatmul.bf16.gmra.mxu0 %v3027_v27  ;;  %2028 = vmatmul.bf16.gmra.mxu3 %v3603_v28  ;;  %v3082_v28 = vld [vmem:[%s4134_s5 + $0x140] sm:$0xf] }
  0xbc   : > { %2117 = vmatmul.bf16.gmra.mxu1 %v3031_v31 }
  0xbd   : > { %v2408_v35 = vadd.f32 %v2407_v3, %v2079_v34 }
  0xbe   : > { %v4287_v36 = vpop.f32.mrf.mxu3 }
  0xbf   : > { %2725 = vst.msk [vmem:[%s4266_s9 + $0x10] sm:$0xff] %vm2722_vm1, %v2408_v35 }
  0xc0   : > { %v2414_v39 = vpop.f32.mrf.mxu2  ;;  %v1751_v40 = vpop.f32.mrf.mxu0 }
  0xc1   : > { %v1752_v41 = vadd.f32 %v4257_v62, %v1751_v40  ;;  %v2080_v42 = vpop.f32.mrf.mxu1  ;;  %v4003_v40 = vld [vmem:[%s4134_s5 + $0x5a8] sm:$0xf0] }
  0xc3   : > { %v2081_v44 = vadd.f32 %v2080_v42, %v1752_v41  ;;  %v3858_v42 = vld [vmem:[%s4134_s5 + $0x124] sm:$0xf] }
  0xc5   : > { %v2410_v49 = vadd.f32 %v2409_v13, %v2081_v44  ;;  %3767 = vmatmul.msk.bf16.gmra.mxu2 %vm1542_vm0, %v3059_v43  ;;  %v3064_v43 = vld [vmem:[%s4134_s5 + $0x12c] sm:$0xf0] }
  0xc6   : > { %v4301_v52 = vpop.f32.mrf.mxu3 }
  0xc7   : > { %2726 = vst.msk [vmem:[%s4266_s9 + $0x18] sm:$0xff] %vm2722_vm1, %v2410_v49  ;;  %v3067_v49 = vor.u32 %v3858_v42, %v3064_v43 }
  0xc8   : > { %v2417_v55 = vpop.f32.mrf.mxu2  ;;  %v1754_v56 = vpop.f32.mrf.mxu0 }
  0xc9   : > { %v1755_v58 = vadd.f32 %v4257_v62, %v1754_v56  ;;  %v2083_v59 = vpop.f32.mrf.mxu1  ;;  %v3094_v56 = vld [vmem:[%s4134_s5 + $0x158] sm:$0xf] }
  0xcb   : > { %v2084_v60 = vadd.f32 %v2083_v59, %v1755_v58  ;;  %1793 = vmatmul.bf16.gmra.mxu0 %v3039_v53  ;;  %2033 = vmatmul.bf16.gmra.mxu3 %v3615_v54 }
  0xcc   : > { %2122 = vmatmul.bf16.gmra.mxu1 %v3043_v57  ;;  %v3866_v57 = vld [vmem:[%s4134_s5 + $0x160] sm:$0xf0] }
  0xcd   : > { %v2413_v61 = vadd.f32 %v2412_v29, %v2084_v60  ;;  %v3863_v29 = vld [vmem:[%s4134_s5 + $0x148] sm:$0xf0]  ;;  %v3095_v0 = vor.u32 %v3866_v57, %v3094_v56 }
  0xce   : > { %v4306_v63 = vpop.f32.mrf.mxu3  ;;  %v3083_v34 = vor.u32 %v3863_v29, %v3082_v28 }
  0xcf   : > { %2727 = vst.msk [vmem:[%s4266_s9 + $0x20] sm:$0xff] %vm2722_vm1, %v2413_v61 }
  0xd0   : > { %v2419_v2 = vpop.f32.mrf.mxu2  ;;  %v1756_v3 = vpop.f32.mrf.mxu0 }
  0xd1   : > { %v1757_v4 = vadd.f32 %v4257_v62, %v1756_v3  ;;  %v2085_v5 = vpop.f32.mrf.mxu1  ;;  %v3862_v3 = vld [vmem:[%s4134_s5 + $0x140] sm:$0xf0] }
  0xd3   : > { %v2086_v7 = vadd.f32 %v2085_v5, %v1757_v4  ;;  %v3650_v4 = vld [vmem:[%s4134_s5 + $0x5b8] sm:$0xf]  ;;  %v4006_v5 = vld [vmem:[%s4134_s5 + $0x5c0] sm:$0xf0] }
  0xd4   : > { %v3651_v12 = vor.u32 %v4006_v5, %v3650_v4  ;;  %v3867_v5 = vld [vmem:[%s4134_s5 + $0x16c] sm:$0xf] }
  0xd5   : > { %v2415_v13 = vadd.f32 %v2414_v39, %v2086_v7  ;;  %3768 = vmatmul.msk.bf16.gmra.mxu2 %vm1542_vm0, %v3071_v6  ;;  %v3638_v39 = vld [vmem:[%s4134_s5 + $0x5a0] sm:$0xf]  ;;  %v3861_v7 = vld [vmem:[%s4134_s5 + $0x13c] sm:$0xf] }
  0xd6   : > { %v4320_v16 = vpop.f32.mrf.mxu3  ;;  %v3639_v46 = vor.u32 %v4003_v40, %v3638_v39  ;;  %v3079_v15 = vor.u32 %v3861_v7, %v3076_v8  ;;  %v3088_v39 = vld [vmem:[%s4134_s5 + $0x15c] sm:$0xf0] }
  0xd7   : > { %2728 = vst.msk [vmem:[%s4266_s9 + $0x28] sm:$0xff] %vm2722_vm1, %v2415_v13 }
  0xd8   : > { %v2422_v19 = vpop.f32.mrf.mxu2  ;;  %v1759_v20 = vpop.f32.mrf.mxu0 }
  0xd9   : > { %v1760_v22 = vadd.f32 %v4257_v62, %v1759_v20  ;;  %v2088_v23 = vpop.f32.mrf.mxu1 }
  0xdb   : > { %v2089_v24 = vadd.f32 %v2088_v23, %v1760_v22  ;;  %1798 = vmatmul.bf16.gmra.mxu0 %v3051_v17  ;;  %2038 = vmatmul.bf16.gmra.mxu3 %v3627_v18  ;;  %v3106_v22 = vld [vmem:[%s4134_s5 + $0x170] sm:$0xf]  ;;  %v3869_v23 = vld [vmem:[%s4134_s5 + $0x178] sm:$0xf0] }
  0xdc   : > { %2127 = vmatmul.bf16.gmra.mxu1 %v3055_v21 }
  0xdd   : > { %v2418_v25 = vadd.f32 %v2417_v55, %v2089_v24 }
  0xde   : > { %v4325_v27 = vpop.f32.mrf.mxu3 }
  0xdf   : > { %2729 = vst.msk [vmem:[%s4266_s9 + $0x30] sm:$0xff] %vm2722_vm1, %v2418_v25 }
  0xe0   : > { %v2424_v30 = vpop.f32.mrf.mxu2  ;;  %v1761_v31 = vpop.f32.mrf.mxu0 }
  0xe1   : > { %v1762_v32 = vadd.f32 %v4257_v62, %v1761_v31  ;;  %v2090_v33 = vpop.f32.mrf.mxu1 }
  0xe3   : > { %v2091_v35 = vadd.f32 %v2090_v33, %v1762_v32  ;;  %v3086_v32 = vld [vmem:[%s4134_s5 + $0x150] sm:$0xf]  ;;  %v3865_v33 = vld [vmem:[%s4134_s5 + $0x158] sm:$0xf0] }
  0xe5   : > { %v2420_v41 = vadd.f32 %v2419_v2, %v2091_v35  ;;  %3769 = vmatmul.msk.bf16.gmra.mxu2 %vm1542_vm0, %v3083_v34  ;;  %v3074_v2 = vld [vmem:[%s4134_s5 + $0x138] sm:$0xf]  ;;  %v3662_v34 = vld [vmem:[%s4134_s5 + $0x5d0] sm:$0xf]  ;;  %v4009_v35 = vld [vmem:[%s4134_s5 + $0x5d8] sm:$0xf0] }
  0xe6   : > { %v4339_v44 = vpop.f32.mrf.mxu3  ;;  %v3075_v11 = vor.u32 %v3862_v3, %v3074_v2  ;;  %v3663_v42 = vor.u32 %v4009_v35, %v3662_v34  ;;  %v3674_v2 = vld [vmem:[%s4134_s5 + $0x5e8] sm:$0xf]  ;;  %v4012_v3 = vld [vmem:[%s4134_s5 + $0x5f0] sm:$0xf0]  ;;  %v3966_v34 = vld [vmem:[%s4134_s5 + $0x484] sm:$0xf] }
  0xe7   : > { %2730 = vst.msk [vmem:[%s4266_s9 + $0x38] sm:$0xff] %vm2722_vm1, %v2420_v41  ;;  %v3087_v41 = vor.u32 %v3865_v33, %v3086_v32  ;;  %v3110_v32 = vld [vmem:[%s4134_s5 + $0x180] sm:$0xf]  ;;  %v3871_v33 = vld [vmem:[%s4134_s5 + $0x188] sm:$0xf0] }
  0xe8   : > { %v2427_v47 = vpop.f32.mrf.mxu2  ;;  %v1764_v48 = vpop.f32.mrf.mxu0  ;;  %v3496_v35 = vld [vmem:[%s4134_s5 + $0x48c] sm:$0xf0] }
  0xe9   : > { %v1765_v50 = vadd.f32 %v4257_v62, %v1764_v48  ;;  %v2093_v51 = vpop.f32.mrf.mxu1 }
  0xeb   : > { %v2094_v53 = vadd.f32 %v2093_v51, %v1765_v50  ;;  %1803 = vmatmul.bf16.gmra.mxu0 %v3063_v45  ;;  %2043 = vmatmul.bf16.gmra.mxu3 %v3639_v46  ;;  %v3091_v46 = vor.u32 %v3864_v38, %v3088_v39  ;;  %v3870_v38 = vld [vmem:[%s4134_s5 + $0x184] sm:$0xf]  ;;  %v3112_v39 = vld [vmem:[%s4134_s5 + $0x18c] sm:$0xf0] }
  0xec   : > { %2132 = vmatmul.bf16.gmra.mxu1 %v3067_v49 }
  0xed   : > { %v2423_v54 = vadd.f32 %v2422_v19, %v2094_v53  ;;  %v3118_v53 = vld [vmem:[%s4134_s5 + $0x188] sm:$0xf] }
  0xee   : > { %v4344_v55 = vpop.f32.mrf.mxu3 }
  0xef   : > { %2731 = vst.msk [vmem:[%s4266_s9 + $0x40] sm:$0xff] %vm2722_vm1, %v2423_v54  ;;  %v3872_v54 = vld [vmem:[%s4134_s5 + $0x190] sm:$0xf0] }
  0xf0   : > { %v2429_v58 = vpop.f32.mrf.mxu2  ;;  %v1766_v59 = vpop.f32.mrf.mxu0 }
  0xf1   : > { %v1767_v60 = vadd.f32 %v4257_v62, %v1766_v59  ;;  %v2095_v61 = vpop.f32.mrf.mxu1 }
  0xf3   : > { %v2096_v1 = vadd.f32 %v2095_v61, %v1767_v60  ;;  %v3119_v60 = vor.u32 %v3872_v54, %v3118_v53 }
  0xf5   : > { %v2425_v6 = vadd.f32 %v2424_v30, %v2096_v1  ;;  %3770 = vmatmul.msk.bf16.gmra.mxu2 %vm1542_vm0, %v3095_v0  ;;  %v3107_v30 = vor.u32 %v3869_v23, %v3106_v22  ;;  %v3098_v0 = vld [vmem:[%s4134_s5 + $0x168] sm:$0xf]  ;;  %v3868_v1 = vld [vmem:[%s4134_s5 + $0x170] sm:$0xf0]  ;;  %v3130_v22 = vld [vmem:[%s4134_s5 + $0x1a0] sm:$0xf] }
  0xf6   : > { %v4358_v9 = vpop.f32.mrf.mxu3  ;;  %v3099_v8 = vor.u32 %v3868_v1, %v3098_v0  ;;  %v3875_v23 = vld [vmem:[%s4134_s5 + $0x1a8] sm:$0xf0] }
  0xf7   : > { %2732 = vst.msk [vmem:[%s4266_s9 + $0x48] sm:$0xff] %vm2722_vm1, %v2425_v6  ;;  %v3100_v6 = vld [vmem:[%s4134_s5 + $0x174] sm:$0xf0] }
  0xf8   : > { %v2432_v13 = vpop.f32.mrf.mxu2  ;;  %v1769_v14 = vpop.f32.mrf.mxu0 }
  0xf9   : > { %v1770_v17 = vadd.f32 %v4257_v62, %v1769_v14  ;;  %v2098_v18 = vpop.f32.mrf.mxu1  ;;  %v3103_v14 = vor.u32 %v3867_v5, %v3100_v6  ;;  %v3508_v5 = vld [vmem:[%s4134_s5 + $0x4a4] sm:$0xf0] }
  0xfb   : > { %v2099_v19 = vadd.f32 %v2098_v18, %v1770_v17  ;;  %1808 = vmatmul.bf16.gmra.mxu0 %v3075_v11  ;;  %2048 = vmatmul.bf16.gmra.mxu3 %v3651_v12  ;;  %v3675_v11 = vor.u32 %v4012_v3, %v3674_v2  ;;  %v3122_v2 = vld [vmem:[%s4134_s5 + $0x198] sm:$0xf]  ;;  %v3874_v3 = vld [vmem:[%s4134_s5 + $0x1a0] sm:$0xf0] }
  0xfc   : > { %2137 = vmatmul.bf16.gmra.mxu1 %v3079_v15 }
  0xfd   : > { %v2428_v20 = vadd.f32 %v2427_v47, %v2099_v19 }
  0xfe   : > { %v4363_v21 = vpop.f32.mrf.mxu3 }
  0xff   : > { %2733 = vst.msk [vmem:[%s4266_s9 + $0x50] sm:$0xff] %vm2722_vm1, %v2428_v20 }
 0x100   : > { %v2434_v24 = vpop.f32.mrf.mxu2  ;;  %v1771_v25 = vpop.f32.mrf.mxu0 }
 0x101   : > { %v1772_v28 = vadd.f32 %v4257_v62, %v1771_v25  ;;  %v2100_v29 = vpop.f32.mrf.mxu1 }
 0x103   : > { %v2101_v31 = vadd.f32 %v2100_v29, %v1772_v28 }
 0x105   : > { %v2430_v37 = vadd.f32 %v2429_v58, %v2101_v31  ;;  %3771 = vmatmul.msk.bf16.gmra.mxu2 %vm1542_vm0, %v3107_v30  ;;  %v3131_v30 = vor.u32 %v3875_v23, %v3130_v22 }
 0x106   : > { %v4377_v40 = vpop.f32.mrf.mxu3 }
 0x107   : > { %2734 = vst.msk [vmem:[%s4266_s9 + $0x58] sm:$0xff] %vm2722_vm1, %v2430_v37 }
 0x108   : > { %v2437_v43 = vpop.f32.mrf.mxu2  ;;  %v1774_v45 = vpop.f32.mrf.mxu0 }
 0x109   : > { %v1775_v47 = vadd.f32 %v4257_v62, %v1774_v45  ;;  %v2103_v48 = vpop.f32.mrf.mxu1 }
 0x10b   : > { %v2104_v49 = vadd.f32 %v2103_v48, %v1775_v47  ;;  %1813 = vmatmul.bf16.gmra.mxu0 %v3087_v41  ;;  %2053 = vmatmul.bf16.gmra.mxu3 %v3663_v42  ;;  %v3111_v42 = vor.u32 %v3871_v33, %v3110_v32  ;;  %v3115_v47 = vor.u32 %v3870_v38, %v3112_v39  ;;  %v3877_v38 = vld [vmem:[%s4134_s5 + $0x1b8] sm:$0xf0]  ;;  %v3972_v39 = vld [vmem:[%s4134_s5 + $0x4b4] sm:$0xf] }
 0x10c   : > { %2142 = vmatmul.bf16.gmra.mxu1 %v3091_v46 }
 0x10d   : > { %v2433_v50 = vadd.f32 %v2432_v13, %v2104_v49 }
 0x10e   : > { %v4382_v51 = vpop.f32.mrf.mxu3 }
 0x10f   : > { %2735 = vst.msk [vmem:[%s4266_s9 + $0x60] sm:$0xff] %vm2722_vm1, %v2433_v50 }
 0x110   : > { %v2439_v56 = vpop.f32.mrf.mxu2  ;;  %v1776_v57 = vpop.f32.mrf.mxu0 }
 0x111   : > { %v1777_v58 = vadd.f32 %v4257_v62, %v1776_v57  ;;  %v2105_v59 = vpop.f32.mrf.mxu1  ;;  %v3878_v57 = vld [vmem:[%s4134_s5 + $0x1c0] sm:$0xf0] }
 0x113   : > { %v2106_v61 = vadd.f32 %v2105_v59, %v1777_v58 }
 0x115   : > { %v2435_v4 = vadd.f32 %v2434_v24, %v2106_v61  ;;  %3772 = vmatmul.msk.bf16.gmra.mxu2 %vm1542_vm0, %v3119_v60 }
 0x116   : > { %v4396_v7 = vpop.f32.mrf.mxu3 }
 0x117   : > { %2736 = vst.msk [vmem:[%s4266_s9 + $0x68] sm:$0xff] %vm2722_vm1, %v2435_v4  ;;  %v3969_v4 = vld [vmem:[%s4134_s5 + $0x49c] sm:$0xf] }
 0x118   : > { %v2442_v12 = vpop.f32.mrf.mxu2  ;;  %v1779_v13 = vpop.f32.mrf.mxu0 }
 0x119   : > { %v1780_v15 = vadd.f32 %v4257_v62, %v1779_v13  ;;  %v2108_v17 = vpop.f32.mrf.mxu1  ;;  %v3123_v13 = vor.u32 %v3874_v3, %v3122_v2 }
 0x11b   : > { %v2109_v18 = vadd.f32 %v2108_v17, %v1780_v15  ;;  %1818 = vmatmul.bf16.gmra.mxu0 %v3099_v8  ;;  %2058 = vmatmul.bf16.gmra.mxu3 %v3675_v11  ;;  %v3873_v8 = vld [vmem:[%s4134_s5 + $0x19c] sm:$0xf]  ;;  %v3124_v11 = vld [vmem:[%s4134_s5 + $0x1a4] sm:$0xf0] }
 0x11c   : > { %2147 = vmatmul.bf16.gmra.mxu1 %v3103_v14  ;;  %v3511_v14 = vor.u32 %v3969_v4, %v3508_v5 }
 0x11d   : > { %v2438_v19 = vadd.f32 %v2437_v43, %v2109_v18  ;;  %v3499_v43 = vor.u32 %v3966_v34, %v3496_v35  ;;  %v3127_v18 = vor.u32 %v3873_v8, %v3124_v11  ;;  %v3146_v11 = vld [vmem:[%s4134_s5 + $0x1c8] sm:$0xf] }
 0x11e   : > { %v4401_v20 = vpop.f32.mrf.mxu3 }
 0x11f   : > { %2737 = vst.msk [vmem:[%s4266_s9 + $0x70] sm:$0xff] %vm2722_vm1, %v2438_v19 }
 0x120   : > { %v2444_v24 = vpop.f32.mrf.mxu2  ;;  %v1781_v25 = vpop.f32.mrf.mxu0 }
 0x121   : > { %v1782_v28 = vadd.f32 %v4257_v62, %v1781_v25  ;;  %v2110_v29 = vpop.f32.mrf.mxu1 }
 0x123   : > { %v2111_v31 = vadd.f32 %v2110_v29, %v1782_v28  ;;  %v3154_v28 = vld [vmem:[%s4134_s5 + $0x1d0] sm:$0xf]  ;;  %v3881_v29 = vld [vmem:[%s4134_s5 + $0x1d8] sm:$0xf0] }
 0x124   : > { %v3155_v34 = vor.u32 %v3881_v29, %v3154_v28 }
 0x125   : > { %v2440_v37 = vadd.f32 %v2439_v56, %v2111_v31  ;;  %3773 = vmatmul.msk.bf16.gmra.mxu2 %vm1542_vm0, %v3131_v30  ;;  %v3142_v56 = vld [vmem:[%s4134_s5 + $0x1b8] sm:$0xf] }
 0x126   : > { %v4415_v41 = vpop.f32.mrf.mxu3  ;;  %v3143_v0 = vor.u32 %v3878_v57, %v3142_v56 }
 0x127   : > { %2738 = vst.msk [vmem:[%s4266_s9 + $0x78] sm:$0xff] %vm2722_vm1, %v2440_v37  ;;  %v3134_v37 = vld [vmem:[%s4134_s5 + $0x1b0] sm:$0xf] }
 0x128   : > { %v2447_v45 = vpop.f32.mrf.mxu2  ;;  %v1784_v46 = vpop.f32.mrf.mxu0 }
 0x129   : > { %v1785_v48 = vadd.f32 %v4257_v62, %v1784_v46  ;;  %v2113_v49 = vpop.f32.mrf.mxu1  ;;  %v3136_v46 = vld [vmem:[%s4134_s5 + $0x1bc] sm:$0xf0] }
 0x12b   : > { %v2114_v50 = vadd.f32 %v2113_v49, %v1785_v48  ;;  %1823 = vmatmul.bf16.gmra.mxu0 %v3111_v42  ;;  %2312 = vmatmul.bf16.vlgmr.msrb.gmra.mxu3 %v3499_v43  ;;  %v3520_v42 = vld [vmem:[%s4134_s5 + $0x4bc] sm:$0xf0]  ;;  %v3135_v48 = vor.u32 %v3877_v38, %v3134_v37  ;;  %v3887_v38 = vld [vmem:[%s4134_s5 + $0x208] sm:$0xf0] }
 0x12c   : > { %2152 = vmatmul.bf16.gmra.mxu1 %v3115_v47  ;;  %v3523_v49 = vor.u32 %v3972_v39, %v3520_v42  ;;  %v3178_v37 = vld [vmem:[%s4134_s5 + $0x200] sm:$0xf] }
 0x12d   : > { %v2443_v53 = vadd.f32 %v2442_v12, %v2114_v50 }
 0x12e   : > { %v4420_v54 = vpop.f32.mrf.mxu3 }
 0x12f   : > { %2739 = vst.msk [vmem:[%s4266_s9 + $0x80] sm:$0xff] %vm2722_vm1, %v2443_v53 }
 0x130   : > { %v2449_v58 = vpop.f32.mrf.mxu2  ;;  %v1786_v59 = vpop.f32.mrf.mxu0 }
 0x131   : > { %v1787_v60 = vadd.f32 %v4257_v62, %v1786_v59  ;;  %v2115_v61 = vpop.f32.mrf.mxu1 }
 0x133   : > { %v2116_v1 = vadd.f32 %v2115_v61, %v1787_v60 }
 0x135   : > { %v2445_v6 = vadd.f32 %v2444_v24, %v2116_v1  ;;  %3774 = vmatmul.msk.bf16.gmra.mxu2 %vm1542_vm0, %v3143_v0  ;;  %v3166_v0 = vld [vmem:[%s4134_s5 + $0x1e8] sm:$0xf]  ;;  %v3884_v1 = vld [vmem:[%s4134_s5 + $0x1f0] sm:$0xf0] }
 0x136   : > { %v4434_v12 = vpop.f32.mrf.mxu3 }
 0x137   : > { %2740 = vst.msk [vmem:[%s4266_s9 + $0x88] sm:$0xff] %vm2722_vm1, %v2445_v6  ;;  %v3167_v6 = vor.u32 %v3884_v1, %v3166_v0 }
 0x138   : > { %v2452_v15 = vpop.f32.mrf.mxu2  ;;  %v1789_v17 = vpop.f32.mrf.mxu0 }
 0x139   : > { %v1790_v19 = vadd.f32 %v4257_v62, %v1789_v17  ;;  %v2118_v22 = vpop.f32.mrf.mxu1 }
 0x13b   : > { %v2119_v23 = vadd.f32 %v2118_v22, %v1790_v19  ;;  %1828 = vmatmul.bf16.gmra.mxu0 %v3123_v13  ;;  %2317 = vmatmul.bf16.gmra.mxu3 %v3511_v14  ;;  %v3880_v13 = vld [vmem:[%s4134_s5 + $0x1d0] sm:$0xf0]  ;;  %v3975_v14 = vld [vmem:[%s4134_s5 + $0x4cc] sm:$0xf]  ;;  %v3148_v19 = vld [vmem:[%s4134_s5 + $0x1d4] sm:$0xf0] }
 0x13c   : > { %2157 = vmatmul.bf16.gmra.mxu1 %v3127_v18  ;;  %v3879_v18 = vld [vmem:[%s4134_s5 + $0x1cc] sm:$0xf] }
 0x13d   : > { %v2448_v24 = vadd.f32 %v2447_v45, %v2119_v23  ;;  %v3876_v45 = vld [vmem:[%s4134_s5 + $0x1b4] sm:$0xf]  ;;  %v3147_v23 = vor.u32 %v3880_v13, %v3146_v11 }
 0x13e   : > { %v4439_v25 = vpop.f32.mrf.mxu3  ;;  %v3139_v56 = vor.u32 %v3876_v45, %v3136_v46  ;;  %v3179_v46 = vor.u32 %v3887_v38, %v3178_v37  ;;  %v3172_v37 = vld [vmem:[%s4134_s5 + $0x204] sm:$0xf0] }
 0x13f   : > { %2741 = vst.msk [vmem:[%s4266_s9 + $0x90] sm:$0xff] %vm2722_vm1, %v2448_v24 }
 0x140   : > { %v2454_v30 = vpop.f32.mrf.mxu2  ;;  %v1791_v31 = vpop.f32.mrf.mxu0 }
 0x141   : > { %v1792_v32 = vadd.f32 %v4257_v62, %v1791_v31  ;;  %v2120_v33 = vpop.f32.mrf.mxu1  ;;  %v3151_v31 = vor.u32 %v3879_v18, %v3148_v19 }
 0x143   : > { %v2121_v35 = vadd.f32 %v2120_v33, %v1792_v32 }
 0x145   : > { %v2450_v43 = vadd.f32 %v2449_v58, %v2121_v35  ;;  %3775 = vmatmul.msk.bf16.gmra.mxu2 %vm1542_vm0, %v3155_v34 }
 0x146   : > { %v4453_v47 = vpop.f32.mrf.mxu3 }
 0x147   : > { %2742 = vst.msk [vmem:[%s4266_s9 + $0x98] sm:$0xff] %vm2722_vm1, %v2450_v43 }
 0x148   : > { %v2457_v50 = vpop.f32.mrf.mxu2  ;;  %v1794_v53 = vpop.f32.mrf.mxu0 }
 0x149   : > { %v1795_v57 = vadd.f32 %v4257_v62, %v1794_v53  ;;  %v2123_v59 = vpop.f32.mrf.mxu1  ;;  %v3883_v53 = vld [vmem:[%s4134_s5 + $0x1e8] sm:$0xf0] }
 0x14b   : > { %v2124_v58 = vadd.f32 %v2123_v59, %v1795_v57  ;;  %1833 = vmatmul.bf16.gmra.mxu0 %v3135_v48  ;;  %2322 = vmatmul.bf16.gmra.mxu3 %v3523_v49  ;;  %v3158_v49 = vld [vmem:[%s4134_s5 + $0x1e0] sm:$0xf]  ;;  %v3882_v59 = vld [vmem:[%s4134_s5 + $0x1e4] sm:$0xf] }
 0x14c   : > { %2162 = vmatmul.bf16.gmra.mxu1 %v3139_v56  ;;  %v3978_v56 = vld [vmem:[%s4134_s5 + $0x4e4] sm:$0xf]  ;;  %v3159_v0 = vor.u32 %v3883_v53, %v3158_v49 }
 0x14d   : > { %v2453_v60 = vadd.f32 %v2452_v15, %v2124_v58  ;;  %v3532_v15 = vld [vmem:[%s4134_s5 + $0x4d4] sm:$0xf0]  ;;  %v3160_v58 = vld [vmem:[%s4134_s5 + $0x1ec] sm:$0xf0] }
 0x14e   : > { %v4458_v61 = vpop.f32.mrf.mxu3  ;;  %v3535_v24 = vor.u32 %v3975_v14, %v3532_v15  ;;  %v3190_v14 = vld [vmem:[%s4134_s5 + $0x218] sm:$0xf]  ;;  %v3890_v15 = vld [vmem:[%s4134_s5 + $0x220] sm:$0xf0] }
 0x14f   : > { %2743 = vst.msk [vmem:[%s4266_s9 + $0xa0] sm:$0xff] %vm2722_vm1, %v2453_v60 }
 0x150   : > { %v2459_v2 = vpop.f32.mrf.mxu2  ;;  %v1796_v3 = vpop.f32.mrf.mxu0 }
 0x151   : > { %v1797_v4 = vadd.f32 %v4257_v62, %v1796_v3  ;;  %v2125_v5 = vpop.f32.mrf.mxu1 }
 0x153   : > { %v2126_v8 = vadd.f32 %v2125_v5, %v1797_v4  ;;  %v3163_v5 = vor.u32 %v3882_v59, %v3160_v58  ;;  %v3893_v59 = vld [vmem:[%s4134_s5 + $0x238] sm:$0xf0] }
 0x155   : > { %v2455_v17 = vadd.f32 %v2454_v30, %v2126_v8  ;;  %3776 = vmatmul.msk.bf16.gmra.mxu2 %vm1542_vm0, %v3167_v6 }
 0x156   : > { %v4472_v22 = vpop.f32.mrf.mxu3 }
 0x157   : > { %2744 = vst.msk [vmem:[%s4266_s9 + $0xa8] sm:$0xff] %vm2722_vm1, %v2455_v17 }
 0x158   : > { %v2462_v28 = vpop.f32.mrf.mxu2  ;;  %v1799_v29 = vpop.f32.mrf.mxu0 }
 0x159   : > { %v1800_v32 = vadd.f32 %v4257_v62, %v1799_v29  ;;  %v2128_v33 = vpop.f32.mrf.mxu1 }
 0x15b   : > { %v2129_v30 = vadd.f32 %v2128_v33, %v1800_v32  ;;  %1838 = vmatmul.bf16.gmra.mxu0 %v3147_v23  ;;  %2327 = vmatmul.bf16.gmra.mxu3 %v3535_v24  ;;  %v3191_v24 = vor.u32 %v3890_v15, %v3190_v14  ;;  %v3886_v32 = vld [vmem:[%s4134_s5 + $0x200] sm:$0xf0]  ;;  %v3981_v33 = vld [vmem:[%s4134_s5 + $0x4fc] sm:$0xf]  ;;  %v3888_v15 = vld [vmem:[%s4134_s5 + $0x214] sm:$0xf] }
 0x15c   : > { %2167 = vmatmul.bf16.gmra.mxu1 %v3151_v31  ;;  %v3170_v31 = vld [vmem:[%s4134_s5 + $0x1f8] sm:$0xf] }
 0x15d   : > { %v2458_v34 = vadd.f32 %v2457_v50, %v2129_v30  ;;  %v3544_v50 = vld [vmem:[%s4134_s5 + $0x4ec] sm:$0xf0] }
 0x15e   : > { %v4477_v35 = vpop.f32.mrf.mxu3  ;;  %v3547_v1 = vor.u32 %v3978_v56, %v3544_v50 }
 0x15f   : > { %2745 = vst.msk [vmem:[%s4266_s9 + $0xb0] sm:$0xff] %vm2722_vm1, %v2458_v34  ;;  %v3885_v34 = vld [vmem:[%s4134_s5 + $0x1fc] sm:$0xf] }
 0x160   : > { %v2464_v39 = vpop.f32.mrf.mxu2  ;;  %v1801_v42 = vpop.f32.mrf.mxu0 }
 0x161   : > { %v1802_v43 = vadd.f32 %v4257_v62, %v1801_v42  ;;  %v2130_v45 = vpop.f32.mrf.mxu1  ;;  %v3171_v42 = vor.u32 %v3886_v32, %v3170_v31 }
 0x163   : > { %v2131_v48 = vadd.f32 %v2130_v45, %v1802_v43 }
 0x165   : > { %v2460_v57 = vadd.f32 %v2459_v2, %v2131_v48  ;;  %3777 = vmatmul.msk.bf16.gmra.mxu2 %vm1542_vm0, %v3179_v46  ;;  %v3175_v48 = vor.u32 %v3885_v34, %v3172_v37  ;;  %v3214_v37 = vld [vmem:[%s4134_s5 + $0x248] sm:$0xf] }
 0x166   : > { %v4491_v60 = vpop.f32.mrf.mxu3 }
 0x167   : > { %2746 = vst.msk [vmem:[%s4266_s9 + $0xb8] sm:$0xff] %vm2722_vm1, %v2460_v57  ;;  %v3202_v57 = vld [vmem:[%s4134_s5 + $0x230] sm:$0xf] }
 0x168   : > { %v2467_v3 = vpop.f32.mrf.mxu2  ;;  %v1804_v4 = vpop.f32.mrf.mxu0 }
 0x169   : > { %v1805_v6 = vadd.f32 %v4257_v62, %v1804_v4  ;;  %v2133_v8 = vpop.f32.mrf.mxu1 }
 0x16b   : > { %v2134_v2 = vadd.f32 %v2133_v8, %v1805_v6  ;;  %1843 = vmatmul.bf16.gmra.mxu0 %v3159_v0  ;;  %2332 = vmatmul.bf16.gmra.mxu3 %v3547_v1  ;;  %v3182_v8 = vld [vmem:[%s4134_s5 + $0x210] sm:$0xf] }
 0x16c   : > { %2172 = vmatmul.bf16.gmra.mxu1 %v3163_v5  ;;  %v3203_v5 = vor.u32 %v3893_v59, %v3202_v57  ;;  %v3892_v57 = vld [vmem:[%s4134_s5 + $0x230] sm:$0xf0]  ;;  %v3987_v59 = vld [vmem:[%s4134_s5 + $0x52c] sm:$0xf] }
 0x16d   : > { %v2463_v11 = vadd.f32 %v2462_v28, %v2134_v2  ;;  %v3556_v28 = vld [vmem:[%s4134_s5 + $0x504] sm:$0xf0]  ;;  %v3889_v2 = vld [vmem:[%s4134_s5 + $0x218] sm:$0xf0] }
 0x16e   : > { %v4496_v13 = vpop.f32.mrf.mxu3  ;;  %v3559_v43 = vor.u32 %v3981_v33, %v3556_v28 }
 0x16f   : > { %2747 = vst.msk [vmem:[%s4266_s9 + $0xc0] sm:$0xff] %vm2722_vm1, %v2463_v11  ;;  %v3984_v11 = vld [vmem:[%s4134_s5 + $0x514] sm:$0xf] }
 0x170   : > { %v2469_v17 = vpop.f32.mrf.mxu2  ;;  %v1806_v18 = vpop.f32.mrf.mxu0 }
 0x171   : > { %v1807_v19 = vadd.f32 %v4257_v62, %v1806_v18  ;;  %v2135_v23 = vpop.f32.mrf.mxu1  ;;  %v3184_v18 = vld [vmem:[%s4134_s5 + $0x21c] sm:$0xf0] }
 0x172   : > { %v3187_v32 = vor.u32 %v3888_v15, %v3184_v18 }
 0x173   : > { %v2136_v29 = vadd.f32 %v2135_v23, %v1807_v19  ;;  %v3183_v23 = vor.u32 %v3889_v2, %v3182_v8 }
 0x175   : > { %v2465_v30 = vadd.f32 %v2464_v39, %v2136_v29  ;;  %3778 = vmatmul.msk.bf16.gmra.mxu2 %vm1542_vm0, %v3191_v24 }
 0x176   : > { %v4510_v38 = vpop.f32.mrf.mxu3 }
 0x177   : > { %2748 = vst.msk [vmem:[%s4266_s9 + $0xc8] sm:$0xff] %vm2722_vm1, %v2465_v30 }
 0x178   : > { %v2472_v45 = vpop.f32.mrf.mxu2  ;;  %v1809_v46 = vpop.f32.mrf.mxu0 }
 0x179   : > { %v1810_v49 = vadd.f32 %v4257_v62, %v1809_v46  ;;  %v2138_v53 = vpop.f32.mrf.mxu1 }
 0x17b   : > { %v2139_v39 = vadd.f32 %v2138_v53, %v1810_v49  ;;  %1848 = vmatmul.bf16.gmra.mxu0 %v3171_v42  ;;  %2337 = vmatmul.bf16.gmra.mxu3 %v3559_v43  ;;  %v3896_v42 = vld [vmem:[%s4134_s5 + $0x250] sm:$0xf0] }
 0x17c   : > { %2177 = vmatmul.bf16.gmra.mxu1 %v3175_v48  ;;  %v3215_v53 = vor.u32 %v3896_v42, %v3214_v37  ;;  %v3206_v42 = vld [vmem:[%s4134_s5 + $0x240] sm:$0xf] }
 0x17d   : > { %v2468_v56 = vadd.f32 %v2467_v3, %v2139_v39  ;;  %v3568_v3 = vld [vmem:[%s4134_s5 + $0x51c] sm:$0xf0] }
 0x17e   : > { %v4515_v50 = vpop.f32.mrf.mxu3  ;;  %v3571_v24 = vor.u32 %v3984_v11, %v3568_v3 }
 0x17f   : > { %2749 = vst.msk [vmem:[%s4266_s9 + $0xd0] sm:$0xff] %vm2722_vm1, %v2468_v56  ;;  %v3194_v56 = vld [vmem:[%s4134_s5 + $0x228] sm:$0xf] }
 0x180   : > { %v2474_v58 = vpop.f32.mrf.mxu2  ;;  %v1811_v0 = vpop.f32.mrf.mxu0 }
 0x181   : > { %v1812_v1 = vadd.f32 %v4257_v62, %v1811_v0  ;;  %v2140_v4 = vpop.f32.mrf.mxu1 }
 0x183   : > { %v2141_v6 = vadd.f32 %v2140_v4, %v1812_v1  ;;  %v3891_v1 = vld [vmem:[%s4134_s5 + $0x22c] sm:$0xf]  ;;  %v3196_v4 = vld [vmem:[%s4134_s5 + $0x234] sm:$0xf0] }
 0x184   : > { %v3199_v3 = vor.u32 %v3891_v1, %v3196_v4 }
 0x185   : > { %v2470_v14 = vadd.f32 %v2469_v17, %v2141_v6  ;;  %3779 = vmatmul.msk.bf16.gmra.mxu2 %vm1542_vm0, %v3203_v5  ;;  %v3195_v6 = vor.u32 %v3892_v57, %v3194_v56 }
 0x186   : > { %v4529_v19 = vpop.f32.mrf.mxu3 }
 0x187   : > { %2750 = vst.msk [vmem:[%s4266_s9 + $0xd8] sm:$0xff] %vm2722_vm1, %v2470_v14 }
 0x188   : > { %v2477_v29 = vpop.f32.mrf.mxu2  ;;  %v1814_v31 = vpop.f32.mrf.mxu0 }
 0x189   : > { %v1815_v33 = vadd.f32 %v4257_v62, %v1814_v31  ;;  %v2143_v28 = vpop.f32.mrf.mxu1  ;;  %v3899_v31 = vld [vmem:[%s4134_s5 + $0x268] sm:$0xf0] }
 0x18b   : > { %v2144_v17 = vadd.f32 %v2143_v28, %v1815_v33  ;;  %1853 = vmatmul.bf16.gmra.mxu0 %v3183_v23  ;;  %2342 = vmatmul.bf16.gmra.mxu3 %v3571_v24  ;;  %v3226_v24 = vld [vmem:[%s4134_s5 + $0x260] sm:$0xf] }
 0x18c   : > { %2182 = vmatmul.bf16.gmra.mxu1 %v3187_v32 }
 0x18d   : > { %v2473_v30 = vadd.f32 %v2472_v45, %v2144_v17  ;;  %v3580_v45 = vld [vmem:[%s4134_s5 + $0x534] sm:$0xf0] }
 0x18e   : > { %v4534_v34 = vpop.f32.mrf.mxu3  ;;  %v3583_v8 = vor.u32 %v3987_v59, %v3580_v45 }
 0x18f   : > { %2751 = vst.msk [vmem:[%s4266_s9 + $0xe0] sm:$0xff] %vm2722_vm1, %v2473_v30  ;;  %v3227_v30 = vor.u32 %v3899_v31, %v3226_v24 }
 0x190   : > { %v2479_v43 = vpop.f32.mrf.mxu2  ;;  %v1816_v46 = vpop.f32.mrf.mxu0 }
 0x191   : > { %v1817_v48 = vadd.f32 %v4257_v62, %v1816_v46  ;;  %v2145_v49 = vpop.f32.mrf.mxu1  ;;  %v3895_v46 = vld [vmem:[%s4134_s5 + $0x248] sm:$0xf0] }
 0x192   : > { %v3207_v57 = vor.u32 %v3895_v46, %v3206_v42 }
 0x193   : > { %v2146_v39 = vadd.f32 %v2145_v49, %v1817_v48  ;;  %v3990_v48 = vld [vmem:[%s4134_s5 + $0x544] sm:$0xf] }
 0x195   : > { %v2475_v0 = vadd.f32 %v2474_v58, %v2146_v39  ;;  %3780 = vmatmul.msk.bf16.gmra.mxu2 %vm1542_vm0, %v3215_v53  ;;  %v3894_v53 = vld [vmem:[%s4134_s5 + $0x244] sm:$0xf]  ;;  %v3208_v39 = vld [vmem:[%s4134_s5 + $0x24c] sm:$0xf0] }
 0x196   : > { %v4548_v5 = vpop.f32.mrf.mxu3 }
 0x197   : > { %2752 = vst.msk [vmem:[%s4266_s9 + $0xe8] sm:$0xff] %vm2722_vm1, %v2475_v0  ;;  %v3211_v0 = vor.u32 %v3894_v53, %v3208_v39 }
 0x198   : > { %v2482_v2 = vpop.f32.mrf.mxu2  ;;  %v1819_v11 = vpop.f32.mrf.mxu0 }
 0x199   : > { %v1820_v14 = vadd.f32 %v4257_v62, %v1819_v11  ;;  %v2148_v15 = vpop.f32.mrf.mxu1 }
 0x19b   : > { %v2149_v58 = vadd.f32 %v2148_v15, %v1820_v14  ;;  %1858 = vmatmul.bf16.gmra.mxu0 %v3195_v6  ;;  %2347 = vmatmul.bf16.gmra.mxu3 %v3583_v8  ;;  %v3238_v14 = vld [vmem:[%s4134_s5 + $0x278] sm:$0xf]  ;;  %v3902_v15 = vld [vmem:[%s4134_s5 + $0x280] sm:$0xf0] }
 0x19c   : > { %2187 = vmatmul.bf16.gmra.mxu1 %v3199_v3 }
 0x19d   : > { %v2478_v18 = vadd.f32 %v2477_v29, %v2149_v58  ;;  %v3592_v29 = vld [vmem:[%s4134_s5 + $0x54c] sm:$0xf0] }
 0x19e   : > { %v4553_v23 = vpop.f32.mrf.mxu3 }
 0x19f   : > { %2753 = vst.msk [vmem:[%s4266_s9 + $0xf0] sm:$0xff] %vm2722_vm1, %v2478_v18 }
 0x1a0   : > { %v2484_v32 = vpop.f32.mrf.mxu2  ;;  %v1821_v33 = vpop.f32.mrf.mxu0 }
 0x1a1   : > { %v1822_v28 = vadd.f32 %v4257_v62, %v1821_v33  ;;  %v2150_v17 = vpop.f32.mrf.mxu1  ;;  %v3595_v62 = vor.u32 %v3990_v48, %v3592_v29  ;;  %v3897_v48 = vld [vmem:[%s4134_s5 + $0x25c] sm:$0xf]  ;;  %v3220_v29 = vld [vmem:[%s4134_s5 + $0x264] sm:$0xf0] }
 0x1a3   : > { %v2151_v37 = vadd.f32 %v2150_v17, %v1822_v28  ;;  %v3239_v28 = vor.u32 %v3902_v15, %v3238_v14 }
 0x1a5   : > { %v2480_v49 = vadd.f32 %v2479_v43, %v2151_v37  ;;  %3781 = vmatmul.msk.bf16.gmra.mxu2 %vm1542_vm0, %v3227_v30  ;;  %v4574_v43 = vld [vmem:[%s5222_s2] ss:$0 sm:$0xff]  ;;  %v3898_v30 = vld [vmem:[%s4134_s5 + $0x260] sm:$0xf0]  ;;  %v3604_v37 = vld [vmem:[%s4134_s5 + $0x564] sm:$0xf0] }
 0x1a6   : > { %v4567_v56 = vpop.f32.mrf.mxu3  ;;  %v1985_v8 = vadd.f32 %v4574_v43, %v4268_v10  ;;  %v3218_v10 = vld [vmem:[%s4134_s5 + $0x258] sm:$0xf]  ;;  %v1987_v42 = vadd.f32 %v4574_v43, %v4282_v26 }
 0x1a7   : > { %2754 = vst.msk [vmem:[%s4266_s9 + $0xf8] sm:$0xff] %vm2722_vm1, %v2480_v49  ;;  %v3219_v39 = vor.u32 %v3898_v30, %v3218_v10  ;;  %v3901_v10 = vld [vmem:[%s4134_s5 + $0x278] sm:$0xf0]  ;;  %v3616_v30 = vld [vmem:[%s4134_s5 + $0x57c] sm:$0xf0] }
 0x1a8   : > { %v2487_v59 = vpop.f32.mrf.mxu2  ;;  %v1824_v45 = vpop.f32.mrf.mxu0 }
 0x1a9   : > { %v1825_v1 = vadd.f32 %v4574_v43, %v1824_v45  ;;  %v2153_v4 = vpop.f32.mrf.mxu1 }
 0x1ab   : > { %v2154_v6 = vadd.f32 %v2153_v4, %v1825_v1  ;;  %1863 = vmatmul.bf16.gmra.mxu0 %v3207_v57  ;;  %2352 = vmatmul.bf16.gmra.mxu3 %v3595_v62  ;;  %v1990_v4 = vadd.f32 %v4574_v43, %v4287_v36  ;;  %v3230_v36 = vld [vmem:[%s4134_s5 + $0x270] sm:$0xf] }
 0x1ac   : > { %2192 = vmatmul.bf16.gmra.mxu1 %v3211_v0  ;;  %v3223_v0 = vor.u32 %v3897_v48, %v3220_v29 }
 0x1ad   : > { %v2483_v11 = vadd.f32 %v2482_v2, %v2154_v6  ;;  %v3993_v2 = vld [vmem:[%s4134_s5 + $0x55c] sm:$0xf] }
 0x1ae   : > { %v2313_v3 = vpop.f32.mrf.mxu3  ;;  %v3607_v57 = vor.u32 %v3993_v2, %v3604_v37  ;;  %v1992_v2 = vadd.f32 %v4574_v43, %v4301_v52 }
 0x1af   : > { %2755 = vst.msk [vmem:[%s4266_s9 + $0x100] sm:$0xff] %vm2722_vm1, %v2483_v11  ;;  %v4583_v58 = vadd.f32 %v2313_v3, %v1985_v8  ;;  %v3250_v11 = vld [vmem:[%s4134_s5 + $0x290] sm:$0xf]  ;;  %v3905_v3 = vld [vmem:[%s4134_s5 + $0x298] sm:$0xf0] }
 0x1b0   : > { %v2489_v18 = vpop.f32.mrf.mxu2  ;;  %v1826_v24 = vpop.f32.mrf.mxu0 }
 0x1b1   : > { %v1827_v31 = vadd.f32 %v4574_v43, %v1826_v24  ;;  %v2155_v33 = vpop.f32.mrf.mxu1 }
 0x1b3   : > { %v2156_v17 = vadd.f32 %v2155_v33, %v1827_v31 }
 0x1b5   : > { %v2485_v46 = vadd.f32 %v2484_v32, %v2156_v17  ;;  %3782 = vmatmul.msk.bf16.gmra.mxu2 %vm1542_vm0, %v3239_v28  ;;  %v3251_v28 = vor.u32 %v3905_v3, %v3250_v11 }
 0x1b6   : > { %v2315_v49 = vpop.f32.mrf.mxu3 }
 0x1b7   : > { %2756 = vst.msk [vmem:[%s4266_s9 + $0x108] sm:$0xff] %vm2722_vm1, %v2485_v46  ;;  %v4597_v53 = vadd.f32 %v2315_v49, %v1987_v42  ;;  %v3900_v42 = vld [vmem:[%s4134_s5 + $0x274] sm:$0xf]  ;;  %v3232_v46 = vld [vmem:[%s4134_s5 + $0x27c] sm:$0xf0]  ;;  %v3231_v49 = vor.u32 %v3901_v10, %v3230_v36 }
 0x1b8   : > { %v2492_v62 = vpop.f32.mrf.mxu2  ;;  %v1829_v45 = vpop.f32.mrf.mxu0  ;;  %v3904_v36 = vld [vmem:[%s4134_s5 + $0x290] sm:$0xf0]  ;;  %v3628_v10 = vld [vmem:[%s4134_s5 + $0x594] sm:$0xf0] }
 0x1b9   : > { %v1830_v26 = vadd.f32 %v4574_v43, %v1829_v45  ;;  %v2158_v32 = vpop.f32.mrf.mxu1 }
 0x1bb   : > { %v2159_v1 = vadd.f32 %v2158_v32, %v1830_v26  ;;  %1868 = vmatmul.bf16.gmra.mxu0 %v3219_v39  ;;  %2357 = vmatmul.bf16.gmra.mxu3 %v3607_v57  ;;  %v1995_v32 = vadd.f32 %v4574_v43, %v4306_v63  ;;  %v3242_v63 = vld [vmem:[%s4134_s5 + $0x288] sm:$0xf] }
 0x1bc   : > { %2197 = vmatmul.bf16.gmra.mxu1 %v3223_v0  ;;  %v3235_v0 = vor.u32 %v3900_v42, %v3232_v46 }
 0x1bd   : > { %v2488_v6 = vadd.f32 %v2487_v59, %v2159_v1  ;;  %v3996_v59 = vld [vmem:[%s4134_s5 + $0x574] sm:$0xf] }
 0x1be   : > { %v2318_v8 = vpop.f32.mrf.mxu3  ;;  %v3619_v39 = vor.u32 %v3996_v59, %v3616_v30  ;;  %v1997_v59 = vadd.f32 %v4574_v43, %v4320_v16 }
 0x1bf   : > { %2757 = vst.msk [vmem:[%s4266_s9 + $0x110] sm:$0xff] %vm2722_vm1, %v2488_v6  ;;  %v4606_v14 = vadd.f32 %v2318_v8, %v1990_v4  ;;  %v3262_v6 = vld [vmem:[%s4134_s5 + $0x2a8] sm:$0xf]  ;;  %v3908_v8 = vld [vmem:[%s4134_s5 + $0x2b0] sm:$0xf0] }
 0x1c0   : > { %v2494_v15 = vpop.f32.mrf.mxu2  ;;  %v1831_v24 = vpop.f32.mrf.mxu0 }
 0x1c1   : > { %v1832_v31 = vadd.f32 %v4574_v43, %v1831_v24  ;;  %v2160_v33 = vpop.f32.mrf.mxu1 }
 0x1c3   : > { %v2161_v17 = vadd.f32 %v2160_v33, %v1832_v31 }
 0x1c5   : > { %v2490_v37 = vadd.f32 %v2489_v18, %v2161_v17  ;;  %3783 = vmatmul.msk.bf16.gmra.mxu2 %vm1542_vm0, %v3251_v28  ;;  %v3263_v28 = vor.u32 %v3908_v8, %v3262_v6 }
 0x1c6   : > { %v2320_v48 = vpop.f32.mrf.mxu3 }
 0x1c7   : > { %2758 = vst.msk [vmem:[%s4266_s9 + $0x118] sm:$0xff] %vm2722_vm1, %v2490_v37  ;;  %v4620_v29 = vadd.f32 %v2320_v48, %v1992_v2  ;;  %v3903_v2 = vld [vmem:[%s4134_s5 + $0x28c] sm:$0xf]  ;;  %v3244_v37 = vld [vmem:[%s4134_s5 + $0x294] sm:$0xf0]  ;;  %v3243_v48 = vor.u32 %v3904_v36, %v3242_v63 }
 0x1c8   : > { %v2497_v57 = vpop.f32.mrf.mxu2  ;;  %v1834_v45 = vpop.f32.mrf.mxu0  ;;  %v3907_v63 = vld [vmem:[%s4134_s5 + $0x2a8] sm:$0xf0]  ;;  %v3640_v36 = vld [vmem:[%s4134_s5 + $0x5ac] sm:$0xf0] }
 0x1c9   : > { %v1835_v52 = vadd.f32 %v4574_v43, %v1834_v45  ;;  %v2163_v18 = vpop.f32.mrf.mxu1 }
 0x1cb   : > { %v2164_v26 = vadd.f32 %v2163_v18, %v1835_v52  ;;  %1873 = vmatmul.bf16.gmra.mxu0 %v3231_v49  ;;  %2362 = vmatmul.bf16.gmra.mxu3 %v3619_v39  ;;  %v2000_v18 = vadd.f32 %v4574_v43, %v4325_v27  ;;  %v3254_v27 = vld [vmem:[%s4134_s5 + $0x2a0] sm:$0xf] }
 0x1cc   : > { %2202 = vmatmul.bf16.gmra.mxu1 %v3235_v0  ;;  %v3247_v0 = vor.u32 %v3903_v2, %v3244_v37 }
 0x1cd   : > { %v2493_v1 = vadd.f32 %v2492_v62, %v2164_v26  ;;  %v3999_v62 = vld [vmem:[%s4134_s5 + $0x58c] sm:$0xf] }
 0x1ce   : > { %v2323_v4 = vpop.f32.mrf.mxu3  ;;  %v3631_v49 = vor.u32 %v3999_v62, %v3628_v10  ;;  %v2002_v62 = vadd.f32 %v4574_v43, %v4339_v44 }
 0x1cf   : > { %2759 = vst.msk [vmem:[%s4266_s9 + $0x120] sm:$0xff] %vm2722_vm1, %v2493_v1  ;;  %v4629_v11 = vadd.f32 %v2323_v4, %v1995_v32  ;;  %v3274_v1 = vld [vmem:[%s4134_s5 + $0x2c0] sm:$0xf]  ;;  %v3911_v4 = vld [vmem:[%s4134_s5 + $0x2c8] sm:$0xf0] }
 0x1d0   : > { %v2499_v3 = vpop.f32.mrf.mxu2  ;;  %v1836_v24 = vpop.f32.mrf.mxu0 }
 0x1d1   : > { %v1837_v31 = vadd.f32 %v4574_v43, %v1836_v24  ;;  %v2165_v33 = vpop.f32.mrf.mxu1 }
 0x1d3   : > { %v2166_v17 = vadd.f32 %v2165_v33, %v1837_v31 }
 0x1d5   : > { %v2495_v30 = vadd.f32 %v2494_v15, %v2166_v17  ;;  %3784 = vmatmul.msk.bf16.gmra.mxu2 %vm1542_vm0, %v3263_v28  ;;  %v3275_v28 = vor.u32 %v3911_v4, %v3274_v1 }
 0x1d6   : > { %v2325_v42 = vpop.f32.mrf.mxu3 }
 0x1d7   : > { %2760 = vst.msk [vmem:[%s4266_s9 + $0x128] sm:$0xff] %vm2722_vm1, %v2495_v30  ;;  %v4643_v46 = vadd.f32 %v2325_v42, %v1997_v59  ;;  %v3906_v59 = vld [vmem:[%s4134_s5 + $0x2a4] sm:$0xf]  ;;  %v3256_v30 = vld [vmem:[%s4134_s5 + $0x2ac] sm:$0xf0]  ;;  %v3255_v42 = vor.u32 %v3907_v63, %v3254_v27 }
 0x1d8   : > { %v2502_v39 = vpop.f32.mrf.mxu2  ;;  %v1839_v45 = vpop.f32.mrf.mxu0  ;;  %v3910_v27 = vld [vmem:[%s4134_s5 + $0x2c0] sm:$0xf0]  ;;  %v3652_v63 = vld [vmem:[%s4134_s5 + $0x5c4] sm:$0xf0] }
 0x1d9   : > { %v1840_v16 = vadd.f32 %v4574_v43, %v1839_v45  ;;  %v2168_v15 = vpop.f32.mrf.mxu1 }
 0x1db   : > { %v2169_v52 = vadd.f32 %v2168_v15, %v1840_v16  ;;  %1878 = vmatmul.bf16.gmra.mxu0 %v3243_v48  ;;  %2367 = vmatmul.bf16.gmra.mxu3 %v3631_v49  ;;  %v2005_v15 = vadd.f32 %v4574_v43, %v4344_v55  ;;  %v3266_v55 = vld [vmem:[%s4134_s5 + $0x2b8] sm:$0xf] }
 0x1dc   : > { %2207 = vmatmul.bf16.gmra.mxu1 %v3247_v0  ;;  %v3259_v0 = vor.u32 %v3906_v59, %v3256_v30 }
 0x1dd   : > { %v2498_v26 = vadd.f32 %v2497_v57, %v2169_v52  ;;  %v4002_v57 = vld [vmem:[%s4134_s5 + $0x5a4] sm:$0xf] }
 0x1de   : > { %v2328_v32 = vpop.f32.mrf.mxu3  ;;  %v3643_v48 = vor.u32 %v4002_v57, %v3640_v36  ;;  %v2007_v57 = vadd.f32 %v4574_v43, %v4358_v9 }
 0x1df   : > { %2761 = vst.msk [vmem:[%s4266_s9 + $0x130] sm:$0xff] %vm2722_vm1, %v2498_v26  ;;  %v4652_v6 = vadd.f32 %v2328_v32, %v2000_v18  ;;  %v3286_v26 = vld [vmem:[%s4134_s5 + $0x2d8] sm:$0xf]  ;;  %v3914_v32 = vld [vmem:[%s4134_s5 + $0x2e0] sm:$0xf0] }
 0x1e0   : > { %v2504_v8 = vpop.f32.mrf.mxu2  ;;  %v1841_v24 = vpop.f32.mrf.mxu0 }
 0x1e1   : > { %v1842_v31 = vadd.f32 %v4574_v43, %v1841_v24  ;;  %v2170_v33 = vpop.f32.mrf.mxu1 }
 0x1e3   : > { %v2171_v17 = vadd.f32 %v2170_v33, %v1842_v31 }
 0x1e5   : > { %v2500_v10 = vadd.f32 %v2499_v3, %v2171_v17  ;;  %3785 = vmatmul.msk.bf16.gmra.mxu2 %vm1542_vm0, %v3275_v28  ;;  %v3287_v28 = vor.u32 %v3914_v32, %v3286_v26 }
 0x1e6   : > { %v2330_v2 = vpop.f32.mrf.mxu3 }
 0x1e7   : > { %2762 = vst.msk [vmem:[%s4266_s9 + $0x138] sm:$0xff] %vm2722_vm1, %v2500_v10  ;;  %v4666_v37 = vadd.f32 %v2330_v2, %v2002_v62  ;;  %v3909_v62 = vld [vmem:[%s4134_s5 + $0x2bc] sm:$0xf]  ;;  %v3268_v10 = vld [vmem:[%s4134_s5 + $0x2c4] sm:$0xf0]  ;;  %v3267_v2 = vor.u32 %v3910_v27, %v3266_v55 }
 0x1e8   : > { %v2507_v49 = vpop.f32.mrf.mxu2  ;;  %v1844_v45 = vpop.f32.mrf.mxu0  ;;  %v3913_v55 = vld [vmem:[%s4134_s5 + $0x2d8] sm:$0xf0]  ;;  %v3664_v27 = vld [vmem:[%s4134_s5 + $0x5dc] sm:$0xf0] }
 0x1e9   : > { %v1845_v44 = vadd.f32 %v4574_v43, %v1844_v45  ;;  %v2173_v3 = vpop.f32.mrf.mxu1 }
 0x1eb   : > { %v2174_v16 = vadd.f32 %v2173_v3, %v1845_v44  ;;  %1883 = vmatmul.bf16.gmra.mxu0 %v3255_v42  ;;  %2372 = vmatmul.bf16.gmra.mxu3 %v3643_v48  ;;  %v2010_v3 = vadd.f32 %v4574_v43, %v4363_v21  ;;  %v3278_v21 = vld [vmem:[%s4134_s5 + $0x2d0] sm:$0xf] }
 0x1ec   : > { %2212 = vmatmul.bf16.gmra.mxu1 %v3259_v0  ;;  %v3271_v0 = vor.u32 %v3909_v62, %v3268_v10 }
 0x1ed   : > { %v2503_v52 = vadd.f32 %v2502_v39, %v2174_v16  ;;  %v4005_v39 = vld [vmem:[%s4134_s5 + $0x5bc] sm:$0xf] }
 0x1ee   : > { %v2333_v18 = vpop.f32.mrf.mxu3  ;;  %v3655_v42 = vor.u32 %v4005_v39, %v3652_v63  ;;  %v2012_v39 = vadd.f32 %v4574_v43, %v4377_v40 }
 0x1ef   : > { %2763 = vst.msk [vmem:[%s4266_s9 + $0x140] sm:$0xff] %vm2722_vm1, %v2503_v52  ;;  %v4675_v1 = vadd.f32 %v2333_v18, %v2005_v15  ;;  %v3298_v52 = vld [vmem:[%s4134_s5 + $0x2f0] sm:$0xf]  ;;  %v3917_v18 = vld [vmem:[%s4134_s5 + $0x2f8] sm:$0xf0] }
 0x1f0   : > { %v2509_v4 = vpop.f32.mrf.mxu2  ;;  %v1846_v24 = vpop.f32.mrf.mxu0 }
 0x1f1   : > { %v1847_v31 = vadd.f32 %v4574_v43, %v1846_v24  ;;  %v2175_v33 = vpop.f32.mrf.mxu1 }
 0x1f3   : > { %v2176_v17 = vadd.f32 %v2175_v33, %v1847_v31 }
 0x1f5   : > { %v2505_v36 = vadd.f32 %v2504_v8, %v2176_v17  ;;  %3786 = vmatmul.msk.bf16.gmra.mxu2 %vm1542_vm0, %v3287_v28  ;;  %v3299_v28 = vor.u32 %v3917_v18, %v3298_v52 }
 0x1f6   : > { %v2335_v59 = vpop.f32.mrf.mxu3 }
 0x1f7   : > { %2764 = vst.msk [vmem:[%s4266_s9 + $0x148] sm:$0xff] %vm2722_vm1, %v2505_v36  ;;  %v4689_v30 = vadd.f32 %v2335_v59, %v2007_v57  ;;  %v3912_v57 = vld [vmem:[%s4134_s5 + $0x2d4] sm:$0xf]  ;;  %v3280_v36 = vld [vmem:[%s4134_s5 + $0x2dc] sm:$0xf0]  ;;  %v3279_v59 = vor.u32 %v3913_v55, %v3278_v21 }
 0x1f8   : > { %v2512_v48 = vpop.f32.mrf.mxu2  ;;  %v1849_v45 = vpop.f32.mrf.mxu0  ;;  %v3916_v21 = vld [vmem:[%s4134_s5 + $0x2f0] sm:$0xf0]  ;;  %v3676_v55 = vld [vmem:[%s4134_s5 + $0x5f4] sm:$0xf0] }
 0x1f9   : > { %v1850_v9 = vadd.f32 %v4574_v43, %v1849_v45  ;;  %v2178_v8 = vpop.f32.mrf.mxu1 }
 0x1fb   : > { %v2179_v44 = vadd.f32 %v2178_v8, %v1850_v9  ;;  %1888 = vmatmul.bf16.gmra.mxu0 %v3267_v2  ;;  %2377 = vmatmul.bf16.gmra.mxu3 %v3655_v42  ;;  %v2015_v8 = vadd.f32 %v4574_v43, %v4382_v51  ;;  %v3290_v51 = vld [vmem:[%s4134_s5 + $0x2e8] sm:$0xf] }
 0x1fc   : > { %2217 = vmatmul.bf16.gmra.mxu1 %v3271_v0  ;;  %v3283_v0 = vor.u32 %v3912_v57, %v3280_v36 }
 0x1fd   : > { %v2508_v16 = vadd.f32 %v2507_v49, %v2179_v44  ;;  %v4008_v49 = vld [vmem:[%s4134_s5 + $0x5d4] sm:$0xf] }
 0x1fe   : > { %v2338_v15 = vpop.f32.mrf.mxu3  ;;  %v3667_v2 = vor.u32 %v4008_v49, %v3664_v27  ;;  %v2017_v49 = vadd.f32 %v4574_v43, %v4396_v7 }
 0x1ff   : > { %2765 = vst.msk [vmem:[%s4266_s9 + $0x150] sm:$0xff] %vm2722_vm1, %v2508_v16  ;;  %v4698_v26 = vadd.f32 %v2338_v15, %v2010_v3  ;;  %v3310_v16 = vld [vmem:[%s4134_s5 + $0x308] sm:$0xf]  ;;  %v3920_v15 = vld [vmem:[%s4134_s5 + $0x310] sm:$0xf0] }
 0x200   : > { %v2514_v32 = vpop.f32.mrf.mxu2  ;;  %v1851_v24 = vpop.f32.mrf.mxu0 }
 0x201   : > { %v1852_v31 = vadd.f32 %v4574_v43, %v1851_v24  ;;  %v2180_v33 = vpop.f32.mrf.mxu1 }
 0x203   : > { %v2181_v17 = vadd.f32 %v2180_v33, %v1852_v31 }
 0x205   : > { %v2510_v63 = vadd.f32 %v2509_v4, %v2181_v17  ;;  %3787 = vmatmul.msk.bf16.gmra.mxu2 %vm1542_vm0, %v3299_v28  ;;  %v3311_v28 = vor.u32 %v3920_v15, %v3310_v16 }
 0x206   : > { %v2340_v62 = vpop.f32.mrf.mxu3 }
 0x207   : > { %2766 = vst.msk [vmem:[%s4266_s9 + $0x158] sm:$0xff] %vm2722_vm1, %v2510_v63  ;;  %v4712_v10 = vadd.f32 %v2340_v62, %v2012_v39  ;;  %v3915_v39 = vld [vmem:[%s4134_s5 + $0x2ec] sm:$0xf]  ;;  %v3292_v63 = vld [vmem:[%s4134_s5 + $0x2f4] sm:$0xf0]  ;;  %v3291_v62 = vor.u32 %v3916_v21, %v3290_v51 }
 0x208   : > { %v2517_v42 = vpop.f32.mrf.mxu2  ;;  %v1854_v45 = vpop.f32.mrf.mxu0  ;;  %v3919_v51 = vld [vmem:[%s4134_s5 + $0x308] sm:$0xf0]  ;;  %v3974_v21 = vld [vmem:[%s4134_s5 + $0x4c0] sm:$0xf0] }
 0x209   : > { %v1855_v40 = vadd.f32 %v4574_v43, %v1854_v45  ;;  %v2183_v4 = vpop.f32.mrf.mxu1 }
 0x20b   : > { %v2184_v9 = vadd.f32 %v2183_v4, %v1855_v40  ;;  %1893 = vmatmul.bf16.gmra.mxu0 %v3279_v59  ;;  %2382 = vmatmul.bf16.gmra.mxu3 %v3667_v2  ;;  %v2020_v4 = vadd.f32 %v4574_v43, %v4401_v20  ;;  %v3302_v20 = vld [vmem:[%s4134_s5 + $0x300] sm:$0xf] }
 0x20c   : > { %2222 = vmatmul.bf16.gmra.mxu1 %v3283_v0  ;;  %v3295_v0 = vor.u32 %v3915_v39, %v3292_v63 }
 0x20d   : > { %v2513_v44 = vadd.f32 %v2512_v48, %v2184_v9  ;;  %v4011_v48 = vld [vmem:[%s4134_s5 + $0x5ec] sm:$0xf] }
 0x20e   : > { %v2343_v3 = vpop.f32.mrf.mxu3  ;;  %v3679_v59 = vor.u32 %v4011_v48, %v3676_v55  ;;  %v2022_v48 = vadd.f32 %v4574_v43, %v4415_v41 }
 0x20f   : > { %2767 = vst.msk [vmem:[%s4266_s9 + $0x160] sm:$0xff] %vm2722_vm1, %v2513_v44  ;;  %v4721_v52 = vadd.f32 %v2343_v3, %v2015_v8  ;;  %v3322_v44 = vld [vmem:[%s4134_s5 + $0x320] sm:$0xf]  ;;  %v3923_v3 = vld [vmem:[%s4134_s5 + $0x328] sm:$0xf0] }
 0x210   : > { %v2519_v18 = vpop.f32.mrf.mxu2  ;;  %v1856_v24 = vpop.f32.mrf.mxu0 }
 0x211   : > { %v1857_v31 = vadd.f32 %v4574_v43, %v1856_v24  ;;  %v2185_v33 = vpop.f32.mrf.mxu1 }
 0x213   : > { %v2186_v17 = vadd.f32 %v2185_v33, %v1857_v31 }
 0x215   : > { %v2515_v27 = vadd.f32 %v2514_v32, %v2186_v17  ;;  %3788 = vmatmul.msk.bf16.gmra.mxu2 %vm1542_vm0, %v3311_v28  ;;  %v3323_v28 = vor.u32 %v3923_v3, %v3322_v44 }
 0x216   : > { %v2345_v57 = vpop.f32.mrf.mxu3 }
 0x217   : > { %2768 = vst.msk [vmem:[%s4266_s9 + $0x168] sm:$0xff] %vm2722_vm1, %v2515_v27  ;;  %v4735_v36 = vadd.f32 %v2345_v57, %v2017_v49  ;;  %v3918_v49 = vld [vmem:[%s4134_s5 + $0x304] sm:$0xf]  ;;  %v3304_v27 = vld [vmem:[%s4134_s5 + $0x30c] sm:$0xf0]  ;;  %v3303_v57 = vor.u32 %v3919_v51, %v3302_v20 }
 0x218   : > { %v2522_v2 = vpop.f32.mrf.mxu2  ;;  %v1859_v45 = vpop.f32.mrf.mxu0  ;;  %v3922_v20 = vld [vmem:[%s4134_s5 + $0x320] sm:$0xf0]  ;;  %v3977_v51 = vld [vmem:[%s4134_s5 + $0x4d8] sm:$0xf0] }
 0x219   : > { %v1860_v7 = vadd.f32 %v4574_v43, %v1859_v45  ;;  %v2188_v32 = vpop.f32.mrf.mxu1 }
 0x21b   : > { %v2189_v40 = vadd.f32 %v2188_v32, %v1860_v7  ;;  %1898 = vmatmul.bf16.gmra.mxu0 %v3291_v62  ;;  %2387 = vmatmul.bf16.gmra.mxu3 %v3679_v59  ;;  %v2025_v32 = vadd.f32 %v4574_v43, %v4420_v54  ;;  %v3314_v54 = vld [vmem:[%s4134_s5 + $0x318] sm:$0xf] }
 0x21c   : > { %2227 = vmatmul.bf16.gmra.mxu1 %v3295_v0  ;;  %v3307_v0 = vor.u32 %v3918_v49, %v3304_v27 }
 0x21d   : > { %v2518_v9 = vadd.f32 %v2517_v42, %v2189_v40  ;;  %v3526_v42 = vld [vmem:[%s4134_s5 + $0x4b8] sm:$0xf] }
 0x21e   : > { %v2348_v8 = vpop.f32.mrf.mxu3  ;;  %v3527_v62 = vor.u32 %v3974_v21, %v3526_v42  ;;  %v2027_v42 = vadd.f32 %v4574_v43, %v4434_v12 }
 0x21f   : > { %2769 = vst.msk [vmem:[%s4266_s9 + $0x170] sm:$0xff] %vm2722_vm1, %v2518_v9  ;;  %v4744_v16 = vadd.f32 %v2348_v8, %v2020_v4  ;;  %v3334_v9 = vld [vmem:[%s4134_s5 + $0x338] sm:$0xf]  ;;  %v3926_v8 = vld [vmem:[%s4134_s5 + $0x340] sm:$0xf0] }
 0x220   : > { %v2524_v15 = vpop.f32.mrf.mxu2  ;;  %v1861_v24 = vpop.f32.mrf.mxu0 }
 0x221   : > { %v1862_v31 = vadd.f32 %v4574_v43, %v1861_v24  ;;  %v2190_v33 = vpop.f32.mrf.mxu1 }
 0x223   : > { %v2191_v17 = vadd.f32 %v2190_v33, %v1862_v31 }
 0x225   : > { %v2520_v55 = vadd.f32 %v2519_v18, %v2191_v17  ;;  %3789 = vmatmul.msk.bf16.gmra.mxu2 %vm1542_vm0, %v3323_v28  ;;  %v3335_v28 = vor.u32 %v3926_v8, %v3334_v9 }
 0x226   : > { %v2350_v39 = vpop.f32.mrf.mxu3 }
 0x227   : > { %2770 = vst.msk [vmem:[%s4266_s9 + $0x178] sm:$0xff] %vm2722_vm1, %v2520_v55  ;;  %v4758_v63 = vadd.f32 %v2350_v39, %v2022_v48  ;;  %v3921_v48 = vld [vmem:[%s4134_s5 + $0x31c] sm:$0xf]  ;;  %v3316_v55 = vld [vmem:[%s4134_s5 + $0x324] sm:$0xf0]  ;;  %v3315_v39 = vor.u32 %v3922_v20, %v3314_v54 }
 0x228   : > { %v2527_v59 = vpop.f32.mrf.mxu2  ;;  %v1864_v45 = vpop.f32.mrf.mxu0  ;;  %v3925_v54 = vld [vmem:[%s4134_s5 + $0x338] sm:$0xf0]  ;;  %v3980_v20 = vld [vmem:[%s4134_s5 + $0x4f0] sm:$0xf0] }
 0x229   : > { %v1865_v41 = vadd.f32 %v4574_v43, %v1864_v45  ;;  %v2193_v18 = vpop.f32.mrf.mxu1 }
 0x22b   : > { %v2194_v7 = vadd.f32 %v2193_v18, %v1865_v41  ;;  %1903 = vmatmul.bf16.gmra.mxu0 %v3303_v57  ;;  %3806 = vmatmul.msk.bf16.vlgmr.msra.gmra.mxu3 %vm1542_vm0, %v3527_v62  ;;  %v2030_v18 = vadd.f32 %v4574_v43, %v4439_v25  ;;  %v3326_v25 = vld [vmem:[%s4134_s5 + $0x330] sm:$0xf] }
 0x22c   : > { %2232 = vmatmul.bf16.gmra.mxu1 %v3307_v0  ;;  %v3319_v0 = vor.u32 %v3921_v48, %v3316_v55 }
 0x22d   : > { %v2523_v40 = vadd.f32 %v2522_v2, %v2194_v7  ;;  %v3538_v2 = vld [vmem:[%s4134_s5 + $0x4d0] sm:$0xf] }
 0x22e   : > { %v2353_v4 = vpop.f32.mrf.mxu3  ;;  %v3539_v57 = vor.u32 %v3977_v51, %v3538_v2  ;;  %v2032_v2 = vadd.f32 %v4574_v43, %v4453_v47 }
 0x22f   : > { %2771 = vst.msk [vmem:[%s4266_s9 + $0x180] sm:$0xff] %vm2722_vm1, %v2523_v40  ;;  %v4768_v44 = vadd.f32 %v2353_v4, %v2025_v32  ;;  %v3346_v40 = vld [vmem:[%s4134_s5 + $0x350] sm:$0xf]  ;;  %v3929_v4 = vld [vmem:[%s4134_s5 + $0x358] sm:$0xf0] }
 0x230   : > { %v2529_v3 = vpop.f32.mrf.mxu2  ;;  %v1866_v24 = vpop.f32.mrf.mxu0 }
 0x231   : > { %v1867_v31 = vadd.f32 %v4574_v43, %v1866_v24  ;;  %v2195_v33 = vpop.f32.mrf.mxu1 }
 0x233   : > { %v2196_v17 = vadd.f32 %v2195_v33, %v1867_v31 }
 0x235   : > { %v2525_v21 = vadd.f32 %v2524_v15, %v2196_v17  ;;  %3790 = vmatmul.msk.bf16.gmra.mxu2 %vm1542_vm0, %v3335_v28  ;;  %v3347_v28 = vor.u32 %v3929_v4, %v3346_v40 }
 0x236   : > { %v2355_v49 = vpop.f32.mrf.mxu3 }
 0x237   : > { %2772 = vst.msk [vmem:[%s4266_s9 + $0x188] sm:$0xff] %vm2722_vm1, %v2525_v21  ;;  %v4782_v27 = vadd.f32 %v2355_v49, %v2027_v42  ;;  %v3924_v42 = vld [vmem:[%s4134_s5 + $0x334] sm:$0xf]  ;;  %v3328_v21 = vld [vmem:[%s4134_s5 + $0x33c] sm:$0xf0]  ;;  %v3327_v49 = vor.u32 %v3925_v54, %v3326_v25 }
 0x238   : > { %v2532_v62 = vpop.f32.mrf.mxu2  ;;  %v1869_v45 = vpop.f32.mrf.mxu0  ;;  %v3928_v25 = vld [vmem:[%s4134_s5 + $0x350] sm:$0xf0]  ;;  %v3983_v54 = vld [vmem:[%s4134_s5 + $0x508] sm:$0xf0] }
 0x239   : > { %v1870_v12 = vadd.f32 %v4574_v43, %v1869_v45  ;;  %v2198_v15 = vpop.f32.mrf.mxu1 }
 0x23b   : > { %v2199_v41 = vadd.f32 %v2198_v15, %v1870_v12  ;;  %1908 = vmatmul.bf16.gmra.mxu0 %v3315_v39  ;;  %3807 = vmatmul.msk.bf16.gmra.mxu3 %vm1542_vm0, %v3539_v57  ;;  %v2035_v15 = vadd.f32 %v4574_v43, %v4458_v61  ;;  %v3338_v61 = vld [vmem:[%s4134_s5 + $0x348] sm:$0xf] }
 0x23c   : > { %2237 = vmatmul.bf16.gmra.mxu1 %v3319_v0  ;;  %v3331_v0 = vor.u32 %v3924_v42, %v3328_v21 }
 0x23d   : > { %v2528_v7 = vadd.f32 %v2527_v59, %v2199_v41  ;;  %v3550_v59 = vld [vmem:[%s4134_s5 + $0x4e8] sm:$0xf] }
 0x23e   : > { %v2358_v32 = vpop.f32.mrf.mxu3  ;;  %v3551_v39 = vor.u32 %v3980_v20, %v3550_v59  ;;  %v2037_v59 = vadd.f32 %v4574_v43, %v4472_v22 }
 0x23f   : > { %2773 = vst.msk [vmem:[%s4266_s9 + $0x190] sm:$0xff] %vm2722_vm1, %v2528_v7  ;;  %v4792_v9 = vadd.f32 %v2358_v32, %v2030_v18  ;;  %v3358_v7 = vld [vmem:[%s4134_s5 + $0x368] sm:$0xf]  ;;  %v3932_v32 = vld [vmem:[%s4134_s5 + $0x370] sm:$0xf0] }
 0x240   : > { %v2534_v8 = vpop.f32.mrf.mxu2  ;;  %v1871_v24 = vpop.f32.mrf.mxu0 }
 0x241   : > { %v1872_v31 = vadd.f32 %v4574_v43, %v1871_v24  ;;  %v2200_v33 = vpop.f32.mrf.mxu1 }
 0x243   : > { %v2201_v17 = vadd.f32 %v2200_v33, %v1872_v31 }
 0x245   : > { %v2530_v51 = vadd.f32 %v2529_v3, %v2201_v17  ;;  %3791 = vmatmul.msk.bf16.gmra.mxu2 %vm1542_vm0, %v3347_v28  ;;  %v3359_v28 = vor.u32 %v3932_v32, %v3358_v7 }
 0x246   : > { %v2360_v48 = vpop.f32.mrf.mxu3 }
 0x247   : > { %2774 = vst.msk [vmem:[%s4266_s9 + $0x198] sm:$0xff] %vm2722_vm1, %v2530_v51  ;;  %v4806_v55 = vadd.f32 %v2360_v48, %v2032_v2  ;;  %v3927_v2 = vld [vmem:[%s4134_s5 + $0x34c] sm:$0xf]  ;;  %v3340_v51 = vld [vmem:[%s4134_s5 + $0x354] sm:$0xf0]  ;;  %v3339_v48 = vor.u32 %v3928_v25, %v3338_v61 }
 0x248   : > { %v2537_v57 = vpop.f32.mrf.mxu2  ;;  %v1874_v45 = vpop.f32.mrf.mxu0  ;;  %v3931_v61 = vld [vmem:[%s4134_s5 + $0x368] sm:$0xf0]  ;;  %v3986_v25 = vld [vmem:[%s4134_s5 + $0x520] sm:$0xf0] }
 0x249   : > { %v1875_v47 = vadd.f32 %v4574_v43, %v1874_v45  ;;  %v2203_v3 = vpop.f32.mrf.mxu1 }
 0x24b   : > { %v2204_v12 = vadd.f32 %v2203_v3, %v1875_v47  ;;  %1913 = vmatmul.bf16.gmra.mxu0 %v3327_v49  ;;  %3808 = vmatmul.msk.bf16.gmra.mxu3 %vm1542_vm0, %v3551_v39  ;;  %v2040_v3 = vadd.f32 %v4574_v43, %v4477_v35  ;;  %v3350_v35 = vld [vmem:[%s4134_s5 + $0x360] sm:$0xf] }
 0x24c   : > { %2242 = vmatmul.bf16.gmra.mxu1 %v3331_v0  ;;  %v3343_v0 = vor.u32 %v3927_v2, %v3340_v51 }
 0x24d   : > { %v2533_v41 = vadd.f32 %v2532_v62, %v2204_v12  ;;  %v3562_v62 = vld [vmem:[%s4134_s5 + $0x500] sm:$0xf] }
 0x24e   : > { %v2363_v18 = vpop.f32.mrf.mxu3  ;;  %v3563_v49 = vor.u32 %v3983_v54, %v3562_v62  ;;  %v2042_v62 = vadd.f32 %v4574_v43, %v4491_v60 }
 0x24f   : > { %2775 = vst.msk [vmem:[%s4266_s9 + $0x1a0] sm:$0xff] %vm2722_vm1, %v2533_v41  ;;  %v4816_v40 = vadd.f32 %v2363_v18, %v2035_v15  ;;  %v3370_v41 = vld [vmem:[%s4134_s5 + $0x380] sm:$0xf]  ;;  %v3935_v18 = vld [vmem:[%s4134_s5 + $0x388] sm:$0xf0] }
 0x250   : > { %v2539_v4 = vpop.f32.mrf.mxu2  ;;  %v1876_v24 = vpop.f32.mrf.mxu0 }
 0x251   : > { %v1877_v31 = vadd.f32 %v4574_v43, %v1876_v24  ;;  %v2205_v33 = vpop.f32.mrf.mxu1 }
 0x253   : > { %v2206_v17 = vadd.f32 %v2205_v33, %v1877_v31 }
 0x255   : > { %v2535_v20 = vadd.f32 %v2534_v8, %v2206_v17  ;;  %3792 = vmatmul.msk.bf16.gmra.mxu2 %vm1542_vm0, %v3359_v28  ;;  %v3371_v28 = vor.u32 %v3935_v18, %v3370_v41 }
 0x256   : > { %v2365_v42 = vpop.f32.mrf.mxu3 }
 0x257   : > { %2776 = vst.msk [vmem:[%s4266_s9 + $0x1a8] sm:$0xff] %vm2722_vm1, %v2535_v20  ;;  %v4830_v21 = vadd.f32 %v2365_v42, %v2037_v59  ;;  %v3930_v59 = vld [vmem:[%s4134_s5 + $0x364] sm:$0xf]  ;;  %v3352_v20 = vld [vmem:[%s4134_s5 + $0x36c] sm:$0xf0]  ;;  %v3351_v42 = vor.u32 %v3931_v61, %v3350_v35 }
 0x258   : > { %v2542_v39 = vpop.f32.mrf.mxu2  ;;  %v1879_v45 = vpop.f32.mrf.mxu0  ;;  %v3934_v35 = vld [vmem:[%s4134_s5 + $0x380] sm:$0xf0]  ;;  %v3989_v61 = vld [vmem:[%s4134_s5 + $0x538] sm:$0xf0] }
 0x259   : > { %v1880_v22 = vadd.f32 %v4574_v43, %v1879_v45  ;;  %v2208_v8 = vpop.f32.mrf.mxu1 }
 0x25b   : > { %v2209_v47 = vadd.f32 %v2208_v8, %v1880_v22  ;;  %1918 = vmatmul.bf16.gmra.mxu0 %v3339_v48  ;;  %3809 = vmatmul.msk.bf16.gmra.mxu3 %vm1542_vm0, %v3563_v49  ;;  %v2045_v8 = vadd.f32 %v4574_v43, %v4496_v13  ;;  %v3362_v13 = vld [vmem:[%s4134_s5 + $0x378] sm:$0xf] }
 0x25c   : > { %2247 = vmatmul.bf16.gmra.mxu1 %v3343_v0  ;;  %v3355_v0 = vor.u32 %v3930_v59, %v3352_v20 }
 0x25d   : > { %v2538_v12 = vadd.f32 %v2537_v57, %v2209_v47  ;;  %v3574_v57 = vld [vmem:[%s4134_s5 + $0x518] sm:$0xf] }
 0x25e   : > { %v2368_v15 = vpop.f32.mrf.mxu3  ;;  %v3575_v48 = vor.u32 %v3986_v25, %v3574_v57  ;;  %v2047_v57 = vadd.f32 %v4574_v43, %v4510_v38 }
 0x25f   : > { %2777 = vst.msk [vmem:[%s4266_s9 + $0x1b0] sm:$0xff] %vm2722_vm1, %v2538_v12  ;;  %v4840_v7 = vadd.f32 %v2368_v15, %v2040_v3  ;;  %v3382_v12 = vld [vmem:[%s4134_s5 + $0x398] sm:$0xf]  ;;  %v3938_v15 = vld [vmem:[%s4134_s5 + $0x3a0] sm:$0xf0] }
 0x260   : > { %v2544_v32 = vpop.f32.mrf.mxu2  ;;  %v1881_v24 = vpop.f32.mrf.mxu0 }
 0x261   : > { %v1882_v31 = vadd.f32 %v4574_v43, %v1881_v24  ;;  %v2210_v33 = vpop.f32.mrf.mxu1 }
 0x263   : > { %v2211_v17 = vadd.f32 %v2210_v33, %v1882_v31 }
 0x265   : > { %v2540_v54 = vadd.f32 %v2539_v4, %v2211_v17  ;;  %3793 = vmatmul.msk.bf16.gmra.mxu2 %vm1542_vm0, %v3371_v28  ;;  %v3383_v28 = vor.u32 %v3938_v15, %v3382_v12 }
 0x266   : > { %v2370_v2 = vpop.f32.mrf.mxu3 }
 0x267   : > { %2778 = vst.msk [vmem:[%s4266_s9 + $0x1b8] sm:$0xff] %vm2722_vm1, %v2540_v54  ;;  %v4854_v51 = vadd.f32 %v2370_v2, %v2042_v62  ;;  %v3933_v62 = vld [vmem:[%s4134_s5 + $0x37c] sm:$0xf]  ;;  %v3364_v54 = vld [vmem:[%s4134_s5 + $0x384] sm:$0xf0]  ;;  %v3363_v2 = vor.u32 %v3934_v35, %v3362_v13 }
 0x268   : > { %v2547_v49 = vpop.f32.mrf.mxu2  ;;  %v1884_v45 = vpop.f32.mrf.mxu0  ;;  %v3937_v13 = vld [vmem:[%s4134_s5 + $0x398] sm:$0xf0]  ;;  %v3992_v35 = vld [vmem:[%s4134_s5 + $0x550] sm:$0xf0] }
 0x269   : > { %v1885_v60 = vadd.f32 %v4574_v43, %v1884_v45  ;;  %v2213_v4 = vpop.f32.mrf.mxu1 }
 0x26b   : > { %v2214_v22 = vadd.f32 %v2213_v4, %v1885_v60  ;;  %1923 = vmatmul.bf16.gmra.mxu0 %v3351_v42  ;;  %3810 = vmatmul.msk.bf16.gmra.mxu3 %vm1542_vm0, %v3575_v48  ;;  %v2050_v4 = vadd.f32 %v4574_v43, %v4515_v50  ;;  %v3374_v50 = vld [vmem:[%s4134_s5 + $0x390] sm:$0xf] }
 0x26c   : > { %2252 = vmatmul.bf16.gmra.mxu1 %v3355_v0  ;;  %v3367_v0 = vor.u32 %v3933_v62, %v3364_v54 }
 0x26d   : > { %v2543_v47 = vadd.f32 %v2542_v39, %v2214_v22  ;;  %v3586_v39 = vld [vmem:[%s4134_s5 + $0x530] sm:$0xf] }
 0x26e   : > { %v2373_v3 = vpop.f32.mrf.mxu3  ;;  %v3587_v42 = vor.u32 %v3989_v61, %v3586_v39  ;;  %v2052_v39 = vadd.f32 %v4574_v43, %v4529_v19 }
 0x26f   : > { %2779 = vst.msk [vmem:[%s4266_s9 + $0x1c0] sm:$0xff] %vm2722_vm1, %v2543_v47  ;;  %v4864_v41 = vadd.f32 %v2373_v3, %v2045_v8  ;;  %v3394_v47 = vld [vmem:[%s4134_s5 + $0x3b0] sm:$0xf]  ;;  %v3941_v3 = vld [vmem:[%s4134_s5 + $0x3b8] sm:$0xf0] }
 0x270   : > { %v2549_v18 = vpop.f32.mrf.mxu2  ;;  %v1886_v24 = vpop.f32.mrf.mxu0 }
 0x271   : > { %v1887_v31 = vadd.f32 %v4574_v43, %v1886_v24  ;;  %v2215_v33 = vpop.f32.mrf.mxu1 }
 0x273   : > { %v2216_v17 = vadd.f32 %v2215_v33, %v1887_v31 }
 0x275   : > { %v2545_v25 = vadd.f32 %v2544_v32, %v2216_v17  ;;  %3794 = vmatmul.msk.bf16.gmra.mxu2 %vm1542_vm0, %v3383_v28  ;;  %v3395_v28 = vor.u32 %v3941_v3, %v3394_v47 }
 0x276   : > { %v2375_v59 = vpop.f32.mrf.mxu3 }
 0x277   : > { %2780 = vst.msk [vmem:[%s4266_s9 + $0x1c8] sm:$0xff] %vm2722_vm1, %v2545_v25  ;;  %v4878_v20 = vadd.f32 %v2375_v59, %v2047_v57  ;;  %v3936_v57 = vld [vmem:[%s4134_s5 + $0x394] sm:$0xf]  ;;  %v3376_v25 = vld [vmem:[%s4134_s5 + $0x39c] sm:$0xf0]  ;;  %v3375_v59 = vor.u32 %v3937_v13, %v3374_v50 }
 0x278   : > { %v2552_v48 = vpop.f32.mrf.mxu2  ;;  %v1889_v45 = vpop.f32.mrf.mxu0  ;;  %v3610_v50 = vld [vmem:[%s4134_s5 + $0x560] sm:$0xf]  ;;  %v3995_v13 = vld [vmem:[%s4134_s5 + $0x568] sm:$0xf0] }
 0x279   : > { %v1890_v38 = vadd.f32 %v4574_v43, %v1889_v45  ;;  %v2218_v32 = vpop.f32.mrf.mxu1 }
 0x27b   : > { %v2219_v60 = vadd.f32 %v2218_v32, %v1890_v38  ;;  %1928 = vmatmul.bf16.gmra.mxu0 %v3363_v2  ;;  %3811 = vmatmul.msk.bf16.gmra.mxu3 %vm1542_vm0, %v3587_v42  ;;  %v2055_v32 = vadd.f32 %v4574_v43, %v4534_v34 }
 0x27c   : > { %2257 = vmatmul.bf16.gmra.mxu1 %v3367_v0  ;;  %v3379_v0 = vor.u32 %v3936_v57, %v3376_v25 }
 0x27d   : > { %v2548_v22 = vadd.f32 %v2547_v49, %v2219_v60  ;;  %v3598_v49 = vld [vmem:[%s4134_s5 + $0x548] sm:$0xf] }
 0x27e   : > { %v2378_v8 = vpop.f32.mrf.mxu3  ;;  %v3599_v2 = vor.u32 %v3992_v35, %v3598_v49 }
 0x27f   : > { %2781 = vst.msk [vmem:[%s4266_s9 + $0x1d0] sm:$0xff] %vm2722_vm1, %v2548_v22  ;;  %v4888_v12 = vadd.f32 %v2378_v8, %v2050_v4  ;;  %v3406_v22 = vld [vmem:[%s4134_s5 + $0x3c8] sm:$0xf]  ;;  %v3944_v8 = vld [vmem:[%s4134_s5 + $0x3d0] sm:$0xf0] }
 0x280   : > { %v2554_v15 = vpop.f32.mrf.mxu2  ;;  %v1891_v24 = vpop.f32.mrf.mxu0 }
 0x281   : > { %v1892_v31 = vadd.f32 %v4574_v43, %v1891_v24  ;;  %v2220_v33 = vpop.f32.mrf.mxu1 }
 0x283   : > { %v2221_v17 = vadd.f32 %v2220_v33, %v1892_v31  ;;  %v4917_v31 = vld [vmem:[%s5222_s2] ss:$0 sm:$0xff] }
 0x284   : > { %v2057_v49 = vadd.f32 %v4917_v31, %v4548_v5 }
 0x285   : > { %v2550_v61 = vadd.f32 %v2549_v18, %v2221_v17  ;;  %3795 = vmatmul.msk.bf16.gmra.mxu2 %vm1542_vm0, %v3395_v28  ;;  %v3386_v28 = vld [vmem:[%s4134_s5 + $0x3a8] sm:$0xf]  ;;  %v3940_v17 = vld [vmem:[%s4134_s5 + $0x3b0] sm:$0xf0] }
 0x286   : > { %v2380_v62 = vpop.f32.mrf.mxu3 }
 0x287   : > { %2782 = vst.msk [vmem:[%s4266_s9 + $0x1d8] sm:$0xff] %vm2722_vm1, %v2550_v61  ;;  %v4902_v54 = vadd.f32 %v2380_v62, %v2052_v39  ;;  %v3939_v39 = vld [vmem:[%s4134_s5 + $0x3ac] sm:$0xf]  ;;  %v3388_v61 = vld [vmem:[%s4134_s5 + $0x3b4] sm:$0xf0]  ;;  %v3387_v62 = vor.u32 %v3940_v17, %v3386_v28 }
 0x288   : > { %v2557_v42 = vpop.f32.mrf.mxu2  ;;  %v1894_v45 = vpop.f32.mrf.mxu0  ;;  %v3943_v28 = vld [vmem:[%s4134_s5 + $0x3c8] sm:$0xf0]  ;;  %v3998_v17 = vld [vmem:[%s4134_s5 + $0x580] sm:$0xf0] }
 0x289   : > { %v1895_v19 = vadd.f32 %v4574_v43, %v1894_v45  ;;  %v2223_v18 = vpop.f32.mrf.mxu1 }
 0x28b   : > { %v2224_v38 = vadd.f32 %v2223_v18, %v1895_v19  ;;  %1933 = vmatmul.bf16.gmra.mxu0 %v3375_v59  ;;  %3812 = vmatmul.msk.bf16.gmra.mxu3 %vm1542_vm0, %v3599_v2  ;;  %v3611_v59 = vor.u32 %v3995_v13, %v3610_v50  ;;  %v2060_v18 = vadd.f32 %v4917_v31, %v4553_v23  ;;  %v3398_v23 = vld [vmem:[%s4134_s5 + $0x3c0] sm:$0xf] }
 0x28c   : > { %2262 = vmatmul.bf16.gmra.mxu1 %v3379_v0  ;;  %v3391_v0 = vor.u32 %v3939_v39, %v3388_v61  ;;  %v2062_v50 = vadd.f32 %v4917_v31, %v4567_v56 }
 0x28d   : > { %v2553_v60 = vadd.f32 %v2552_v48, %v2224_v38  ;;  %v3407_v48 = vor.u32 %v3944_v8, %v3406_v22 }
 0x28e   : > { %v2383_v4 = vpop.f32.mrf.mxu3 }
 0x28f   : > { %2783 = vst.msk [vmem:[%s4266_s9 + $0x1e0] sm:$0xff] %vm2722_vm1, %v2553_v60  ;;  %v4912_v47 = vadd.f32 %v2383_v4, %v2055_v32  ;;  %v3418_v60 = vld [vmem:[%s4134_s5 + $0x3e0] sm:$0xf]  ;;  %v3947_v4 = vld [vmem:[%s4134_s5 + $0x3e8] sm:$0xf0] }
 0x290   : > { %v2559_v3 = vpop.f32.mrf.mxu2  ;;  %v1896_v24 = vpop.f32.mrf.mxu0 }
 0x291   : > { %v1897_v34 = vadd.f32 %v4917_v31, %v1896_v24  ;;  %v2225_v43 = vpop.f32.mrf.mxu1 }
 0x293   : > { %v2226_v33 = vadd.f32 %v2225_v43, %v1897_v34 }
 0x295   : > { %v2555_v35 = vadd.f32 %v2554_v15, %v2226_v33  ;;  %3796 = vmatmul.msk.bf16.gmra.mxu2 %vm1542_vm0, %v3407_v48  ;;  %v3419_v48 = vor.u32 %v3947_v4, %v3418_v60 }
 0x296   : > { %v2385_v57 = vpop.f32.mrf.mxu3 }
 0x297   : > { %2784 = vst.msk [vmem:[%s4266_s9 + $0x1e8] sm:$0xff] %vm2722_vm1, %v2555_v35  ;;  %v4931_v25 = vadd.f32 %v2385_v57, %v2057_v49  ;;  %v3942_v49 = vld [vmem:[%s4134_s5 + $0x3c4] sm:$0xf]  ;;  %v3400_v35 = vld [vmem:[%s4134_s5 + $0x3cc] sm:$0xf0]  ;;  %v3399_v57 = vor.u32 %v3943_v28, %v3398_v23 }
 0x298   : > { %v2562_v2 = vpop.f32.mrf.mxu2  ;;  %v1899_v45 = vpop.f32.mrf.mxu0  ;;  %v3634_v23 = vld [vmem:[%s4134_s5 + $0x590] sm:$0xf]  ;;  %v4001_v28 = vld [vmem:[%s4134_s5 + $0x598] sm:$0xf0] }
 0x299   : > { %v1900_v5 = vadd.f32 %v4917_v31, %v1899_v45  ;;  %v2228_v15 = vpop.f32.mrf.mxu1 }
 0x29b   : > { %v2229_v19 = vadd.f32 %v2228_v15, %v1900_v5  ;;  %1938 = vmatmul.bf16.gmra.mxu0 %v3387_v62  ;;  %3813 = vmatmul.msk.bf16.gmra.mxu3 %vm1542_vm0, %v3611_v59 }
 0x29c   : > { %2267 = vmatmul.bf16.gmra.mxu1 %v3391_v0  ;;  %v3403_v0 = vor.u32 %v3942_v49, %v3400_v35  ;;  %v3635_v35 = vor.u32 %v4001_v28, %v3634_v23 }
 0x29d   : > { %v2558_v38 = vadd.f32 %v2557_v42, %v2229_v19  ;;  %v3622_v42 = vld [vmem:[%s4134_s5 + $0x578] sm:$0xf] }
 0x29e   : > { %v2388_v32 = vpop.f32.mrf.mxu3  ;;  %v3623_v62 = vor.u32 %v3998_v17, %v3622_v42  ;;  %v3945_v17 = vld [vmem:[%s4134_s5 + $0x3dc] sm:$0xf] }
 0x29f   : > { %2785 = vst.msk [vmem:[%s4266_s9 + $0x1f0] sm:$0xff] %vm2722_vm1, %v2558_v38  ;;  %v4941_v22 = vadd.f32 %v2388_v32, %v2060_v18  ;;  %v3430_v18 = vld [vmem:[%s4134_s5 + $0x3f8] sm:$0xf]  ;;  %v3950_v38 = vld [vmem:[%s4134_s5 + $0x400] sm:$0xf0] }
 0x2a0   : > { %v2564_v8 = vpop.f32.mrf.mxu2  ;;  %v1901_v24 = vpop.f32.mrf.mxu0 }
 0x2a1   : > { %v1902_v34 = vadd.f32 %v4917_v31, %v1901_v24  ;;  %v2230_v43 = vpop.f32.mrf.mxu1 }
 0x2a3   : > { %v2231_v33 = vadd.f32 %v2230_v43, %v1902_v34  ;;  %v3431_v43 = vor.u32 %v3950_v38, %v3430_v18 }
 0x2a5   : > { %v2560_v13 = vadd.f32 %v2559_v3, %v2231_v33  ;;  %3797 = vmatmul.msk.bf16.gmra.mxu2 %vm1542_vm0, %v3419_v48  ;;  %v3410_v48 = vld [vmem:[%s4134_s5 + $0x3d8] sm:$0xf]  ;;  %v3946_v33 = vld [vmem:[%s4134_s5 + $0x3e0] sm:$0xf0] }
 0x2a6   : > { %v2390_v39 = vpop.f32.mrf.mxu3  ;;  %v3411_v49 = vor.u32 %v3946_v33, %v3410_v48  ;;  %v3948_v33 = vld [vmem:[%s4134_s5 + $0x3f4] sm:$0xf] }
 0x2a7   : > { %2786 = vst.msk [vmem:[%s4266_s9 + $0x1f8] sm:$0xff] %vm2722_vm1, %v2560_v13  ;;  %v4955_v61 = vadd.f32 %v2390_v39, %v2062_v50 }
 0x2a8   : > { %v2567_v59 = vpop.f32.mrf.mxu2  ;;  %v1904_v45 = vpop.f32.mrf.mxu0 }
 0x2a9   : > { %v1905_v56 = vadd.f32 %v4917_v31, %v1904_v45  ;;  %v2233_v3 = vpop.f32.mrf.mxu1 }
 0x2ab   : > { %v2234_v5 = vadd.f32 %v2233_v3, %v1905_v56  ;;  %1943 = vmatmul.bf16.gmra.mxu0 %v3399_v57  ;;  %3814 = vmatmul.msk.bf16.gmra.mxu3 %vm1542_vm0, %v3623_v62  ;;  %v3442_v3 = vld [vmem:[%s4134_s5 + $0x410] sm:$0xf] }
 0x2ac   : > { %2272 = vmatmul.bf16.gmra.mxu1 %v3403_v0 }
 0x2ad   : > { %v2563_v15 = vadd.f32 %v2562_v2, %v2234_v5  ;;  %v3953_v5 = vld [vmem:[%s4134_s5 + $0x418] sm:$0xf0] }
 0x2ae   : > { %v2652_v19 = vpop.f32.mrf.mxu3 }
 0x2af   : > { %2787 = vst.msk [vmem:[%s4266_s9 + $0x200] sm:$0xff] %vm2722_vm1, %v2563_v15  ;;  %v2653_v32 = vadd.f32 %v2652_v19, %v4629_v11  ;;  %v3412_v11 = vld [vmem:[%s4134_s5 + $0x3e4] sm:$0xf0] }
 0x2b0   : > { %v2569_v60 = vpop.f32.mrf.mxu2  ;;  %v1906_v4 = vpop.f32.mrf.mxu0  ;;  %v3415_v62 = vor.u32 %v3945_v17, %v3412_v11 }
 0x2b1   : > { %2823 = vst.msk [vmem:[%s4266_s9 + $0x320] sm:$0xff] %vm2722_vm1, %v2653_v32  ;;  %v1907_v24 = vadd.f32 %v4917_v31, %v1906_v4  ;;  %v2235_v34 = vpop.f32.mrf.mxu1  ;;  %v3443_v4 = vor.u32 %v3953_v5, %v3442_v3 }
 0x2b3   : > { %v2236_v2 = vadd.f32 %v2235_v34, %v1907_v24  ;;  %v3422_v24 = vld [vmem:[%s4134_s5 + $0x3f0] sm:$0xf]  ;;  %v3949_v34 = vld [vmem:[%s4134_s5 + $0x3f8] sm:$0xf0] }
 0x2b5   : > { %v2565_v42 = vadd.f32 %v2564_v8, %v2236_v2  ;;  %3798 = vmatmul.msk.bf16.gmra.mxu2 %vm1542_vm0, %v3431_v43  ;;  %v3646_v43 = vld [vmem:[%s4134_s5 + $0x5a8] sm:$0xf]  ;;  %v4004_v2 = vld [vmem:[%s4134_s5 + $0x5b0] sm:$0xf0] }
 0x2b6   : > { %v2654_v50 = vpop.f32.mrf.mxu3  ;;  %v3647_v17 = vor.u32 %v4004_v2, %v3646_v43 }
 0x2b7   : > { %2788 = vst.msk [vmem:[%s4266_s9 + $0x208] sm:$0xff] %vm2722_vm1, %v2565_v42  ;;  %v2655_v13 = vadd.f32 %v2654_v50, %v4643_v46  ;;  %v3423_v42 = vor.u32 %v3949_v34, %v3422_v24 }
 0x2b8   : > { %v2572_v39 = vpop.f32.mrf.mxu2  ;;  %v1909_v57 = vpop.f32.mrf.mxu0 }
 0x2b9   : > { %2824 = vst.msk [vmem:[%s4266_s9 + $0x328] sm:$0xff] %vm2722_vm1, %v2655_v13  ;;  %v1910_v8 = vadd.f32 %v4917_v31, %v1909_v57  ;;  %v2238_v45 = vpop.f32.mrf.mxu1 }
 0x2bb   : > { %v2239_v0 = vadd.f32 %v2238_v45, %v1910_v8  ;;  %1948 = vmatmul.bf16.gmra.mxu0 %v3411_v49  ;;  %3815 = vmatmul.msk.bf16.gmra.mxu3 %vm1542_vm0, %v3635_v35  ;;  %v3956_v8 = vld [vmem:[%s4134_s5 + $0x430] sm:$0xf0] }
 0x2bc   : > { %2277 = vmatmul.bf16.gmra.mxu1 %v3415_v62  ;;  %v3454_v62 = vld [vmem:[%s4134_s5 + $0x428] sm:$0xf] }
 0x2bd   : > { %v2568_v46 = vadd.f32 %v2567_v59, %v2239_v0  ;;  %v3455_v5 = vor.u32 %v3956_v8, %v3454_v62  ;;  %v3446_v62 = vld [vmem:[%s4134_s5 + $0x420] sm:$0xf]  ;;  %v3955_v8 = vld [vmem:[%s4134_s5 + $0x428] sm:$0xf0] }
 0x2be   : > { %v2657_v56 = vpop.f32.mrf.mxu3 }
 0x2bf   : > { %2789 = vst.msk [vmem:[%s4266_s9 + $0x210] sm:$0xff] %vm2722_vm1, %v2568_v46  ;;  %v2658_v15 = vadd.f32 %v2657_v56, %v4652_v6  ;;  %v3424_v6 = vld [vmem:[%s4134_s5 + $0x3fc] sm:$0xf0] }
 0x2c0   : > { %v2574_v19 = vpop.f32.mrf.mxu2  ;;  %v1911_v18 = vpop.f32.mrf.mxu0  ;;  %v3427_v13 = vor.u32 %v3948_v33, %v3424_v6 }
 0x2c1   : > { %2825 = vst.msk [vmem:[%s4266_s9 + $0x330] sm:$0xff] %vm2722_vm1, %v2658_v15  ;;  %v1912_v38 = vadd.f32 %v4917_v31, %v1911_v18  ;;  %v2240_v32 = vpop.f32.mrf.mxu1  ;;  %v3434_v15 = vld [vmem:[%s4134_s5 + $0x408] sm:$0xf]  ;;  %v3952_v18 = vld [vmem:[%s4134_s5 + $0x410] sm:$0xf0] }
 0x2c2   : > { %v3435_v43 = vor.u32 %v3952_v18, %v3434_v15  ;;  %v3447_v15 = vor.u32 %v3955_v8, %v3446_v62 }
 0x2c3   : > { %v2241_v59 = vadd.f32 %v2240_v32, %v1912_v38  ;;  %v3658_v38 = vld [vmem:[%s4134_s5 + $0x5c0] sm:$0xf]  ;;  %v4007_v32 = vld [vmem:[%s4134_s5 + $0x5c8] sm:$0xf0] }
 0x2c4   : > { %v3659_v2 = vor.u32 %v4007_v32, %v3658_v38 }
 0x2c5   : > { %v2570_v48 = vadd.f32 %v2569_v60, %v2241_v59  ;;  %3799 = vmatmul.msk.bf16.gmra.mxu2 %vm1542_vm0, %v3443_v4  ;;  %v3951_v59 = vld [vmem:[%s4134_s5 + $0x40c] sm:$0xf] }
 0x2c6   : > { %v2659_v23 = vpop.f32.mrf.mxu3 }
 0x2c7   : > { %2790 = vst.msk [vmem:[%s4266_s9 + $0x218] sm:$0xff] %vm2722_vm1, %v2570_v48  ;;  %v2660_v28 = vadd.f32 %v2659_v23, %v4666_v37 }
 0x2c8   : > { %v2577_v11 = vpop.f32.mrf.mxu2  ;;  %v1914_v50 = vpop.f32.mrf.mxu0 }
 0x2c9   : > { %2826 = vst.msk [vmem:[%s4266_s9 + $0x338] sm:$0xff] %vm2722_vm1, %v2660_v28  ;;  %v1915_v60 = vadd.f32 %v4917_v31, %v1914_v50  ;;  %v2243_v49 = vpop.f32.mrf.mxu1  ;;  %v3959_v50 = vld [vmem:[%s4134_s5 + $0x448] sm:$0xf0] }
 0x2cb   : > { %v2244_v35 = vadd.f32 %v2243_v49, %v1915_v60  ;;  %1953 = vmatmul.bf16.gmra.mxu0 %v3423_v42  ;;  %3816 = vmatmul.msk.bf16.gmra.mxu3 %vm1542_vm0, %v3647_v17  ;;  %v3466_v17 = vld [vmem:[%s4134_s5 + $0x440] sm:$0xf] }
 0x2cc   : > { %2282 = vmatmul.bf16.gmra.mxu1 %v3427_v13 }
 0x2cd   : > { %v2573_v37 = vadd.f32 %v2572_v39, %v2244_v35 }
 0x2ce   : > { %v2662_v57 = vpop.f32.mrf.mxu3 }
 0x2cf   : > { %2791 = vst.msk [vmem:[%s4266_s9 + $0x220] sm:$0xff] %vm2722_vm1, %v2573_v37  ;;  %v2663_v45 = vadd.f32 %v2662_v57, %v4675_v1  ;;  %v3436_v1 = vld [vmem:[%s4134_s5 + $0x414] sm:$0xf0]  ;;  %v3467_v57 = vor.u32 %v3959_v50, %v3466_v17  ;;  %v3682_v17 = vld [vmem:[%s4134_s5 + $0x5f0] sm:$0xf] }
 0x2d0   : > { %v2579_v0 = vpop.f32.mrf.mxu2  ;;  %v1916_v46 = vpop.f32.mrf.mxu0  ;;  %v3439_v6 = vor.u32 %v3951_v59, %v3436_v1  ;;  %v4013_v50 = vld [vmem:[%s4134_s5 + $0x5f8] sm:$0xf0] }
 0x2d1   : > { %2827 = vst.msk [vmem:[%s4266_s9 + $0x340] sm:$0xff] %vm2722_vm1, %v2663_v45  ;;  %v1917_v56 = vadd.f32 %v4917_v31, %v1916_v46  ;;  %v2245_v3 = vpop.f32.mrf.mxu1  ;;  %v3670_v45 = vld [vmem:[%s4134_s5 + $0x5d8] sm:$0xf]  ;;  %v4010_v46 = vld [vmem:[%s4134_s5 + $0x5e0] sm:$0xf0] }
 0x2d2   : > { %v3671_v18 = vor.u32 %v4010_v46, %v3670_v45 }
 0x2d3   : > { %v2246_v39 = vadd.f32 %v2245_v3, %v1917_v56  ;;  %v3954_v3 = vld [vmem:[%s4134_s5 + $0x424] sm:$0xf] }
 0x2d5   : > { %v2575_v4 = vadd.f32 %v2574_v19, %v2246_v39  ;;  %3800 = vmatmul.msk.bf16.gmra.mxu2 %vm1542_vm0, %v3455_v5 }
 0x2d6   : > { %v2664_v24 = vpop.f32.mrf.mxu3 }
 0x2d7   : > { %2792 = vst.msk [vmem:[%s4266_s9 + $0x228] sm:$0xff] %vm2722_vm1, %v2575_v4  ;;  %v2665_v34 = vadd.f32 %v2664_v24, %v4689_v30 }
 0x2d8   : > { %v2582_v48 = vpop.f32.mrf.mxu2  ;;  %v1919_v33 = vpop.f32.mrf.mxu0 }
 0x2d9   : > { %2828 = vst.msk [vmem:[%s4266_s9 + $0x348] sm:$0xff] %vm2722_vm1, %v2665_v34  ;;  %v1920_v19 = vadd.f32 %v4917_v31, %v1919_v33  ;;  %v2248_v23 = vpop.f32.mrf.mxu1  ;;  %v3478_v34 = vld [vmem:[%s4134_s5 + $0x458] sm:$0xf] }
 0x2db   : > { %v2249_v28 = vadd.f32 %v2248_v23, %v1920_v19  ;;  %1958 = vmatmul.bf16.gmra.mxu0 %v3435_v43  ;;  %3817 = vmatmul.msk.bf16.gmra.mxu3 %vm1542_vm0, %v3659_v2  ;;  %v3962_v43 = vld [vmem:[%s4134_s5 + $0x460] sm:$0xf0] }
 0x2dc   : > { %2287 = vmatmul.bf16.gmra.mxu1 %v3439_v6 }
 0x2dd   : > { %v2578_v30 = vadd.f32 %v2577_v11, %v2249_v28  ;;  %v3479_v28 = vor.u32 %v3962_v43, %v3478_v34  ;;  %v3472_v34 = vld [vmem:[%s4134_s5 + $0x45c] sm:$0xf0] }
 0x2de   : > { %v2667_v42 = vpop.f32.mrf.mxu3 }
 0x2df   : > { %2793 = vst.msk [vmem:[%s4266_s9 + $0x230] sm:$0xff] %vm2722_vm1, %v2578_v30  ;;  %v2668_v13 = vadd.f32 %v2667_v42, %v4698_v26  ;;  %v3448_v26 = vld [vmem:[%s4134_s5 + $0x42c] sm:$0xf0]  ;;  %v3458_v30 = vld [vmem:[%s4134_s5 + $0x438] sm:$0xf] }
 0x2e0   : > { %v2584_v60 = vpop.f32.mrf.mxu2  ;;  %v1921_v49 = vpop.f32.mrf.mxu0  ;;  %v3451_v4 = vor.u32 %v3954_v3, %v3448_v26  ;;  %v3958_v42 = vld [vmem:[%s4134_s5 + $0x440] sm:$0xf0]  ;;  %v3490_v26 = vld [vmem:[%s4134_s5 + $0x470] sm:$0xf] }
 0x2e1   : > { %2829 = vst.msk [vmem:[%s4266_s9 + $0x350] sm:$0xff] %vm2722_vm1, %v2668_v13  ;;  %v1922_v35 = vadd.f32 %v4917_v31, %v1921_v49  ;;  %v2250_v37 = vpop.f32.mrf.mxu1  ;;  %v3957_v49 = vld [vmem:[%s4134_s5 + $0x43c] sm:$0xf] }
 0x2e3   : > { %v2251_v11 = vadd.f32 %v2250_v37, %v1922_v35 }
 0x2e5   : > { %v2580_v56 = vadd.f32 %v2579_v0, %v2251_v11  ;;  %3801 = vmatmul.msk.bf16.gmra.mxu2 %vm1542_vm0, %v3467_v57  ;;  %v3459_v57 = vor.u32 %v3958_v42, %v3458_v30  ;;  %v3683_v11 = vor.u32 %v4013_v50, %v3682_v17  ;;  %v3502_v17 = vld [vmem:[%s4134_s5 + $0x488] sm:$0xf] }
 0x2e6   : > { %v2669_v5 = vpop.f32.mrf.mxu3 }
 0x2e7   : > { %2794 = vst.msk [vmem:[%s4266_s9 + $0x238] sm:$0xff] %vm2722_vm1, %v2580_v56  ;;  %v2670_v39 = vadd.f32 %v2669_v5, %v4712_v10  ;;  %v3965_v5 = vld [vmem:[%s4134_s5 + $0x478] sm:$0xf0] }
 0x2e8   : > { %v2587_v38 = vpop.f32.mrf.mxu2  ;;  %v1924_v32 = vpop.f32.mrf.mxu0 }
 0x2e9   : > { %2830 = vst.msk [vmem:[%s4266_s9 + $0x358] sm:$0xff] %vm2722_vm1, %v2670_v39  ;;  %v1925_v0 = vadd.f32 %v4917_v31, %v1924_v32  ;;  %v2253_v59 = vpop.f32.mrf.mxu1 }
 0x2eb   : > { %v2254_v1 = vadd.f32 %v2253_v59, %v1925_v0  ;;  %1963 = vmatmul.bf16.gmra.mxu0 %v3447_v15  ;;  %3818 = vmatmul.msk.bf16.gmra.mxu3 %vm1542_vm0, %v3671_v18  ;;  %v3491_v0 = vor.u32 %v3965_v5, %v3490_v26  ;;  %v3470_v59 = vld [vmem:[%s4134_s5 + $0x450] sm:$0xf] }
 0x2ec   : > { %2292 = vmatmul.bf16.gmra.mxu1 %v3451_v4 }
 0x2ed   : > { %v2583_v10 = vadd.f32 %v2582_v48, %v2254_v1  ;;  %v3961_v1 = vld [vmem:[%s4134_s5 + $0x458] sm:$0xf0] }
 0x2ee   : > { %v2672_v24 = vpop.f32.mrf.mxu3 }
 0x2ef   : > { %2795 = vst.msk [vmem:[%s4266_s9 + $0x240] sm:$0xff] %vm2722_vm1, %v2583_v10  ;;  %v2673_v2 = vadd.f32 %v2672_v24, %v4721_v52  ;;  %v3460_v52 = vld [vmem:[%s4134_s5 + $0x444] sm:$0xf0]  ;;  %v3960_v24 = vld [vmem:[%s4134_s5 + $0x454] sm:$0xf] }
 0x2f0   : > { %v2589_v33 = vpop.f32.mrf.mxu2  ;;  %v1926_v6 = vpop.f32.mrf.mxu0  ;;  %v3463_v45 = vor.u32 %v3957_v49, %v3460_v52 }
 0x2f1   : > { %2831 = vst.msk [vmem:[%s4266_s9 + $0x360] sm:$0xff] %vm2722_vm1, %v2673_v2  ;;  %v1927_v19 = vadd.f32 %v4917_v31, %v1926_v6  ;;  %v2255_v23 = vpop.f32.mrf.mxu1  ;;  %v3471_v2 = vor.u32 %v3961_v1, %v3470_v59 }
 0x2f3   : > { %v2256_v48 = vadd.f32 %v2255_v23, %v1927_v19  ;;  %v3475_v23 = vor.u32 %v3960_v24, %v3472_v34 }
 0x2f5   : > { %v2585_v13 = vadd.f32 %v2584_v60, %v2256_v48  ;;  %3802 = vmatmul.msk.bf16.gmra.mxu2 %vm1542_vm0, %v3479_v28 }
 0x2f6   : > { %v2674_v35 = vpop.f32.mrf.mxu3 }
 0x2f7   : > { %2796 = vst.msk [vmem:[%s4266_s9 + $0x248] sm:$0xff] %vm2722_vm1, %v2585_v13  ;;  %v2675_v37 = vadd.f32 %v2674_v35, %v4735_v36 }
 0x2f8   : > { %v2592_v62 = vpop.f32.mrf.mxu2  ;;  %v1929_v8 = vpop.f32.mrf.mxu0 }
 0x2f9   : > { %2832 = vst.msk [vmem:[%s4266_s9 + $0x368] sm:$0xff] %vm2722_vm1, %v2675_v37  ;;  %v1930_v60 = vadd.f32 %v4917_v31, %v1929_v8  ;;  %v2258_v46 = vpop.f32.mrf.mxu1 }
 0x2fb   : > { %v2259_v56 = vadd.f32 %v2258_v46, %v1930_v60  ;;  %1968 = vmatmul.bf16.gmra.mxu0 %v3459_v57  ;;  %3819 = vmatmul.msk.bf16.gmra.mxu3 %vm1542_vm0, %v3683_v11  ;;  %v3482_v11 = vld [vmem:[%s4134_s5 + $0x468] sm:$0xf]  ;;  %v3484_v60 = vld [vmem:[%s4134_s5 + $0x474] sm:$0xf0] }
 0x2fc   : > { %2297 = vmatmul.bf16.gmra.mxu1 %v3463_v45  ;;  %v3963_v45 = vld [vmem:[%s4134_s5 + $0x46c] sm:$0xf] }
 0x2fd   : > { %v2588_v36 = vadd.f32 %v2587_v38, %v2259_v56  ;;  %v3487_v26 = vor.u32 %v3963_v45, %v3484_v60 }
 0x2fe   : > { %v2677_v3 = vpop.f32.mrf.mxu3 }
 0x2ff   : > { %2797 = vst.msk [vmem:[%s4266_s9 + $0x250] sm:$0xff] %vm2722_vm1, %v2588_v36  ;;  %v2678_v39 = vadd.f32 %v2677_v3, %v4744_v16 }
 0x300   : > { %v2594_v15 = vpop.f32.mrf.mxu2  ;;  %v1931_v18 = vpop.f32.mrf.mxu0 }
 0x301   : > { %2833 = vst.msk [vmem:[%s4266_s9 + $0x370] sm:$0xff] %vm2722_vm1, %v2678_v39  ;;  %v1932_v32 = vadd.f32 %v4917_v31, %v1931_v18  ;;  %v2260_v4 = vpop.f32.mrf.mxu1 }
 0x303   : > { %v2261_v38 = vadd.f32 %v2260_v4, %v1932_v32  ;;  %v3514_v4 = vld [vmem:[%s4134_s5 + $0x4a0] sm:$0xf] }
 0x305   : > { %v2590_v10 = vadd.f32 %v2589_v33, %v2261_v38  ;;  %3803 = vmatmul.msk.bf16.gmra.mxu2 %vm1542_vm0, %v3491_v0  ;;  %v3971_v0 = vld [vmem:[%s4134_s5 + $0x4a8] sm:$0xf0] }
 0x306   : > { %v2679_v43 = vpop.f32.mrf.mxu3  ;;  %v3515_v24 = vor.u32 %v3971_v0, %v3514_v4 }
 0x307   : > { %2798 = vst.msk [vmem:[%s4266_s9 + $0x258] sm:$0xff] %vm2722_vm1, %v2590_v10  ;;  %v2680_v16 = vadd.f32 %v2679_v43, %v4758_v63  ;;  %v3968_v63 = vld [vmem:[%s4134_s5 + $0x490] sm:$0xf0] }
 0x308   : > { %v2597_v6 = vpop.f32.mrf.mxu2  ;;  %v1934_v19 = vpop.f32.mrf.mxu0  ;;  %v3503_v37 = vor.u32 %v3968_v63, %v3502_v17 }
 0x309   : > { %2834 = vst.msk [vmem:[%s4266_s9 + $0x378] sm:$0xff] %vm2722_vm1, %v2680_v16  ;;  %v1935_v33 = vadd.f32 %v4917_v31, %v1934_v19  ;;  %v2263_v28 = vpop.f32.mrf.mxu1 }
 0x30b   : > { %v2264_v48 = vadd.f32 %v2263_v28, %v1935_v33  ;;  %1973 = vmatmul.bf16.gmra.mxu0 %v3471_v2 }
 0x30c   : > { %2302 = vmatmul.bf16.gmra.mxu1 %v3475_v23 }
 0x30d   : > { %v2593_v30 = vadd.f32 %v2592_v62, %v2264_v48  ;;  %v3964_v62 = vld [vmem:[%s4134_s5 + $0x470] sm:$0xf0] }
 0x30e   : > { %v2682_v42 = vpop.f32.mrf.mxu3  ;;  %v3483_v56 = vor.u32 %v3964_v62, %v3482_v11 }
 0x30f   : > { %2799 = vst.msk [vmem:[%s4266_s9 + $0x260] sm:$0xff] %vm2722_vm1, %v2593_v30  ;;  %v2683_v50 = vadd.f32 %v2682_v42, %v4768_v44 }
 0x310   : > { %v2599_v13 = vpop.f32.mrf.mxu2  ;;  %v1936_v49 = vpop.f32.mrf.mxu0 }
 0x311   : > { %2835 = vst.msk [vmem:[%s4266_s9 + $0x380] sm:$0xff] %vm2722_vm1, %v2683_v50  ;;  %v1937_v52 = vadd.f32 %v4917_v31, %v1936_v49  ;;  %v2265_v35 = vpop.f32.mrf.mxu1 }
 0x313   : > { %v2266_v57 = vadd.f32 %v2265_v35, %v1937_v52 }
 0x315   : > { %v2595_v8 = vadd.f32 %v2594_v15, %v2266_v57  ;;  %3804 = vmatmul.msk.bf16.gmra.mxu2 %vm1542_vm0, %v3503_v37 }
 0x316   : > { %v2684_v46 = vpop.f32.mrf.mxu3 }
 0x317   : > { %2800 = vst.msk [vmem:[%s4266_s9 + $0x268] sm:$0xff] %vm2722_vm1, %v2595_v8  ;;  %v2685_v44 = vadd.f32 %v2684_v46, %v4782_v27 }
 0x318   : > { %v2602_v36 = vpop.f32.mrf.mxu2  ;;  %v1939_v3 = vpop.f32.mrf.mxu0 }
 0x319   : > { %2836 = vst.msk [vmem:[%s4266_s9 + $0x388] sm:$0xff] %vm2722_vm1, %v2685_v44  ;;  %v1940_v5 = vadd.f32 %v4917_v31, %v1939_v3  ;;  %v2268_v39 = vpop.f32.mrf.mxu1 }
 0x31b   : > { %v2269_v15 = vadd.f32 %v2268_v39, %v1940_v5  ;;  %1978 = vmatmul.bf16.gmra.mxu0 %v3483_v56 }
 0x31c   : > { %2307 = vmatmul.bf16.gmra.mxu1 %v3487_v26 }
 0x31d   : > { %v2598_v18 = vadd.f32 %v2597_v6, %v2269_v15 }
 0x31e   : > { %v2687_v32 = vpop.f32.mrf.mxu3 }
 0x31f   : > { %2801 = vst.msk [vmem:[%s4266_s9 + $0x270] sm:$0xff] %vm2722_vm1, %v2598_v18  ;;  %v2688_v27 = vadd.f32 %v2687_v32, %v4792_v9 }
 0x320   : > { %v2604_v38 = vpop.f32.mrf.mxu2  ;;  %v1941_v59 = vpop.f32.mrf.mxu0 }
 0x321   : > { %2837 = vst.msk [vmem:[%s4266_s9 + $0x390] sm:$0xff] %vm2722_vm1, %v2688_v27  ;;  %v1942_v1 = vadd.f32 %v4917_v31, %v1941_v59  ;;  %v2270_v10 = vpop.f32.mrf.mxu1 }
 0x323   : > { %v2271_v34 = vadd.f32 %v2270_v10, %v1942_v1 }
 0x325   : > { %v2600_v43 = vadd.f32 %v2599_v13, %v2271_v34  ;;  %3805 = vmatmul.msk.bf16.gmra.mxu2 %vm1542_vm0, %v3515_v24 }
 0x326   : > { %v2689_v16 = vpop.f32.mrf.mxu3 }
 0x327   : > { %2802 = vst.msk [vmem:[%s4266_s9 + $0x278] sm:$0xff] %vm2722_vm1, %v2600_v43  ;;  %v2690_v2 = vadd.f32 %v2689_v16, %v4806_v55 }
 0x328   : > { %v2607_v9 = vpop.f32.mrf.mxu2  ;;  %v1944_v6 = vpop.f32.mrf.mxu0 }
 0x329   : > { %2838 = vst.msk [vmem:[%s4266_s9 + $0x398] sm:$0xff] %vm2722_vm1, %v2690_v2  ;;  %v1945_v19 = vadd.f32 %v4917_v31, %v1944_v6  ;;  %v2273_v23 = vpop.f32.mrf.mxu1 }
 0x32b   : > { %v2274_v33 = vadd.f32 %v2273_v23, %v1945_v19 }
 0x32d   : > { %v2603_v28 = vadd.f32 %v2602_v36, %v2274_v33 }
 0x32e   : > { %v2692_v48 = vpop.f32.mrf.mxu3 }
 0x32f   : > { %2803 = vst.msk [vmem:[%s4266_s9 + $0x280] sm:$0xff] %vm2722_vm1, %v2603_v28  ;;  %v2693_v30 = vadd.f32 %v2692_v48, %v4816_v40 }
 0x330   : > { %v2609_v42 = vpop.f32.mrf.mxu2  ;;  %v1946_v17 = vpop.f32.mrf.mxu0 }
 0x331   : > { %2839 = vst.msk [vmem:[%s4266_s9 + $0x3a0] sm:$0xff] %vm2722_vm1, %v2693_v30  ;;  %v1947_v55 = vadd.f32 %v4917_v31, %v1946_v17  ;;  %v2275_v63 = vpop.f32.mrf.mxu1 }
 0x333   : > { %v2276_v50 = vadd.f32 %v2275_v63, %v1947_v55 }
 0x335   : > { %v2605_v13 = vadd.f32 %v2604_v38, %v2276_v50 }
 0x336   : > { %v2694_v49 = vpop.f32.mrf.mxu3 }
 0x337   : > { %2804 = vst.msk [vmem:[%s4266_s9 + $0x288] sm:$0xff] %vm2722_vm1, %v2605_v13  ;;  %v2695_v52 = vadd.f32 %v2694_v49, %v4830_v21 }
 0x338   : > { %v2612_v35 = vpop.f32.mrf.mxu2  ;;  %v1949_v37 = vpop.f32.mrf.mxu0 }
 0x339   : > { %2840 = vst.msk [vmem:[%s4266_s9 + $0x3a8] sm:$0xff] %vm2722_vm1, %v2695_v52  ;;  %v1950_v40 = vadd.f32 %v4917_v31, %v1949_v37  ;;  %v2278_v57 = vpop.f32.mrf.mxu1 }
 0x33b   : > { %v2279_v11 = vadd.f32 %v2278_v57, %v1950_v40 }
 0x33d   : > { %v2608_v62 = vadd.f32 %v2607_v9, %v2279_v11 }
 0x33e   : > { %v2697_v8 = vpop.f32.mrf.mxu3 }
 0x33f   : > { %2805 = vst.msk [vmem:[%s4266_s9 + $0x290] sm:$0xff] %vm2722_vm1, %v2608_v62  ;;  %v2698_v45 = vadd.f32 %v2697_v8, %v4840_v7 }
 0x340   : > { %v2614_v60 = vpop.f32.mrf.mxu2  ;;  %v1951_v46 = vpop.f32.mrf.mxu0 }
 0x341   : > { %2841 = vst.msk [vmem:[%s4266_s9 + $0x3b0] sm:$0xff] %vm2722_vm1, %v2698_v45  ;;  %v1952_v21 = vadd.f32 %v4917_v31, %v1951_v46  ;;  %v2280_v44 = vpop.f32.mrf.mxu1 }
 0x343   : > { %v2281_v56 = vadd.f32 %v2280_v44, %v1952_v21 }
 0x345   : > { %v2610_v36 = vadd.f32 %v2609_v42, %v2281_v56 }
 0x346   : > { %v2699_v3 = vpop.f32.mrf.mxu3 }
 0x347   : > { %2806 = vst.msk [vmem:[%s4266_s9 + $0x298] sm:$0xff] %vm2722_vm1, %v2610_v36  ;;  %v2700_v26 = vadd.f32 %v2699_v3, %v4854_v51 }
 0x348   : > { %v2617_v5 = vpop.f32.mrf.mxu2  ;;  %v1954_v39 = vpop.f32.mrf.mxu0 }
 0x349   : > { %2842 = vst.msk [vmem:[%s4266_s9 + $0x3b8] sm:$0xff] %vm2722_vm1, %v2700_v26  ;;  %v1955_v7 = vadd.f32 %v4917_v31, %v1954_v39  ;;  %v2283_v15 = vpop.f32.mrf.mxu1 }
 0x34b   : > { %v2284_v18 = vadd.f32 %v2283_v15, %v1955_v7 }
 0x34d   : > { %v2613_v32 = vadd.f32 %v2612_v35, %v2284_v18 }
 0x34e   : > { %v2702_v4 = vpop.f32.mrf.mxu3 }
 0x34f   : > { %2807 = vst.msk [vmem:[%s4266_s9 + $0x2a0] sm:$0xff] %vm2722_vm1, %v2613_v32  ;;  %v2703_v0 = vadd.f32 %v2702_v4, %v4864_v41 }
 0x350   : > { %v2619_v27 = vpop.f32.mrf.mxu2  ;;  %v1956_v38 = vpop.f32.mrf.mxu0 }
 0x351   : > { %2843 = vst.msk [vmem:[%s4266_s9 + $0x3c0] sm:$0xff] %vm2722_vm1, %v2703_v0  ;;  %v1957_v51 = vadd.f32 %v4917_v31, %v1956_v38  ;;  %v2285_v59 = vpop.f32.mrf.mxu1 }
 0x353   : > { %v2286_v1 = vadd.f32 %v2285_v59, %v1957_v51 }
 0x355   : > { %v2615_v10 = vadd.f32 %v2614_v60, %v2286_v1 }
 0x356   : > { %v2704_v24 = vpop.f32.mrf.mxu3 }
 0x357   : > { %2808 = vst.msk [vmem:[%s4266_s9 + $0x2a8] sm:$0xff] %vm2722_vm1, %v2615_v10  ;;  %v2705_v34 = vadd.f32 %v2704_v24, %v4878_v20 }
 0x358   : > { %v2622_v43 = vpop.f32.mrf.mxu2  ;;  %v1959_v16 = vpop.f32.mrf.mxu0 }
 0x359   : > { %2844 = vst.msk [vmem:[%s4266_s9 + $0x3c8] sm:$0xff] %vm2722_vm1, %v2705_v34  ;;  %v1960_v41 = vadd.f32 %v4917_v31, %v1959_v16  ;;  %v2288_v2 = vpop.f32.mrf.mxu1 }
 0x35b   : > { %v2289_v9 = vadd.f32 %v2288_v2, %v1960_v41 }
 0x35d   : > { %v2618_v6 = vadd.f32 %v2617_v5, %v2289_v9 }
 0x35e   : > { %v2707_v19 = vpop.f32.mrf.mxu3 }
 0x35f   : > { %2809 = vst.msk [vmem:[%s4266_s9 + $0x2b0] sm:$0xff] %vm2722_vm1, %v2618_v6  ;;  %v2708_v23 = vadd.f32 %v2707_v19, %v4888_v12 }
 0x360   : > { %v2624_v33 = vpop.f32.mrf.mxu2  ;;  %v1961_v28 = vpop.f32.mrf.mxu0 }
 0x361   : > { %2845 = vst.msk [vmem:[%s4266_s9 + $0x3d0] sm:$0xff] %vm2722_vm1, %v2708_v23  ;;  %v1962_v20 = vadd.f32 %v4917_v31, %v1961_v28  ;;  %v2290_v48 = vpop.f32.mrf.mxu1 }
 0x363   : > { %v2291_v30 = vadd.f32 %v2290_v48, %v1962_v20 }
 0x365   : > { %v2620_v42 = vadd.f32 %v2619_v27, %v2291_v30 }
 0x366   : > { %v2709_v17 = vpop.f32.mrf.mxu3 }
 0x367   : > { %2810 = vst.msk [vmem:[%s4266_s9 + $0x2b8] sm:$0xff] %vm2722_vm1, %v2620_v42  ;;  %v2710_v55 = vadd.f32 %v2709_v17, %v4902_v54 }
 0x368   : > { %v2627_v63 = vpop.f32.mrf.mxu2  ;;  %v1964_v50 = vpop.f32.mrf.mxu0 }
 0x369   : > { %2846 = vst.msk [vmem:[%s4266_s9 + $0x3d8] sm:$0xff] %vm2722_vm1, %v2710_v55  ;;  %v1965_v12 = vadd.f32 %v4917_v31, %v1964_v50  ;;  %v2293_v13 = vpop.f32.mrf.mxu1 }
 0x36b   : > { %v2294_v49 = vadd.f32 %v2293_v13, %v1965_v12 }
 0x36d   : > { %v2623_v52 = vadd.f32 %v2622_v43, %v2294_v49 }
 0x36e   : > { %v2712_v35 = vpop.f32.mrf.mxu3 }
 0x36f   : > { %2811 = vst.msk [vmem:[%s4266_s9 + $0x2c0] sm:$0xff] %vm2722_vm1, %v2623_v52  ;;  %v2713_v37 = vadd.f32 %v2712_v35, %v4912_v47 }
 0x370   : > { %v2629_v40 = vpop.f32.mrf.mxu2  ;;  %v1966_v57 = vpop.f32.mrf.mxu0 }
 0x371   : > { %2847 = vst.msk [vmem:[%s4266_s9 + $0x3e0] sm:$0xff] %vm2722_vm1, %v2713_v37  ;;  %v1967_v54 = vadd.f32 %v4917_v31, %v1966_v57  ;;  %v2295_v11 = vpop.f32.mrf.mxu1 }
 0x373   : > { %v2296_v62 = vadd.f32 %v2295_v11, %v1967_v54 }
 0x375   : > { %v2625_v8 = vadd.f32 %v2624_v33, %v2296_v62 }
 0x376   : > { %v2714_v45 = vpop.f32.mrf.mxu3 }
 0x377   : > { %2812 = vst.msk [vmem:[%s4266_s9 + $0x2c8] sm:$0xff] %vm2722_vm1, %v2625_v8  ;;  %v2715_v60 = vadd.f32 %v2714_v45, %v4931_v25 }
 0x378   : > { %v2632_v46 = vpop.f32.mrf.mxu2  ;;  %v1969_v21 = vpop.f32.mrf.mxu0 }
 0x379   : > { %2848 = vst.msk [vmem:[%s4266_s9 + $0x3e8] sm:$0xff] %vm2722_vm1, %v2715_v60  ;;  %v1970_v47 = vadd.f32 %v4917_v31, %v1969_v21  ;;  %v2298_v44 = vpop.f32.mrf.mxu1 }
 0x37b   : > { %v2299_v56 = vadd.f32 %v2298_v44, %v1970_v47 }
 0x37d   : > { %v2628_v36 = vadd.f32 %v2627_v63, %v2299_v56 }
 0x37e   : > { %v2717_v3 = vpop.f32.mrf.mxu3 }
 0x37f   : > { %2813 = vst.msk [vmem:[%s4266_s9 + $0x2d0] sm:$0xff] %vm2722_vm1, %v2628_v36  ;;  %v2718_v26 = vadd.f32 %v2717_v3, %v4941_v22 }
 0x380   : > { %v2634_v5 = vpop.f32.mrf.mxu2  ;;  %v1971_v39 = vpop.f32.mrf.mxu0 }
 0x381   : > { %2849 = vst.msk [vmem:[%s4266_s9 + $0x3f0] sm:$0xff] %vm2722_vm1, %v2718_v26  ;;  %v1972_v25 = vadd.f32 %v4917_v31, %v1971_v39  ;;  %v2300_v7 = vpop.f32.mrf.mxu1 }
 0x383   : > { %v2301_v15 = vadd.f32 %v2300_v7, %v1972_v25 }
 0x385   : > { %v2630_v18 = vadd.f32 %v2629_v40, %v2301_v15 }
 0x386   : > { %v2719_v32 = vpop.f32.mrf.mxu3 }
 0x387   : > { %2814 = vst.msk [vmem:[%s4266_s9 + $0x2d8] sm:$0xff] %vm2722_vm1, %v2630_v18  ;;  %v2720_v4 = vadd.f32 %v2719_v32, %v4955_v61 }
 0x388   : > { %v2637_v0 = vpop.f32.mrf.mxu2  ;;  %v1974_v27 = vpop.f32.mrf.mxu0 }
 0x389   : > { %2850 = vst.msk [vmem:[%s4266_s9 + $0x3f8] sm:$0xff] %vm2722_vm1, %v2720_v4  ;;  %v1975_v22 = vadd.f32 %v4917_v31, %v1974_v27  ;;  %v2303_v38 = vpop.f32.mrf.mxu1 }
 0x38b   : > { %v2304_v51 = vadd.f32 %v2303_v38, %v1975_v22 }
 0x38d   : > { %v2633_v59 = vadd.f32 %v2632_v46, %v2304_v51 }
 0x38f   : > { %2815 = vst.msk [vmem:[%s4266_s9 + $0x2e0] sm:$0xff] %vm2722_vm1, %v2633_v59 }
 0x390   : > { %v2639_v1 = vpop.f32.mrf.mxu2  ;;  %v1976_v10 = vpop.f32.mrf.mxu0 }
 0x391   : > { %v1977_v24 = vadd.f32 %v4917_v31, %v1976_v10  ;;  %v2305_v34 = vpop.f32.mrf.mxu1 }
 0x393   : > { %v2306_v43 = vadd.f32 %v2305_v34, %v1977_v24 }
 0x395   : > { %v2635_v61 = vadd.f32 %v2634_v5, %v2306_v43 }
 0x397   : > { %2816 = vst.msk [vmem:[%s4266_s9 + $0x2e8] sm:$0xff] %vm2722_vm1, %v2635_v61 }
 0x398   : > { %v2642_v16 = vpop.f32.mrf.mxu2  ;;  %v1979_v41 = vpop.f32.mrf.mxu0 }
 0x399   : > { %v2643_v2 = vadd.f32 %v2642_v16, %v4583_v58  ;;  %v1980_v9 = vadd.f32 %v4917_v31, %v1979_v41  ;;  %v2308_v6 = vpop.f32.mrf.mxu1 }
 0x39b   : > { %2819 = vst.msk [vmem:[%s4266_s9 + $0x300] sm:$0xff] %vm2722_vm1, %v2643_v2  ;;  %v2309_v19 = vadd.f32 %v2308_v6, %v1980_v9 }
 0x39d   : > { %v2638_v23 = vadd.f32 %v2637_v0, %v2309_v19 }
 0x39f   : > { %2817 = vst.msk [vmem:[%s4266_s9 + $0x2f0] sm:$0xff] %vm2722_vm1, %v2638_v23 }
 0x3a0   : > { %v2644_v33 = vpop.f32.mrf.mxu2  ;;  %v1981_v28 = vpop.f32.mrf.mxu0 }
 0x3a1   : > { %v2645_v20 = vadd.f32 %v2644_v33, %v4597_v53  ;;  %v1982_v48 = vadd.f32 %v4917_v31, %v1981_v28  ;;  %v2310_v30 = vpop.f32.mrf.mxu1 }
 0x3a3   : > { %2820 = vst.msk [vmem:[%s4266_s9 + $0x308] sm:$0xff] %vm2722_vm1, %v2645_v20  ;;  %v2311_v58 = vadd.f32 %v2310_v30, %v1982_v48 }
 0x3a5   : > { %v2640_v42 = vadd.f32 %v2639_v1, %v2311_v58 }
 0x3a7   : > { %2818 = vst.msk [vmem:[%s4266_s9 + $0x2f8] sm:$0xff] %vm2722_vm1, %v2640_v42 }
 0x3a8   : > { %v2647_v17 = vpop.f32.mrf.mxu2 }
 0x3a9   : > { %v2648_v55 = vadd.f32 %v2647_v17, %v4606_v14 }
 0x3ab   : > { %2821 = vst.msk [vmem:[%s4266_s9 + $0x310] sm:$0xff] %vm2722_vm1, %v2648_v55 }
 0x3b0   : > { %v2649_v63 = vpop.f32.mrf.mxu2 }
 0x3b1   : > { %v2650_v50 = vadd.f32 %v2649_v63, %v4620_v29 }
 0x3b3   : > { %2822 = vst.msk [vmem:[%s4266_s9 + $0x318] sm:$0xff] %vm2722_vm1, %v2650_v50 }
 0x3b4 PF: > { %s13_s12 = sadd.s32 1, %s4068_s12  }
 0x3b5   : > { %p10_p4 = scmp.ge.s32.totalorder %s13_s12, 4  }
 0x3b7   :  { %12 = sbr.rel (!%p10_p4) target bundleno = 1 (0x1), region = 62 }

</bundles_post_ra>
